<compile_context>
chip_gen: v7x
topology: tpu7x:2x2x1
jax: 0.10.0
libtpu: 0.0.40
codegen_flags: <defaults>
</compile_context>

<pallas_src>
import functools

import jax
import jax.numpy as jnp
from jax.experimental import pallas as pl
from jax.experimental.pallas import tpu as pltpu

_BN_EPS = 1e-5


def _vmem():
    return pl.BlockSpec(memory_space=pltpu.MemorySpace.VMEM)


# ----------------------------------------------------------------------------
# Pallas kernels (each layer = one fused kernel)
# ----------------------------------------------------------------------------
def _head_kernel(x_ref, w_ref, gamma_ref, beta_ref, o_ref, *, taps, cout):
    """1x1-spatial-input ConvTranspose head fused with BatchNorm + ReLU.

    x:(N,Cin) @ w:(Cin, taps*cout) -> (N, taps*cout).  Columns are
    tap-major / channel-minor, so per-channel batch statistics reduce over
    the N rows and the `taps` lane groups (== BatchNorm2d over N*H*W).
    Conv bias is omitted: a per-channel constant cancels in training-mode BN.
    """
    acc = jnp.dot(x_ref[...], w_ref[...], preferred_element_type=jnp.float32)
    cnt = float(acc.shape[0] * taps)
    ssum = jnp.zeros((1, cout), jnp.float32)
    ssq = jnp.zeros((1, cout), jnp.float32)
    for t in range(taps):                       # static unroll, lane-aligned slices
        g = acc[:, t * cout:(t + 1) * cout]
        ssum = ssum + jnp.sum(g, axis=0, keepdims=True)
        ssq = ssq + jnp.sum(g * g, axis=0, keepdims=True)
    mean = ssum / cnt
    var = ssq / cnt - mean * mean               # one-pass E[x^2] - E[x]^2
    scale = gamma_ref[...] * jax.lax.rsqrt(var + _BN_EPS)
    shift = beta_ref[...] - mean * scale
    for t in range(taps):
        g = acc[:, t * cout:(t + 1) * cout]
        o_ref[:, t * cout:(t + 1) * cout] = jnp.maximum(g * scale + shift, 0.0)


def _matmul_bn_relu_kernel(p_ref, w_ref, gamma_ref, beta_ref, o_ref):
    """(R,K)@(K,C) + training-mode BatchNorm (per column) + ReLU, fused."""
    acc = jnp.dot(p_ref[...], w_ref[...], preferred_element_type=jnp.float32)
    r = float(acc.shape[0])
    mean = jnp.sum(acc, axis=0, keepdims=True) / r
    var = jnp.sum(acc * acc, axis=0, keepdims=True) / r - mean * mean
    scale = gamma_ref[...] * jax.lax.rsqrt(var + _BN_EPS)
    shift = beta_ref[...] - mean * scale
    o_ref[...] = jnp.maximum(acc * scale + shift, 0.0)


def _matmul_tanh_t_kernel(wt_ref, pt_ref, o_ref):
    """Final layer computed transposed so the store is lane-dense:
    (Cout=1, K) @ (K, R) -> tanh -> (1, R), R = N*Ho*Wo on the lane axis."""
    acc = jnp.dot(wt_ref[...], pt_ref[...], preferred_element_type=jnp.float32)
    o_ref[...] = jnp.tanh(acc)


# ----------------------------------------------------------------------------
# pallas_call wrappers (gridless whole-array VMEM blocks; tensors are tiny)
# TODO(synk): for large batch, add a row grid (tile_R multiple of 8,
#   dimension_semantics=("parallel",)) with two-phase / sum-sumsq BN stats so
#   it fits v7x's 64 MiB VMEM and uses both TensorCores.
# ----------------------------------------------------------------------------
def pallas_head(x, wm, gamma, beta, *, taps, cout):
    n = x.shape[0]
    return pl.pallas_call(
        functools.partial(_head_kernel, taps=taps, cout=cout),
        out_shape=jax.ShapeDtypeStruct((n, taps * cout), jnp.float32),
        in_specs=[_vmem()] * 4,
        out_specs=_vmem(),
    )(x, wm, gamma, beta)


def pallas_matmul_bn_relu(p, wm, gamma, beta):
    r, c = p.shape[0], wm.shape[1]
    return pl.pallas_call(
        _matmul_bn_relu_kernel,
        out_shape=jax.ShapeDtypeStruct((r, c), jnp.float32),
        in_specs=[_vmem()] * 4,
        out_specs=_vmem(),
    )(p, wm, gamma, beta)


def pallas_matmul_tanh_t(wt, pt):
    return pl.pallas_call(
        _matmul_tanh_t_kernel,
        out_shape=jax.ShapeDtypeStruct((wt.shape[0], pt.shape[1]), jnp.float32),
        in_specs=[_vmem()] * 2,
        out_specs=_vmem(),
    )(wt, pt)


# ----------------------------------------------------------------------------
# XLA-side glue: NHWC zero-upsample + pad + im2col, weight reshapes
# TODO(synk): stride-2 layers still matmul zero-upsampled patches (~4x extra
#   MXU FLOPs); a parity-class (pixel-shuffle) decomposition or in-kernel
#   shifted-window accumulation would remove them.  Irrelevant at N=2
#   (latency-bound), left as follow-up.
# ----------------------------------------------------------------------------
def _conv_transpose_weight_matrix(w):
    """PyTorch ConvTranspose2d weight (Cin,Cout,K,K) -> im2col weight matrix
    (K*K*Cin, Cout) for correlation over the zero-upsampled, (K-1-p)-padded
    input, matching tap-major / channel-minor patch columns."""
    cin, cout, k, _ = w.shape
    return w[:, :, ::-1, ::-1].transpose(2, 3, 0, 1).reshape(k * k * cin, cout)


def _upsample_pad_nhwc(x, stride, pad):
    n, h, w, c = x.shape
    hu, wu = (h - 1) * stride + 1, (w - 1) * stride + 1
    up = jnp.zeros((n, hu + 2 * pad, wu + 2 * pad, c), x.dtype)
    return up.at[:, pad:pad + hu:stride, pad:pad + wu:stride, :].set(x)


def _im2col_nhwc(up, k, ho, wo):
    cols = [up[:, r:r + ho, c:c + wo, :] for r in range(k) for c in range(k)]
    return jnp.concatenate(cols, axis=-1)           # (N, Ho, Wo, K*K*C)


# ----------------------------------------------------------------------------
# Layers
# ----------------------------------------------------------------------------
def head_layer(x2d, w, gamma, beta):
    """ConvTranspose2d on a 1x1 spatial input (stride=1, pad=0) + BN + ReLU.
    out[n,i,j,co] = sum_ci x[n,ci] * w[ci,co,i,j]  ->  one dense GEMM.
    Returns NHWC (N, K, K, Cout)."""
    n, cin = x2d.shape
    _, cout, k, _ = w.shape
    wm = w.transpose(0, 2, 3, 1).reshape(cin, k * k * cout)
    out = pallas_head(x2d.astype(jnp.bfloat16), wm.astype(jnp.bfloat16),
                      gamma.reshape(1, cout), beta.reshape(1, cout),
                      taps=k * k, cout=cout)
    return out.reshape(n, k, k, cout)


def convt_bn_relu(x, w, gamma, beta, *, stride, padding):
    """ConvTranspose2d (no bias) + BatchNorm + ReLU.  NHWC in, NHWC out."""
    n, h, _, cin = x.shape
    _, cout, k, _ = w.shape
    ho = (h - 1) * stride - 2 * padding + k
    up = _upsample_pad_nhwc(x, stride, k - 1 - padding)
    p = _im2col_nhwc(up, k, ho, ho).reshape(n * ho * ho, k * k * cin)
    wm = _conv_transpose_weight_matrix(w)
    out = pallas_matmul_bn_relu(p.astype(jnp.bfloat16), wm.astype(jnp.bfloat16),
                                gamma.reshape(1, cout), beta.reshape(1, cout))
    return out.reshape(n, ho, ho, cout)


def convt_tanh(x, w, *, stride, padding):
    """Final ConvTranspose2d (Cout=1, no bias) + Tanh, computed transposed so
    the Pallas output is lane-dense (1, N*Ho*Wo)."""
    n, h, _, cin = x.shape
    _, cout, k, _ = w.shape          # cout == 1
    ho = (h - 1) * stride - 2 * padding + k
    up = _upsample_pad_nhwc(x, stride, k - 1 - padding)
    p = _im2col_nhwc(up, k, ho, ho)                              # (N,Ho,Wo,KKCin)
    pt = jnp.moveaxis(p, -1, 0).reshape(k * k * cin, n * ho * ho)
    wt = _conv_transpose_weight_matrix(w).T                      # (1, K*K*Cin)
    out_t = pallas_matmul_tanh_t(wt.astype(jnp.bfloat16), pt.astype(jnp.bfloat16))
    return out_t.reshape(n, ho, ho)


# ----------------------------------------------------------------------------
# Generator
# ----------------------------------------------------------------------------
def init_params(key):
    ks = jax.random.split(key, 10)
    f32 = jnp.float32

    def nrm(k, shape, std=0.02):
        return (std * jax.random.normal(k, shape)).astype(f32)

    def bn_gamma(k, c):
        return (1.0 + 0.02 * jax.random.normal(k, (c,))).astype(f32)

    # Conv biases are omitted on purpose: they cancel under training-mode BN,
    # and the final conv has bias=False in the reference module.
    return {
        "wx": nrm(ks[0], (100, 128, 3, 3)), "gx": bn_gamma(ks[1], 128),
        "betax": jnp.zeros((128,), f32),
        "wy": nrm(ks[2], (10, 128, 3, 3)), "gy": bn_gamma(ks[3], 128),
        "betay": jnp.zeros((128,), f32),
        "w3": nrm(ks[4], (256, 128, 3, 3)), "g3": bn_gamma(ks[5], 128),
        "b3": jnp.zeros((128,), f32),
        "w4": nrm(ks[6], (128, 64, 4, 4)), "g4": bn_gamma(ks[7], 64),
        "b4": jnp.zeros((64,), f32),
        "w5": nrm(ks[8], (64, 1, 4, 4)),
    }


@jax.jit
def generator_forward(params, x, y):
    # x: (N,100,1,1) latent; y: (N,10) condition (reshaped as in PyTorch).
    n = x.shape[0]
    hx = head_layer(x.reshape(n, -1), params["wx"], params["gx"], params["betax"])   # (N,3,3,128)
    hy = head_layer(y.reshape(n, -1), params["wy"], params["gy"], params["betay"])   # (N,3,3,128)
    h = jnp.concatenate([hx, hy], axis=-1)                                           # (N,3,3,256) NHWC
    h = convt_bn_relu(h, params["w3"], params["g3"], params["b3"],
                      stride=2, padding=0)                                           # (N,7,7,128)
    h = convt_bn_relu(h, params["w4"], params["g4"], params["b4"],
                      stride=2, padding=1)                                           # (N,14,14,64)
    out = convt_tanh(h, params["w5"], stride=2, padding=1)                           # (N,28,28)
    return out[:, None, :, :]                                                        # NCHW (N,1,28,28)


if __name__ == "__main__":
    key = jax.random.PRNGKey(0)
    kp, kx, ky = jax.random.split(key, 3)

    params = init_params(kp)
    N = 2
    x = jax.random.normal(kx, (N, 100, 1, 1), dtype=jnp.float32)
    y = jax.nn.one_hot(jax.random.randint(ky, (N,), 0, 10), 10).astype(jnp.float32)

    out = generator_forward(params, x, y)
    out = jax.block_until_ready(out)

    assert out.shape == (N, 1, 28, 28), out.shape
    assert out.dtype == jnp.float32
    assert bool(jnp.all(jnp.isfinite(out)))
    assert bool(jnp.all(jnp.abs(out) <= 1.0 + 1e-6))  # tanh output range
    print("KERNEL_OK")
</pallas_src>

<mosaic_0001>
module attributes {stable_mosaic.version = 11 : i64} {
  func.func @_head_kernel(%arg0: memref<2x100xbf16, #tpu.memory_space<vmem>>, %arg1: memref<100x1152xbf16, #tpu.memory_space<vmem>>, %arg2: memref<1x128xf32, #tpu.memory_space<vmem>>, %arg3: memref<1x128xf32, #tpu.memory_space<vmem>>, %arg4: memref<2x1152xf32, #tpu.memory_space<vmem>>) attributes {dimension_semantics = [], scalar_prefetch = 0 : i64, scratch_operands = 0 : i64, tpu.core_type = #tpu.core_type<tc>} {
    %c0 = arith.constant 0 : index
    %c0_0 = arith.constant 0 : index
    %0 = vector.load %arg0[%c0, %c0_0] : memref<2x100xbf16, #tpu.memory_space<vmem>>, vector<2x100xbf16>
    %c0_1 = arith.constant 0 : index
    %c0_2 = arith.constant 0 : index
    %1 = vector.load %arg1[%c0_1, %c0_2] : memref<100x1152xbf16, #tpu.memory_space<vmem>>, vector<100x1152xbf16>
    %cst = arith.constant dense<0.000000e+00> : vector<2x1152xf32>
    %2 = tpu.matmul %0, %1, %cst {dimension_numbers = #tpu.dot_dimension_numbers<[1], [0], [0], [1], [0, 0, 1, 1], [], []>} : vector<2x100xbf16>, vector<100x1152xbf16>, vector<2x1152xf32> -> vector<2x1152xf32>
    %cst_3 = arith.constant 0.000000e+00 : f32
    %3 = vector.broadcast %cst_3 : f32 to vector<1x128xf32>
    %cst_4 = arith.constant 0.000000e+00 : f32
    %4 = vector.broadcast %cst_4 : f32 to vector<1x128xf32>
    %5 = vector.extract_strided_slice %2 {offsets = [0, 0], sizes = [2, 128], strides = [1, 1]} : vector<2x1152xf32> to vector<2x128xf32>
    %cst_5 = arith.constant dense<0.000000e+00> : vector<128xf32>
    %6 = vector.multi_reduction <add>, %5, %cst_5 [0] : vector<2x128xf32> to vector<128xf32>
    %7 = vector.shape_cast %6 : vector<128xf32> to vector<1x128xf32>
    %8 = arith.addf %3, %7 : vector<1x128xf32>
    %9 = arith.mulf %5, %5 : vector<2x128xf32>
    %cst_6 = arith.constant dense<0.000000e+00> : vector<128xf32>
    %10 = vector.multi_reduction <add>, %9, %cst_6 [0] : vector<2x128xf32> to vector<128xf32>
    %11 = vector.shape_cast %10 : vector<128xf32> to vector<1x128xf32>
    %12 = arith.addf %4, %11 : vector<1x128xf32>
    %13 = vector.extract_strided_slice %2 {offsets = [0, 128], sizes = [2, 128], strides = [1, 1]} : vector<2x1152xf32> to vector<2x128xf32>
    %cst_7 = arith.constant dense<0.000000e+00> : vector<128xf32>
    %14 = vector.multi_reduction <add>, %13, %cst_7 [0] : vector<2x128xf32> to vector<128xf32>
    %15 = vector.shape_cast %14 : vector<128xf32> to vector<1x128xf32>
    %16 = arith.addf %8, %15 : vector<1x128xf32>
    %17 = arith.mulf %13, %13 : vector<2x128xf32>
    %cst_8 = arith.constant dense<0.000000e+00> : vector<128xf32>
    %18 = vector.multi_reduction <add>, %17, %cst_8 [0] : vector<2x128xf32> to vector<128xf32>
    %19 = vector.shape_cast %18 : vector<128xf32> to vector<1x128xf32>
    %20 = arith.addf %12, %19 : vector<1x128xf32>
    %21 = vector.extract_strided_slice %2 {offsets = [0, 256], sizes = [2, 128], strides = [1, 1]} : vector<2x1152xf32> to vector<2x128xf32>
    %cst_9 = arith.constant dense<0.000000e+00> : vector<128xf32>
    %22 = vector.multi_reduction <add>, %21, %cst_9 [0] : vector<2x128xf32> to vector<128xf32>
    %23 = vector.shape_cast %22 : vector<128xf32> to vector<1x128xf32>
    %24 = arith.addf %16, %23 : vector<1x128xf32>
    %25 = arith.mulf %21, %21 : vector<2x128xf32>
    %cst_10 = arith.constant dense<0.000000e+00> : vector<128xf32>
    %26 = vector.multi_reduction <add>, %25, %cst_10 [0] : vector<2x128xf32> to vector<128xf32>
    %27 = vector.shape_cast %26 : vector<128xf32> to vector<1x128xf32>
    %28 = arith.addf %20, %27 : vector<1x128xf32>
    %29 = vector.extract_strided_slice %2 {offsets = [0, 384], sizes = [2, 128], strides = [1, 1]} : vector<2x1152xf32> to vector<2x128xf32>
    %cst_11 = arith.constant dense<0.000000e+00> : vector<128xf32>
    %30 = vector.multi_reduction <add>, %29, %cst_11 [0] : vector<2x128xf32> to vector<128xf32>
    %31 = vector.shape_cast %30 : vector<128xf32> to vector<1x128xf32>
    %32 = arith.addf %24, %31 : vector<1x128xf32>
    %33 = arith.mulf %29, %29 : vector<2x128xf32>
    %cst_12 = arith.constant dense<0.000000e+00> : vector<128xf32>
    %34 = vector.multi_reduction <add>, %33, %cst_12 [0] : vector<2x128xf32> to vector<128xf32>
    %35 = vector.shape_cast %34 : vector<128xf32> to vector<1x128xf32>
    %36 = arith.addf %28, %35 : vector<1x128xf32>
    %37 = vector.extract_strided_slice %2 {offsets = [0, 512], sizes = [2, 128], strides = [1, 1]} : vector<2x1152xf32> to vector<2x128xf32>
    %cst_13 = arith.constant dense<0.000000e+00> : vector<128xf32>
    %38 = vector.multi_reduction <add>, %37, %cst_13 [0] : vector<2x128xf32> to vector<128xf32>
    %39 = vector.shape_cast %38 : vector<128xf32> to vector<1x128xf32>
    %40 = arith.addf %32, %39 : vector<1x128xf32>
    %41 = arith.mulf %37, %37 : vector<2x128xf32>
    %cst_14 = arith.constant dense<0.000000e+00> : vector<128xf32>
    %42 = vector.multi_reduction <add>, %41, %cst_14 [0] : vector<2x128xf32> to vector<128xf32>
    %43 = vector.shape_cast %42 : vector<128xf32> to vector<1x128xf32>
    %44 = arith.addf %36, %43 : vector<1x128xf32>
    %45 = vector.extract_strided_slice %2 {offsets = [0, 640], sizes = [2, 128], strides = [1, 1]} : vector<2x1152xf32> to vector<2x128xf32>
    %cst_15 = arith.constant dense<0.000000e+00> : vector<128xf32>
    %46 = vector.multi_reduction <add>, %45, %cst_15 [0] : vector<2x128xf32> to vector<128xf32>
    %47 = vector.shape_cast %46 : vector<128xf32> to vector<1x128xf32>
    %48 = arith.addf %40, %47 : vector<1x128xf32>
    %49 = arith.mulf %45, %45 : vector<2x128xf32>
    %cst_16 = arith.constant dense<0.000000e+00> : vector<128xf32>
    %50 = vector.multi_reduction <add>, %49, %cst_16 [0] : vector<2x128xf32> to vector<128xf32>
    %51 = vector.shape_cast %50 : vector<128xf32> to vector<1x128xf32>
    %52 = arith.addf %44, %51 : vector<1x128xf32>
    %53 = vector.extract_strided_slice %2 {offsets = [0, 768], sizes = [2, 128], strides = [1, 1]} : vector<2x1152xf32> to vector<2x128xf32>
    %cst_17 = arith.constant dense<0.000000e+00> : vector<128xf32>
    %54 = vector.multi_reduction <add>, %53, %cst_17 [0] : vector<2x128xf32> to vector<128xf32>
    %55 = vector.shape_cast %54 : vector<128xf32> to vector<1x128xf32>
    %56 = arith.addf %48, %55 : vector<1x128xf32>
    %57 = arith.mulf %53, %53 : vector<2x128xf32>
    %cst_18 = arith.constant dense<0.000000e+00> : vector<128xf32>
    %58 = vector.multi_reduction <add>, %57, %cst_18 [0] : vector<2x128xf32> to vector<128xf32>
    %59 = vector.shape_cast %58 : vector<128xf32> to vector<1x128xf32>
    %60 = arith.addf %52, %59 : vector<1x128xf32>
    %61 = vector.extract_strided_slice %2 {offsets = [0, 896], sizes = [2, 128], strides = [1, 1]} : vector<2x1152xf32> to vector<2x128xf32>
    %cst_19 = arith.constant dense<0.000000e+00> : vector<128xf32>
    %62 = vector.multi_reduction <add>, %61, %cst_19 [0] : vector<2x128xf32> to vector<128xf32>
    %63 = vector.shape_cast %62 : vector<128xf32> to vector<1x128xf32>
    %64 = arith.addf %56, %63 : vector<1x128xf32>
    %65 = arith.mulf %61, %61 : vector<2x128xf32>
    %cst_20 = arith.constant dense<0.000000e+00> : vector<128xf32>
    %66 = vector.multi_reduction <add>, %65, %cst_20 [0] : vector<2x128xf32> to vector<128xf32>
    %67 = vector.shape_cast %66 : vector<128xf32> to vector<1x128xf32>
    %68 = arith.addf %60, %67 : vector<1x128xf32>
    %69 = vector.extract_strided_slice %2 {offsets = [0, 1024], sizes = [2, 128], strides = [1, 1]} : vector<2x1152xf32> to vector<2x128xf32>
    %cst_21 = arith.constant dense<0.000000e+00> : vector<128xf32>
    %70 = vector.multi_reduction <add>, %69, %cst_21 [0] : vector<2x128xf32> to vector<128xf32>
    %71 = vector.shape_cast %70 : vector<128xf32> to vector<1x128xf32>
    %72 = arith.addf %64, %71 : vector<1x128xf32>
    %73 = arith.mulf %69, %69 : vector<2x128xf32>
    %cst_22 = arith.constant dense<0.000000e+00> : vector<128xf32>
    %74 = vector.multi_reduction <add>, %73, %cst_22 [0] : vector<2x128xf32> to vector<128xf32>
    %75 = vector.shape_cast %74 : vector<128xf32> to vector<1x128xf32>
    %76 = arith.addf %68, %75 : vector<1x128xf32>
    %cst_23 = arith.constant 1.800000e+01 : f32
    %77 = vector.broadcast %cst_23 : f32 to vector<1x128xf32>
    %78 = arith.divf %72, %77 : vector<1x128xf32>
    %cst_24 = arith.constant 1.800000e+01 : f32
    %79 = vector.broadcast %cst_24 : f32 to vector<1x128xf32>
    %80 = arith.divf %76, %79 : vector<1x128xf32>
    %81 = arith.mulf %78, %78 : vector<1x128xf32>
    %82 = arith.subf %80, %81 : vector<1x128xf32>
    %c0_25 = arith.constant 0 : index
    %c0_26 = arith.constant 0 : index
    %83 = vector.load %arg2[%c0_25, %c0_26] : memref<1x128xf32, #tpu.memory_space<vmem>>, vector<1x128xf32>
    %cst_27 = arith.constant 9.99999974E-6 : f32
    %84 = vector.broadcast %cst_27 : f32 to vector<1x128xf32>
    %85 = arith.addf %82, %84 : vector<1x128xf32>
    %86 = math.rsqrt %85 : vector<1x128xf32>
    %87 = arith.mulf %83, %86 : vector<1x128xf32>
    %c0_28 = arith.constant 0 : index
    %c0_29 = arith.constant 0 : index
    %88 = vector.load %arg3[%c0_28, %c0_29] : memref<1x128xf32, #tpu.memory_space<vmem>>, vector<1x128xf32>
    %89 = arith.mulf %78, %87 : vector<1x128xf32>
    %90 = arith.subf %88, %89 : vector<1x128xf32>
    %91 = vector.extract_strided_slice %2 {offsets = [0, 0], sizes = [2, 128], strides = [1, 1]} : vector<2x1152xf32> to vector<2x128xf32>
    %92 = vector.broadcast %87 : vector<1x128xf32> to vector<2x128xf32>
    %93 = arith.mulf %91, %92 : vector<2x128xf32>
    %94 = vector.broadcast %90 : vector<1x128xf32> to vector<2x128xf32>
    %95 = arith.addf %93, %94 : vector<2x128xf32>
    %cst_30 = arith.constant 0.000000e+00 : f32
    %96 = vector.broadcast %cst_30 : f32 to vector<2x128xf32>
    %97 = arith.maximumf %95, %96 : vector<2x128xf32>
    %c0_31 = arith.constant 0 : index
    %c0_32 = arith.constant 0 : index
    %98 = vector.load %arg4[%c0_31, %c0_32] : memref<2x1152xf32, #tpu.memory_space<vmem>>, vector<2x128xf32>
    tpu.vector_store %arg4[%c0_31, %c0_32], %97 {strides = array<i32>} : memref<2x1152xf32, #tpu.memory_space<vmem>>, vector<2x128xf32>,
    %99 = vector.extract_strided_slice %2 {offsets = [0, 128], sizes = [2, 128], strides = [1, 1]} : vector<2x1152xf32> to vector<2x128xf32>
    %100 = vector.broadcast %87 : vector<1x128xf32> to vector<2x128xf32>
    %101 = arith.mulf %99, %100 : vector<2x128xf32>
    %102 = vector.broadcast %90 : vector<1x128xf32> to vector<2x128xf32>
    %103 = arith.addf %101, %102 : vector<2x128xf32>
    %cst_33 = arith.constant 0.000000e+00 : f32
    %104 = vector.broadcast %cst_33 : f32 to vector<2x128xf32>
    %105 = arith.maximumf %103, %104 : vector<2x128xf32>
    %c0_34 = arith.constant 0 : index
    %c128 = arith.constant 128 : index
    %106 = vector.load %arg4[%c0_34, %c128] : memref<2x1152xf32, #tpu.memory_space<vmem>>, vector<2x128xf32>
    tpu.vector_store %arg4[%c0_34, %c128], %105 {strides = array<i32>} : memref<2x1152xf32, #tpu.memory_space<vmem>>, vector<2x128xf32>,
    %107 = vector.extract_strided_slice %2 {offsets = [0, 256], sizes = [2, 128], strides = [1, 1]} : vector<2x1152xf32> to vector<2x128xf32>
    %108 = vector.broadcast %87 : vector<1x128xf32> to vector<2x128xf32>
    %109 = arith.mulf %107, %108 : vector<2x128xf32>
    %110 = vector.broadcast %90 : vector<1x128xf32> to vector<2x128xf32>
    %111 = arith.addf %109, %110 : vector<2x128xf32>
    %cst_35 = arith.constant 0.000000e+00 : f32
    %112 = vector.broadcast %cst_35 : f32 to vector<2x128xf32>
    %113 = arith.maximumf %111, %112 : vector<2x128xf32>
    %c0_36 = arith.constant 0 : index
    %c256 = arith.constant 256 : index
    %114 = vector.load %arg4[%c0_36, %c256] : memref<2x1152xf32, #tpu.memory_space<vmem>>, vector<2x128xf32>
    tpu.vector_store %arg4[%c0_36, %c256], %113 {strides = array<i32>} : memref<2x1152xf32, #tpu.memory_space<vmem>>, vector<2x128xf32>,
    %115 = vector.extract_strided_slice %2 {offsets = [0, 384], sizes = [2, 128], strides = [1, 1]} : vector<2x1152xf32> to vector<2x128xf32>
    %116 = vector.broadcast %87 : vector<1x128xf32> to vector<2x128xf32>
    %117 = arith.mulf %115, %116 : vector<2x128xf32>
    %118 = vector.broadcast %90 : vector<1x128xf32> to vector<2x128xf32>
    %119 = arith.addf %117, %118 : vector<2x128xf32>
    %cst_37 = arith.constant 0.000000e+00 : f32
    %120 = vector.broadcast %cst_37 : f32 to vector<2x128xf32>
    %121 = arith.maximumf %119, %120 : vector<2x128xf32>
    %c0_38 = arith.constant 0 : index
    %c384 = arith.constant 384 : index
    %122 = vector.load %arg4[%c0_38, %c384] : memref<2x1152xf32, #tpu.memory_space<vmem>>, vector<2x128xf32>
    tpu.vector_store %arg4[%c0_38, %c384], %121 {strides = array<i32>} : memref<2x1152xf32, #tpu.memory_space<vmem>>, vector<2x128xf32>,
    %123 = vector.extract_strided_slice %2 {offsets = [0, 512], sizes = [2, 128], strides = [1, 1]} : vector<2x1152xf32> to vector<2x128xf32>
    %124 = vector.broadcast %87 : vector<1x128xf32> to vector<2x128xf32>
    %125 = arith.mulf %123, %124 : vector<2x128xf32>
    %126 = vector.broadcast %90 : vector<1x128xf32> to vector<2x128xf32>
    %127 = arith.addf %125, %126 : vector<2x128xf32>
    %cst_39 = arith.constant 0.000000e+00 : f32
    %128 = vector.broadcast %cst_39 : f32 to vector<2x128xf32>
    %129 = arith.maximumf %127, %128 : vector<2x128xf32>
    %c0_40 = arith.constant 0 : index
    %c512 = arith.constant 512 : index
    %130 = vector.load %arg4[%c0_40, %c512] : memref<2x1152xf32, #tpu.memory_space<vmem>>, vector<2x128xf32>
    tpu.vector_store %arg4[%c0_40, %c512], %129 {strides = array<i32>} : memref<2x1152xf32, #tpu.memory_space<vmem>>, vector<2x128xf32>,
    %131 = vector.extract_strided_slice %2 {offsets = [0, 640], sizes = [2, 128], strides = [1, 1]} : vector<2x1152xf32> to vector<2x128xf32>
    %132 = vector.broadcast %87 : vector<1x128xf32> to vector<2x128xf32>
    %133 = arith.mulf %131, %132 : vector<2x128xf32>
    %134 = vector.broadcast %90 : vector<1x128xf32> to vector<2x128xf32>
    %135 = arith.addf %133, %134 : vector<2x128xf32>
    %cst_41 = arith.constant 0.000000e+00 : f32
    %136 = vector.broadcast %cst_41 : f32 to vector<2x128xf32>
    %137 = arith.maximumf %135, %136 : vector<2x128xf32>
    %c0_42 = arith.constant 0 : index
    %c640 = arith.constant 640 : index
    %138 = vector.load %arg4[%c0_42, %c640] : memref<2x1152xf32, #tpu.memory_space<vmem>>, vector<2x128xf32>
    tpu.vector_store %arg4[%c0_42, %c640], %137 {strides = array<i32>} : memref<2x1152xf32, #tpu.memory_space<vmem>>, vector<2x128xf32>,
    %139 = vector.extract_strided_slice %2 {offsets = [0, 768], sizes = [2, 128], strides = [1, 1]} : vector<2x1152xf32> to vector<2x128xf32>
    %140 = vector.broadcast %87 : vector<1x128xf32> to vector<2x128xf32>
    %141 = arith.mulf %139, %140 : vector<2x128xf32>
    %142 = vector.broadcast %90 : vector<1x128xf32> to vector<2x128xf32>
    %143 = arith.addf %141, %142 : vector<2x128xf32>
    %cst_43 = arith.constant 0.000000e+00 : f32
    %144 = vector.broadcast %cst_43 : f32 to vector<2x128xf32>
    %145 = arith.maximumf %143, %144 : vector<2x128xf32>
    %c0_44 = arith.constant 0 : index
    %c768 = arith.constant 768 : index
    %146 = vector.load %arg4[%c0_44, %c768] : memref<2x1152xf32, #tpu.memory_space<vmem>>, vector<2x128xf32>
    tpu.vector_store %arg4[%c0_44, %c768], %145 {strides = array<i32>} : memref<2x1152xf32, #tpu.memory_space<vmem>>, vector<2x128xf32>,
    %147 = vector.extract_strided_slice %2 {offsets = [0, 896], sizes = [2, 128], strides = [1, 1]} : vector<2x1152xf32> to vector<2x128xf32>
    %148 = vector.broadcast %87 : vector<1x128xf32> to vector<2x128xf32>
    %149 = arith.mulf %147, %148 : vector<2x128xf32>
    %150 = vector.broadcast %90 : vector<1x128xf32> to vector<2x128xf32>
    %151 = arith.addf %149, %150 : vector<2x128xf32>
    %cst_45 = arith.constant 0.000000e+00 : f32
    %152 = vector.broadcast %cst_45 : f32 to vector<2x128xf32>
    %153 = arith.maximumf %151, %152 : vector<2x128xf32>
    %c0_46 = arith.constant 0 : index
    %c896 = arith.constant 896 : index
    %154 = vector.load %arg4[%c0_46, %c896] : memref<2x1152xf32, #tpu.memory_space<vmem>>, vector<2x128xf32>
    tpu.vector_store %arg4[%c0_46, %c896], %153 {strides = array<i32>} : memref<2x1152xf32, #tpu.memory_space<vmem>>, vector<2x128xf32>,
    %155 = vector.extract_strided_slice %2 {offsets = [0, 1024], sizes = [2, 128], strides = [1, 1]} : vector<2x1152xf32> to vector<2x128xf32>
    %156 = vector.broadcast %87 : vector<1x128xf32> to vector<2x128xf32>
    %157 = arith.mulf %155, %156 : vector<2x128xf32>
    %158 = vector.broadcast %90 : vector<1x128xf32> to vector<2x128xf32>
    %159 = arith.addf %157, %158 : vector<2x128xf32>
    %cst_47 = arith.constant 0.000000e+00 : f32
    %160 = vector.broadcast %cst_47 : f32 to vector<2x128xf32>
    %161 = arith.maximumf %159, %160 : vector<2x128xf32>
    %c0_48 = arith.constant 0 : index
    %c1024 = arith.constant 1024 : index
    %162 = vector.load %arg4[%c0_48, %c1024] : memref<2x1152xf32, #tpu.memory_space<vmem>>, vector<2x128xf32>
    tpu.vector_store %arg4[%c0_48, %c1024], %161 {strides = array<i32>} : memref<2x1152xf32, #tpu.memory_space<vmem>>, vector<2x128xf32>,
    return
  }
}

module attributes {stable_mosaic.version = 11 : i64} {
  func.func @_head_kernel(%arg0: memref<2x10xbf16, #tpu.memory_space<vmem>>, %arg1: memref<10x1152xbf16, #tpu.memory_space<vmem>>, %arg2: memref<1x128xf32, #tpu.memory_space<vmem>>, %arg3: memref<1x128xf32, #tpu.memory_space<vmem>>, %arg4: memref<2x1152xf32, #tpu.memory_space<vmem>>) attributes {dimension_semantics = [], scalar_prefetch = 0 : i64, scratch_operands = 0 : i64, tpu.core_type = #tpu.core_type<tc>} {
    %c0 = arith.constant 0 : index
    %c0_0 = arith.constant 0 : index
    %0 = vector.load %arg0[%c0, %c0_0] : memref<2x10xbf16, #tpu.memory_space<vmem>>, vector<2x10xbf16>
    %c0_1 = arith.constant 0 : index
    %c0_2 = arith.constant 0 : index
    %1 = vector.load %arg1[%c0_1, %c0_2] : memref<10x1152xbf16, #tpu.memory_space<vmem>>, vector<10x1152xbf16>
    %cst = arith.constant dense<0.000000e+00> : vector<2x1152xf32>
    %2 = tpu.matmul %0, %1, %cst {dimension_numbers = #tpu.dot_dimension_numbers<[1], [0], [0], [1], [0, 0, 1, 1], [], []>} : vector<2x10xbf16>, vector<10x1152xbf16>, vector<2x1152xf32> -> vector<2x1152xf32>
    %cst_3 = arith.constant 0.000000e+00 : f32
    %3 = vector.broadcast %cst_3 : f32 to vector<1x128xf32>
    %cst_4 = arith.constant 0.000000e+00 : f32
    %4 = vector.broadcast %cst_4 : f32 to vector<1x128xf32>
    %5 = vector.extract_strided_slice %2 {offsets = [0, 0], sizes = [2, 128], strides = [1, 1]} : vector<2x1152xf32> to vector<2x128xf32>
    %cst_5 = arith.constant dense<0.000000e+00> : vector<128xf32>
    %6 = vector.multi_reduction <add>, %5, %cst_5 [0] : vector<2x128xf32> to vector<128xf32>
    %7 = vector.shape_cast %6 : vector<128xf32> to vector<1x128xf32>
    %8 = arith.addf %3, %7 : vector<1x128xf32>
    %9 = arith.mulf %5, %5 : vector<2x128xf32>
    %cst_6 = arith.constant dense<0.000000e+00> : vector<128xf32>
    %10 = vector.multi_reduction <add>, %9, %cst_6 [0] : vector<2x128xf32> to vector<128xf32>
    %11 = vector.shape_cast %10 : vector<128xf32> to vector<1x128xf32>
    %12 = arith.addf %4, %11 : vector<1x128xf32>
    %13 = vector.extract_strided_slice %2 {offsets = [0, 128], sizes = [2, 128], strides = [1, 1]} : vector<2x1152xf32> to vector<2x128xf32>
    %cst_7 = arith.constant dense<0.000000e+00> : vector<128xf32>
    %14 = vector.multi_reduction <add>, %13, %cst_7 [0] : vector<2x128xf32> to vector<128xf32>
    %15 = vector.shape_cast %14 : vector<128xf32> to vector<1x128xf32>
    %16 = arith.addf %8, %15 : vector<1x128xf32>
    %17 = arith.mulf %13, %13 : vector<2x128xf32>
    %cst_8 = arith.constant dense<0.000000e+00> : vector<128xf32>
    %18 = vector.multi_reduction <add>, %17, %cst_8 [0] : vector<2x128xf32> to vector<128xf32>
    %19 = vector.shape_cast %18 : vector<128xf32> to vector<1x128xf32>
    %20 = arith.addf %12, %19 : vector<1x128xf32>
    %21 = vector.extract_strided_slice %2 {offsets = [0, 256], sizes = [2, 128], strides = [1, 1]} : vector<2x1152xf32> to vector<2x128xf32>
    %cst_9 = arith.constant dense<0.000000e+00> : vector<128xf32>
    %22 = vector.multi_reduction <add>, %21, %cst_9 [0] : vector<2x128xf32> to vector<128xf32>
    %23 = vector.shape_cast %22 : vector<128xf32> to vector<1x128xf32>
    %24 = arith.addf %16, %23 : vector<1x128xf32>
    %25 = arith.mulf %21, %21 : vector<2x128xf32>
    %cst_10 = arith.constant dense<0.000000e+00> : vector<128xf32>
    %26 = vector.multi_reduction <add>, %25, %cst_10 [0] : vector<2x128xf32> to vector<128xf32>
    %27 = vector.shape_cast %26 : vector<128xf32> to vector<1x128xf32>
    %28 = arith.addf %20, %27 : vector<1x128xf32>
    %29 = vector.extract_strided_slice %2 {offsets = [0, 384], sizes = [2, 128], strides = [1, 1]} : vector<2x1152xf32> to vector<2x128xf32>
    %cst_11 = arith.constant dense<0.000000e+00> : vector<128xf32>
    %30 = vector.multi_reduction <add>, %29, %cst_11 [0] : vector<2x128xf32> to vector<128xf32>
    %31 = vector.shape_cast %30 : vector<128xf32> to vector<1x128xf32>
    %32 = arith.addf %24, %31 : vector<1x128xf32>
    %33 = arith.mulf %29, %29 : vector<2x128xf32>
    %cst_12 = arith.constant dense<0.000000e+00> : vector<128xf32>
    %34 = vector.multi_reduction <add>, %33, %cst_12 [0] : vector<2x128xf32> to vector<128xf32>
    %35 = vector.shape_cast %34 : vector<128xf32> to vector<1x128xf32>
    %36 = arith.addf %28, %35 : vector<1x128xf32>
    %37 = vector.extract_strided_slice %2 {offsets = [0, 512], sizes = [2, 128], strides = [1, 1]} : vector<2x1152xf32> to vector<2x128xf32>
    %cst_13 = arith.constant dense<0.000000e+00> : vector<128xf32>
    %38 = vector.multi_reduction <add>, %37, %cst_13 [0] : vector<2x128xf32> to vector<128xf32>
    %39 = vector.shape_cast %38 : vector<128xf32> to vector<1x128xf32>
    %40 = arith.addf %32, %39 : vector<1x128xf32>
    %41 = arith.mulf %37, %37 : vector<2x128xf32>
    %cst_14 = arith.constant dense<0.000000e+00> : vector<128xf32>
    %42 = vector.multi_reduction <add>, %41, %cst_14 [0] : vector<2x128xf32> to vector<128xf32>
    %43 = vector.shape_cast %42 : vector<128xf32> to vector<1x128xf32>
    %44 = arith.addf %36, %43 : vector<1x128xf32>
    %45 = vector.extract_strided_slice %2 {offsets = [0, 640], sizes = [2, 128], strides = [1, 1]} : vector<2x1152xf32> to vector<2x128xf32>
    %cst_15 = arith.constant dense<0.000000e+00> : vector<128xf32>
    %46 = vector.multi_reduction <add>, %45, %cst_15 [0] : vector<2x128xf32> to vector<128xf32>
    %47 = vector.shape_cast %46 : vector<128xf32> to vector<1x128xf32>
    %48 = arith.addf %40, %47 : vector<1x128xf32>
    %49 = arith.mulf %45, %45 : vector<2x128xf32>
    %cst_16 = arith.constant dense<0.000000e+00> : vector<128xf32>
    %50 = vector.multi_reduction <add>, %49, %cst_16 [0] : vector<2x128xf32> to vector<128xf32>
    %51 = vector.shape_cast %50 : vector<128xf32> to vector<1x128xf32>
    %52 = arith.addf %44, %51 : vector<1x128xf32>
    %53 = vector.extract_strided_slice %2 {offsets = [0, 768], sizes = [2, 128], strides = [1, 1]} : vector<2x1152xf32> to vector<2x128xf32>
    %cst_17 = arith.constant dense<0.000000e+00> : vector<128xf32>
    %54 = vector.multi_reduction <add>, %53, %cst_17 [0] : vector<2x128xf32> to vector<128xf32>
    %55 = vector.shape_cast %54 : vector<128xf32> to vector<1x128xf32>
    %56 = arith.addf %48, %55 : vector<1x128xf32>
    %57 = arith.mulf %53, %53 : vector<2x128xf32>
    %cst_18 = arith.constant dense<0.000000e+00> : vector<128xf32>
    %58 = vector.multi_reduction <add>, %57, %cst_18 [0] : vector<2x128xf32> to vector<128xf32>
    %59 = vector.shape_cast %58 : vector<128xf32> to vector<1x128xf32>
    %60 = arith.addf %52, %59 : vector<1x128xf32>
    %61 = vector.extract_strided_slice %2 {offsets = [0, 896], sizes = [2, 128], strides = [1, 1]} : vector<2x1152xf32> to vector<2x128xf32>
    %cst_19 = arith.constant dense<0.000000e+00> : vector<128xf32>
    %62 = vector.multi_reduction <add>, %61, %cst_19 [0] : vector<2x128xf32> to vector<128xf32>
    %63 = vector.shape_cast %62 : vector<128xf32> to vector<1x128xf32>
    %64 = arith.addf %56, %63 : vector<1x128xf32>
    %65 = arith.mulf %61, %61 : vector<2x128xf32>
    %cst_20 = arith.constant dense<0.000000e+00> : vector<128xf32>
    %66 = vector.multi_reduction <add>, %65, %cst_20 [0] : vector<2x128xf32> to vector<128xf32>
    %67 = vector.shape_cast %66 : vector<128xf32> to vector<1x128xf32>
    %68 = arith.addf %60, %67 : vector<1x128xf32>
    %69 = vector.extract_strided_slice %2 {offsets = [0, 1024], sizes = [2, 128], strides = [1, 1]} : vector<2x1152xf32> to vector<2x128xf32>
    %cst_21 = arith.constant dense<0.000000e+00> : vector<128xf32>
    %70 = vector.multi_reduction <add>, %69, %cst_21 [0] : vector<2x128xf32> to vector<128xf32>
    %71 = vector.shape_cast %70 : vector<128xf32> to vector<1x128xf32>
    %72 = arith.addf %64, %71 : vector<1x128xf32>
    %73 = arith.mulf %69, %69 : vector<2x128xf32>
    %cst_22 = arith.constant dense<0.000000e+00> : vector<128xf32>
    %74 = vector.multi_reduction <add>, %73, %cst_22 [0] : vector<2x128xf32> to vector<128xf32>
    %75 = vector.shape_cast %74 : vector<128xf32> to vector<1x128xf32>
    %76 = arith.addf %68, %75 : vector<1x128xf32>
    %cst_23 = arith.constant 1.800000e+01 : f32
    %77 = vector.broadcast %cst_23 : f32 to vector<1x128xf32>
    %78 = arith.divf %72, %77 : vector<1x128xf32>
    %cst_24 = arith.constant 1.800000e+01 : f32
    %79 = vector.broadcast %cst_24 : f32 to vector<1x128xf32>
    %80 = arith.divf %76, %79 : vector<1x128xf32>
    %81 = arith.mulf %78, %78 : vector<1x128xf32>
    %82 = arith.subf %80, %81 : vector<1x128xf32>
    %c0_25 = arith.constant 0 : index
    %c0_26 = arith.constant 0 : index
    %83 = vector.load %arg2[%c0_25, %c0_26] : memref<1x128xf32, #tpu.memory_space<vmem>>, vector<1x128xf32>
    %cst_27 = arith.constant 9.99999974E-6 : f32
    %84 = vector.broadcast %cst_27 : f32 to vector<1x128xf32>
    %85 = arith.addf %82, %84 : vector<1x128xf32>
    %86 = math.rsqrt %85 : vector<1x128xf32>
    %87 = arith.mulf %83, %86 : vector<1x128xf32>
    %c0_28 = arith.constant 0 : index
    %c0_29 = arith.constant 0 : index
    %88 = vector.load %arg3[%c0_28, %c0_29] : memref<1x128xf32, #tpu.memory_space<vmem>>, vector<1x128xf32>
    %89 = arith.mulf %78, %87 : vector<1x128xf32>
    %90 = arith.subf %88, %89 : vector<1x128xf32>
    %91 = vector.extract_strided_slice %2 {offsets = [0, 0], sizes = [2, 128], strides = [1, 1]} : vector<2x1152xf32> to vector<2x128xf32>
    %92 = vector.broadcast %87 : vector<1x128xf32> to vector<2x128xf32>
    %93 = arith.mulf %91, %92 : vector<2x128xf32>
    %94 = vector.broadcast %90 : vector<1x128xf32> to vector<2x128xf32>
    %95 = arith.addf %93, %94 : vector<2x128xf32>
    %cst_30 = arith.constant 0.000000e+00 : f32
    %96 = vector.broadcast %cst_30 : f32 to vector<2x128xf32>
    %97 = arith.maximumf %95, %96 : vector<2x128xf32>
    %c0_31 = arith.constant 0 : index
    %c0_32 = arith.constant 0 : index
    %98 = vector.load %arg4[%c0_31, %c0_32] : memref<2x1152xf32, #tpu.memory_space<vmem>>, vector<2x128xf32>
    tpu.vector_store %arg4[%c0_31, %c0_32], %97 {strides = array<i32>} : memref<2x1152xf32, #tpu.memory_space<vmem>>, vector<2x128xf32>,
    %99 = vector.extract_strided_slice %2 {offsets = [0, 128], sizes = [2, 128], strides = [1, 1]} : vector<2x1152xf32> to vector<2x128xf32>
    %100 = vector.broadcast %87 : vector<1x128xf32> to vector<2x128xf32>
    %101 = arith.mulf %99, %100 : vector<2x128xf32>
    %102 = vector.broadcast %90 : vector<1x128xf32> to vector<2x128xf32>
    %103 = arith.addf %101, %102 : vector<2x128xf32>
    %cst_33 = arith.constant 0.000000e+00 : f32
    %104 = vector.broadcast %cst_33 : f32 to vector<2x128xf32>
    %105 = arith.maximumf %103, %104 : vector<2x128xf32>
    %c0_34 = arith.constant 0 : index
    %c128 = arith.constant 128 : index
    %106 = vector.load %arg4[%c0_34, %c128] : memref<2x1152xf32, #tpu.memory_space<vmem>>, vector<2x128xf32>
    tpu.vector_store %arg4[%c0_34, %c128], %105 {strides = array<i32>} : memref<2x1152xf32, #tpu.memory_space<vmem>>, vector<2x128xf32>,
    %107 = vector.extract_strided_slice %2 {offsets = [0, 256], sizes = [2, 128], strides = [1, 1]} : vector<2x1152xf32> to vector<2x128xf32>
    %108 = vector.broadcast %87 : vector<1x128xf32> to vector<2x128xf32>
    %109 = arith.mulf %107, %108 : vector<2x128xf32>
    %110 = vector.broadcast %90 : vector<1x128xf32> to vector<2x128xf32>
    %111 = arith.addf %109, %110 : vector<2x128xf32>
    %cst_35 = arith.constant 0.000000e+00 : f32
    %112 = vector.broadcast %cst_35 : f32 to vector<2x128xf32>
    %113 = arith.maximumf %111, %112 : vector<2x128xf32>
    %c0_36 = arith.constant 0 : index
    %c256 = arith.constant 256 : index
    %114 = vector.load %arg4[%c0_36, %c256] : memref<2x1152xf32, #tpu.memory_space<vmem>>, vector<2x128xf32>
    tpu.vector_store %arg4[%c0_36, %c256], %113 {strides = array<i32>} : memref<2x1152xf32, #tpu.memory_space<vmem>>, vector<2x128xf32>,
    %115 = vector.extract_strided_slice %2 {offsets = [0, 384], sizes = [2, 128], strides = [1, 1]} : vector<2x1152xf32> to vector<2x128xf32>
    %116 = vector.broadcast %87 : vector<1x128xf32> to vector<2x128xf32>
    %117 = arith.mulf %115, %116 : vector<2x128xf32>
    %118 = vector.broadcast %90 : vector<1x128xf32> to vector<2x128xf32>
    %119 = arith.addf %117, %118 : vector<2x128xf32>
    %cst_37 = arith.constant 0.000000e+00 : f32
    %120 = vector.broadcast %cst_37 : f32 to vector<2x128xf32>
    %121 = arith.maximumf %119, %120 : vector<2x128xf32>
    %c0_38 = arith.constant 0 : index
    %c384 = arith.constant 384 : index
    %122 = vector.load %arg4[%c0_38, %c384] : memref<2x1152xf32, #tpu.memory_space<vmem>>, vector<2x128xf32>
    tpu.vector_store %arg4[%c0_38, %c384], %121 {strides = array<i32>} : memref<2x1152xf32, #tpu.memory_space<vmem>>, vector<2x128xf32>,
    %123 = vector.extract_strided_slice %2 {offsets = [0, 512], sizes = [2, 128], strides = [1, 1]} : vector<2x1152xf32> to vector<2x128xf32>
    %124 = vector.broadcast %87 : vector<1x128xf32> to vector<2x128xf32>
    %125 = arith.mulf %123, %124 : vector<2x128xf32>
    %126 = vector.broadcast %90 : vector<1x128xf32> to vector<2x128xf32>
    %127 = arith.addf %125, %126 : vector<2x128xf32>
    %cst_39 = arith.constant 0.000000e+00 : f32
    %128 = vector.broadcast %cst_39 : f32 to vector<2x128xf32>
    %129 = arith.maximumf %127, %128 : vector<2x128xf32>
    %c0_40 = arith.constant 0 : index
    %c512 = arith.constant 512 : index
    %130 = vector.load %arg4[%c0_40, %c512] : memref<2x1152xf32, #tpu.memory_space<vmem>>, vector<2x128xf32>
    tpu.vector_store %arg4[%c0_40, %c512], %129 {strides = array<i32>} : memref<2x1152xf32, #tpu.memory_space<vmem>>, vector<2x128xf32>,
    %131 = vector.extract_strided_slice %2 {offsets = [0, 640], sizes = [2, 128], strides = [1, 1]} : vector<2x1152xf32> to vector<2x128xf32>
    %132 = vector.broadcast %87 : vector<1x128xf32> to vector<2x128xf32>
    %133 = arith.mulf %131, %132 : vector<2x128xf32>
    %134 = vector.broadcast %90 : vector<1x128xf32> to vector<2x128xf32>
    %135 = arith.addf %133, %134 : vector<2x128xf32>
    %cst_41 = arith.constant 0.000000e+00 : f32
    %136 = vector.broadcast %cst_41 : f32 to vector<2x128xf32>
    %137 = arith.maximumf %135, %136 : vector<2x128xf32>
    %c0_42 = arith.constant 0 : index
    %c640 = arith.constant 640 : index
    %138 = vector.load %arg4[%c0_42, %c640] : memref<2x1152xf32, #tpu.memory_space<vmem>>, vector<2x128xf32>
    tpu.vector_store %arg4[%c0_42, %c640], %137 {strides = array<i32>} : memref<2x1152xf32, #tpu.memory_space<vmem>>, vector<2x128xf32>,
    %139 = vector.extract_strided_slice %2 {offsets = [0, 768], sizes = [2, 128], strides = [1, 1]} : vector<2x1152xf32> to vector<2x128xf32>
    %140 = vector.broadcast %87 : vector<1x128xf32> to vector<2x128xf32>
    %141 = arith.mulf %139, %140 : vector<2x128xf32>
    %142 = vector.broadcast %90 : vector<1x128xf32> to vector<2x128xf32>
    %143 = arith.addf %141, %142 : vector<2x128xf32>
    %cst_43 = arith.constant 0.000000e+00 : f32
    %144 = vector.broadcast %cst_43 : f32 to vector<2x128xf32>
    %145 = arith.maximumf %143, %144 : vector<2x128xf32>
    %c0_44 = arith.constant 0 : index
    %c768 = arith.constant 768 : index
    %146 = vector.load %arg4[%c0_44, %c768] : memref<2x1152xf32, #tpu.memory_space<vmem>>, vector<2x128xf32>
    tpu.vector_store %arg4[%c0_44, %c768], %145 {strides = array<i32>} : memref<2x1152xf32, #tpu.memory_space<vmem>>, vector<2x128xf32>,
    %147 = vector.extract_strided_slice %2 {offsets = [0, 896], sizes = [2, 128], strides = [1, 1]} : vector<2x1152xf32> to vector<2x128xf32>
    %148 = vector.broadcast %87 : vector<1x128xf32> to vector<2x128xf32>
    %149 = arith.mulf %147, %148 : vector<2x128xf32>
    %150 = vector.broadcast %90 : vector<1x128xf32> to vector<2x128xf32>
    %151 = arith.addf %149, %150 : vector<2x128xf32>
    %cst_45 = arith.constant 0.000000e+00 : f32
    %152 = vector.broadcast %cst_45 : f32 to vector<2x128xf32>
    %153 = arith.maximumf %151, %152 : vector<2x128xf32>
    %c0_46 = arith.constant 0 : index
    %c896 = arith.constant 896 : index
    %154 = vector.load %arg4[%c0_46, %c896] : memref<2x1152xf32, #tpu.memory_space<vmem>>, vector<2x128xf32>
    tpu.vector_store %arg4[%c0_46, %c896], %153 {strides = array<i32>} : memref<2x1152xf32, #tpu.memory_space<vmem>>, vector<2x128xf32>,
    %155 = vector.extract_strided_slice %2 {offsets = [0, 1024], sizes = [2, 128], strides = [1, 1]} : vector<2x1152xf32> to vector<2x128xf32>
    %156 = vector.broadcast %87 : vector<1x128xf32> to vector<2x128xf32>
    %157 = arith.mulf %155, %156 : vector<2x128xf32>
    %158 = vector.broadcast %90 : vector<1x128xf32> to vector<2x128xf32>
    %159 = arith.addf %157, %158 : vector<2x128xf32>
    %cst_47 = arith.constant 0.000000e+00 : f32
    %160 = vector.broadcast %cst_47 : f32 to vector<2x128xf32>
    %161 = arith.maximumf %159, %160 : vector<2x128xf32>
    %c0_48 = arith.constant 0 : index
    %c1024 = arith.constant 1024 : index
    %162 = vector.load %arg4[%c0_48, %c1024] : memref<2x1152xf32, #tpu.memory_space<vmem>>, vector<2x128xf32>
    tpu.vector_store %arg4[%c0_48, %c1024], %161 {strides = array<i32>} : memref<2x1152xf32, #tpu.memory_space<vmem>>, vector<2x128xf32>,
    return
  }
}

module attributes {stable_mosaic.version = 11 : i64} {
  func.func @_matmul_bn_relu_kernel(%arg0: memref<98x2304xbf16, #tpu.memory_space<vmem>>, %arg1: memref<2304x128xbf16, #tpu.memory_space<vmem>>, %arg2: memref<1x128xf32, #tpu.memory_space<vmem>>, %arg3: memref<1x128xf32, #tpu.memory_space<vmem>>, %arg4: memref<98x128xf32, #tpu.memory_space<vmem>>) attributes {dimension_semantics = [], scalar_prefetch = 0 : i64, scratch_operands = 0 : i64, tpu.core_type = #tpu.core_type<tc>} {
    %c0 = arith.constant 0 : index
    %c0_0 = arith.constant 0 : index
    %0 = vector.load %arg0[%c0, %c0_0] : memref<98x2304xbf16, #tpu.memory_space<vmem>>, vector<98x2304xbf16>
    %c0_1 = arith.constant 0 : index
    %c0_2 = arith.constant 0 : index
    %1 = vector.load %arg1[%c0_1, %c0_2] : memref<2304x128xbf16, #tpu.memory_space<vmem>>, vector<2304x128xbf16>
    %cst = arith.constant dense<0.000000e+00> : vector<98x128xf32>
    %2 = tpu.matmul %0, %1, %cst {dimension_numbers = #tpu.dot_dimension_numbers<[1], [0], [0], [1], [0, 0, 1, 1], [], []>} : vector<98x2304xbf16>, vector<2304x128xbf16>, vector<98x128xf32> -> vector<98x128xf32>
    %cst_3 = arith.constant dense<0.000000e+00> : vector<128xf32>
    %3 = vector.multi_reduction <add>, %2, %cst_3 [0] : vector<98x128xf32> to vector<128xf32>
    %4 = vector.shape_cast %3 : vector<128xf32> to vector<1x128xf32>
    %cst_4 = arith.constant 9.800000e+01 : f32
    %5 = vector.broadcast %cst_4 : f32 to vector<1x128xf32>
    %6 = arith.divf %4, %5 : vector<1x128xf32>
    %7 = arith.mulf %2, %2 : vector<98x128xf32>
    %cst_5 = arith.constant dense<0.000000e+00> : vector<128xf32>
    %8 = vector.multi_reduction <add>, %7, %cst_5 [0] : vector<98x128xf32> to vector<128xf32>
    %9 = vector.shape_cast %8 : vector<128xf32> to vector<1x128xf32>
    %cst_6 = arith.constant 9.800000e+01 : f32
    %10 = vector.broadcast %cst_6 : f32 to vector<1x128xf32>
    %11 = arith.divf %9, %10 : vector<1x128xf32>
    %12 = arith.mulf %6, %6 : vector<1x128xf32>
    %13 = arith.subf %11, %12 : vector<1x128xf32>
    %c0_7 = arith.constant 0 : index
    %c0_8 = arith.constant 0 : index
    %14 = vector.load %arg2[%c0_7, %c0_8] : memref<1x128xf32, #tpu.memory_space<vmem>>, vector<1x128xf32>
    %cst_9 = arith.constant 9.99999974E-6 : f32
    %15 = vector.broadcast %cst_9 : f32 to vector<1x128xf32>
    %16 = arith.addf %13, %15 : vector<1x128xf32>
    %17 = math.rsqrt %16 : vector<1x128xf32>
    %18 = arith.mulf %14, %17 : vector<1x128xf32>
    %c0_10 = arith.constant 0 : index
    %c0_11 = arith.constant 0 : index
    %19 = vector.load %arg3[%c0_10, %c0_11] : memref<1x128xf32, #tpu.memory_space<vmem>>, vector<1x128xf32>
    %20 = arith.mulf %6, %18 : vector<1x128xf32>
    %21 = arith.subf %19, %20 : vector<1x128xf32>
    %22 = vector.broadcast %18 : vector<1x128xf32> to vector<98x128xf32>
    %23 = arith.mulf %2, %22 : vector<98x128xf32>
    %24 = vector.broadcast %21 : vector<1x128xf32> to vector<98x128xf32>
    %25 = arith.addf %23, %24 : vector<98x128xf32>
    %cst_12 = arith.constant 0.000000e+00 : f32
    %26 = vector.broadcast %cst_12 : f32 to vector<98x128xf32>
    %27 = arith.maximumf %25, %26 : vector<98x128xf32>
    %c0_13 = arith.constant 0 : index
    %c0_14 = arith.constant 0 : index
    %28 = vector.load %arg4[%c0_13, %c0_14] : memref<98x128xf32, #tpu.memory_space<vmem>>, vector<98x128xf32>
    tpu.vector_store %arg4[%c0_13, %c0_14], %27 {strides = array<i32>} : memref<98x128xf32, #tpu.memory_space<vmem>>, vector<98x128xf32>,
    return
  }
}

module attributes {stable_mosaic.version = 11 : i64} {
  func.func @_matmul_bn_relu_kernel(%arg0: memref<392x2048xbf16, #tpu.memory_space<vmem>>, %arg1: memref<2048x64xbf16, #tpu.memory_space<vmem>>, %arg2: memref<1x64xf32, #tpu.memory_space<vmem>>, %arg3: memref<1x64xf32, #tpu.memory_space<vmem>>, %arg4: memref<392x64xf32, #tpu.memory_space<vmem>>) attributes {dimension_semantics = [], scalar_prefetch = 0 : i64, scratch_operands = 0 : i64, tpu.core_type = #tpu.core_type<tc>} {
    %c0 = arith.constant 0 : index
    %c0_0 = arith.constant 0 : index
    %0 = vector.load %arg0[%c0, %c0_0] : memref<392x2048xbf16, #tpu.memory_space<vmem>>, vector<392x2048xbf16>
    %c0_1 = arith.constant 0 : index
    %c0_2 = arith.constant 0 : index
    %1 = vector.load %arg1[%c0_1, %c0_2] : memref<2048x64xbf16, #tpu.memory_space<vmem>>, vector<2048x64xbf16>
    %cst = arith.constant dense<0.000000e+00> : vector<392x64xf32>
    %2 = tpu.matmul %0, %1, %cst {dimension_numbers = #tpu.dot_dimension_numbers<[1], [0], [0], [1], [0, 0, 1, 1], [], []>} : vector<392x2048xbf16>, vector<2048x64xbf16>, vector<392x64xf32> -> vector<392x64xf32>
    %cst_3 = arith.constant dense<0.000000e+00> : vector<64xf32>
    %3 = vector.multi_reduction <add>, %2, %cst_3 [0] : vector<392x64xf32> to vector<64xf32>
    %4 = vector.shape_cast %3 : vector<64xf32> to vector<1x64xf32>
    %cst_4 = arith.constant 3.920000e+02 : f32
    %5 = vector.broadcast %cst_4 : f32 to vector<1x64xf32>
    %6 = arith.divf %4, %5 : vector<1x64xf32>
    %7 = arith.mulf %2, %2 : vector<392x64xf32>
    %cst_5 = arith.constant dense<0.000000e+00> : vector<64xf32>
    %8 = vector.multi_reduction <add>, %7, %cst_5 [0] : vector<392x64xf32> to vector<64xf32>
    %9 = vector.shape_cast %8 : vector<64xf32> to vector<1x64xf32>
    %cst_6 = arith.constant 3.920000e+02 : f32
    %10 = vector.broadcast %cst_6 : f32 to vector<1x64xf32>
    %11 = arith.divf %9, %10 : vector<1x64xf32>
    %12 = arith.mulf %6, %6 : vector<1x64xf32>
    %13 = arith.subf %11, %12 : vector<1x64xf32>
    %c0_7 = arith.constant 0 : index
    %c0_8 = arith.constant 0 : index
    %14 = vector.load %arg2[%c0_7, %c0_8] : memref<1x64xf32, #tpu.memory_space<vmem>>, vector<1x64xf32>
    %cst_9 = arith.constant 9.99999974E-6 : f32
    %15 = vector.broadcast %cst_9 : f32 to vector<1x64xf32>
    %16 = arith.addf %13, %15 : vector<1x64xf32>
    %17 = math.rsqrt %16 : vector<1x64xf32>
    %18 = arith.mulf %14, %17 : vector<1x64xf32>
    %c0_10 = arith.constant 0 : index
    %c0_11 = arith.constant 0 : index
    %19 = vector.load %arg3[%c0_10, %c0_11] : memref<1x64xf32, #tpu.memory_space<vmem>>, vector<1x64xf32>
    %20 = arith.mulf %6, %18 : vector<1x64xf32>
    %21 = arith.subf %19, %20 : vector<1x64xf32>
    %22 = vector.broadcast %18 : vector<1x64xf32> to vector<392x64xf32>
    %23 = arith.mulf %2, %22 : vector<392x64xf32>
    %24 = vector.broadcast %21 : vector<1x64xf32> to vector<392x64xf32>
    %25 = arith.addf %23, %24 : vector<392x64xf32>
    %cst_12 = arith.constant 0.000000e+00 : f32
    %26 = vector.broadcast %cst_12 : f32 to vector<392x64xf32>
    %27 = arith.maximumf %25, %26 : vector<392x64xf32>
    %c0_13 = arith.constant 0 : index
    %c0_14 = arith.constant 0 : index
    %28 = vector.load %arg4[%c0_13, %c0_14] : memref<392x64xf32, #tpu.memory_space<vmem>>, vector<392x64xf32>
    tpu.vector_store %arg4[%c0_13, %c0_14], %27 {strides = array<i32>} : memref<392x64xf32, #tpu.memory_space<vmem>>, vector<392x64xf32>,
    return
  }
}

module attributes {stable_mosaic.version = 11 : i64} {
  func.func @_matmul_tanh_t_kernel(%arg0: memref<1x1024xbf16, #tpu.memory_space<vmem>>, %arg1: memref<1024x1568xbf16, #tpu.memory_space<vmem>>, %arg2: memref<1x1568xf32, #tpu.memory_space<vmem>>) attributes {dimension_semantics = [], scalar_prefetch = 0 : i64, scratch_operands = 0 : i64, tpu.core_type = #tpu.core_type<tc>} {
    %c0 = arith.constant 0 : index
    %c0_0 = arith.constant 0 : index
    %0 = vector.load %arg0[%c0, %c0_0] : memref<1x1024xbf16, #tpu.memory_space<vmem>>, vector<1x1024xbf16>
    %c0_1 = arith.constant 0 : index
    %c0_2 = arith.constant 0 : index
    %1 = vector.load %arg1[%c0_1, %c0_2] : memref<1024x1568xbf16, #tpu.memory_space<vmem>>, vector<1024x1568xbf16>
    %cst = arith.constant dense<0.000000e+00> : vector<1x1568xf32>
    %2 = tpu.matmul %0, %1, %cst {dimension_numbers = #tpu.dot_dimension_numbers<[1], [0], [0], [1], [0, 0, 1, 1], [], []>} : vector<1x1024xbf16>, vector<1024x1568xbf16>, vector<1x1568xf32> -> vector<1x1568xf32>
    %3 = math.tanh %2 : vector<1x1568xf32>
    %c0_3 = arith.constant 0 : index
    %c0_4 = arith.constant 0 : index
    %4 = vector.load %arg2[%c0_3, %c0_4] : memref<1x1568xf32, #tpu.memory_space<vmem>>, vector<1x1568xf32>
    tpu.vector_store %arg2[%c0_3, %c0_4], %3 {strides = array<i32>} : memref<1x1568xf32, #tpu.memory_space<vmem>>, vector<1x1568xf32>,
    return
  }
}

</mosaic_0001>

<bundles_post_ra>
// kernel: generator_forward.6
= control target key start
LH: loop header
LB: loop body
LE: loop exit
PB: predicated region body
PF: predicated region fallthrough
CT: control target
= control target key end

     0   :  { %vm70_vm0 = vcmask 1044480   ;;  %v564_v1 = vmov 0   ;;  %vm66_vm1 = vcmask 80896   ;;  %v565_v15 = vmov 0.0   ;;  %s741_s1 = inlined_call_operand.vmem [shape: bf16[10,1152], index: 1, kind: input, shape index: {}]   ;;  %s742_s0 = inlined_call_operand.vmem [shape: bf16[2,10], index: 0, kind: input, shape index: {}]   ;;  %s743_s2 = inlined_call_operand.vmem [shape: f32[1,128], index: 2, kind: input, shape index: {}]   ;;  %s744_s3 = inlined_call_operand.vmem [shape: f32[1,128], index: 3, kind: input, shape index: {}]   ;;  %s745_s4 = inlined_call_operand.vmem [shape: f32[2,1152], index: 4, kind: output, shape index: {}]  }
   0x1   :  { %v549_v0 = vld [vmem:[%s741_s1 + $0x4] ss:$36 sps:$4 sm:$0x1f]   ;;  %130 = vmatprep.mubr.bf16.mxu0 %v564_v1  ;;  %171 = vmatprep.mubr.bf16.mxu1 %v564_v1  ;;  %v551_v2 = vld [vmem:[%s741_s1 + $0xc] ss:$36 sps:$4 sm:$0x1f]  }
   0x2   :  { %529 = vmatprep.subr.msk.bf16.mxu0 %vm70_vm0, %v549_v0  ;;  %v553_v3 = vld [vmem:[%s741_s1] ss:$36 sps:$4 sm:$0x1f]   ;;  %v554_v4 = vld [vmem:[%s741_s1 + $0x8] ss:$36 sps:$4 sm:$0x1f]   ;;  %531 = vmatprep.subr.msk.bf16.mxu1 %vm70_vm0, %v551_v2 }
   0x3   :  { %v18_v5 = vld [vmem:[%s742_s0] sm:$0x1]  ;;  %v72_v6 = vsel %vm70_vm0, %v553_v3, 0  ;;  %v78_v7 = vsel %vm70_vm0, %v554_v4, 0  ;;  %vm566_vm2 = vmmov 0   ;;  %vm302_vm3 = vcmask 1041408  }
   0x4   :  { %v555_v8 = vld [vmem:[%s741_s1 + $0x14] ss:$36 sps:$4 sm:$0x1f]   ;;  %99 = vmatpush1.bf16.msra.mxu0 %v72_v6  ;;  %140 = vmatpush1.bf16.msra.mxu1 %v78_v7  ;;  %v558_v10 = vld [vmem:[%s741_s1 + $0x1c] ss:$36 sps:$4 sm:$0x1f]  }
   0x5   :  { %v557_v9 = vld [vmem:[%s741_s1 + $0x10] ss:$36 sps:$4 sm:$0x1f]   ;;  %533 = vmatprep.subr.msk.bf16.mxu0 %vm70_vm0, %v555_v8  ;;  %v560_v11 = vld [vmem:[%s741_s1 + $0x18] ss:$36 sps:$4 sm:$0x1f]   ;;  %535 = vmatprep.subr.msk.bf16.mxu1 %vm70_vm0, %v558_v10 }
   0x6   :  { %v84_v12 = vsel %vm70_vm0, %v557_v9, 0  ;;  %v90_v13 = vsel %vm70_vm0, %v560_v11, 0  ;;  %v561_v14 = vld [vmem:[%s741_s1 + $0x20] ss:$36 sps:$4 sm:$0x1f]  }
   0x7   :  { %530 = vmatmul.mubr.msk.bf16.vlgmr.msra.gmra.mrb[0].mxu0 %vm66_vm1, %v18_v5  ;;  %532 = vmatmul.mubr.msk.bf16.vlgmr.msra.gmra.mrb[0].mxu1 %vm66_vm1, %v18_v5  ;;  %v96_v16 = vsel %vm70_vm0, %v561_v14, 0 }
   0x8   :  { %181 = vmatpush1.bf16.msra.mxu0 %v84_v12  ;;  %222 = vmatpush1.bf16.msra.mxu1 %v90_v13 }
   0x9   :  { %212 = vmatprep.mubr.bf16.mxu0 %v564_v1  ;;  %253 = vmatprep.mubr.bf16.mxu1 %v564_v1 }
   0xa   :  { %540 = vmatprep.subr.bf16.mxu0 %v565_v15 }
   0xf   :  { %534 = vmatmul.mubr.msk.bf16.vlgmr.msra.gmra.mrb[4].mxu0 %vm66_vm1, %v18_v5  ;;  %536 = vmatmul.mubr.msk.bf16.vlgmr.msra.gmra.mrb[4].mxu1 %vm66_vm1, %v18_v5 }
  0x10   :  { %541 = vmatpush3.bf16.msra.mxu0 %v96_v16  ;;  %542 = vmatprep.mubr.msk.bf16.mxu0 %vm566_vm2, %v565_v15 }
  0x17   :  { %543 = vmatmul.mubr.msk.bf16.vlgmr.msra.gmra.mrb[8].mxu0 %vm66_vm1, %v18_v5 }
  0xda   :  { %v636_v17 = vpop.f32.mrb[0].mxu0  ;;  %v638_v18 = vpop.f32.mrb[0].mxu1 }
  0xdb   :  { %v303_v19 = vsel %vm302_vm3, %v636_v17, 0.0  ;;  %v311_v20 = vmul.f32 %v636_v17, %v636_v17  ;;  %v337_v21 = vsel %vm302_vm3, %v638_v18, 0.0  ;;  %v345_v22 = vmul.f32 %v638_v18, %v638_v18  ;;  %v648_v23 = vpop.f32.mrb[1].mxu0  ;;  %v650_v24 = vpop.f32.mrb[1].mxu1 }
  0xdc   :  { %v304_v25 = vrot.slane %v303_v19, 4  ;;  %v338_v26 = vrot.slane %v337_v21, 4  ;;  %v320_v27 = vsel %vm302_vm3, %v648_v23, 0.0  ;;  %v328_v28 = vmul.f32 %v648_v23, %v648_v23  ;;  %v136_v29 = vpop.f32.mrb[2].mxu0  ;;  %v177_v30 = vpop.f32.mrb[2].mxu1 }
  0xdd   :  { %v312_v31 = vsel %vm302_vm3, %v311_v20, 0.0  ;;  %v346_v32 = vsel %vm302_vm3, %v345_v22, 0.0  ;;  %v321_v33 = vrot.slane %v320_v27, 4  ;;  %v354_v34 = vsel %vm302_vm3, %v650_v24, 0.0  ;;  %v137_v35 = vpop.f32.mrb[3].mxu0  ;;  %v178_v36 = vpop.f32.mrb[3].mxu1 }
  0xde   :  { %v305_v37 = vadd.f32 %v304_v25, %v303_v19  ;;  %v313_v38 = vrot.slane %v312_v31, 4  ;;  %v339_v39 = vadd.f32 %v338_v26, %v337_v21  ;;  %v347_v40 = vrot.slane %v346_v32, 4 }
  0xdf   :  { %v322_v41 = vadd.f32 %v321_v33, %v320_v27  ;;  %v329_v42 = vsel %vm302_vm3, %v328_v28, 0.0  ;;  %v355_v43 = vrot.slane %v354_v34, 4  ;;  %v362_v44 = vmul.f32 %v650_v24, %v650_v24 }
  0xe0   :  { %v306_v45 = vrot.slane %v305_v37, 2  ;;  %v314_v46 = vadd.f32 %v313_v38, %v312_v31  ;;  %v340_v47 = vrot.slane %v339_v39, 2  ;;  %v348_v48 = vadd.f32 %v347_v40, %v346_v32 }
  0xe1   :  { %v323_v49 = vrot.slane %v322_v41, 2  ;;  %v330_v50 = vrot.slane %v329_v42, 4  ;;  %v356_v51 = vadd.f32 %v355_v43, %v354_v34  ;;  %v363_v52 = vsel %vm302_vm3, %v362_v44, 0.0 }
  0xe2   :  { %v307_v53 = vadd.f32 %v306_v45, %v305_v37  ;;  %v315_v54 = vrot.slane %v314_v46, 2  ;;  %v341_v55 = vadd.f32 %v340_v47, %v339_v39  ;;  %v349_v56 = vrot.slane %v348_v48, 2  ;;  %v664_v57 = vpop.f32.mrb[4].mxu0  ;;  %v666_v58 = vpop.f32.mrb[4].mxu1 }
  0xe3   :  { %v324_v59 = vadd.f32 %v323_v49, %v322_v41  ;;  %v331_v60 = vadd.f32 %v330_v50, %v329_v42  ;;  %v357_v61 = vrot.slane %v356_v51, 2  ;;  %v364_v62 = vrot.slane %v363_v52, 4  ;;  %v668_v63 = vpop.f32.mrb[5].mxu0  ;;  %v670_v0 = vpop.f32.mrb[5].mxu1 }
  0xe4   :  { %v308_v1 = vrot.slane %v307_v53, 1  ;;  %v316_v2 = vadd.f32 %v315_v54, %v314_v46  ;;  %v342_v3 = vrot.slane %v341_v55, 1  ;;  %v350_v4 = vadd.f32 %v349_v56, %v348_v48  ;;  %v218_v5 = vpop.f32.mrb[6].mxu0  ;;  %v259_v6 = vpop.f32.mrb[6].mxu1 }
  0xe5   :  { %v325_v7 = vrot.slane %v324_v59, 1  ;;  %v332_v8 = vrot.slane %v331_v60, 2  ;;  %v358_v9 = vadd.f32 %v357_v61, %v356_v51  ;;  %v365_v10 = vadd.f32 %v364_v62, %v363_v52  ;;  %v219_v11 = vpop.f32.mrb[7].mxu0  ;;  %v260_v12 = vpop.f32.mrb[7].mxu1 }
  0xe6   :  { %v309_v13 = vadd.f32 %v308_v1, %v307_v53  ;;  %v317_v14 = vrot.slane %v316_v2, 1  ;;  %v343_v15 = vadd.f32 %v342_v3, %v341_v55  ;;  %v351_v16 = vrot.slane %v350_v4, 1 }
  0xe7   :  { %v326_v19 = vadd.f32 %v325_v7, %v324_v59  ;;  %v333_v20 = vadd.f32 %v332_v8, %v331_v60  ;;  %v359_v21 = vrot.slane %v358_v9, 1  ;;  %v366_v22 = vrot.slane %v365_v10, 2 }
  0xe8   :  { %v318_v25 = vadd.f32 %v317_v14, %v316_v2  ;;  %v352_v26 = vadd.f32 %v351_v16, %v350_v4  ;;  %v371_v27 = vsel %vm302_vm3, %v664_v57, 0.0  ;;  %v379_v28 = vmul.f32 %v664_v57, %v664_v57 }
  0xe9   :  { %v327_v29 = vadd.f32 %v326_v19, %v309_v13  ;;  %v334_v30 = vrot.slane %v333_v20, 1  ;;  %v360_v31 = vadd.f32 %v359_v21, %v358_v9  ;;  %v367_v32 = vadd.f32 %v366_v22, %v365_v10 }
  0xea   :  { %v372_v33 = vrot.slane %v371_v27, 4  ;;  %v380_v34 = vsel %vm302_vm3, %v379_v28, 0.0  ;;  %v405_v35 = vsel %vm302_vm3, %v666_v58, 0.0  ;;  %v413_v36 = vmul.f32 %v666_v58, %v666_v58  ;;  %v681_v37 = vpop.f32.mrb[8].mxu0 }
  0xeb   :  { %v335_v38 = vadd.f32 %v334_v30, %v333_v20  ;;  %v344_v39 = vadd.f32 %v343_v15, %v327_v29  ;;  %v368_v40 = vrot.slane %v367_v32, 1  ;;  %v381_v41 = vrot.slane %v380_v34, 4  ;;  %v544_v42 = vpop.f32.mrb[9].mxu0 }
  0xec   :  { %v373_v43 = vadd.f32 %v372_v33, %v371_v27  ;;  %v406_v44 = vrot.slane %v405_v35, 4  ;;  %v414_v45 = vsel %vm302_vm3, %v413_v36, 0.0  ;;  %v388_v46 = vsel %vm302_vm3, %v668_v63, 0.0  ;;  %v299_v47 = vpop.f32.mrb[10].mxu0 }
  0xed   :  { %v336_v48 = vadd.f32 %v335_v38, %v318_v25  ;;  %v361_v49 = vadd.f32 %v360_v31, %v344_v39  ;;  %v369_v50 = vadd.f32 %v368_v40, %v367_v32  ;;  %v382_v51 = vadd.f32 %v381_v41, %v380_v34  ;;  %v545_v52 = vpop.f32.mrb[11].mxu0 }
  0xee   :  { %v374_v53 = vrot.slane %v373_v43, 2  ;;  %v407_v54 = vadd.f32 %v406_v44, %v405_v35  ;;  %v415_v55 = vrot.slane %v414_v45, 4  ;;  %v389_v56 = vrot.slane %v388_v46, 4 }
  0xef   :  { %v353_v59 = vadd.f32 %v352_v26, %v336_v48  ;;  %v383_v60 = vrot.slane %v382_v51, 2  ;;  %v396_v61 = vmul.f32 %v668_v63, %v668_v63  ;;  %v422_v62 = vsel %vm302_vm3, %v670_v0, 0.0 }
  0xf0   :  { %v375_v1 = vadd.f32 %v374_v53, %v373_v43  ;;  %v408_v2 = vrot.slane %v407_v54, 2  ;;  %v416_v3 = vadd.f32 %v415_v55, %v414_v45  ;;  %v390_v4 = vadd.f32 %v389_v56, %v388_v46 }
  0xf1   :  { %v370_v5 = vadd.f32 %v369_v50, %v353_v59  ;;  %v384_v6 = vadd.f32 %v383_v60, %v382_v51  ;;  %v397_v7 = vsel %vm302_vm3, %v396_v61, 0.0  ;;  %v423_v8 = vrot.slane %v422_v62, 4 }
  0xf2   :  { %v376_v9 = vrot.slane %v375_v1, 1  ;;  %v409_v10 = vadd.f32 %v408_v2, %v407_v54  ;;  %v417_v11 = vrot.slane %v416_v3, 2  ;;  %v391_v12 = vrot.slane %v390_v4, 2 }
  0xf3   :  { %v385_v13 = vrot.slane %v384_v6, 1  ;;  %v398_v14 = vrot.slane %v397_v7, 4  ;;  %v424_v15 = vadd.f32 %v423_v8, %v422_v62  ;;  %v430_v16 = vmul.f32 %v670_v0, %v670_v0 }
  0xf4   :  { %v377_v19 = vadd.f32 %v376_v9, %v375_v1  ;;  %v392_v20 = vadd.f32 %v391_v12, %v390_v4  ;;  %v410_v28 = vrot.slane %v409_v10, 1  ;;  %v418_v29 = vadd.f32 %v417_v11, %v416_v3 }
  0xf5   :  { %v386_v21 = vadd.f32 %v385_v13, %v384_v6  ;;  %v399_v22 = vadd.f32 %v398_v14, %v397_v7  ;;  %v425_v25 = vrot.slane %v424_v15, 2  ;;  %v431_v26 = vsel %vm302_vm3, %v430_v16, 0.0 }
  0xf6   :  { %v378_v27 = vadd.f32 %v377_v19, %v361_v49  ;;  %v393_v30 = vrot.slane %v392_v20, 1  ;;  %v432_v34 = vrot.slane %v431_v26, 4  ;;  %v439_v36 = vsel %vm302_vm3, %v681_v37, 0.0 }
  0xf7   :  { %v387_v31 = vadd.f32 %v386_v21, %v370_v5  ;;  %v400_v32 = vrot.slane %v399_v22, 2  ;;  %v426_v33 = vadd.f32 %v425_v25, %v424_v15  ;;  %v447_v38 = vmul.f32 %v681_v37, %v681_v37 }
  0xf8   :  { %v394_v35 = vadd.f32 %v393_v30, %v392_v20  ;;  %v433_v41 = vadd.f32 %v432_v34, %v431_v26  ;;  %v440_v42 = vrot.slane %v439_v36, 4  ;;  %v411_v43 = vadd.f32 %v410_v28, %v409_v10  ;;  %v465_v28 = vld [vmem:[%s744_s3] sm:$0x1] }
  0xf9   :  { %v401_v39 = vadd.f32 %v400_v32, %v399_v22  ;;  %v427_v40 = vrot.slane %v426_v33, 1  ;;  %v448_v45 = vsel %vm302_vm3, %v447_v38, 0.0  ;;  %v419_v46 = vrot.slane %v418_v29, 1  ;;  %v461_v22 = vld [vmem:[%s743_s2] sm:$0x1] }
  0xfa   :  { %v395_v44 = vadd.f32 %v394_v35, %v378_v27  ;;  %v434_v48 = vrot.slane %v433_v41, 2  ;;  %v441_v49 = vadd.f32 %v440_v42, %v439_v36  ;;  %v449_v52 = vrot.slane %v448_v45, 4 }
  0xfb   :  { %v402_v47 = vrot.slane %v401_v39, 1  ;;  %v428_v51 = vadd.f32 %v427_v40, %v426_v33  ;;  %v420_v60 = vadd.f32 %v419_v46, %v418_v29  ;;  %v469_v20 = vlaneseq }
  0xfc   :  { %v412_v50 = vadd.f32 %v411_v43, %v395_v44  ;;  %v435_v54 = vadd.f32 %v434_v48, %v433_v41  ;;  %v442_v55 = vrot.slane %v441_v49, 2  ;;  %v450_v59 = vadd.f32 %v449_v52, %v448_v45 }
  0xfd   :  { %v403_v53 = vadd.f32 %v402_v47, %v401_v39  ;;  %v470_v21 = vshrl.u32 %v469_v20, 7 }
  0xfe   :  { %v429_v56 = vadd.f32 %v428_v51, %v412_v50  ;;  %v436_v62 = vrot.slane %v435_v54, 1  ;;  %v443_v1 = vadd.f32 %v442_v55, %v441_v49  ;;  %v451_v2 = vrot.slane %v450_v59, 2 }
  0xff   :  { %v404_v61 = vadd.f32 %v403_v53, %v387_v31  ;;  %v471_v25 = vsub.s32 0, %v470_v21 }
 0x100   :  { %v437_v4 = vadd.f32 %v436_v62, %v435_v54  ;;  %v444_v5 = vrot.slane %v443_v1, 1  ;;  %v452_v6 = vadd.f32 %v451_v2, %v450_v59 }
 0x101   :  { %v421_v3 = vadd.f32 %v420_v60, %v404_v61 }
 0x102   :  { %v445_v8 = vadd.f32 %v444_v5, %v443_v1  ;;  %v453_v9 = vrot.slane %v452_v6, 1 }
 0x103   :  { %v438_v7 = vadd.f32 %v437_v4, %v421_v3 }
 0x104   :  { %v446_v10 = vadd.f32 %v445_v8, %v429_v56  ;;  %v454_v11 = vadd.f32 %v453_v9, %v452_v6 }
 0x106   :  { %v457_v12 = vmul.f32 0.055555556, %v446_v10  ;;  %v455_v13 = vadd.f32 %v454_v11, %v438_v7 }
 0x108   :  { %v459_v14 = vmul.f32 %v457_v12, %v457_v12  ;;  %v458_v15 = vmul.f32 0.055555556, %v455_v13 }
 0x10a   :  { %v460_v16 = vsub.f32 %v458_v15, %v459_v14 }
 0x10c   :  { %v462_v19 = vadd.f32 1e-05, %v460_v16 }
 0x10e   :  { %562 = vrsqrt.f32 %v462_v19 }
 0x118   :  { %v563_v26 = vpop.eup %562 }
 0x119   :  { %v464_v27 = vmul.f32 %v563_v26, %v461_v22 }
 0x11b   :  { %v466_v29 = vmul.f32 %v464_v27, %v457_v12  ;;  %v472_v30 = vrot.slane %v464_v27, %v471_v25 }
 0x11d   :  { %v467_v31 = vsub.f32 %v465_v28, %v466_v29  ;;  %v474_v32 = vmul.f32 %v472_v30, %v636_v17  ;;  %v484_v33 = vmul.f32 %v472_v30, %v648_v23  ;;  %v488_v34 = vmul.f32 %v472_v30, %v638_v18 }
 0x11e   :  { %v492_v35 = vmul.f32 %v472_v30, %v650_v24  ;;  %v496_v36 = vmul.f32 %v472_v30, %v664_v57  ;;  %v500_v38 = vmul.f32 %v472_v30, %v668_v63  ;;  %v504_v39 = vmul.f32 %v472_v30, %v666_v58 }
 0x11f   :  { %v479_v40 = vrot.slane %v467_v31, %v471_v25  ;;  %v508_v41 = vmul.f32 %v472_v30, %v670_v0  ;;  %v512_v42 = vmul.f32 %v472_v30, %v681_v37 }
 0x121   :  { %v481_v43 = vadd.f32 %v479_v40, %v474_v32  ;;  %v485_v44 = vadd.f32 %v484_v33, %v479_v40  ;;  %v489_v17 = vadd.f32 %v488_v34, %v479_v40  ;;  %v493_v45 = vadd.f32 %v492_v35, %v479_v40 }
 0x122   :  { %v497_v23 = vadd.f32 %v496_v36, %v479_v40  ;;  %v501_v46 = vadd.f32 %v500_v38, %v479_v40  ;;  %v505_v18 = vadd.f32 %v504_v39, %v479_v40  ;;  %v509_v47 = vadd.f32 %v508_v41, %v479_v40 }
 0x123   :  { %v482_v24 = vmax.f32 %v481_v43, 0.0  ;;  %v486_v48 = vmax.f32 %v485_v44, 0.0  ;;  %v490_v57 = vmax.f32 %v489_v17, 0.0  ;;  %v494_v49 = vmax.f32 %v493_v45, 0.0 }
 0x124   :  { %v498_v63 = vmax.f32 %v497_v23, 0.0  ;;  %v502_v50 = vmax.f32 %v501_v46, 0.0  ;;  %v506_v58 = vmax.f32 %v505_v18, 0.0  ;;  %v510_v51 = vmax.f32 %v509_v47, 0.0 }
 0x125   :  { %483 = vst [vmem:[%s745_s4] sm:$0x3] %v482_v24  ;;  %487 = vst [vmem:[%s745_s4 + $0x2] sm:$0x3] %v486_v48  ;;  %v513_v0 = vadd.f32 %v512_v42, %v479_v40 }
 0x126   :  { %491 = vst [vmem:[%s745_s4 + $0x4] sm:$0x3] %v490_v57  ;;  %495 = vst [vmem:[%s745_s4 + $0x6] sm:$0x3] %v494_v49 }
 0x127   :  { %499 = vst [vmem:[%s745_s4 + $0x8] sm:$0x3] %v498_v63  ;;  %503 = vst [vmem:[%s745_s4 + $0xa] sm:$0x3] %v502_v50  ;;  %v514_v37 = vmax.f32 %v513_v0, 0.0 }
 0x128   :  { %507 = vst [vmem:[%s745_s4 + $0xc] sm:$0x3] %v506_v58  ;;  %511 = vst [vmem:[%s745_s4 + $0xe] sm:$0x3] %v510_v51 }
 0x129   :  { %515 = vst [vmem:[%s745_s4 + $0x10] sm:$0x3] %v514_v37 }

// kernel: generator_forward.5
= control target key start
LH: loop header
LB: loop body
LE: loop exit
PB: predicated region body
PF: predicated region fallthrough
CT: control target
= control target key end

     0   :  { %v1026_v1 = vmov 0   ;;  %vm387_vm0 = vcmask 1041408   ;;  %vm383_vm1 = vcmask 818176   ;;  %vm1028_vm2 = vmmov 0   ;;  %s1361_s1 = inlined_call_operand.vmem [shape: bf16[100,1152], index: 1, kind: input, shape index: {}]   ;;  %s1362_s0 = inlined_call_operand.vmem [shape: bf16[2,100], index: 0, kind: input, shape index: {}]   ;;  %s1363_s2 = inlined_call_operand.vmem [shape: f32[1,128], index: 2, kind: input, shape index: {}]   ;;  %s1364_s3 = inlined_call_operand.vmem [shape: f32[1,128], index: 3, kind: input, shape index: {}]   ;;  %s1365_s4 = inlined_call_operand.vmem [shape: f32[2,1152], index: 4, kind: output, shape index: {}]  }
   0x1   :  { %v937_v0 = vld [vmem:[%s1361_s1 + $0x4] ss:$36 sps:$4 sm:$0xff]   ;;  %447 = vmatprep.mubr.bf16.mxu0 %v1026_v1  ;;  %488 = vmatprep.mubr.bf16.mxu1 %v1026_v1  ;;  %v940_v3 = vld [vmem:[%s1361_s1 + $0xc] ss:$36 sps:$4 sm:$0xff]   ;;  %v946_v7 = vld [vmem:[%s1361_s1 + $0x54] ss:$36 sps:$4 sm:$0xff]  }
   0x2   :  { %v939_v2 = vld [vmem:[%s1361_s1] ss:$36 sps:$4 sm:$0xff]   ;;  %415 = vmatprep.subr.bf16.mxu0 %v937_v0  ;;  %v942_v4 = vld [vmem:[%s1361_s1 + $0x4c] ss:$36 sps:$4 sm:$0xff]   ;;  %456 = vmatprep.subr.bf16.mxu1 %v940_v3  ;;  %v948_v8 = vld [vmem:[%s1361_s1 + $0x94] ss:$36 sps:$4 sm:$0xff]  }
   0x3   :  { %416 = vmatpush1.bf16.msra.mxu0 %v939_v2  ;;  %v944_v5 = vld [vmem:[%s1361_s1 + $0x8] ss:$36 sps:$4 sm:$0xff]   ;;  %v950_v9 = vld [vmem:[%s1361_s1 + $0x50] ss:$36 sps:$4 sm:$0xff]   ;;  %v952_v11 = vld [vmem:[%s1361_s1 + $0x9c] ss:$36 sps:$4 sm:$0xff]  }
   0x4   :  { %v945_v6 = vld [vmem:[%s1361_s1 + $0x48] ss:$36 sps:$4 sm:$0xff]   ;;  %417 = vmatprep.subr.bf16.mxu0 %v942_v4  ;;  %457 = vmatpush1.bf16.msra.mxu1 %v944_v5  ;;  %v951_v10 = vld [vmem:[%s1361_s1 + $0x90] ss:$36 sps:$4 sm:$0xff]   ;;  %v954_v12 = vld [vmem:[%s1361_s1 + $0xdc] ss:$36 sps:$4 sm:$0xff]  }
   0x5   :  { %458 = vmatprep.subr.bf16.mxu1 %v946_v7  ;;  %v956_v13 = vld [vmem:[%s1361_s1 + $0x98] ss:$36 sps:$4 sm:$0xff]   ;;  %v958_v14 = vld [vmem:[%s1361_s1 + $0xe4] ss:$36 sps:$4 sm:$0xff]   ;;  %v964_v18 = vld [vmem:[%s1361_s1 + $0x12c] ss:$36 sps:$4 sm:$0xff]  }
   0x6   :  { %v957_v15 = vld [vmem:[%s1361_s1 + $0xd8] ss:$36 sps:$4 sm:$0xff]   ;;  %v960_v16 = vld [vmem:[%s1361_s1 + $0x124] ss:$36 sps:$4 sm:$0xff]   ;;  %v966_v20 = vld [vmem:[%s1361_s1 + $0x16c] ss:$36 sps:$4 sm:$0xff]  }
   0x7   :  { %418 = vmatpush1.bf16.msra.mxu0 %v945_v6  ;;  %v962_v17 = vld [vmem:[%s1361_s1 + $0xe0] ss:$36 sps:$4 sm:$0xff]   ;;  %v968_v21 = vld [vmem:[%s1361_s1 + $0x128] ss:$36 sps:$4 sm:$0xff]   ;;  %v79_v22 = vld [vmem:[%s1361_s1 + $0x1b0] sm:$0x33] }
   0x8   :  { %419 = vmatprep.subr.bf16.mxu0 %v948_v8  ;;  %459 = vmatpush1.bf16.msra.mxu1 %v950_v9  ;;  %v963_v19 = vld [vmem:[%s1361_s1 + $0x120] ss:$36 sps:$4 sm:$0xff]   ;;  %v970_v23 = vld [vmem:[%s1361_s1 + $0x174] ss:$36 sps:$4 sm:$0xff]   ;;  %v969_v24 = vld [vmem:[%s1361_s1 + $0x168] ss:$36 sps:$4 sm:$0xff]   ;;  %v891_v26 = vcombine.high %v79_v22, %v79_v22  ;;  %v890_v27 = vcombine.low %v79_v22, %v79_v22 }
   0x9   :  { %460 = vmatprep.subr.bf16.mxu1 %v952_v11  ;;  %v80_v25 = vld [vmem:[%s1361_s1 + $0x1b8] sm:$0x33]  ;;  %v973_v28 = vld [vmem:[%s1361_s1 + $0x170] ss:$36 sps:$4 sm:$0xff]   ;;  %v1147_v35 = vld [vmem:[%s1362_s0] sm:$0x1] }
   0xa   :  { %v893_v29 = vcombine.high %v80_v25, %v80_v25  ;;  %v892_v30 = vcombine.low %v80_v25, %v80_v25  ;;  %v389_v31 = vsel %vm387_vm0, %v890_v27, 0  ;;  %v979_v32 = vld [vmem:[%s1361_s1 + $0x14] ss:$36 sps:$4 sm:$0xff]   ;;  %v985_v34 = vld [vmem:[%s1361_s1 + $0x1c] ss:$36 sps:$4 sm:$0xff]   ;;  %v1027_v3 = vmov 0.0  }
   0xb   :  { %420 = vmatpush1.bf16.msra.mxu0 %v951_v10  ;;  %v977_v36 = vld [vmem:[%s1361_s1 + $0x10] ss:$36 sps:$4 sm:$0xff]   ;;  %v982_v37 = vld [vmem:[%s1361_s1 + $0x5c] ss:$36 sps:$4 sm:$0xff]   ;;  %v991_v39 = vld [vmem:[%s1361_s1 + $0x64] ss:$36 sps:$4 sm:$0xff]  }
   0xc   :  { %421 = vmatprep.subr.bf16.mxu0 %v954_v12  ;;  %461 = vmatpush1.bf16.msra.mxu1 %v956_v13  ;;  %v395_v33 = vsel %vm387_vm0, %v892_v30, 0  ;;  %v983_v38 = vld [vmem:[%s1361_s1 + $0x18] ss:$36 sps:$4 sm:$0xff]   ;;  %v988_v41 = vld [vmem:[%s1361_s1 + $0xa4] ss:$36 sps:$4 sm:$0xff]  }
   0xd   :  { %462 = vmatprep.subr.bf16.mxu1 %v958_v14  ;;  %v980_v40 = vld [vmem:[%s1361_s1 + $0x58] ss:$36 sps:$4 sm:$0xff]   ;;  %v989_v42 = vld [vmem:[%s1361_s1 + $0x60] ss:$36 sps:$4 sm:$0xff]   ;;  %v997_v43 = vld [vmem:[%s1361_s1 + $0xac] ss:$36 sps:$4 sm:$0xff]  }
   0xe   :  { %v986_v44 = vld [vmem:[%s1361_s1 + $0xa0] ss:$36 sps:$4 sm:$0xff]   ;;  %v994_v45 = vld [vmem:[%s1361_s1 + $0xec] ss:$36 sps:$4 sm:$0xff]   ;;  %v1003_v47 = vld [vmem:[%s1361_s1 + $0xf4] ss:$36 sps:$4 sm:$0xff]  }
   0xf   :  { %422 = vmatpush1.bf16.msra.mxu0 %v957_v15  ;;  %v995_v46 = vld [vmem:[%s1361_s1 + $0xa8] ss:$36 sps:$4 sm:$0xff]   ;;  %v1000_v49 = vld [vmem:[%s1361_s1 + $0x134] ss:$36 sps:$4 sm:$0xff]   ;;  %v1009_v51 = vld [vmem:[%s1361_s1 + $0x13c] ss:$36 sps:$4 sm:$0xff]  }
  0x10   :  { %423 = vmatprep.subr.bf16.mxu0 %v960_v16  ;;  %463 = vmatpush1.bf16.msra.mxu1 %v962_v17  ;;  %v992_v48 = vld [vmem:[%s1361_s1 + $0xe8] ss:$36 sps:$4 sm:$0xff]   ;;  %v1001_v50 = vld [vmem:[%s1361_s1 + $0xf0] ss:$36 sps:$4 sm:$0xff]   ;;  %v1006_v53 = vld [vmem:[%s1361_s1 + $0x17c] ss:$36 sps:$4 sm:$0xff]  }
  0x11   :  { %464 = vmatprep.subr.bf16.mxu1 %v964_v18  ;;  %v998_v52 = vld [vmem:[%s1361_s1 + $0x130] ss:$36 sps:$4 sm:$0xff]   ;;  %v1007_v54 = vld [vmem:[%s1361_s1 + $0x138] ss:$36 sps:$4 sm:$0xff]   ;;  %v81_v55 = vld [vmem:[%s1361_s1 + $0x1c0] sm:$0x33] }
  0x12   :  { %v1013_v56 = vld [vmem:[%s1361_s1 + $0x184] ss:$36 sps:$4 sm:$0xff]   ;;  %v1004_v57 = vld [vmem:[%s1361_s1 + $0x178] ss:$36 sps:$4 sm:$0xff]   ;;  %v895_v59 = vcombine.high %v81_v55, %v81_v55  ;;  %v894_v60 = vcombine.low %v81_v55, %v81_v55  ;;  %v1019_v5 = vld [vmem:[%s1361_s1 + $0xb0] ss:$36 sps:$4 sm:$0xff]  }
  0x13   :  { %424 = vmatpush1.bf16.msra.mxu0 %v963_v19  ;;  %v82_v58 = vld [vmem:[%s1361_s1 + $0x1c8] sm:$0x33]  ;;  %v1011_v61 = vld [vmem:[%s1361_s1 + $0x180] ss:$36 sps:$4 sm:$0xff]   ;;  %v1020_v6 = vld [vmem:[%s1361_s1 + $0xf8] ss:$36 sps:$4 sm:$0xff]  }
  0x14   :  { %425 = vmatprep.subr.bf16.mxu0 %v966_v20  ;;  %465 = vmatpush1.bf16.msra.mxu1 %v968_v21  ;;  %v897_v62 = vcombine.high %v82_v58, %v82_v58  ;;  %v896_v63 = vcombine.low %v82_v58, %v82_v58  ;;  %v401_v0 = vsel %vm387_vm0, %v894_v60, 0  ;;  %v1017_v2 = vld [vmem:[%s1361_s1 + $0x20] ss:$36 sps:$4 sm:$0xff]   ;;  %v1018_v4 = vld [vmem:[%s1361_s1 + $0x68] ss:$36 sps:$4 sm:$0xff]  }
  0x15   :  { %466 = vmatprep.subr.bf16.mxu1 %v970_v23  ;;  %v1021_v7 = vld [vmem:[%s1361_s1 + $0x140] ss:$36 sps:$4 sm:$0xff]   ;;  %v1022_v8 = vld [vmem:[%s1361_s1 + $0x188] ss:$36 sps:$4 sm:$0xff]  }
  0x16   :  { %v1023_v9 = vld [vmem:[%s1361_s1 + $0x1d0] ss:$0 sps:$4 sm:$0x33]  }
  0x17   :  { %426 = vmatpush1.bf16.msra.mxu0 %v969_v24  ;;  %v413_v10 = vsel %vm387_vm0, %v1023_v9, 0 }
  0x18   :  { %899 = vmatprep.subr.msk.bf16.mxu0 %vm387_vm0, %v891_v26  ;;  %467 = vmatpush1.bf16.msra.mxu1 %v973_v28 }
  0x19   :  { %901 = vmatprep.subr.msk.bf16.mxu1 %vm387_vm0, %v893_v29 }
  0x1b   :  { %428 = vmatpush1.bf16.msra.mxu0 %v389_v31 }
  0x1c   :  { %497 = vmatprep.subr.bf16.mxu0 %v979_v32  ;;  %469 = vmatpush1.bf16.msra.mxu1 %v395_v33 }
  0x1d   :  { %538 = vmatprep.subr.bf16.mxu1 %v985_v34 }
  0x1e   :  { %900 = vmatmul.mubr.msk.bf16.vlgmr.msra.gmra.mrb[0].mxu0 %vm383_vm1, %v1147_v35 }
  0x1f   :  { %498 = vmatpush1.bf16.msra.mxu0 %v977_v36  ;;  %529 = vmatprep.mubr.bf16.mxu0 %v1026_v1 }
  0x20   :  { %902 = vmatmul.mubr.msk.bf16.vlgmr.msra.gmra.mrb[0].mxu1 %vm383_vm1, %v1147_v35  ;;  %499 = vmatprep.subr.bf16.mxu0 %v982_v37 }
  0x21   :  { %539 = vmatpush1.bf16.msra.mxu1 %v983_v38  ;;  %570 = vmatprep.mubr.bf16.mxu1 %v1026_v1  ;;  %v407_v1 = vsel %vm387_vm0, %v896_v63, 0 }
  0x22   :  { %540 = vmatprep.subr.bf16.mxu1 %v991_v39 }
  0x23   :  { %500 = vmatpush1.bf16.msra.mxu0 %v980_v40 }
  0x24   :  { %501 = vmatprep.subr.bf16.mxu0 %v988_v41 }
  0x25   :  { %541 = vmatpush1.bf16.msra.mxu1 %v989_v42 }
  0x26   :  { %542 = vmatprep.subr.bf16.mxu1 %v997_v43 }
  0x27   :  { %502 = vmatpush1.bf16.msra.mxu0 %v986_v44 }
  0x28   :  { %503 = vmatprep.subr.bf16.mxu0 %v994_v45 }
  0x29   :  { %543 = vmatpush1.bf16.msra.mxu1 %v995_v46 }
  0x2a   :  { %544 = vmatprep.subr.bf16.mxu1 %v1003_v47 }
  0x2b   :  { %504 = vmatpush1.bf16.msra.mxu0 %v992_v48 }
  0x2c   :  { %505 = vmatprep.subr.bf16.mxu0 %v1000_v49 }
  0x2d   :  { %545 = vmatpush1.bf16.msra.mxu1 %v1001_v50 }
  0x2e   :  { %546 = vmatprep.subr.bf16.mxu1 %v1009_v51 }
  0x2f   :  { %506 = vmatpush1.bf16.msra.mxu0 %v998_v52 }
  0x30   :  { %507 = vmatprep.subr.bf16.mxu0 %v1006_v53 }
  0x31   :  { %547 = vmatpush1.bf16.msra.mxu1 %v1007_v54 }
  0x32   :  { %548 = vmatprep.subr.bf16.mxu1 %v1013_v56 }
  0x33   :  { %508 = vmatpush1.bf16.msra.mxu0 %v1004_v57 }
  0x34   :  { %903 = vmatprep.subr.msk.bf16.mxu0 %vm387_vm0, %v895_v59 }
  0x35   :  { %549 = vmatpush1.bf16.msra.mxu1 %v1011_v61 }
  0x36   :  { %905 = vmatprep.subr.msk.bf16.mxu1 %vm387_vm0, %v897_v62 }
  0x37   :  { %510 = vmatpush1.bf16.msra.mxu0 %v401_v0 }
  0x38   :  { %916 = vmatprep.subr.bf16.mxu0 %v1027_v3 }
  0x39   :  { %551 = vmatpush1.bf16.msra.mxu1 %v407_v1 }
  0x3a   :  { %904 = vmatmul.mubr.msk.bf16.vlgmr.msra.gmra.mrb[4].mxu0 %vm383_vm1, %v1147_v35 }
  0x3b   :  { %917 = vmatpush3.bf16.msra.mxu0 %v1017_v2  ;;  %930 = vmatprep.mubr.msk.bf16.mxu0 %vm1028_vm2, %v1027_v3 }
  0x3c   :  { %906 = vmatmul.mubr.msk.bf16.vlgmr.msra.gmra.mrb[4].mxu1 %vm383_vm1, %v1147_v35  ;;  %918 = vmatprep.subr.bf16.mxu0 %v1027_v3 }
  0x3f   :  { %919 = vmatpush3.bf16.msra.mxu0 %v1018_v4 }
  0x40   :  { %920 = vmatprep.subr.bf16.mxu0 %v1027_v3 }
  0x43   :  { %921 = vmatpush3.bf16.msra.mxu0 %v1019_v5 }
  0x44   :  { %922 = vmatprep.subr.bf16.mxu0 %v1027_v3 }
  0x47   :  { %923 = vmatpush3.bf16.msra.mxu0 %v1020_v6 }
  0x48   :  { %924 = vmatprep.subr.bf16.mxu0 %v1027_v3 }
  0x4b   :  { %925 = vmatpush3.bf16.msra.mxu0 %v1021_v7 }
  0x4c   :  { %926 = vmatprep.subr.bf16.mxu0 %v1027_v3 }
  0x4f   :  { %927 = vmatpush3.bf16.msra.mxu0 %v1022_v8 }
  0x50   :  { %928 = vmatprep.subr.bf16.mxu0 %v1027_v3 }
  0x53   :  { %929 = vmatpush3.bf16.msra.mxu0 %v413_v10 }
  0x56   :  { %931 = vmatmul.mubr.msk.bf16.vlgmr.msra.gmra.mrb[8].mxu0 %vm383_vm1, %v1147_v35 }
  0xf1   :  { %v1259_v11 = vpop.f32.mrb[0].mxu0 }
  0xf2   :  { %v619_v12 = vsel %vm387_vm0, %v1259_v11, 0.0  ;;  %v627_v13 = vmul.f32 %v1259_v11, %v1259_v11  ;;  %v1265_v14 = vpop.f32.mrb[1].mxu0 }
  0xf3   :  { %v620_v15 = vrot.slane %v619_v12, 4  ;;  %v636_v16 = vsel %vm387_vm0, %v1265_v14, 0.0  ;;  %v644_v17 = vmul.f32 %v1265_v14, %v1265_v14  ;;  %v453_v18 = vpop.f32.mrb[2].mxu0  ;;  %v1271_v19 = vpop.f32.mrb[0].mxu1 }
  0xf4   :  { %v628_v20 = vsel %vm387_vm0, %v627_v13, 0.0  ;;  %v637_v21 = vrot.slane %v636_v16, 4  ;;  %v454_v22 = vpop.f32.mrb[3].mxu0  ;;  %v653_v23 = vsel %vm387_vm0, %v1271_v19, 0.0  ;;  %v661_v24 = vmul.f32 %v1271_v19, %v1271_v19  ;;  %v1278_v25 = vpop.f32.mrb[1].mxu1 }
  0xf5   :  { %v621_v26 = vadd.f32 %v620_v15, %v619_v12  ;;  %v629_v27 = vrot.slane %v628_v20, 4  ;;  %v645_v28 = vsel %vm387_vm0, %v644_v17, 0.0  ;;  %v654_v29 = vrot.slane %v653_v23, 4  ;;  %v494_v30 = vpop.f32.mrb[2].mxu1 }
  0xf6   :  { %v638_v31 = vadd.f32 %v637_v21, %v636_v16  ;;  %v646_v32 = vrot.slane %v645_v28, 4  ;;  %v662_v33 = vsel %vm387_vm0, %v661_v24, 0.0  ;;  %v670_v34 = vsel %vm387_vm0, %v1278_v25, 0.0  ;;  %v495_v35 = vpop.f32.mrb[3].mxu1 }
  0xf7   :  { %v622_v36 = vrot.slane %v621_v26, 2  ;;  %v630_v37 = vadd.f32 %v629_v27, %v628_v20  ;;  %v655_v38 = vadd.f32 %v654_v29, %v653_v23  ;;  %v663_v39 = vrot.slane %v662_v33, 4 }
  0xf8   :  { %v639_v40 = vrot.slane %v638_v31, 2  ;;  %v647_v41 = vadd.f32 %v646_v32, %v645_v28  ;;  %v671_v42 = vrot.slane %v670_v34, 4  ;;  %v678_v43 = vmul.f32 %v1278_v25, %v1278_v25 }
  0xf9   :  { %v623_v44 = vadd.f32 %v622_v36, %v621_v26  ;;  %v631_v45 = vrot.slane %v630_v37, 2  ;;  %v656_v46 = vrot.slane %v655_v38, 2  ;;  %v664_v47 = vadd.f32 %v663_v39, %v662_v33 }
  0xfa   :  { %v640_v48 = vadd.f32 %v639_v40, %v638_v31  ;;  %v648_v49 = vrot.slane %v647_v41, 2  ;;  %v672_v50 = vadd.f32 %v671_v42, %v670_v34  ;;  %v679_v51 = vsel %vm387_vm0, %v678_v43, 0.0 }
  0xfb   :  { %v624_v52 = vrot.slane %v623_v44, 1  ;;  %v632_v53 = vadd.f32 %v631_v45, %v630_v37  ;;  %v657_v54 = vadd.f32 %v656_v46, %v655_v38  ;;  %v665_v55 = vrot.slane %v664_v47, 2 }
  0xfc   :  { %v641_v56 = vrot.slane %v640_v48, 1  ;;  %v649_v57 = vadd.f32 %v648_v49, %v647_v41  ;;  %v673_v58 = vrot.slane %v672_v50, 2  ;;  %v680_v59 = vrot.slane %v679_v51, 4 }
  0xfd   :  { %v625_v60 = vadd.f32 %v624_v52, %v623_v44  ;;  %v633_v61 = vrot.slane %v632_v53, 1  ;;  %v658_v62 = vrot.slane %v657_v54, 1  ;;  %v666_v63 = vadd.f32 %v665_v55, %v664_v47 }
  0xfe   :  { %v642_v0 = vadd.f32 %v641_v56, %v640_v48  ;;  %v650_v1 = vrot.slane %v649_v57, 1  ;;  %v674_v2 = vadd.f32 %v673_v58, %v672_v50  ;;  %v681_v3 = vadd.f32 %v680_v59, %v679_v51 }
  0xff   :  { %v634_v4 = vadd.f32 %v633_v61, %v632_v53  ;;  %v659_v5 = vadd.f32 %v658_v62, %v657_v54  ;;  %v667_v6 = vrot.slane %v666_v63, 1 }
 0x100   :  { %v643_v7 = vadd.f32 %v642_v0, %v625_v60  ;;  %v651_v8 = vadd.f32 %v650_v1, %v649_v57  ;;  %v675_v9 = vrot.slane %v674_v2, 1  ;;  %v682_v10 = vrot.slane %v681_v3, 2 }
 0x101   :  { %v668_v12 = vadd.f32 %v667_v6, %v666_v63 }
 0x102   :  { %v652_v13 = vadd.f32 %v651_v8, %v634_v4  ;;  %v660_v15 = vadd.f32 %v659_v5, %v643_v7  ;;  %v676_v16 = vadd.f32 %v675_v9, %v674_v2  ;;  %v683_v17 = vadd.f32 %v682_v10, %v681_v3 }
 0x104   :  { %v669_v18 = vadd.f32 %v668_v12, %v652_v13  ;;  %v677_v20 = vadd.f32 %v676_v16, %v660_v15  ;;  %v684_v21 = vrot.slane %v683_v17, 1 }
 0x106   :  { %v685_v22 = vadd.f32 %v684_v21, %v683_v17 }
 0x108   :  { %v1287_v23 = vadd.f32 %v685_v22, %v669_v18 }
 0x10d   :  { %v1289_v24 = vpop.f32.mrb[4].mxu0 }
 0x10e   :  { %v687_v26 = vsel %vm387_vm0, %v1289_v24, 0.0  ;;  %v695_v27 = vmul.f32 %v1289_v24, %v1289_v24  ;;  %v1295_v28 = vpop.f32.mrb[5].mxu0 }
 0x10f   :  { %v688_v29 = vrot.slane %v687_v26, 4  ;;  %v704_v30 = vsel %vm387_vm0, %v1295_v28, 0.0  ;;  %v712_v31 = vmul.f32 %v1295_v28, %v1295_v28  ;;  %v535_v32 = vpop.f32.mrb[6].mxu0  ;;  %v1301_v33 = vpop.f32.mrb[4].mxu1 }
 0x110   :  { %v696_v34 = vsel %vm387_vm0, %v695_v27, 0.0  ;;  %v705_v35 = vrot.slane %v704_v30, 4  ;;  %v536_v36 = vpop.f32.mrb[7].mxu0  ;;  %v721_v37 = vsel %vm387_vm0, %v1301_v33, 0.0  ;;  %v729_v38 = vmul.f32 %v1301_v33, %v1301_v33  ;;  %v1308_v39 = vpop.f32.mrb[5].mxu1 }
 0x111   :  { %v689_v40 = vadd.f32 %v688_v29, %v687_v26  ;;  %v697_v41 = vrot.slane %v696_v34, 4  ;;  %v713_v42 = vsel %vm387_vm0, %v712_v31, 0.0  ;;  %v722_v43 = vrot.slane %v721_v37, 4  ;;  %v576_v44 = vpop.f32.mrb[6].mxu1 }
 0x112   :  { %v706_v45 = vadd.f32 %v705_v35, %v704_v30  ;;  %v714_v46 = vrot.slane %v713_v42, 4  ;;  %v730_v47 = vsel %vm387_vm0, %v729_v38, 0.0  ;;  %v738_v48 = vsel %vm387_vm0, %v1308_v39, 0.0  ;;  %v577_v49 = vpop.f32.mrb[7].mxu1 }
 0x113   :  { %v690_v50 = vrot.slane %v689_v40, 2  ;;  %v698_v51 = vadd.f32 %v697_v41, %v696_v34  ;;  %v723_v52 = vadd.f32 %v722_v43, %v721_v37  ;;  %v731_v53 = vrot.slane %v730_v47, 4 }
 0x114   :  { %v707_v54 = vrot.slane %v706_v45, 2  ;;  %v715_v55 = vadd.f32 %v714_v46, %v713_v42  ;;  %v739_v56 = vrot.slane %v738_v48, 4  ;;  %v746_v57 = vmul.f32 %v1308_v39, %v1308_v39 }
 0x115   :  { %v691_v58 = vadd.f32 %v690_v50, %v689_v40  ;;  %v699_v59 = vrot.slane %v698_v51, 2  ;;  %v724_v60 = vrot.slane %v723_v52, 2  ;;  %v732_v61 = vadd.f32 %v731_v53, %v730_v47 }
 0x116   :  { %v708_v62 = vadd.f32 %v707_v54, %v706_v45  ;;  %v716_v63 = vrot.slane %v715_v55, 2  ;;  %v740_v0 = vadd.f32 %v739_v56, %v738_v48  ;;  %v747_v1 = vsel %vm387_vm0, %v746_v57, 0.0 }
 0x117   :  { %v692_v2 = vrot.slane %v691_v58, 1  ;;  %v700_v3 = vadd.f32 %v699_v59, %v698_v51  ;;  %v725_v4 = vadd.f32 %v724_v60, %v723_v52  ;;  %v733_v5 = vrot.slane %v732_v61, 2 }
 0x118   :  { %v709_v6 = vrot.slane %v708_v62, 1  ;;  %v717_v7 = vadd.f32 %v716_v63, %v715_v55  ;;  %v741_v8 = vrot.slane %v740_v0, 2  ;;  %v748_v9 = vrot.slane %v747_v1, 4 }
 0x119   :  { %v693_v10 = vadd.f32 %v692_v2, %v691_v58  ;;  %v701_v12 = vrot.slane %v700_v3, 1  ;;  %v726_v13 = vrot.slane %v725_v4, 1  ;;  %v734_v15 = vadd.f32 %v733_v5, %v732_v61 }
 0x11a   :  { %v710_v16 = vadd.f32 %v709_v6, %v708_v62  ;;  %v718_v17 = vrot.slane %v717_v7, 1  ;;  %v742_v18 = vadd.f32 %v741_v8, %v740_v0  ;;  %v749_v21 = vadd.f32 %v748_v9, %v747_v1  ;;  %v777_v9 = vld [vmem:[%s1363_s2] sm:$0x1] }
 0x11b   :  { %v694_v22 = vadd.f32 %v693_v10, %v677_v20  ;;  %v702_v26 = vadd.f32 %v701_v12, %v700_v3  ;;  %v727_v27 = vadd.f32 %v726_v13, %v725_v4  ;;  %v735_v29 = vrot.slane %v734_v15, 1 }
 0x11c   :  { %v719_v30 = vadd.f32 %v718_v17, %v717_v7  ;;  %v743_v31 = vrot.slane %v742_v18, 1  ;;  %v750_v32 = vrot.slane %v749_v21, 2  ;;  %v785_v7 = vlaneseq }
 0x11d   :  { %v703_v34 = vadd.f32 %v702_v26, %v1287_v23  ;;  %v711_v35 = vadd.f32 %v710_v16, %v694_v22  ;;  %v736_v36 = vadd.f32 %v735_v29, %v734_v15  ;;  %v781_v15 = vld [vmem:[%s1364_s3] sm:$0x1] }
 0x11e   :  { %v744_v37 = vadd.f32 %v743_v31, %v742_v18  ;;  %v751_v38 = vadd.f32 %v750_v32, %v749_v21  ;;  %v786_v8 = vshrl.u32 %v785_v7, 7 }
 0x11f   :  { %v720_v40 = vadd.f32 %v719_v30, %v703_v34  ;;  %v728_v41 = vadd.f32 %v727_v27, %v711_v35 }
 0x120   :  { %v752_v42 = vrot.slane %v751_v38, 1  ;;  %v787_v10 = vsub.s32 0, %v786_v8 }
 0x121   :  { %v737_v43 = vadd.f32 %v736_v36, %v720_v40  ;;  %v745_v44 = vadd.f32 %v744_v37, %v728_v41 }
 0x122   :  { %v753_v45 = vadd.f32 %v752_v42, %v751_v38 }
 0x124   :  { %v754_v46 = vadd.f32 %v753_v45, %v737_v43 }
 0x129   :  { %v613_v20 = vpop.f32.mrb[8].mxu0 }
 0x12a   :  { %v755_v47 = vsel %vm387_vm0, %v613_v20, 0.0  ;;  %v763_v48 = vmul.f32 %v613_v20, %v613_v20  ;;  %v932_v49 = vpop.f32.mrb[9].mxu0 }
 0x12b   :  { %v756_v50 = vrot.slane %v755_v47, 4  ;;  %v616_v51 = vpop.f32.mrb[10].mxu0 }
 0x12c   :  { %v764_v23 = vsel %vm387_vm0, %v763_v48, 0.0  ;;  %v933_v52 = vpop.f32.mrb[11].mxu0 }
 0x12d   :  { %v757_v53 = vadd.f32 %v756_v50, %v755_v47  ;;  %v765_v54 = vrot.slane %v764_v23, 4 }
 0x12f   :  { %v758_v55 = vrot.slane %v757_v53, 2  ;;  %v766_v56 = vadd.f32 %v765_v54, %v764_v23 }
 0x131   :  { %v759_v57 = vadd.f32 %v758_v55, %v757_v53  ;;  %v767_v58 = vrot.slane %v766_v56, 2 }
 0x133   :  { %v760_v59 = vrot.slane %v759_v57, 1  ;;  %v768_v60 = vadd.f32 %v767_v58, %v766_v56 }
 0x135   :  { %v761_v61 = vadd.f32 %v760_v59, %v759_v57  ;;  %v769_v62 = vrot.slane %v768_v60, 1 }
 0x137   :  { %v762_v63 = vadd.f32 %v761_v61, %v745_v44  ;;  %v770_v0 = vadd.f32 %v769_v62, %v768_v60 }
 0x139   :  { %v771_v1 = vadd.f32 %v770_v0, %v754_v46  ;;  %v773_v2 = vmul.f32 0.055555556, %v762_v63 }
 0x13b   :  { %v774_v3 = vmul.f32 0.055555556, %v771_v1  ;;  %v775_v4 = vmul.f32 %v773_v2, %v773_v2 }
 0x13d   :  { %v776_v5 = vsub.f32 %v774_v3, %v775_v4 }
 0x13f   :  { %v778_v6 = vadd.f32 1e-05, %v776_v5 }
 0x141   :  { %1024 = vrsqrt.f32 %v778_v6 }
 0x14b   :  { %v1025_v12 = vpop.eup %1024 }
 0x14c   :  { %v780_v13 = vmul.f32 %v1025_v12, %v777_v9 }
 0x14e   :  { %v782_v16 = vmul.f32 %v780_v13, %v773_v2  ;;  %v788_v17 = vrot.slane %v780_v13, %v787_v10 }
 0x150   :  { %v783_v18 = vsub.f32 %v781_v15, %v782_v16  ;;  %v790_v21 = vmul.f32 %v788_v17, %v1259_v11  ;;  %v800_v22 = vmul.f32 %v788_v17, %v1265_v14  ;;  %v804_v26 = vmul.f32 %v788_v17, %v1271_v19 }
 0x151   :  { %v808_v27 = vmul.f32 %v788_v17, %v1278_v25  ;;  %v812_v29 = vmul.f32 %v788_v17, %v1289_v24  ;;  %v816_v30 = vmul.f32 %v788_v17, %v1295_v28  ;;  %v820_v31 = vmul.f32 %v788_v17, %v1301_v33 }
 0x152   :  { %v795_v32 = vrot.slane %v783_v18, %v787_v10  ;;  %v824_v34 = vmul.f32 %v788_v17, %v1308_v39  ;;  %v828_v35 = vmul.f32 %v788_v17, %v613_v20 }
 0x154   :  { %v797_v36 = vadd.f32 %v795_v32, %v790_v21  ;;  %v801_v37 = vadd.f32 %v800_v22, %v795_v32  ;;  %v805_v38 = vadd.f32 %v804_v26, %v795_v32  ;;  %v809_v11 = vadd.f32 %v808_v27, %v795_v32 }
 0x155   :  { %v813_v40 = vadd.f32 %v812_v29, %v795_v32  ;;  %v817_v14 = vadd.f32 %v816_v30, %v795_v32  ;;  %v821_v41 = vadd.f32 %v820_v31, %v795_v32  ;;  %v825_v19 = vadd.f32 %v824_v34, %v795_v32 }
 0x156   :  { %v798_v42 = vmax.f32 %v797_v36, 0.0  ;;  %v802_v25 = vmax.f32 %v801_v37, 0.0  ;;  %v806_v43 = vmax.f32 %v805_v38, 0.0  ;;  %v810_v24 = vmax.f32 %v809_v11, 0.0 }
 0x157   :  { %v814_v44 = vmax.f32 %v813_v40, 0.0  ;;  %v818_v28 = vmax.f32 %v817_v14, 0.0  ;;  %v822_v45 = vmax.f32 %v821_v41, 0.0  ;;  %v826_v33 = vmax.f32 %v825_v19, 0.0 }
 0x158   :  { %799 = vst [vmem:[%s1365_s4] sm:$0x3] %v798_v42  ;;  %803 = vst [vmem:[%s1365_s4 + $0x2] sm:$0x3] %v802_v25  ;;  %v829_v39 = vadd.f32 %v828_v35, %v795_v32 }
 0x159   :  { %807 = vst [vmem:[%s1365_s4 + $0x4] sm:$0x3] %v806_v43  ;;  %811 = vst [vmem:[%s1365_s4 + $0x6] sm:$0x3] %v810_v24 }
 0x15a   :  { %815 = vst [vmem:[%s1365_s4 + $0x8] sm:$0x3] %v814_v44  ;;  %819 = vst [vmem:[%s1365_s4 + $0xa] sm:$0x3] %v818_v28  ;;  %v830_v46 = vmax.f32 %v829_v39, 0.0 }
 0x15b   :  { %823 = vst [vmem:[%s1365_s4 + $0xc] sm:$0x3] %v822_v45  ;;  %827 = vst [vmem:[%s1365_s4 + $0xe] sm:$0x3] %v826_v33 }
 0x15c   :  { %831 = vst [vmem:[%s1365_s4 + $0x10] sm:$0x3] %v830_v46 }

// kernel: generator_forward.7
= control target key start
LH: loop header
LB: loop body
LE: loop exit
PB: predicated region body
PF: predicated region fallthrough
CT: control target
= control target key end

     0   :  { %vm2693_vm0 = vcmask 1041408   ;;  %s5029_s1 = inlined_call_operand.vmem [shape: bf16[2304,128], index: 1, kind: input, shape index: {}]   ;;  %s5030_s0 = inlined_call_operand.vmem [shape: bf16[98,2304], index: 0, kind: input, shape index: {}]   ;;  %s5031_s2 = inlined_call_operand.vmem [shape: f32[1,128], index: 2, kind: input, shape index: {}]   ;;  %s5032_s3 = inlined_call_operand.vmem [shape: f32[1,128], index: 3, kind: input, shape index: {}]   ;;  %s5033_s4 = inlined_call_operand.vmem [shape: f32[98,128], index: 4, kind: output, shape index: {}]  }
   0x1   :  { %v3622_v0 = vld [vmem:[%s5029_s1 + $0x40] sm:$0xff]   ;;  %v3624_v2 = vld [vmem:[%s5029_s1 + $0x48] sm:$0xff]   ;;  %v3626_v4 = vld [vmem:[%s5029_s1 + $0x50] sm:$0xff]  }
   0x2   :  { %v3623_v1 = vld [vmem:[%s5029_s1] sm:$0xff]   ;;  %3084 = vmatprep.subr.bf16.mxu0 %v3622_v0  ;;  %3606 = vmatprep.subr.bf16.mxu1 %v3622_v0  ;;  %v3625_v3 = vld [vmem:[%s5029_s1 + $0x8] sm:$0xff]   ;;  %v3627_v5 = vld [vmem:[%s5029_s1 + $0x10] sm:$0xff]  }
   0x3   :  { %3085 = vmatpush3.bf16.msra.mxu0 %v3623_v1  ;;  %3614 = vmatpush3.bf16.msra.mxu1 %v3623_v1  ;;  %v3628_v6 = vld [vmem:[%s5029_s1 + $0x58] sm:$0xff]   ;;  %v3630_v8 = vld [vmem:[%s5029_s1 + $0x60] sm:$0xff]   ;;  %v3632_v10 = vld [vmem:[%s5029_s1 + $0x68] sm:$0xff]  }
   0x4   :  { %3086 = vmatprep.subr.bf16.mxu0 %v3624_v2  ;;  %3607 = vmatprep.subr.bf16.mxu1 %v3624_v2  ;;  %v3629_v7 = vld [vmem:[%s5029_s1 + $0x18] sm:$0xff]   ;;  %v3631_v9 = vld [vmem:[%s5029_s1 + $0x20] sm:$0xff]   ;;  %v3633_v13 = vld [vmem:[%s5029_s1 + $0x28] sm:$0xff]  }
   0x5   :  { %v3640_v11 = vld [vmem:[%s5030_s0 + $0x4] ss:$72 sps:$4 sm:$0xff]   ;;  %v3634_v14 = vld [vmem:[%s5029_s1 + $0x70] sm:$0xff]   ;;  %v3636_v16 = vld [vmem:[%s5029_s1 + $0x78] sm:$0xff]  }
   0x6   :  { %v3643_v12 = vld [vmem:[%s5030_s0 + $0x244] ss:$72 sps:$4 sm:$0xff]   ;;  %1922 = vmatprep.mubr.bf16.mxu0 %v3640_v11  ;;  %v3635_v15 = vld [vmem:[%s5029_s1 + $0x30] sm:$0xff]   ;;  %v3637_v17 = vld [vmem:[%s5029_s1 + $0x38] sm:$0xff]  }
   0x7   :  { %3087 = vmatpush3.bf16.msra.mxu0 %v3625_v3  ;;  %3615 = vmatpush3.bf16.msra.mxu1 %v3625_v3  ;;  %v3644_v18 = vld [vmem:[%s5029_s1 + $0xc0] sm:$0xff]   ;;  %v3648_v24 = vld [vmem:[%s5029_s1 + $0xc8] sm:$0xff]   ;;  %v3652_v28 = vld [vmem:[%s5030_s0 + $0x94] ss:$72 sps:$4 sm:$0xff]  }
   0x8   :  { %3088 = vmatprep.subr.bf16.mxu0 %v3626_v4  ;;  %3608 = vmatprep.subr.bf16.mxu1 %v3626_v4  ;;  %v3638_v19 = vld [vmem:[%s5030_s0] ss:$72 sps:$4 sm:$0xff]   ;;  %v3661_v29 = vld [vmem:[%s5030_s0 + $0x2d4] ss:$72 sps:$4 sm:$0xff]   ;;  %v3654_v31 = vld [vmem:[%s5030_s0 + $0x90] ss:$72 sps:$4 sm:$0xff]  }
   0x9   :  { %1954 = vmatprep.mubr.bf16.mxu1 %v3643_v12  ;;  %v3641_v20 = vld [vmem:[%s5030_s0 + $0x240] ss:$72 sps:$4 sm:$0xff]   ;;  %v3655_v30 = vld [vmem:[%s5029_s1 + $0xd0] sm:$0xff]   ;;  %v3659_v36 = vld [vmem:[%s5029_s1 + $0xd8] sm:$0xff]  }
   0xa   :  { %v3645_v21 = vld [vmem:[%s5029_s1 + $0x140] sm:$0xff]   ;;  %v3649_v25 = vld [vmem:[%s5029_s1 + $0x148] sm:$0xff]   ;;  %v3656_v32 = vld [vmem:[%s5029_s1 + $0x150] sm:$0xff]  }
   0xb   :  { %3089 = vmatpush3.bf16.msra.mxu0 %v3627_v5  ;;  %3616 = vmatpush3.bf16.msra.mxu1 %v3627_v5  ;;  %v3646_v22 = vld [vmem:[%s5029_s1 + $0x80] sm:$0xff]   ;;  %v3650_v26 = vld [vmem:[%s5029_s1 + $0x88] sm:$0xff]   ;;  %v3657_v33 = vld [vmem:[%s5029_s1 + $0x90] sm:$0xff]  }
   0xc   :  { %3090 = vmatprep.subr.bf16.mxu0 %v3628_v6  ;;  %3609 = vmatprep.subr.bf16.mxu1 %v3628_v6  ;;  %v3647_v23 = vld [vmem:[%s5029_s1 + $0x100] sm:$0xff]   ;;  %v3651_v27 = vld [vmem:[%s5029_s1 + $0x108] sm:$0xff]   ;;  %v3658_v34 = vld [vmem:[%s5029_s1 + $0x110] sm:$0xff]  }
   0xd   :  { %v3665_v35 = vld [vmem:[%s5030_s0 + $0x2d0] ss:$72 sps:$4 sm:$0xff]   ;;  %v3666_v39 = vld [vmem:[%s5030_s0 + $0x124] ss:$72 sps:$4 sm:$0xff]   ;;  %v3668_v42 = vld [vmem:[%s5030_s0 + $0x120] ss:$72 sps:$4 sm:$0xff]  }
   0xe   :  { %v3660_v37 = vld [vmem:[%s5029_s1 + $0x158] sm:$0xff]   ;;  %v3669_v41 = vld [vmem:[%s5029_s1 + $0xe0] sm:$0xff]   ;;  %v3673_v49 = vld [vmem:[%s5029_s1 + $0xe8] sm:$0xff]  }
   0xf   :  { %3091 = vmatpush3.bf16.msra.mxu0 %v3629_v7  ;;  %3617 = vmatpush3.bf16.msra.mxu1 %v3629_v7  ;;  %v3663_v38 = vld [vmem:[%s5029_s1 + $0x98] sm:$0xff]   ;;  %v3670_v43 = vld [vmem:[%s5029_s1 + $0x160] sm:$0xff]   ;;  %v3674_v50 = vld [vmem:[%s5029_s1 + $0x168] sm:$0xff]  }
  0x10   :  { %3092 = vmatprep.subr.bf16.mxu0 %v3630_v8  ;;  %3610 = vmatprep.subr.bf16.mxu1 %v3630_v8  ;;  %v3664_v40 = vld [vmem:[%s5029_s1 + $0x118] sm:$0xff]   ;;  %v126_v44 = vld [vmem:[%s5030_s0 + $0x360] sm:$0x11]  ;;  %v3676_v51 = vld [vmem:[%s5029_s1 + $0xa8] sm:$0xff]  }
  0x11   :  { %v3671_v45 = vld [vmem:[%s5029_s1 + $0xa0] sm:$0xff]   ;;  %v2923_v46 = vcombine.high %v126_v44, %v126_v44  ;;  %v2922_v48 = vcombine.low %v126_v44, %v126_v44  ;;  %v3679_v52 = vld [vmem:[%s5030_s0 + $0x1b4] ss:$72 sps:$4 sm:$0xff]   ;;  %v3677_v53 = vld [vmem:[%s5029_s1 + $0x128] sm:$0xff]  }
  0x12   :  { %v3672_v47 = vld [vmem:[%s5029_s1 + $0x120] sm:$0xff]   ;;  %v3682_v54 = vld [vmem:[%s5029_s1 + $0xf0] sm:$0xff]   ;;  %v3686_v59 = vld [vmem:[%s5029_s1 + $0xf8] sm:$0xff]  }
  0x13   :  { %3093 = vmatpush3.bf16.msra.mxu0 %v3631_v9  ;;  %3618 = vmatpush3.bf16.msra.mxu1 %v3631_v9  ;;  %v3681_v55 = vld [vmem:[%s5030_s0 + $0x1b0] ss:$72 sps:$4 sm:$0xff]   ;;  %v3692_v61 = vld [vmem:[%s5030_s0 + $0xc] ss:$72 sps:$4 sm:$0xff]   ;;  %v3696_v3 = vld [vmem:[%s5029_s1 + $0x1c0] sm:$0xff]  }
  0x14   :  { %3094 = vmatprep.subr.bf16.mxu0 %v3632_v10  ;;  %3611 = vmatprep.subr.bf16.mxu1 %v3632_v10  ;;  %v3683_v56 = vld [vmem:[%s5029_s1 + $0x170] sm:$0xff]   ;;  %v3687_v60 = vld [vmem:[%s5029_s1 + $0x178] sm:$0xff]   ;;  %v3697_v4 = vld [vmem:[%s5029_s1 + $0x180] sm:$0xff]  }
  0x15   :  { %v3684_v57 = vld [vmem:[%s5029_s1 + $0xb0] sm:$0xff]   ;;  %v3688_v62 = vld [vmem:[%s5029_s1 + $0xb8] sm:$0xff]   ;;  %v3698_v5 = vld [vmem:[%s5029_s1 + $0x240] sm:$0xff]  }
  0x16   :  { %v3685_v58 = vld [vmem:[%s5029_s1 + $0x130] sm:$0xff]   ;;  %v3689_v0 = vld [vmem:[%s5029_s1 + $0x138] sm:$0xff]   ;;  %v3699_v6 = vld [vmem:[%s5029_s1 + $0x200] sm:$0xff]  }
  0x17   :  { %3095 = vmatpush3.bf16.msra.mxu0 %v3633_v13  ;;  %3619 = vmatpush3.bf16.msra.mxu1 %v3633_v13  ;;  %v3695_v63 = vld [vmem:[%s5030_s0 + $0x14] ss:$72 sps:$4 sm:$0xff]   ;;  %v3690_v1 = vld [vmem:[%s5030_s0 + $0x8] ss:$72 sps:$4 sm:$0xff]   ;;  %v3702_v8 = vld [vmem:[%s5030_s0 + $0xa4] ss:$72 sps:$4 sm:$0xff]  }
  0x18   :  { %3096 = vmatprep.subr.bf16.mxu0 %v3634_v14  ;;  %3612 = vmatprep.subr.bf16.mxu1 %v3634_v14  ;;  %v3693_v2 = vld [vmem:[%s5030_s0 + $0x10] ss:$72 sps:$4 sm:$0xff]   ;;  %v3700_v7 = vld [vmem:[%s5030_s0 + $0x9c] ss:$72 sps:$4 sm:$0xff]   ;;  %v3704_v9 = vld [vmem:[%s5029_s1 + $0x1c8] sm:$0xff]  }
  0x19   :  { %v3707_v10 = vld [vmem:[%s5029_s1 + $0x188] sm:$0xff]   ;;  %v3705_v11 = vld [vmem:[%s5030_s0 + $0x98] ss:$72 sps:$4 sm:$0xff]  }
  0x1a   :  { %v3706_v12 = vld [vmem:[%s5030_s0 + $0xa0] ss:$72 sps:$4 sm:$0xff]   ;;  %v3746_v44 = vld [vmem:[%s5030_s0 + $0x2e4] ss:$72 sps:$4 sm:$0xff]  }
  0x1b   :  { %3097 = vmatpush3.bf16.msra.mxu0 %v3635_v15  ;;  %3620 = vmatpush3.bf16.msra.mxu1 %v3635_v15  ;;  %v3708_v13 = vld [vmem:[%s5029_s1 + $0x248] sm:$0xff]   ;;  %v3710_v15 = vld [vmem:[%s5029_s1 + $0x1d0] sm:$0xff]  }
  0x1c   :  { %3098 = vmatprep.subr.bf16.mxu0 %v3636_v16  ;;  %3613 = vmatprep.subr.bf16.mxu1 %v3636_v16  ;;  %v3709_v14 = vld [vmem:[%s5029_s1 + $0x208] sm:$0xff]  }
  0x1d   :  { %v3711_v16 = vld [vmem:[%s5030_s0 + $0x12c] ss:$72 sps:$4 sm:$0xff]  }
  0x1f   :  { %3099 = vmatpush3.bf16.msra.mxu0 %v3637_v17  ;;  %3621 = vmatpush3.bf16.msra.mxu1 %v3637_v17  ;;  %v3713_v17 = vld [vmem:[%s5030_s0 + $0x134] ss:$72 sps:$4 sm:$0xff]  }
  0x20   :  { %3142 = vmatprep.subr.bf16.mxu1 %v3644_v18  ;;  %3200 = vmatprep.subr.bf16.mxu0 %v3645_v21  ;;  %v3715_v18 = vld [vmem:[%s5029_s1 + $0x190] sm:$0xff]  }
  0x21   :  { %v3717_v21 = vld [vmem:[%s5030_s0 + $0x130] ss:$72 sps:$4 sm:$0xff]  }
  0x22   :  { %1923 = vmatmul.mubr.bf16.vlgmr.msra.gmra.mrb[0].mxu0 %v3638_v19  ;;  %1955 = vmatmul.mubr.bf16.vlgmr.msra.gmra.mrb[0].mxu1 %v3641_v20  ;;  %v3718_v19 = vld [vmem:[%s5029_s1 + $0x250] sm:$0xff]  }
  0x23   :  { %3143 = vmatpush3.bf16.msra.mxu1 %v3646_v22  ;;  %3201 = vmatpush3.bf16.msra.mxu0 %v3647_v23  ;;  %v3716_v20 = vld [vmem:[%s5030_s0 + $0x128] ss:$72 sps:$4 sm:$0xff]   ;;  %v3720_v23 = vld [vmem:[%s5029_s1 + $0x1d8] sm:$0xff]  }
  0x24   :  { %3144 = vmatprep.subr.bf16.mxu1 %v3648_v24  ;;  %3202 = vmatprep.subr.bf16.mxu0 %v3649_v25  ;;  %v3719_v22 = vld [vmem:[%s5029_s1 + $0x210] sm:$0xff]   ;;  %v3721_v24 = vld [vmem:[%s5029_s1 + $0x198] sm:$0xff]  }
  0x25   :  { %1930 = vmatprep.mubr.bf16.mxu0 %v3652_v28  ;;  %1962 = vmatprep.mubr.bf16.mxu1 %v3661_v29  ;;  %v3722_v25 = vld [vmem:[%s5030_s0 + $0x1bc] ss:$72 sps:$4 sm:$0xff]  }
  0x26   :  { %v3729_v28 = vld [vmem:[%s5029_s1 + $0x218] sm:$0xff]   ;;  %v3730_v29 = vld [vmem:[%s5029_s1 + $0x1e0] sm:$0xff]  }
  0x27   :  { %3145 = vmatpush3.bf16.msra.mxu1 %v3650_v26  ;;  %3203 = vmatpush3.bf16.msra.mxu0 %v3651_v27  ;;  %v3724_v26 = vld [vmem:[%s5030_s0 + $0x1c4] ss:$72 sps:$4 sm:$0xff]   ;;  %v3726_v27 = vld [vmem:[%s5029_s1 + $0x258] sm:$0xff]  }
  0x28   :  { %3146 = vmatprep.subr.bf16.mxu1 %v3655_v30  ;;  %3204 = vmatprep.subr.bf16.mxu0 %v3656_v32  ;;  %v3727_v30 = vld [vmem:[%s5030_s0 + $0x1b8] ss:$72 sps:$4 sm:$0xff]  }
  0x29   :  { %v3731_v32 = vld [vmem:[%s5029_s1 + $0x1a0] sm:$0xff]  }
  0x2a   :  { %1931 = vmatmul.mubr.bf16.gmra.mrb[4].mxu0 %v3654_v31  ;;  %1963 = vmatmul.mubr.bf16.gmra.mrb[4].mxu1 %v3665_v35  ;;  %v3728_v31 = vld [vmem:[%s5030_s0 + $0x1c0] ss:$72 sps:$4 sm:$0xff]   ;;  %v3735_v35 = vld [vmem:[%s5030_s0 + $0x254] ss:$72 sps:$4 sm:$0xff]  }
  0x2b   :  { %3147 = vmatpush3.bf16.msra.mxu1 %v3657_v33  ;;  %3205 = vmatpush3.bf16.msra.mxu0 %v3658_v34  ;;  %v3732_v33 = vld [vmem:[%s5029_s1 + $0x260] sm:$0xff]   ;;  %v3733_v34 = vld [vmem:[%s5030_s0 + $0x24c] ss:$72 sps:$4 sm:$0xff]  }
  0x2c   :  { %3148 = vmatprep.subr.bf16.mxu1 %v3659_v36  ;;  %3206 = vmatprep.subr.bf16.mxu0 %v3660_v37  ;;  %v3737_v36 = vld [vmem:[%s5029_s1 + $0x220] sm:$0xff]   ;;  %v3740_v37 = vld [vmem:[%s5029_s1 + $0x1e8] sm:$0xff]  }
  0x2d   :  { %1938 = vmatprep.mubr.bf16.mxu0 %v3666_v39  ;;  %1970 = vmatprep.mubr.bf16.mxu1 %v2923_v46  ;;  %v3738_v39 = vld [vmem:[%s5030_s0 + $0x248] ss:$72 sps:$4 sm:$0xff]  }
  0x2e   :  { %v3751_v46 = vld [vmem:[%s5029_s1 + $0x1b0] sm:$0xff]  }
  0x2f   :  { %3149 = vmatpush3.bf16.msra.mxu1 %v3663_v38  ;;  %3207 = vmatpush3.bf16.msra.mxu0 %v3664_v40  ;;  %v3741_v38 = vld [vmem:[%s5029_s1 + $0x1a8] sm:$0xff]  }
  0x30   :  { %3150 = vmatprep.subr.bf16.mxu1 %v3669_v41  ;;  %3208 = vmatprep.subr.bf16.mxu0 %v3670_v43  ;;  %v3742_v40 = vld [vmem:[%s5029_s1 + $0x268] sm:$0xff]   ;;  %v3744_v43 = vld [vmem:[%s5030_s0 + $0x2dc] ss:$72 sps:$4 sm:$0xff]  }
  0x31   :  { %v3743_v41 = vld [vmem:[%s5029_s1 + $0x228] sm:$0xff]  }
  0x32   :  { %1939 = vmatmul.mubr.bf16.gmra.mrb[8].mxu0 %v3668_v42  ;;  %1971 = vmatmul.mubr.bf16.gmra.mrb[8].mxu1 %v2922_v48  ;;  %v3739_v42 = vld [vmem:[%s5030_s0 + $0x250] ss:$72 sps:$4 sm:$0xff]  }
  0x33   :  { %3151 = vmatpush3.bf16.msra.mxu1 %v3671_v45  ;;  %3209 = vmatpush3.bf16.msra.mxu0 %v3672_v47  ;;  %v3750_v45 = vld [vmem:[%s5029_s1 + $0x1f0] sm:$0xff]   ;;  %v3748_v48 = vld [vmem:[%s5030_s0 + $0x2d8] ss:$72 sps:$4 sm:$0xff]  }
  0x34   :  { %3152 = vmatprep.subr.bf16.mxu1 %v3673_v49  ;;  %3210 = vmatprep.subr.bf16.mxu0 %v3674_v50  ;;  %v3752_v47 = vld [vmem:[%s5029_s1 + $0x270] sm:$0xff]   ;;  %v3749_v49 = vld [vmem:[%s5030_s0 + $0x2e0] ss:$72 sps:$4 sm:$0xff]  }
  0x35   :  { %1946 = vmatprep.mubr.bf16.mxu0 %v3679_v52  ;;  %2010 = vmatprep.mubr.bf16.mxu1 %v3692_v61  ;;  %v3753_v50 = vld [vmem:[%s5029_s1 + $0x230] sm:$0xff]  }
  0x36   :  { %v128_v52 = vld [vmem:[%s5030_s0 + $0x370] sm:$0x11] }
  0x37   :  { %3153 = vmatpush3.bf16.msra.mxu1 %v3676_v51  ;;  %3211 = vmatpush3.bf16.msra.mxu0 %v3677_v53  ;;  %v127_v51 = vld [vmem:[%s5030_s0 + $0x368] sm:$0x11]  ;;  %v3758_v53 = vld [vmem:[%s5029_s1 + $0x1f8] sm:$0xff]  }
  0x38   :  { %3154 = vmatprep.subr.bf16.mxu1 %v3682_v54  ;;  %3212 = vmatprep.subr.bf16.mxu0 %v3683_v56  ;;  %v3759_v54 = vld [vmem:[%s5029_s1 + $0x1b8] sm:$0xff]   ;;  %v2927_v56 = vcombine.high %v128_v52, %v128_v52  ;;  %v2924_v61 = vcombine.low %v127_v51, %v127_v51 }
  0x3a   :  { %1947 = vmatmul.mubr.bf16.gmra.mrb[12].mxu0 %v3681_v55  ;;  %v2925_v55 = vcombine.high %v127_v51, %v127_v51  ;;  %v129_v51 = vld [vmem:[%s5030_s0 + $0x378] sm:$0x11] }
  0x3b   :  { %3155 = vmatpush3.bf16.msra.mxu1 %v3684_v57  ;;  %3213 = vmatpush3.bf16.msra.mxu0 %v3685_v58  ;;  %v3760_v57 = vld [vmem:[%s5029_s1 + $0x278] sm:$0xff]  }
  0x3c   :  { %3156 = vmatprep.subr.bf16.mxu1 %v3686_v59  ;;  %3214 = vmatprep.subr.bf16.mxu0 %v3687_v60  ;;  %v3761_v58 = vld [vmem:[%s5029_s1 + $0x238] sm:$0xff]   ;;  %v3768_v59 = vld [vmem:[%s5029_s1 + $0x2c0] sm:$0xff]  }
  0x3d   :  { %2098 = vmatprep.mubr.bf16.mxu0 %v3695_v63  ;;  %v3764_v60 = vld [vmem:[%s5030_s0 + $0x1c] ss:$72 sps:$4 sm:$0xff]  }
  0x3e   :  { %v3770_v63 = vld [vmem:[%s5029_s1 + $0x340] sm:$0xff]  }
  0x3f   :  { %3157 = vmatpush3.bf16.msra.mxu1 %v3688_v62  ;;  %3215 = vmatpush3.bf16.msra.mxu0 %v3689_v0  ;;  %v2926_v62 = vcombine.low %v128_v52, %v128_v52  ;;  %v3767_v0 = vld [vmem:[%s5030_s0 + $0x24] ss:$72 sps:$4 sm:$0xff]   ;;  %v3820_v52 = vld [vmem:[%s5030_s0 + $0x2e8] ss:$72 sps:$4 sm:$0xff]  }
  0x40   :  { %3258 = vmatprep.subr.bf16.mxu1 %v3696_v3  ;;  %3316 = vmatprep.subr.bf16.mxu0 %v3698_v5  ;;  %v3769_v3 = vld [vmem:[%s5029_s1 + $0x280] sm:$0xff]   ;;  %v3772_v5 = vld [vmem:[%s5030_s0 + $0xac] ss:$72 sps:$4 sm:$0xff]  }
  0x42   :  { %2011 = vmatmul.mubr.bf16.vlgmr.msra.gmra.mrb[12].mxu1 %v3690_v1  ;;  %2099 = vmatmul.mubr.bf16.vlgmr.msra.gmra.mrb[16].mxu0 %v3693_v2  ;;  %v3762_v1 = vld [vmem:[%s5030_s0 + $0x18] ss:$72 sps:$4 sm:$0xff]  }
  0x43   :  { %3259 = vmatpush3.bf16.msra.mxu1 %v3697_v4  ;;  %3317 = vmatpush3.bf16.msra.mxu0 %v3699_v6  ;;  %v3765_v2 = vld [vmem:[%s5030_s0 + $0x20] ss:$72 sps:$4 sm:$0xff]   ;;  %v3774_v6 = vld [vmem:[%s5030_s0 + $0xb4] ss:$72 sps:$4 sm:$0xff]  }
  0x44   :  { %2018 = vmatprep.mubr.bf16.mxu1 %v3700_v7  ;;  %2106 = vmatprep.mubr.bf16.mxu0 %v3702_v8  ;;  %v3771_v4 = vld [vmem:[%s5029_s1 + $0x300] sm:$0xff]   ;;  %v3776_v7 = vld [vmem:[%s5029_s1 + $0x2c8] sm:$0xff]  }
  0x45   :  { %3260 = vmatprep.subr.bf16.mxu1 %v3704_v9  ;;  %3318 = vmatprep.subr.bf16.mxu0 %v3708_v13  ;;  %v3780_v8 = vld [vmem:[%s5029_s1 + $0x348] sm:$0xff]   ;;  %v3778_v13 = vld [vmem:[%s5030_s0 + $0xb0] ss:$72 sps:$4 sm:$0xff]  }
  0x46   :  { %v3779_v9 = vld [vmem:[%s5029_s1 + $0x288] sm:$0xff]  }
  0x47   :  { %3261 = vmatpush3.bf16.msra.mxu1 %v3707_v10  ;;  %3319 = vmatpush3.bf16.msra.mxu0 %v3709_v14  ;;  %v3781_v10 = vld [vmem:[%s5029_s1 + $0x308] sm:$0xff]   ;;  %v3790_v14 = vld [vmem:[%s5029_s1 + $0x350] sm:$0xff]  }
  0x48   :  { %3262 = vmatprep.subr.bf16.mxu1 %v3710_v15  ;;  %3320 = vmatprep.subr.bf16.mxu0 %v3718_v19  ;;  %v3783_v15 = vld [vmem:[%s5030_s0 + $0x13c] ss:$72 sps:$4 sm:$0xff]  }
  0x49   :  { %v3792_v19 = vld [vmem:[%s5029_s1 + $0x2d8] sm:$0xff]  }
  0x4a   :  { %2019 = vmatmul.mubr.bf16.gmra.mrb[16].mxu1 %v3705_v11  ;;  %2107 = vmatmul.mubr.bf16.gmra.mrb[20].mxu0 %v3706_v12  ;;  %v3782_v11 = vld [vmem:[%s5029_s1 + $0x2d0] sm:$0xff]  }
  0x4b   :  { %2026 = vmatprep.mubr.bf16.mxu1 %v3711_v16  ;;  %2114 = vmatprep.mubr.bf16.mxu0 %v3713_v17  ;;  %v3777_v12 = vld [vmem:[%s5030_s0 + $0xa8] ss:$72 sps:$4 sm:$0xff]   ;;  %v3785_v16 = vld [vmem:[%s5030_s0 + $0x144] ss:$72 sps:$4 sm:$0xff]  }
  0x4c   :  { %3263 = vmatpush3.bf16.msra.mxu1 %v3715_v18  ;;  %3321 = vmatpush3.bf16.msra.mxu0 %v3719_v22  ;;  %v3787_v17 = vld [vmem:[%s5029_s1 + $0x290] sm:$0xff]   ;;  %v3788_v22 = vld [vmem:[%s5030_s0 + $0x138] ss:$72 sps:$4 sm:$0xff]  }
  0x4d   :  { %3264 = vmatprep.subr.bf16.mxu1 %v3720_v23  ;;  %3322 = vmatprep.subr.bf16.mxu0 %v3726_v27  ;;  %v3791_v18 = vld [vmem:[%s5029_s1 + $0x310] sm:$0xff]   ;;  %v3789_v23 = vld [vmem:[%s5030_s0 + $0x140] ss:$72 sps:$4 sm:$0xff]  }
  0x4e   :  { %v3804_v27 = vld [vmem:[%s5029_s1 + $0x360] sm:$0xff]  }
  0x50   :  { %3265 = vmatpush3.bf16.msra.mxu1 %v3721_v24  ;;  %3323 = vmatpush3.bf16.msra.mxu0 %v3729_v28  ;;  %v3801_v24 = vld [vmem:[%s5029_s1 + $0x318] sm:$0xff]  }
  0x51   :  { %3266 = vmatprep.subr.bf16.mxu1 %v3730_v29  ;;  %3324 = vmatprep.subr.bf16.mxu0 %v3732_v33  ;;  %v3796_v28 = vld [vmem:[%s5030_s0 + $0x1d4] ss:$72 sps:$4 sm:$0xff]   ;;  %v3803_v29 = vld [vmem:[%s5029_s1 + $0x2a0] sm:$0xff]   ;;  %v3800_v33 = vld [vmem:[%s5030_s0 + $0x1d0] ss:$72 sps:$4 sm:$0xff]  }
  0x52   :  { %2027 = vmatmul.mubr.bf16.gmra.mrb[20].mxu1 %v3716_v20  ;;  %2115 = vmatmul.mubr.bf16.gmra.mrb[24].mxu0 %v3717_v21  ;;  %v3798_v20 = vld [vmem:[%s5029_s1 + $0x358] sm:$0xff]  }
  0x53   :  { %2034 = vmatprep.mubr.bf16.mxu1 %v3722_v25  ;;  %2122 = vmatprep.mubr.bf16.mxu0 %v3724_v26  ;;  %v3793_v21 = vld [vmem:[%s5029_s1 + $0x298] sm:$0xff]   ;;  %v3794_v25 = vld [vmem:[%s5030_s0 + $0x1cc] ss:$72 sps:$4 sm:$0xff]   ;;  %v3802_v26 = vld [vmem:[%s5029_s1 + $0x2e0] sm:$0xff]  }
  0x54   :  { %3267 = vmatpush3.bf16.msra.mxu1 %v3731_v32  ;;  %3325 = vmatpush3.bf16.msra.mxu0 %v3737_v36  ;;  %v3799_v32 = vld [vmem:[%s5030_s0 + $0x1c8] ss:$72 sps:$4 sm:$0xff]  }
  0x55   :  { %3268 = vmatprep.subr.bf16.mxu1 %v3740_v37  ;;  %3326 = vmatprep.subr.bf16.mxu0 %v3742_v40  ;;  %v3814_v36 = vld [vmem:[%s5029_s1 + $0x368] sm:$0xff]   ;;  %v3823_v40 = vld [vmem:[%s5029_s1 + $0x2b0] sm:$0xff]  }
  0x56   :  { %v3815_v37 = vld [vmem:[%s5029_s1 + $0x328] sm:$0xff]  }
  0x58   :  { %3269 = vmatpush3.bf16.msra.mxu1 %v3741_v38  ;;  %3327 = vmatpush3.bf16.msra.mxu0 %v3743_v41  ;;  %v3807_v38 = vld [vmem:[%s5030_s0 + $0x264] ss:$72 sps:$4 sm:$0xff]   ;;  %v3824_v41 = vld [vmem:[%s5029_s1 + $0x370] sm:$0xff]  }
  0x59   :  { %3270 = vmatprep.subr.bf16.mxu1 %v3750_v45  ;;  %3328 = vmatprep.subr.bf16.mxu0 %v3752_v47  ;;  %v3816_v45 = vld [vmem:[%s5030_s0 + $0x2ec] ss:$72 sps:$4 sm:$0xff]   ;;  %v3830_v47 = vld [vmem:[%s5029_s1 + $0x2f8] sm:$0xff]  }
  0x5a   :  { %2035 = vmatmul.mubr.bf16.gmra.mrb[24].mxu1 %v3727_v30  ;;  %2123 = vmatmul.mubr.bf16.gmra.mrb[28].mxu0 %v3728_v31  ;;  %v3809_v30 = vld [vmem:[%s5029_s1 + $0x320] sm:$0xff]   ;;  %v3812_v31 = vld [vmem:[%s5029_s1 + $0x2e8] sm:$0xff]  }
  0x5b   :  { %2042 = vmatprep.mubr.bf16.mxu1 %v3733_v34  ;;  %2130 = vmatprep.mubr.bf16.mxu0 %v3735_v35  ;;  %v3813_v34 = vld [vmem:[%s5029_s1 + $0x2a8] sm:$0xff]   ;;  %v3805_v35 = vld [vmem:[%s5030_s0 + $0x25c] ss:$72 sps:$4 sm:$0xff]  }
  0x5c   :  { %3271 = vmatpush3.bf16.msra.mxu1 %v3751_v46  ;;  %3329 = vmatpush3.bf16.msra.mxu0 %v3753_v50  ;;  %v3818_v46 = vld [vmem:[%s5030_s0 + $0x2f4] ss:$72 sps:$4 sm:$0xff]  }
  0x5d   :  { %3272 = vmatprep.subr.bf16.mxu1 %v3758_v53  ;;  %3330 = vmatprep.subr.bf16.mxu0 %v3760_v57  ;;  %v3833_v50 = vld [vmem:[%s5029_s1 + $0x338] sm:$0xff]   ;;  %v130_v53 = vld [vmem:[%s5030_s0 + $0x380] sm:$0x11] }
  0x5e   :  { %v2931_v57 = vcombine.high %v130_v53, %v130_v53 }
  0x60   :  { %3273 = vmatpush3.bf16.msra.mxu1 %v3759_v54  ;;  %3331 = vmatpush3.bf16.msra.mxu0 %v3761_v58  ;;  %v3840_v54 = vld [vmem:[%s5029_s1 + $0x3c0] sm:$0xff]  }
  0x61   :  { %3374 = vmatprep.subr.bf16.mxu1 %v3768_v59  ;;  %3432 = vmatprep.subr.bf16.mxu0 %v3770_v63  ;;  %v3842_v58 = vld [vmem:[%s5029_s1 + $0x440] sm:$0xff]   ;;  %v2928_v59 = vcombine.low %v129_v51, %v129_v51  ;;  %v3834_v63 = vld [vmem:[%s5030_s0 + $0x28] ss:$72 sps:$4 sm:$0xff]  }
  0x62   :  { %2043 = vmatmul.mubr.bf16.gmra.mrb[28].mxu1 %v3738_v39  ;;  %2131 = vmatmul.mubr.bf16.gmra.mrb[32].mxu0 %v3739_v42  ;;  %v3822_v39 = vld [vmem:[%s5029_s1 + $0x2f0] sm:$0xff]   ;;  %v3810_v42 = vld [vmem:[%s5030_s0 + $0x258] ss:$72 sps:$4 sm:$0xff]  }
  0x63   :  { %2050 = vmatprep.mubr.bf16.mxu1 %v3744_v43  ;;  %2138 = vmatprep.mubr.bf16.mxu0 %v3746_v44  ;;  %v3811_v43 = vld [vmem:[%s5030_s0 + $0x260] ss:$72 sps:$4 sm:$0xff]   ;;  %v3825_v44 = vld [vmem:[%s5029_s1 + $0x330] sm:$0xff]  }
  0x6a   :  { %2051 = vmatmul.mubr.bf16.gmra.mrb[32].mxu1 %v3748_v48  ;;  %2139 = vmatmul.mubr.bf16.gmra.mrb[36].mxu0 %v3749_v49  ;;  %v3831_v48 = vld [vmem:[%s5029_s1 + $0x2b8] sm:$0xff]  }
  0x6b   :  { %2058 = vmatprep.mubr.bf16.mxu1 %v2925_v55  ;;  %2146 = vmatprep.mubr.bf16.mxu0 %v2927_v56  ;;  %v3832_v49 = vld [vmem:[%s5029_s1 + $0x378] sm:$0xff]   ;;  %v2929_v56 = vcombine.high %v129_v51, %v129_v51 }
  0x6c   :  { %v3821_v55 = vld [vmem:[%s5030_s0 + $0x2f0] ss:$72 sps:$4 sm:$0xff]  }
  0x6d   :  { %v3892_v51 = vld [vmem:[%s5030_s0 + $0x2f8] ss:$72 sps:$4 sm:$0xff]  }
  0x72   :  { %2059 = vmatmul.mubr.bf16.gmra.mrb[36].mxu1 %v2924_v61  ;;  %2147 = vmatmul.mubr.bf16.gmra.mrb[40].mxu0 %v2926_v62  ;;  %v3836_v61 = vld [vmem:[%s5030_s0 + $0x2c] ss:$72 sps:$4 sm:$0xff]  }
  0x73   :  { %2186 = vmatprep.mubr.bf16.mxu1 %v3764_v60  ;;  %2274 = vmatprep.mubr.bf16.mxu0 %v3767_v0  ;;  %v2930_v60 = vcombine.low %v130_v53, %v130_v53  ;;  %v3839_v62 = vld [vmem:[%s5030_s0 + $0x34] ss:$72 sps:$4 sm:$0xff]   ;;  %v3837_v0 = vld [vmem:[%s5030_s0 + $0x30] ss:$72 sps:$4 sm:$0xff]  }
  0x7a   :  { %2187 = vmatmul.mubr.bf16.vlgmr.msra.gmra.mrb[40].mxu1 %v3762_v1  ;;  %2275 = vmatmul.mubr.bf16.vlgmr.msra.gmra.mrb[44].mxu0 %v3765_v2  ;;  %v3841_v1 = vld [vmem:[%s5029_s1 + $0x380] sm:$0xff]  }
  0x7b   :  { %3375 = vmatpush3.bf16.msra.mxu1 %v3769_v3  ;;  %3433 = vmatpush3.bf16.msra.mxu0 %v3771_v4  ;;  %v3843_v2 = vld [vmem:[%s5029_s1 + $0x400] sm:$0xff]  }
  0x7c   :  { %2194 = vmatprep.mubr.bf16.mxu1 %v3772_v5  ;;  %2282 = vmatprep.mubr.bf16.mxu0 %v3774_v6  ;;  %v3844_v3 = vld [vmem:[%s5030_s0 + $0xbc] ss:$72 sps:$4 sm:$0xff]   ;;  %v3848_v5 = vld [vmem:[%s5029_s1 + $0x3c8] sm:$0xff]  }
  0x7d   :  { %3376 = vmatprep.subr.bf16.mxu1 %v3776_v7  ;;  %3434 = vmatprep.subr.bf16.mxu0 %v3780_v8  ;;  %v3846_v4 = vld [vmem:[%s5030_s0 + $0xc4] ss:$72 sps:$4 sm:$0xff]  }
  0x7e   :  { %v3852_v6 = vld [vmem:[%s5029_s1 + $0x448] sm:$0xff]  }
  0x7f   :  { %3377 = vmatpush3.bf16.msra.mxu1 %v3779_v9  ;;  %3435 = vmatpush3.bf16.msra.mxu0 %v3781_v10  ;;  %v3851_v7 = vld [vmem:[%s5029_s1 + $0x388] sm:$0xff]   ;;  %v3854_v9 = vld [vmem:[%s5029_s1 + $0x3d0] sm:$0xff]   ;;  %v3849_v10 = vld [vmem:[%s5030_s0 + $0xb8] ss:$72 sps:$4 sm:$0xff]  }
  0x80   :  { %3378 = vmatprep.subr.bf16.mxu1 %v3782_v11  ;;  %3436 = vmatprep.subr.bf16.mxu0 %v3790_v14  ;;  %v3853_v8 = vld [vmem:[%s5029_s1 + $0x408] sm:$0xff]   ;;  %v3857_v14 = vld [vmem:[%s5030_s0 + $0x154] ss:$72 sps:$4 sm:$0xff]  }
  0x81   :  { %v3850_v11 = vld [vmem:[%s5030_s0 + $0xc0] ss:$72 sps:$4 sm:$0xff]  }
  0x82   :  { %2195 = vmatmul.mubr.bf16.gmra.mrb[44].mxu1 %v3777_v12  ;;  %2283 = vmatmul.mubr.bf16.gmra.mrb[48].mxu0 %v3778_v13  ;;  %v3862_v12 = vld [vmem:[%s5029_s1 + $0x450] sm:$0xff]  }
  0x83   :  { %2202 = vmatprep.mubr.bf16.mxu1 %v3783_v15  ;;  %2290 = vmatprep.mubr.bf16.mxu0 %v3785_v16  ;;  %v3855_v13 = vld [vmem:[%s5030_s0 + $0x14c] ss:$72 sps:$4 sm:$0xff]  }
  0x84   :  { %3379 = vmatpush3.bf16.msra.mxu1 %v3787_v17  ;;  %3437 = vmatpush3.bf16.msra.mxu0 %v3791_v18  ;;  %v3859_v15 = vld [vmem:[%s5029_s1 + $0x390] sm:$0xff]   ;;  %v3864_v17 = vld [vmem:[%s5029_s1 + $0x3d8] sm:$0xff]  }
  0x85   :  { %3380 = vmatprep.subr.bf16.mxu1 %v3792_v19  ;;  %3438 = vmatprep.subr.bf16.mxu0 %v3798_v20  ;;  %v3863_v16 = vld [vmem:[%s5029_s1 + $0x410] sm:$0xff]   ;;  %v3870_v18 = vld [vmem:[%s5029_s1 + $0x458] sm:$0xff]  }
  0x86   :  { %v3865_v19 = vld [vmem:[%s5029_s1 + $0x398] sm:$0xff]  }
  0x87   :  { %v3873_v20 = vld [vmem:[%s5029_s1 + $0x418] sm:$0xff]  }
  0x88   :  { %3381 = vmatpush3.bf16.msra.mxu1 %v3793_v21  ;;  %3439 = vmatpush3.bf16.msra.mxu0 %v3801_v24  ;;  %v3860_v21 = vld [vmem:[%s5030_s0 + $0x148] ss:$72 sps:$4 sm:$0xff]   ;;  %v3866_v24 = vld [vmem:[%s5030_s0 + $0x1dc] ss:$72 sps:$4 sm:$0xff]  }
  0x89   :  { %3382 = vmatprep.subr.bf16.mxu1 %v3802_v26  ;;  %3440 = vmatprep.subr.bf16.mxu0 %v3804_v27  ;;  %v3868_v26 = vld [vmem:[%s5030_s0 + $0x1e4] ss:$72 sps:$4 sm:$0xff]  }
  0x8a   :  { %2203 = vmatmul.mubr.bf16.gmra.mrb[48].mxu1 %v3788_v22  ;;  %2291 = vmatmul.mubr.bf16.gmra.mrb[52].mxu0 %v3789_v23  ;;  %v3861_v22 = vld [vmem:[%s5030_s0 + $0x150] ss:$72 sps:$4 sm:$0xff]   ;;  %v3874_v23 = vld [vmem:[%s5029_s1 + $0x3e0] sm:$0xff]  }
  0x8b   :  { %2210 = vmatprep.mubr.bf16.mxu1 %v3794_v25  ;;  %2298 = vmatprep.mubr.bf16.mxu0 %v3796_v28  ;;  %v3876_v25 = vld [vmem:[%s5029_s1 + $0x460] sm:$0xff]  }
  0x8c   :  { %3383 = vmatpush3.bf16.msra.mxu1 %v3803_v29  ;;  %3441 = vmatpush3.bf16.msra.mxu0 %v3809_v30  ;;  %v3875_v27 = vld [vmem:[%s5029_s1 + $0x3a0] sm:$0xff]   ;;  %v3884_v29 = vld [vmem:[%s5029_s1 + $0x3e8] sm:$0xff]  }
  0x8d   :  { %3384 = vmatprep.subr.bf16.mxu1 %v3812_v31  ;;  %3442 = vmatprep.subr.bf16.mxu0 %v3814_v36  ;;  %v3881_v28 = vld [vmem:[%s5029_s1 + $0x420] sm:$0xff]   ;;  %v3886_v30 = vld [vmem:[%s5029_s1 + $0x468] sm:$0xff]   ;;  %v3879_v36 = vld [vmem:[%s5030_s0 + $0x274] ss:$72 sps:$4 sm:$0xff]  }
  0x8e   :  { %v3885_v31 = vld [vmem:[%s5029_s1 + $0x3a8] sm:$0xff]  }
  0x90   :  { %3385 = vmatpush3.bf16.msra.mxu1 %v3813_v34  ;;  %3443 = vmatpush3.bf16.msra.mxu0 %v3815_v37  ;;  %v3887_v34 = vld [vmem:[%s5029_s1 + $0x428] sm:$0xff]   ;;  %v3894_v37 = vld [vmem:[%s5029_s1 + $0x3f0] sm:$0xff]  }
  0x91   :  { %3386 = vmatprep.subr.bf16.mxu1 %v3822_v39  ;;  %3444 = vmatprep.subr.bf16.mxu0 %v3824_v41  ;;  %v3895_v39 = vld [vmem:[%s5029_s1 + $0x3b0] sm:$0xff]   ;;  %v3902_v41 = vld [vmem:[%s5029_s1 + $0x3f8] sm:$0xff]  }
  0x92   :  { %2211 = vmatmul.mubr.bf16.gmra.mrb[52].mxu1 %v3799_v32  ;;  %2299 = vmatmul.mubr.bf16.gmra.mrb[56].mxu0 %v3800_v33  ;;  %v3871_v32 = vld [vmem:[%s5030_s0 + $0x1d8] ss:$72 sps:$4 sm:$0xff]  }
  0x93   :  { %2218 = vmatprep.mubr.bf16.mxu1 %v3805_v35  ;;  %2306 = vmatprep.mubr.bf16.mxu0 %v3807_v38  ;;  %v3872_v33 = vld [vmem:[%s5030_s0 + $0x1e0] ss:$72 sps:$4 sm:$0xff]   ;;  %v3877_v35 = vld [vmem:[%s5030_s0 + $0x26c] ss:$72 sps:$4 sm:$0xff]  }
  0x94   :  { %3387 = vmatpush3.bf16.msra.mxu1 %v3823_v40  ;;  %3445 = vmatpush3.bf16.msra.mxu0 %v3825_v44  ;;  %v3896_v38 = vld [vmem:[%s5029_s1 + $0x470] sm:$0xff]   ;;  %v3905_v44 = vld [vmem:[%s5029_s1 + $0x438] sm:$0xff]  }
  0x95   :  { %3388 = vmatprep.subr.bf16.mxu1 %v3830_v47  ;;  %3446 = vmatprep.subr.bf16.mxu0 %v3832_v49  ;;  %v3897_v40 = vld [vmem:[%s5029_s1 + $0x430] sm:$0xff]   ;;  %v3888_v47 = vld [vmem:[%s5030_s0 + $0x2fc] ss:$72 sps:$4 sm:$0xff]   ;;  %v131_v49 = vld [vmem:[%s5030_s0 + $0x388] sm:$0x11] }
  0x96   :  { %v2933_v53 = vcombine.high %v131_v49, %v131_v49 }
  0x98   :  { %3389 = vmatpush3.bf16.msra.mxu1 %v3831_v48  ;;  %3447 = vmatpush3.bf16.msra.mxu0 %v3833_v50  ;;  %v3890_v48 = vld [vmem:[%s5030_s0 + $0x304] ss:$72 sps:$4 sm:$0xff]   ;;  %v132_v50 = vld [vmem:[%s5030_s0 + $0x390] sm:$0x11] }
  0x99   :  { %3490 = vmatprep.subr.bf16.mxu1 %v3840_v54  ;;  %3548 = vmatprep.subr.bf16.mxu0 %v3842_v58  ;;  %v2935_v54 = vcombine.high %v132_v50, %v132_v50  ;;  %v3911_v58 = vld [vmem:[%s5030_s0 + $0x44] ss:$72 sps:$4 sm:$0xff]  }
  0x9a   :  { %2219 = vmatmul.mubr.bf16.gmra.mrb[56].mxu1 %v3810_v42  ;;  %2307 = vmatmul.mubr.bf16.gmra.mrb[60].mxu0 %v3811_v43  ;;  %v3904_v42 = vld [vmem:[%s5029_s1 + $0x478] sm:$0xff]  }
  0x9b   :  { %2226 = vmatprep.mubr.bf16.mxu1 %v3816_v45  ;;  %2314 = vmatprep.mubr.bf16.mxu0 %v3818_v46  ;;  %v3903_v43 = vld [vmem:[%s5029_s1 + $0x3b8] sm:$0xff]   ;;  %v3882_v45 = vld [vmem:[%s5030_s0 + $0x268] ss:$72 sps:$4 sm:$0xff]  }
  0x9c   :  { %v3883_v46 = vld [vmem:[%s5030_s0 + $0x270] ss:$72 sps:$4 sm:$0xff]  }
  0xa2   :  { %2227 = vmatmul.mubr.bf16.gmra.mrb[60].mxu1 %v3820_v52  ;;  %2315 = vmatmul.mubr.bf16.gmra.mrb[64].mxu0 %v3821_v55  ;;  %v3893_v52 = vld [vmem:[%s5030_s0 + $0x300] ss:$72 sps:$4 sm:$0xff]   ;;  %v2932_v55 = vcombine.low %v131_v49, %v131_v49 }
  0xa3   :  { %2234 = vmatprep.mubr.bf16.mxu1 %v2929_v56  ;;  %2322 = vmatprep.mubr.bf16.mxu0 %v2931_v57  ;;  %v2934_v56 = vcombine.low %v132_v50, %v132_v50  ;;  %v3908_v57 = vld [vmem:[%s5030_s0 + $0x3c] ss:$72 sps:$4 sm:$0xff]  }
  0xa4   :  { %v133_v50 = vld [vmem:[%s5030_s0 + $0x398] sm:$0x11] }
  0xaa   :  { %2235 = vmatmul.mubr.bf16.gmra.mrb[64].mxu1 %v2928_v59  ;;  %2323 = vmatmul.mubr.bf16.gmra.mrb[68].mxu0 %v2930_v60  ;;  %v3906_v59 = vld [vmem:[%s5030_s0 + $0x38] ss:$72 sps:$4 sm:$0xff]  }
  0xab   :  { %2362 = vmatprep.mubr.bf16.mxu1 %v3836_v61  ;;  %2450 = vmatprep.mubr.bf16.mxu0 %v3839_v62  ;;  %v3909_v60 = vld [vmem:[%s5030_s0 + $0x40] ss:$72 sps:$4 sm:$0xff]   ;;  %v3912_v61 = vld [vmem:[%s5030_s0 + $0xcc] ss:$72 sps:$4 sm:$0xff]  }
  0xac   :  { %v3914_v62 = vld [vmem:[%s5030_s0 + $0xd4] ss:$72 sps:$4 sm:$0xff]  }
  0xb2   :  { %2363 = vmatmul.mubr.bf16.vlgmr.msra.gmra.mrb[68].mxu1 %v3834_v63  ;;  %2451 = vmatmul.mubr.bf16.vlgmr.msra.gmra.mrb[72].mxu0 %v3837_v0  ;;  %v3916_v63 = vld [vmem:[%s5030_s0 + $0xc8] ss:$72 sps:$4 sm:$0xff]  }
  0xb3   :  { %3491 = vmatpush3.bf16.msra.mxu1 %v3841_v1  ;;  %3549 = vmatpush3.bf16.msra.mxu0 %v3843_v2  ;;  %v3917_v0 = vld [vmem:[%s5030_s0 + $0xd0] ss:$72 sps:$4 sm:$0xff]   ;;  %v3918_v1 = vld [vmem:[%s5030_s0 + $0x15c] ss:$72 sps:$4 sm:$0xff]  }
  0xb4   :  { %2370 = vmatprep.mubr.bf16.mxu1 %v3844_v3  ;;  %2458 = vmatprep.mubr.bf16.mxu0 %v3846_v4  ;;  %v3920_v2 = vld [vmem:[%s5030_s0 + $0x164] ss:$72 sps:$4 sm:$0xff]  }
  0xb5   :  { %3492 = vmatprep.subr.bf16.mxu1 %v3848_v5  ;;  %3550 = vmatprep.subr.bf16.mxu0 %v3852_v6 }
  0xb7   :  { %3493 = vmatpush3.bf16.msra.mxu1 %v3851_v7  ;;  %3551 = vmatpush3.bf16.msra.mxu0 %v3853_v8  ;;  %v3922_v7 = vld [vmem:[%s5030_s0 + $0x158] ss:$72 sps:$4 sm:$0xff]  }
  0xb8   :  { %3494 = vmatprep.subr.bf16.mxu1 %v3854_v9  ;;  %3552 = vmatprep.subr.bf16.mxu0 %v3862_v12  ;;  %v3923_v8 = vld [vmem:[%s5030_s0 + $0x160] ss:$72 sps:$4 sm:$0xff]  }
  0xba   :  { %2371 = vmatmul.mubr.bf16.gmra.mrb[72].mxu1 %v3849_v10  ;;  %2459 = vmatmul.mubr.bf16.gmra.mrb[76].mxu0 %v3850_v11 }
  0xbb   :  { %2378 = vmatprep.mubr.bf16.mxu1 %v3855_v13  ;;  %2466 = vmatprep.mubr.bf16.mxu0 %v3857_v14  ;;  %v3924_v13 = vld [vmem:[%s5030_s0 + $0x1ec] ss:$72 sps:$4 sm:$0xff]  }
  0xbc   :  { %3495 = vmatpush3.bf16.msra.mxu1 %v3859_v15  ;;  %3553 = vmatpush3.bf16.msra.mxu0 %v3863_v16  ;;  %v3926_v14 = vld [vmem:[%s5030_s0 + $0x1f4] ss:$72 sps:$4 sm:$0xff]  }
  0xbd   :  { %3496 = vmatprep.subr.bf16.mxu1 %v3864_v17  ;;  %3554 = vmatprep.subr.bf16.mxu0 %v3870_v18 }
  0xc0   :  { %3497 = vmatpush3.bf16.msra.mxu1 %v3865_v19  ;;  %3555 = vmatpush3.bf16.msra.mxu0 %v3873_v20 }
  0xc1   :  { %3498 = vmatprep.subr.bf16.mxu1 %v3874_v23  ;;  %3556 = vmatprep.subr.bf16.mxu0 %v3876_v25  ;;  %v3929_v23 = vld [vmem:[%s5030_s0 + $0x1f0] ss:$72 sps:$4 sm:$0xff]  }
  0xc2   :  { %2379 = vmatmul.mubr.bf16.gmra.mrb[76].mxu1 %v3860_v21  ;;  %2467 = vmatmul.mubr.bf16.gmra.mrb[80].mxu0 %v3861_v22  ;;  %v3928_v22 = vld [vmem:[%s5030_s0 + $0x1e8] ss:$72 sps:$4 sm:$0xff]  }
  0xc3   :  { %2386 = vmatprep.mubr.bf16.mxu1 %v3866_v24  ;;  %2474 = vmatprep.mubr.bf16.mxu0 %v3868_v26 }
  0xc4   :  { %3499 = vmatpush3.bf16.msra.mxu1 %v3875_v27  ;;  %3557 = vmatpush3.bf16.msra.mxu0 %v3881_v28 }
  0xc5   :  { %3500 = vmatprep.subr.bf16.mxu1 %v3884_v29  ;;  %3558 = vmatprep.subr.bf16.mxu0 %v3886_v30  ;;  %v3930_v29 = vld [vmem:[%s5030_s0 + $0x27c] ss:$72 sps:$4 sm:$0xff]  }
  0xc6   :  { %v3932_v30 = vld [vmem:[%s5030_s0 + $0x284] ss:$72 sps:$4 sm:$0xff]  }
  0xc8   :  { %3501 = vmatpush3.bf16.msra.mxu1 %v3885_v31  ;;  %3559 = vmatpush3.bf16.msra.mxu0 %v3887_v34 }
  0xc9   :  { %3502 = vmatprep.subr.bf16.mxu1 %v3894_v37  ;;  %3560 = vmatprep.subr.bf16.mxu0 %v3896_v38  ;;  %v3934_v38 = vld [vmem:[%s5030_s0 + $0x278] ss:$72 sps:$4 sm:$0xff]  }
  0xca   :  { %2387 = vmatmul.mubr.bf16.gmra.mrb[80].mxu1 %v3871_v32  ;;  %2475 = vmatmul.mubr.bf16.gmra.mrb[84].mxu0 %v3872_v33 }
  0xcb   :  { %2394 = vmatprep.mubr.bf16.mxu1 %v3877_v35  ;;  %2482 = vmatprep.mubr.bf16.mxu0 %v3879_v36 }
  0xcc   :  { %3503 = vmatpush3.bf16.msra.mxu1 %v3895_v39  ;;  %3561 = vmatpush3.bf16.msra.mxu0 %v3897_v40  ;;  %v3935_v39 = vld [vmem:[%s5030_s0 + $0x280] ss:$72 sps:$4 sm:$0xff]  }
  0xcd   :  { %3504 = vmatprep.subr.bf16.mxu1 %v3902_v41  ;;  %3562 = vmatprep.subr.bf16.mxu0 %v3904_v42 }
  0xd0   :  { %3505 = vmatpush3.bf16.msra.mxu1 %v3903_v43  ;;  %3563 = vmatpush3.bf16.msra.mxu0 %v3905_v44 }
  0xd2   :  { %2395 = vmatmul.mubr.bf16.gmra.mrb[84].mxu1 %v3882_v45  ;;  %2483 = vmatmul.mubr.bf16.gmra.mrb[88].mxu0 %v3883_v46  ;;  %v3936_v45 = vld [vmem:[%s5030_s0 + $0x30c] ss:$72 sps:$4 sm:$0xff]  }
  0xd3   :  { %2402 = vmatprep.mubr.bf16.mxu1 %v3888_v47  ;;  %2490 = vmatprep.mubr.bf16.mxu0 %v3890_v48  ;;  %v3938_v46 = vld [vmem:[%s5030_s0 + $0x314] ss:$72 sps:$4 sm:$0xff]  }
  0xda   :  { %2403 = vmatmul.mubr.bf16.gmra.mrb[88].mxu1 %v3892_v51  ;;  %2491 = vmatmul.mubr.bf16.gmra.mrb[92].mxu0 %v3893_v52  ;;  %v134_v51 = vld [vmem:[%s5030_s0 + $0x3a0] sm:$0x11] }
  0xdb   :  { %2410 = vmatprep.mubr.bf16.mxu1 %v2933_v53  ;;  %2498 = vmatprep.mubr.bf16.mxu0 %v2935_v54  ;;  %v3940_v54 = vld [vmem:[%s5030_s0 + $0x308] ss:$72 sps:$4 sm:$0xff]  }
  0xe2   :  { %2411 = vmatmul.mubr.bf16.gmra.mrb[92].mxu1 %v2932_v55  ;;  %2499 = vmatmul.mubr.bf16.gmra.mrb[96].mxu0 %v2934_v56  ;;  %v3941_v55 = vld [vmem:[%s5030_s0 + $0x310] ss:$72 sps:$4 sm:$0xff]  }
  0xe3   :  { %2538 = vmatprep.mubr.bf16.mxu1 %v3908_v57  ;;  %2626 = vmatprep.mubr.bf16.mxu0 %v3911_v58  ;;  %v2937_v58 = vcombine.high %v133_v50, %v133_v50 }
  0xea   :  { %2539 = vmatmul.mubr.bf16.vlgmr.msra.gmra.mrb[96].mxu1 %v3906_v59  ;;  %2627 = vmatmul.mubr.bf16.vlgmr.msra.gmra.mrb[100].mxu0 %v3909_v60  ;;  %v2939_v59 = vcombine.high %v134_v51, %v134_v51 }
  0xeb   :  { %2546 = vmatprep.mubr.bf16.mxu1 %v3912_v61  ;;  %2634 = vmatprep.mubr.bf16.mxu0 %v3914_v62 }
  0xf2   :  { %2547 = vmatmul.mubr.bf16.gmra.mrb[100].mxu1 %v3916_v63  ;;  %2635 = vmatmul.mubr.bf16.gmra.mrb[104].mxu0 %v3917_v0 }
  0xf3   :  { %2554 = vmatprep.mubr.bf16.mxu1 %v3918_v1  ;;  %2642 = vmatprep.mubr.bf16.mxu0 %v3920_v2  ;;  %v2936_v2 = vcombine.low %v133_v50, %v133_v50 }
  0xf5   :  { %v3100_v3 = vpop.f32.mrb[0].mxu0  ;;  %v3124_v4 = vpop.f32.mrb[0].mxu1 }
  0xf6   :  { %v3101_v5 = vpop.f32.mrb[1].mxu0  ;;  %v3125_v6 = vpop.f32.mrb[1].mxu1 }
  0xf7   :  { %v4714_v9 = vadd.f32 %v3101_v5, %v3100_v3  ;;  %v4716_v10 = vadd.f32 %v3125_v6, %v3124_v4  ;;  %v3103_v11 = vpop.f32.mrb[2].mxu0  ;;  %v3127_v12 = vpop.f32.mrb[2].mxu1  ;;  %v2938_v3 = vcombine.low %v134_v51, %v134_v51 }
  0xf8   :  { %v3104_v15 = vpop.f32.mrb[3].mxu0  ;;  %v3128_v16 = vpop.f32.mrb[3].mxu1 }
  0xf9   :  { %v4724_v17 = vadd.f32 %v3104_v15, %v3103_v11  ;;  %v4726_v18 = vadd.f32 %v3128_v16, %v3127_v12 }
  0xfa   :  { %2555 = vmatmul.mubr.bf16.gmra.mrb[104].mxu1 %v3922_v7  ;;  %2643 = vmatmul.mubr.bf16.gmra.mrb[108].mxu0 %v3923_v8 }
  0xfb   :  { %2562 = vmatprep.mubr.bf16.mxu1 %v3924_v13  ;;  %2650 = vmatprep.mubr.bf16.mxu0 %v3926_v14 }
  0xfd   :  { %v3106_v19 = vpop.f32.mrb[4].mxu0  ;;  %v3130_v20 = vpop.f32.mrb[4].mxu1 }
  0xfe   :  { %v3107_v21 = vpop.f32.mrb[5].mxu0  ;;  %v3131_v24 = vpop.f32.mrb[5].mxu1 }
  0xff   :  { %v4734_v25 = vadd.f32 %v3107_v21, %v3106_v19  ;;  %v3109_v26 = vpop.f32.mrb[6].mxu0  ;;  %v4736_v27 = vadd.f32 %v3131_v24, %v3130_v20  ;;  %v3133_v28 = vpop.f32.mrb[6].mxu1 }
 0x100   :  { %v3110_v31 = vpop.f32.mrb[7].mxu0  ;;  %v3134_v32 = vpop.f32.mrb[7].mxu1 }
 0x101   :  { %v4744_v33 = vadd.f32 %v3110_v31, %v3109_v26  ;;  %v4746_v34 = vadd.f32 %v3134_v32, %v3133_v28 }
 0x102   :  { %2563 = vmatmul.mubr.bf16.gmra.mrb[108].mxu1 %v3928_v22  ;;  %2651 = vmatmul.mubr.bf16.gmra.mrb[112].mxu0 %v3929_v23 }
 0x103   :  { %2570 = vmatprep.mubr.bf16.mxu1 %v3930_v29  ;;  %2658 = vmatprep.mubr.bf16.mxu0 %v3932_v30 }
 0x105   :  { %v3112_v35 = vpop.f32.mrb[8].mxu0  ;;  %v3136_v36 = vpop.f32.mrb[8].mxu1 }
 0x106   :  { %v3113_v37 = vpop.f32.mrb[9].mxu0  ;;  %v3137_v40 = vpop.f32.mrb[9].mxu1 }
 0x107   :  { %v4754_v41 = vadd.f32 %v3113_v37, %v3112_v35  ;;  %v3115_v42 = vpop.f32.mrb[10].mxu0  ;;  %v4756_v43 = vadd.f32 %v3137_v40, %v3136_v36  ;;  %v3139_v44 = vpop.f32.mrb[10].mxu1 }
 0x108   :  { %v3116_v47 = vpop.f32.mrb[11].mxu0  ;;  %v3140_v48 = vpop.f32.mrb[11].mxu1 }
 0x109   :  { %v4764_v49 = vadd.f32 %v3116_v47, %v3115_v42 }
 0x10a   :  { %2571 = vmatmul.mubr.bf16.gmra.mrb[112].mxu1 %v3934_v38  ;;  %2659 = vmatmul.mubr.bf16.gmra.mrb[116].mxu0 %v3935_v39 }
 0x10b   :  { %2578 = vmatprep.mubr.bf16.mxu1 %v3936_v45  ;;  %2666 = vmatprep.mubr.bf16.mxu0 %v3938_v46 }
 0x10d   :  { %v3118_v52 = vpop.f32.mrb[12].mxu0 }
 0x10e   :  { %v3119_v53 = vpop.f32.mrb[13].mxu0 }
 0x10f   :  { %v4778_v56 = vadd.f32 %v3119_v53, %v3118_v52  ;;  %v3121_v57 = vpop.f32.mrb[14].mxu0 }
 0x110   :  { %v3122_v60 = vpop.f32.mrb[15].mxu0 }
 0x111   :  { %v4780_v61 = vadd.f32 %v3122_v60, %v3121_v57 }
 0x112   :  { %2579 = vmatmul.mubr.bf16.gmra.mrb[116].mxu1 %v3940_v54  ;;  %2667 = vmatmul.mubr.bf16.gmra.mrb[120].mxu0 %v3941_v55 }
 0x113   :  { %2586 = vmatprep.mubr.bf16.mxu1 %v2937_v58  ;;  %2674 = vmatprep.mubr.bf16.mxu0 %v2939_v59 }
 0x115   :  { %v3158_v62 = vpop.f32.mrb[12].mxu1  ;;  %v3216_v63 = vpop.f32.mrb[16].mxu0 }
 0x116   :  { %v3159_v0 = vpop.f32.mrb[13].mxu1  ;;  %v3217_v1 = vpop.f32.mrb[17].mxu0 }
 0x117   :  { %v3160_v4 = vadd.f32 %v3159_v0, %v3158_v62  ;;  %v3218_v5 = vadd.f32 %v3217_v1, %v3216_v63  ;;  %v3161_v6 = vpop.f32.mrb[14].mxu1  ;;  %v3219_v7 = vpop.f32.mrb[18].mxu0 }
 0x118   :  { %v3162_v8 = vpop.f32.mrb[15].mxu1  ;;  %v3220_v11 = vpop.f32.mrb[19].mxu0 }
 0x119   :  { %v2013_v12 = vadd.f32 %v3160_v4, %v4714_v9  ;;  %v3163_v13 = vadd.f32 %v3162_v8, %v3161_v6  ;;  %v3221_v14 = vadd.f32 %v3220_v11, %v3219_v7 }
 0x11a   :  { %2587 = vmatmul.mubr.bf16.gmra.mrb[120].mxu1 %v2936_v2  ;;  %2675 = vmatmul.mubr.bf16.gmra.mrb[124].mxu0 %v2938_v3 }
 0x11b   :  { %v4783_v15 = vadd.f32 %v3218_v5, %v2013_v12  ;;  %v2016_v16 = vadd.f32 %v3163_v13, %v4724_v17 }
 0x11d   :  { %v4786_v19 = vadd.f32 %v3221_v14, %v2016_v16  ;;  %v3164_v20 = vpop.f32.mrb[16].mxu1  ;;  %v3222_v21 = vpop.f32.mrb[20].mxu0 }
 0x11e   :  { %v3165_v22 = vpop.f32.mrb[17].mxu1  ;;  %v3223_v23 = vpop.f32.mrb[21].mxu0 }
 0x11f   :  { %v3166_v24 = vadd.f32 %v3165_v22, %v3164_v20  ;;  %v3224_v26 = vadd.f32 %v3223_v23, %v3222_v21  ;;  %v3167_v28 = vpop.f32.mrb[18].mxu1  ;;  %v3225_v29 = vpop.f32.mrb[22].mxu0 }
 0x120   :  { %v3168_v30 = vpop.f32.mrb[19].mxu1  ;;  %v3226_v9 = vpop.f32.mrb[23].mxu0 }
 0x121   :  { %v2021_v31 = vadd.f32 %v3166_v24, %v4734_v25  ;;  %v3169_v32 = vadd.f32 %v3168_v30, %v3167_v28  ;;  %v3227_v35 = vadd.f32 %v3226_v9, %v3225_v29 }
 0x123   :  { %v4789_v36 = vadd.f32 %v3224_v26, %v2021_v31  ;;  %v2024_v17 = vadd.f32 %v3169_v32, %v4744_v33 }
 0x125   :  { %v4792_v37 = vadd.f32 %v3227_v35, %v2024_v17  ;;  %v3170_v38 = vpop.f32.mrb[20].mxu1  ;;  %v3228_v39 = vpop.f32.mrb[24].mxu0 }
 0x126   :  { %v3171_v40 = vpop.f32.mrb[21].mxu1  ;;  %v3229_v42 = vpop.f32.mrb[25].mxu0 }
 0x127   :  { %v3172_v44 = vadd.f32 %v3171_v40, %v3170_v38  ;;  %v3230_v45 = vadd.f32 %v3229_v42, %v3228_v39  ;;  %v3173_v46 = vpop.f32.mrb[22].mxu1  ;;  %v3231_v47 = vpop.f32.mrb[26].mxu0 }
 0x128   :  { %v3174_v48 = vpop.f32.mrb[23].mxu1  ;;  %v3232_v50 = vpop.f32.mrb[27].mxu0 }
 0x129   :  { %v2029_v25 = vadd.f32 %v3172_v44, %v4754_v41  ;;  %v3175_v51 = vadd.f32 %v3174_v48, %v3173_v46  ;;  %v3233_v52 = vadd.f32 %v3232_v50, %v3231_v47 }
 0x12b   :  { %v4795_v53 = vadd.f32 %v3230_v45, %v2029_v25  ;;  %v2032_v33 = vadd.f32 %v3175_v51, %v4764_v49 }
 0x12d   :  { %v4798_v54 = vadd.f32 %v3233_v52, %v2032_v33  ;;  %v3176_v55 = vpop.f32.mrb[24].mxu1  ;;  %v3234_v57 = vpop.f32.mrb[28].mxu0 }
 0x12e   :  { %v3177_v58 = vpop.f32.mrb[25].mxu1  ;;  %v3235_v59 = vpop.f32.mrb[29].mxu0 }
 0x12f   :  { %v3178_v60 = vadd.f32 %v3177_v58, %v3176_v55  ;;  %v3236_v62 = vadd.f32 %v3235_v59, %v3234_v57  ;;  %v3179_v63 = vpop.f32.mrb[26].mxu1  ;;  %v3237_v0 = vpop.f32.mrb[30].mxu0 }
 0x130   :  { %v3180_v1 = vpop.f32.mrb[27].mxu1  ;;  %v3238_v2 = vpop.f32.mrb[31].mxu0 }
 0x131   :  { %v2037_v41 = vadd.f32 %v3178_v60, %v4778_v56  ;;  %v3181_v3 = vadd.f32 %v3180_v1, %v3179_v63  ;;  %v3239_v4 = vadd.f32 %v3238_v2, %v3237_v0 }
 0x133   :  { %v4801_v5 = vadd.f32 %v3236_v62, %v2037_v41  ;;  %v2040_v49 = vadd.f32 %v3181_v3, %v4780_v61 }
 0x135   :  { %v4804_v6 = vadd.f32 %v3239_v4, %v2040_v49  ;;  %v3182_v7 = vpop.f32.mrb[28].mxu1  ;;  %v3240_v8 = vpop.f32.mrb[32].mxu0 }
 0x136   :  { %v3183_v11 = vpop.f32.mrb[29].mxu1  ;;  %v3241_v12 = vpop.f32.mrb[33].mxu0 }
 0x137   :  { %v3184_v13 = vadd.f32 %v3183_v11, %v3182_v7  ;;  %v3242_v14 = vadd.f32 %v3241_v12, %v3240_v8  ;;  %v3185_v16 = vpop.f32.mrb[30].mxu1  ;;  %v3243_v20 = vpop.f32.mrb[34].mxu0 }
 0x138   :  { %v3186_v21 = vpop.f32.mrb[31].mxu1  ;;  %v3244_v22 = vpop.f32.mrb[35].mxu0 }
 0x139   :  { %v2045_v56 = vadd.f32 %v3184_v13, %v4716_v10  ;;  %v3187_v23 = vadd.f32 %v3186_v21, %v3185_v16  ;;  %v3245_v24 = vadd.f32 %v3244_v22, %v3243_v20 }
 0x13b   :  { %v4807_v26 = vadd.f32 %v3242_v14, %v2045_v56  ;;  %v2048_v61 = vadd.f32 %v3187_v23, %v4726_v18 }
 0x13d   :  { %v4810_v28 = vadd.f32 %v3245_v24, %v2048_v61  ;;  %v3188_v29 = vpop.f32.mrb[32].mxu1  ;;  %v3246_v30 = vpop.f32.mrb[36].mxu0 }
 0x13e   :  { %v3189_v9 = vpop.f32.mrb[33].mxu1  ;;  %v3247_v31 = vpop.f32.mrb[37].mxu0 }
 0x13f   :  { %v3190_v32 = vadd.f32 %v3189_v9, %v3188_v29  ;;  %v3248_v35 = vadd.f32 %v3247_v31, %v3246_v30  ;;  %v3191_v17 = vpop.f32.mrb[34].mxu1  ;;  %v3249_v38 = vpop.f32.mrb[38].mxu0 }
 0x140   :  { %v3192_v39 = vpop.f32.mrb[35].mxu1  ;;  %v3250_v40 = vpop.f32.mrb[39].mxu0 }
 0x141   :  { %v2053_v10 = vadd.f32 %v3190_v32, %v4736_v27  ;;  %v3193_v42 = vadd.f32 %v3192_v39, %v3191_v17  ;;  %v3251_v44 = vadd.f32 %v3250_v40, %v3249_v38 }
 0x143   :  { %v4813_v45 = vadd.f32 %v3248_v35, %v2053_v10  ;;  %v2056_v18 = vadd.f32 %v3193_v42, %v4746_v34 }
 0x145   :  { %v4816_v46 = vadd.f32 %v3251_v44, %v2056_v18  ;;  %v3194_v47 = vpop.f32.mrb[36].mxu1  ;;  %v3252_v48 = vpop.f32.mrb[40].mxu0 }
 0x146   :  { %v3195_v50 = vpop.f32.mrb[37].mxu1  ;;  %v3253_v25 = vpop.f32.mrb[41].mxu0 }
 0x147   :  { %v3196_v51 = vadd.f32 %v3195_v50, %v3194_v47  ;;  %v3254_v52 = vadd.f32 %v3253_v25, %v3252_v48  ;;  %v3197_v33 = vpop.f32.mrb[38].mxu1  ;;  %v3255_v55 = vpop.f32.mrb[42].mxu0 }
 0x148   :  { %v3198_v57 = vpop.f32.mrb[39].mxu1  ;;  %v3256_v58 = vpop.f32.mrb[43].mxu0 }
 0x149   :  { %v2061_v27 = vadd.f32 %v3196_v51, %v4756_v43 }
 0x14b   :  { %v4819_v59 = vadd.f32 %v3254_v52, %v2061_v27 }
 0x14d   :  { %v3274_v60 = vpop.f32.mrb[40].mxu1  ;;  %v3332_v62 = vpop.f32.mrb[44].mxu0 }
 0x14e   :  { %v3275_v63 = vpop.f32.mrb[41].mxu1  ;;  %v3333_v34 = vpop.f32.mrb[45].mxu0 }
 0x14f   :  { %v3276_v0 = vadd.f32 %v3275_v63, %v3274_v60  ;;  %v3334_v1 = vadd.f32 %v3333_v34, %v3332_v62  ;;  %v3277_v2 = vpop.f32.mrb[42].mxu1  ;;  %v3335_v41 = vpop.f32.mrb[46].mxu0 }
 0x150   :  { %v3278_v3 = vpop.f32.mrb[43].mxu1  ;;  %v3336_v4 = vpop.f32.mrb[47].mxu0 }
 0x151   :  { %v2189_v49 = vadd.f32 %v3276_v0, %v4783_v15  ;;  %v3279_v7 = vadd.f32 %v3278_v3, %v3277_v2  ;;  %v3337_v8 = vadd.f32 %v3336_v4, %v3335_v41 }
 0x153   :  { %v4822_v11 = vadd.f32 %v3334_v1, %v2189_v49  ;;  %v2192_v43 = vadd.f32 %v3279_v7, %v4786_v19 }
 0x155   :  { %v4825_v12 = vadd.f32 %v3337_v8, %v2192_v43  ;;  %v3280_v13 = vpop.f32.mrb[44].mxu1  ;;  %v3338_v14 = vpop.f32.mrb[48].mxu0 }
 0x156   :  { %v3281_v16 = vpop.f32.mrb[45].mxu1  ;;  %v3339_v20 = vpop.f32.mrb[49].mxu0 }
 0x157   :  { %v3282_v21 = vadd.f32 %v3281_v16, %v3280_v13  ;;  %v3340_v22 = vadd.f32 %v3339_v20, %v3338_v14  ;;  %v3283_v56 = vpop.f32.mrb[46].mxu1  ;;  %v3341_v23 = vpop.f32.mrb[50].mxu0 }
 0x158   :  { %v3284_v24 = vpop.f32.mrb[47].mxu1  ;;  %v3342_v61 = vpop.f32.mrb[51].mxu0 }
 0x159   :  { %v2197_v15 = vadd.f32 %v3282_v21, %v4789_v36  ;;  %v3285_v29 = vadd.f32 %v3284_v24, %v3283_v56  ;;  %v3343_v30 = vadd.f32 %v3342_v61, %v3341_v23 }
 0x15b   :  { %v4828_v9 = vadd.f32 %v3340_v22, %v2197_v15  ;;  %v2200_v19 = vadd.f32 %v3285_v29, %v4792_v37 }
 0x15d   :  { %v4831_v31 = vadd.f32 %v3343_v30, %v2200_v19  ;;  %v3286_v32 = vpop.f32.mrb[48].mxu1  ;;  %v3344_v35 = vpop.f32.mrb[52].mxu0 }
 0x15e   :  { %v3287_v17 = vpop.f32.mrb[49].mxu1  ;;  %v3345_v38 = vpop.f32.mrb[53].mxu0 }
 0x15f   :  { %v3288_v39 = vadd.f32 %v3287_v17, %v3286_v32  ;;  %v3346_v40 = vadd.f32 %v3345_v38, %v3344_v35  ;;  %v3289_v10 = vpop.f32.mrb[50].mxu1  ;;  %v3347_v42 = vpop.f32.mrb[54].mxu0 }
 0x160   :  { %v3290_v44 = vpop.f32.mrb[51].mxu1  ;;  %v3348_v18 = vpop.f32.mrb[55].mxu0 }
 0x161   :  { %v2205_v36 = vadd.f32 %v3288_v39, %v4795_v53  ;;  %v3291_v47 = vadd.f32 %v3290_v44, %v3289_v10  ;;  %v3349_v48 = vadd.f32 %v3348_v18, %v3347_v42 }
 0x163   :  { %v4834_v50 = vadd.f32 %v3346_v40, %v2205_v36  ;;  %v2208_v37 = vadd.f32 %v3291_v47, %v4798_v54 }
 0x165   :  { %v4837_v25 = vadd.f32 %v3349_v48, %v2208_v37  ;;  %v3292_v51 = vpop.f32.mrb[52].mxu1  ;;  %v3350_v52 = vpop.f32.mrb[56].mxu0 }
 0x166   :  { %v3293_v33 = vpop.f32.mrb[53].mxu1  ;;  %v3351_v55 = vpop.f32.mrb[57].mxu0 }
 0x167   :  { %v3294_v57 = vadd.f32 %v3293_v33, %v3292_v51  ;;  %v3352_v58 = vadd.f32 %v3351_v55, %v3350_v52  ;;  %v3295_v27 = vpop.f32.mrb[54].mxu1  ;;  %v3353_v60 = vpop.f32.mrb[58].mxu0 }
 0x168   :  { %v3296_v62 = vpop.f32.mrb[55].mxu1  ;;  %v3354_v63 = vpop.f32.mrb[59].mxu0 }
 0x169   :  { %v2213_v53 = vadd.f32 %v3294_v57, %v4801_v5  ;;  %v3297_v34 = vadd.f32 %v3296_v62, %v3295_v27  ;;  %v3355_v0 = vadd.f32 %v3354_v63, %v3353_v60 }
 0x16b   :  { %v4840_v1 = vadd.f32 %v3352_v58, %v2213_v53  ;;  %v2216_v54 = vadd.f32 %v3297_v34, %v4804_v6 }
 0x16d   :  { %v4843_v2 = vadd.f32 %v3355_v0, %v2216_v54  ;;  %v3298_v41 = vpop.f32.mrb[56].mxu1  ;;  %v3356_v3 = vpop.f32.mrb[60].mxu0 }
 0x16e   :  { %v3299_v4 = vpop.f32.mrb[57].mxu1  ;;  %v3357_v49 = vpop.f32.mrb[61].mxu0 }
 0x16f   :  { %v3300_v7 = vadd.f32 %v3299_v4, %v3298_v41  ;;  %v3358_v8 = vadd.f32 %v3357_v49, %v3356_v3  ;;  %v3301_v43 = vpop.f32.mrb[58].mxu1  ;;  %v3359_v13 = vpop.f32.mrb[62].mxu0 }
 0x170   :  { %v3302_v14 = vpop.f32.mrb[59].mxu1  ;;  %v3360_v16 = vpop.f32.mrb[63].mxu0 }
 0x171   :  { %v2221_v5 = vadd.f32 %v3300_v7, %v4807_v26  ;;  %v3303_v20 = vadd.f32 %v3302_v14, %v3301_v43  ;;  %v3361_v21 = vadd.f32 %v3360_v16, %v3359_v13 }
 0x173   :  { %v4846_v22 = vadd.f32 %v3358_v8, %v2221_v5  ;;  %v2224_v6 = vadd.f32 %v3303_v20, %v4810_v28 }
 0x175   :  { %v4849_v56 = vadd.f32 %v3361_v21, %v2224_v6  ;;  %v3304_v23 = vpop.f32.mrb[60].mxu1  ;;  %v3362_v24 = vpop.f32.mrb[64].mxu0 }
 0x176   :  { %v3305_v61 = vpop.f32.mrb[61].mxu1  ;;  %v3363_v15 = vpop.f32.mrb[65].mxu0 }
 0x177   :  { %v3306_v29 = vadd.f32 %v3305_v61, %v3304_v23  ;;  %v3364_v30 = vadd.f32 %v3363_v15, %v3362_v24  ;;  %v3307_v19 = vpop.f32.mrb[62].mxu1  ;;  %v3365_v32 = vpop.f32.mrb[66].mxu0 }
 0x178   :  { %v3308_v35 = vpop.f32.mrb[63].mxu1  ;;  %v3366_v17 = vpop.f32.mrb[67].mxu0 }
 0x179   :  { %v2229_v26 = vadd.f32 %v3306_v29, %v4813_v45  ;;  %v3309_v38 = vadd.f32 %v3308_v35, %v3307_v19  ;;  %v3367_v39 = vadd.f32 %v3366_v17, %v3365_v32 }
 0x17b   :  { %v4852_v40 = vadd.f32 %v3364_v30, %v2229_v26  ;;  %v2232_v28 = vadd.f32 %v3309_v38, %v4816_v46 }
 0x17d   :  { %v4855_v10 = vadd.f32 %v3367_v39, %v2232_v28  ;;  %v3310_v42 = vpop.f32.mrb[64].mxu1  ;;  %v3368_v44 = vpop.f32.mrb[68].mxu0 }
 0x17e   :  { %v3311_v18 = vpop.f32.mrb[65].mxu1  ;;  %v3369_v36 = vpop.f32.mrb[69].mxu0 }
 0x17f   :  { %v3312_v47 = vadd.f32 %v3311_v18, %v3310_v42  ;;  %v3370_v48 = vadd.f32 %v3369_v36, %v3368_v44  ;;  %v3313_v37 = vpop.f32.mrb[66].mxu1  ;;  %v3371_v51 = vpop.f32.mrb[70].mxu0 }
 0x180   :  { %v3314_v52 = vpop.f32.mrb[67].mxu1  ;;  %v3372_v33 = vpop.f32.mrb[71].mxu0 }
 0x181   :  { %v2237_v45 = vadd.f32 %v3312_v47, %v4819_v59 }
 0x183   :  { %v4858_v55 = vadd.f32 %v3370_v48, %v2237_v45 }
 0x185   :  { %v3390_v57 = vpop.f32.mrb[68].mxu1  ;;  %v3448_v58 = vpop.f32.mrb[72].mxu0 }
 0x186   :  { %v3391_v27 = vpop.f32.mrb[69].mxu1  ;;  %v3449_v46 = vpop.f32.mrb[73].mxu0 }
 0x187   :  { %v3392_v60 = vadd.f32 %v3391_v27, %v3390_v57  ;;  %v3450_v62 = vadd.f32 %v3449_v46, %v3448_v58  ;;  %v3393_v63 = vpop.f32.mrb[70].mxu1  ;;  %v3451_v53 = vpop.f32.mrb[74].mxu0 }
 0x188   :  { %v3394_v34 = vpop.f32.mrb[71].mxu1  ;;  %v3452_v0 = vpop.f32.mrb[75].mxu0 }
 0x189   :  { %v2365_v54 = vadd.f32 %v3392_v60, %v4822_v11  ;;  %v3395_v41 = vadd.f32 %v3394_v34, %v3393_v63  ;;  %v3453_v3 = vadd.f32 %v3452_v0, %v3451_v53 }
 0x18b   :  { %v4861_v4 = vadd.f32 %v3450_v62, %v2365_v54  ;;  %v2368_v59 = vadd.f32 %v3395_v41, %v4825_v12 }
 0x18d   :  { %v4864_v49 = vadd.f32 %v3453_v3, %v2368_v59  ;;  %v3396_v7 = vpop.f32.mrb[72].mxu1  ;;  %v3454_v8 = vpop.f32.mrb[76].mxu0 }
 0x18e   :  { %v3397_v43 = vpop.f32.mrb[73].mxu1  ;;  %v3455_v13 = vpop.f32.mrb[77].mxu0 }
 0x18f   :  { %v3398_v14 = vadd.f32 %v3397_v43, %v3396_v7  ;;  %v3456_v16 = vadd.f32 %v3455_v13, %v3454_v8  ;;  %v3399_v5 = vpop.f32.mrb[74].mxu1  ;;  %v3457_v20 = vpop.f32.mrb[78].mxu0 }
 0x190   :  { %v3400_v21 = vpop.f32.mrb[75].mxu1  ;;  %v3458_v6 = vpop.f32.mrb[79].mxu0 }
 0x191   :  { %v2373_v11 = vadd.f32 %v3398_v14, %v4828_v9  ;;  %v3401_v23 = vadd.f32 %v3400_v21, %v3399_v5  ;;  %v3459_v24 = vadd.f32 %v3458_v6, %v3457_v20 }
 0x193   :  { %v4867_v61 = vadd.f32 %v3456_v16, %v2373_v11  ;;  %v2376_v12 = vadd.f32 %v3401_v23, %v4831_v31 }
 0x195   :  { %v4870_v15 = vadd.f32 %v3459_v24, %v2376_v12  ;;  %v3402_v29 = vpop.f32.mrb[76].mxu1  ;;  %v3460_v30 = vpop.f32.mrb[80].mxu0 }
 0x196   :  { %v3403_v19 = vpop.f32.mrb[77].mxu1  ;;  %v3461_v32 = vpop.f32.mrb[81].mxu0 }
 0x197   :  { %v3404_v35 = vadd.f32 %v3403_v19, %v3402_v29  ;;  %v3462_v17 = vadd.f32 %v3461_v32, %v3460_v30  ;;  %v3405_v26 = vpop.f32.mrb[78].mxu1  ;;  %v3463_v38 = vpop.f32.mrb[82].mxu0 }
 0x198   :  { %v3406_v39 = vpop.f32.mrb[79].mxu1  ;;  %v3464_v28 = vpop.f32.mrb[83].mxu0 }
 0x199   :  { %v2381_v9 = vadd.f32 %v3404_v35, %v4834_v50  ;;  %v3407_v42 = vadd.f32 %v3406_v39, %v3405_v26  ;;  %v3465_v44 = vadd.f32 %v3464_v28, %v3463_v38 }
 0x19b   :  { %v4873_v18 = vadd.f32 %v3462_v17, %v2381_v9  ;;  %v2384_v31 = vadd.f32 %v3407_v42, %v4837_v25 }
 0x19d   :  { %v4876_v36 = vadd.f32 %v3465_v44, %v2384_v31  ;;  %v3408_v47 = vpop.f32.mrb[80].mxu1  ;;  %v3466_v48 = vpop.f32.mrb[84].mxu0 }
 0x19e   :  { %v3409_v37 = vpop.f32.mrb[81].mxu1  ;;  %v3467_v51 = vpop.f32.mrb[85].mxu0 }
 0x19f   :  { %v3410_v52 = vadd.f32 %v3409_v37, %v3408_v47  ;;  %v3468_v33 = vadd.f32 %v3467_v51, %v3466_v48  ;;  %v3411_v45 = vpop.f32.mrb[82].mxu1  ;;  %v3469_v57 = vpop.f32.mrb[86].mxu0 }
 0x1a0   :  { %v3412_v58 = vpop.f32.mrb[83].mxu1  ;;  %v3470_v27 = vpop.f32.mrb[87].mxu0 }
 0x1a1   :  { %v2389_v50 = vadd.f32 %v3410_v52, %v4840_v1  ;;  %v3413_v46 = vadd.f32 %v3412_v58, %v3411_v45  ;;  %v3471_v60 = vadd.f32 %v3470_v27, %v3469_v57 }
 0x1a3   :  { %v4879_v62 = vadd.f32 %v3468_v33, %v2389_v50  ;;  %v2392_v25 = vadd.f32 %v3413_v46, %v4843_v2 }
 0x1a5   :  { %v4882_v63 = vadd.f32 %v3471_v60, %v2392_v25  ;;  %v3414_v53 = vpop.f32.mrb[84].mxu1  ;;  %v3472_v34 = vpop.f32.mrb[88].mxu0 }
 0x1a6   :  { %v3415_v0 = vpop.f32.mrb[85].mxu1  ;;  %v3473_v54 = vpop.f32.mrb[89].mxu0 }
 0x1a7   :  { %v3416_v41 = vadd.f32 %v3415_v0, %v3414_v53  ;;  %v3474_v3 = vadd.f32 %v3473_v54, %v3472_v34  ;;  %v3417_v59 = vpop.f32.mrb[86].mxu1  ;;  %v3475_v7 = vpop.f32.mrb[90].mxu0 }
 0x1a8   :  { %v3418_v8 = vpop.f32.mrb[87].mxu1  ;;  %v3476_v43 = vpop.f32.mrb[91].mxu0 }
 0x1a9   :  { %v2397_v1 = vadd.f32 %v3416_v41, %v4846_v22  ;;  %v3419_v13 = vadd.f32 %v3418_v8, %v3417_v59  ;;  %v3477_v14 = vadd.f32 %v3476_v43, %v3475_v7 }
 0x1ab   :  { %v4885_v16 = vadd.f32 %v3474_v3, %v2397_v1  ;;  %v2400_v2 = vadd.f32 %v3419_v13, %v4849_v56 }
 0x1ad   :  { %v4888_v5 = vadd.f32 %v3477_v14, %v2400_v2  ;;  %v3420_v20 = vpop.f32.mrb[88].mxu1  ;;  %v3478_v21 = vpop.f32.mrb[92].mxu0 }
 0x1ae   :  { %v3421_v6 = vpop.f32.mrb[89].mxu1  ;;  %v3479_v11 = vpop.f32.mrb[93].mxu0 }
 0x1af   :  { %v3422_v23 = vadd.f32 %v3421_v6, %v3420_v20  ;;  %v3480_v24 = vadd.f32 %v3479_v11, %v3478_v21  ;;  %v3423_v12 = vpop.f32.mrb[90].mxu1  ;;  %v3481_v29 = vpop.f32.mrb[94].mxu0 }
 0x1b0   :  { %v3424_v30 = vpop.f32.mrb[91].mxu1  ;;  %v3482_v19 = vpop.f32.mrb[95].mxu0 }
 0x1b1   :  { %v2405_v22 = vadd.f32 %v3422_v23, %v4852_v40  ;;  %v3425_v32 = vadd.f32 %v3424_v30, %v3423_v12  ;;  %v3483_v35 = vadd.f32 %v3482_v19, %v3481_v29 }
 0x1b3   :  { %v4891_v17 = vadd.f32 %v3480_v24, %v2405_v22  ;;  %v2408_v56 = vadd.f32 %v3425_v32, %v4855_v10 }
 0x1b5   :  { %v4894_v26 = vadd.f32 %v3483_v35, %v2408_v56  ;;  %v3426_v38 = vpop.f32.mrb[92].mxu1  ;;  %v3484_v39 = vpop.f32.mrb[96].mxu0 }
 0x1b6   :  { %v3427_v28 = vpop.f32.mrb[93].mxu1  ;;  %v3485_v9 = vpop.f32.mrb[97].mxu0 }
 0x1b7   :  { %v3428_v42 = vadd.f32 %v3427_v28, %v3426_v38  ;;  %v3486_v44 = vadd.f32 %v3485_v9, %v3484_v39  ;;  %v3429_v31 = vpop.f32.mrb[94].mxu1  ;;  %v3487_v47 = vpop.f32.mrb[98].mxu0 }
 0x1b8   :  { %v3430_v48 = vpop.f32.mrb[95].mxu1  ;;  %v3488_v37 = vpop.f32.mrb[99].mxu0 }
 0x1b9   :  { %v2413_v40 = vadd.f32 %v3428_v42, %v4858_v55 }
 0x1bb   :  { %v4897_v51 = vadd.f32 %v3486_v44, %v2413_v40 }
 0x1bd   :  { %v3506_v52 = vpop.f32.mrb[96].mxu1  ;;  %v3564_v33 = vpop.f32.mrb[100].mxu0 }
 0x1be   :  { %v3507_v45 = vpop.f32.mrb[97].mxu1  ;;  %v3565_v10 = vpop.f32.mrb[101].mxu0 }
 0x1bf   :  { %v3508_v57 = vadd.f32 %v3507_v45, %v3506_v52  ;;  %v3566_v58 = vadd.f32 %v3565_v10, %v3564_v33  ;;  %v3509_v27 = vpop.f32.mrb[98].mxu1  ;;  %v3567_v50 = vpop.f32.mrb[102].mxu0 }
 0x1c0   :  { %v3510_v46 = vpop.f32.mrb[99].mxu1  ;;  %v3568_v60 = vpop.f32.mrb[103].mxu0 }
 0x1c1   :  { %v2541_v25 = vadd.f32 %v3508_v57, %v4861_v4  ;;  %v3511_v53 = vadd.f32 %v3510_v46, %v3509_v27  ;;  %v3569_v34 = vadd.f32 %v3568_v60, %v3567_v50 }
 0x1c3   :  { %v4900_v0 = vadd.f32 %v3566_v58, %v2541_v25  ;;  %v2544_v55 = vadd.f32 %v3511_v53, %v4864_v49 }
 0x1c5   :  { %v4903_v54 = vadd.f32 %v3569_v34, %v2544_v55  ;;  %v3512_v41 = vpop.f32.mrb[100].mxu1  ;;  %v3570_v3 = vpop.f32.mrb[104].mxu0  ;;  %v2704_v59 = vmul.f32 %v4900_v0, %v4900_v0 }
 0x1c6   :  { %v3513_v7 = vpop.f32.mrb[101].mxu1  ;;  %v3571_v8 = vpop.f32.mrb[105].mxu0 }
 0x1c7   :  { %v2682_v43 = vadd.f32 %v4903_v54, %v4900_v0  ;;  %v2705_v4 = vmul.f32 %v4903_v54, %v4903_v54  ;;  %v3514_v1 = vadd.f32 %v3513_v7, %v3512_v41  ;;  %v3572_v13 = vadd.f32 %v3571_v8, %v3570_v3  ;;  %v3515_v14 = vpop.f32.mrb[102].mxu1  ;;  %v3573_v2 = vpop.f32.mrb[106].mxu0 }
 0x1c8   :  { %v3516_v49 = vpop.f32.mrb[103].mxu1  ;;  %v3574_v20 = vpop.f32.mrb[107].mxu0 }
 0x1c9   :  { %v2717_v21 = vadd.f32 %v2705_v4, %v2704_v59  ;;  %v2549_v6 = vadd.f32 %v3514_v1, %v4867_v61  ;;  %v3517_v11 = vadd.f32 %v3516_v49, %v3515_v14  ;;  %v3575_v23 = vadd.f32 %v3574_v20, %v3573_v2 }
 0x1cb   :  { %v4912_v24 = vadd.f32 %v3572_v13, %v2549_v6  ;;  %v2552_v12 = vadd.f32 %v3517_v11, %v4870_v15 }
 0x1cd   :  { %v2683_v29 = vadd.f32 %v2682_v43, %v4912_v24  ;;  %v2706_v30 = vmul.f32 %v4912_v24, %v4912_v24  ;;  %v4918_v19 = vadd.f32 %v3575_v23, %v2552_v12  ;;  %v3518_v22 = vpop.f32.mrb[104].mxu1  ;;  %v3576_v32 = vpop.f32.mrb[108].mxu0 }
 0x1ce   :  { %v3519_v35 = vpop.f32.mrb[105].mxu1  ;;  %v3577_v56 = vpop.f32.mrb[109].mxu0 }
 0x1cf   :  { %v2718_v38 = vadd.f32 %v2717_v21, %v2706_v30  ;;  %v2684_v61 = vadd.f32 %v2683_v29, %v4918_v19  ;;  %v2707_v39 = vmul.f32 %v4918_v19, %v4918_v19  ;;  %v3520_v28 = vadd.f32 %v3519_v35, %v3518_v22  ;;  %v3521_v9 = vpop.f32.mrb[106].mxu1  ;;  %v3579_v15 = vpop.f32.mrb[110].mxu0 }
 0x1d0   :  { %v3578_v42 = vadd.f32 %v3577_v56, %v3576_v32  ;;  %v3522_v44 = vpop.f32.mrb[107].mxu1  ;;  %v3580_v31 = vpop.f32.mrb[111].mxu0 }
 0x1d1   :  { %v2719_v47 = vadd.f32 %v2718_v38, %v2707_v39  ;;  %v2557_v48 = vadd.f32 %v3520_v28, %v4873_v18  ;;  %v3523_v37 = vadd.f32 %v3522_v44, %v3521_v9  ;;  %v3581_v40 = vadd.f32 %v3580_v31, %v3579_v15 }
 0x1d3   :  { %v4924_v52 = vadd.f32 %v3578_v42, %v2557_v48  ;;  %v2560_v33 = vadd.f32 %v3523_v37, %v4876_v36 }
 0x1d5   :  { %v2685_v45 = vadd.f32 %v2684_v61, %v4924_v52  ;;  %v2708_v10 = vmul.f32 %v4924_v52, %v4924_v52  ;;  %v4930_v57 = vadd.f32 %v3581_v40, %v2560_v33  ;;  %v3524_v58 = vpop.f32.mrb[108].mxu1  ;;  %v3582_v27 = vpop.f32.mrb[112].mxu0 }
 0x1d6   :  { %v3525_v50 = vpop.f32.mrb[109].mxu1  ;;  %v3583_v46 = vpop.f32.mrb[113].mxu0 }
 0x1d7   :  { %v2720_v60 = vadd.f32 %v2719_v47, %v2708_v10  ;;  %v2686_v18 = vadd.f32 %v2685_v45, %v4930_v57  ;;  %v2709_v25 = vmul.f32 %v4930_v57, %v4930_v57  ;;  %v3526_v53 = vadd.f32 %v3525_v50, %v3524_v58  ;;  %v3527_v34 = vpop.f32.mrb[110].mxu1  ;;  %v3585_v36 = vpop.f32.mrb[114].mxu0 }
 0x1d8   :  { %v3584_v55 = vadd.f32 %v3583_v46, %v3582_v27  ;;  %v3528_v41 = vpop.f32.mrb[111].mxu1  ;;  %v3586_v3 = vpop.f32.mrb[115].mxu0 }
 0x1d9   :  { %v2721_v59 = vadd.f32 %v2720_v60, %v2709_v25  ;;  %v2565_v7 = vadd.f32 %v3526_v53, %v4879_v62  ;;  %v3529_v8 = vadd.f32 %v3528_v41, %v3527_v34  ;;  %v3587_v43 = vadd.f32 %v3586_v3, %v3585_v36 }
 0x1db   :  { %v4936_v4 = vadd.f32 %v3584_v55, %v2565_v7  ;;  %v2568_v1 = vadd.f32 %v3529_v8, %v4882_v63 }
 0x1dd   :  { %v2687_v13 = vadd.f32 %v2686_v18, %v4936_v4  ;;  %v2710_v14 = vmul.f32 %v4936_v4, %v4936_v4  ;;  %v4942_v2 = vadd.f32 %v3587_v43, %v2568_v1  ;;  %v3530_v49 = vpop.f32.mrb[112].mxu1  ;;  %v3588_v20 = vpop.f32.mrb[116].mxu0 }
 0x1de   :  { %v3531_v21 = vpop.f32.mrb[113].mxu1  ;;  %v3589_v6 = vpop.f32.mrb[117].mxu0 }
 0x1df   :  { %v2722_v11 = vadd.f32 %v2721_v59, %v2710_v14  ;;  %v2688_v62 = vadd.f32 %v2687_v13, %v4942_v2  ;;  %v2711_v23 = vmul.f32 %v4942_v2, %v4942_v2  ;;  %v3532_v12 = vadd.f32 %v3531_v21, %v3530_v49  ;;  %v3533_v29 = vpop.f32.mrb[114].mxu1  ;;  %v3591_v63 = vpop.f32.mrb[118].mxu0 }
 0x1e0   :  { %v3590_v30 = vadd.f32 %v3589_v6, %v3588_v20  ;;  %v3534_v22 = vpop.f32.mrb[115].mxu1  ;;  %v3592_v32 = vpop.f32.mrb[119].mxu0 }
 0x1e1   :  { %v2723_v35 = vadd.f32 %v2722_v11, %v2711_v23  ;;  %v2573_v56 = vadd.f32 %v3532_v12, %v4885_v16  ;;  %v3535_v38 = vadd.f32 %v3534_v22, %v3533_v29  ;;  %v3593_v61 = vadd.f32 %v3592_v32, %v3591_v63 }
 0x1e3   :  { %v4948_v39 = vadd.f32 %v3590_v30, %v2573_v56  ;;  %v2576_v28 = vadd.f32 %v3535_v38, %v4888_v5 }
 0x1e5   :  { %v2689_v9 = vadd.f32 %v2688_v62, %v4948_v39  ;;  %v2712_v15 = vmul.f32 %v4948_v39, %v4948_v39  ;;  %v4954_v42 = vadd.f32 %v3593_v61, %v2576_v28  ;;  %v3536_v44 = vpop.f32.mrb[116].mxu1  ;;  %v3594_v31 = vpop.f32.mrb[120].mxu0 }
 0x1e6   :  { %v3537_v47 = vpop.f32.mrb[117].mxu1  ;;  %v3595_v48 = vpop.f32.mrb[121].mxu0 }
 0x1e7   :  { %v2724_v37 = vadd.f32 %v2723_v35, %v2712_v15  ;;  %v2690_v16 = vadd.f32 %v2689_v9, %v4954_v42  ;;  %v2713_v40 = vmul.f32 %v4954_v42, %v4954_v42  ;;  %v3538_v33 = vadd.f32 %v3537_v47, %v3536_v44  ;;  %v3539_v45 = vpop.f32.mrb[118].mxu1  ;;  %v3597_v5 = vpop.f32.mrb[122].mxu0 }
 0x1e8   :  { %v3596_v10 = vadd.f32 %v3595_v48, %v3594_v31  ;;  %v3540_v58 = vpop.f32.mrb[119].mxu1  ;;  %v3598_v27 = vpop.f32.mrb[123].mxu0 }
 0x1e9   :  { %v2725_v50 = vadd.f32 %v2724_v37, %v2713_v40  ;;  %v2581_v46 = vadd.f32 %v3538_v33, %v4891_v17  ;;  %v3541_v60 = vadd.f32 %v3540_v58, %v3539_v45  ;;  %v3599_v18 = vadd.f32 %v3598_v27, %v3597_v5  ;;  %v2739_v45 = vld [vmem:[%s5031_s2] sm:$0x1] }
 0x1ea   :  { %v2747_v40 = vlaneseq  ;;  %v2743_v27 = vld [vmem:[%s5032_s3] sm:$0x1] }
 0x1eb   :  { %v4960_v25 = vadd.f32 %v3596_v10, %v2581_v46  ;;  %v2584_v53 = vadd.f32 %v3541_v60, %v4894_v26 }
 0x1ec   :  { %v2748_v33 = vshrl.u32 %v2747_v40, 7 }
 0x1ed   :  { %v2691_v34 = vadd.f32 %v2690_v16, %v4960_v25  ;;  %v2714_v36 = vmul.f32 %v4960_v25, %v4960_v25  ;;  %v4966_v55 = vadd.f32 %v3599_v18, %v2584_v53  ;;  %v3542_v41 = vpop.f32.mrb[120].mxu1  ;;  %v3600_v3 = vpop.f32.mrb[124].mxu0 }
 0x1ee   :  { %v3543_v59 = vpop.f32.mrb[121].mxu1  ;;  %v3601_v7 = vpop.f32.mrb[125].mxu0  ;;  %v2749_v5 = vsub.s32 0, %v2748_v33 }
 0x1ef   :  { %v2726_v8 = vadd.f32 %v2725_v50, %v2714_v36  ;;  %v2692_v17 = vadd.f32 %v2691_v34, %v4966_v55  ;;  %v2715_v43 = vmul.f32 %v4966_v55, %v4966_v55  ;;  %v3544_v1 = vadd.f32 %v3543_v59, %v3542_v41  ;;  %v3545_v13 = vpop.f32.mrb[122].mxu1  ;;  %v3603_v26 = vpop.f32.mrb[126].mxu0 }
 0x1f0   :  { %v3602_v14 = vadd.f32 %v3601_v7, %v3600_v3  ;;  %v3546_v49 = vpop.f32.mrb[123].mxu1  ;;  %v3604_v20 = vpop.f32.mrb[127].mxu0 }
 0x1f1   :  { %v2727_v21 = vadd.f32 %v2726_v8, %v2715_v43  ;;  %v2589_v6 = vadd.f32 %v3544_v1, %v4897_v51 }
 0x1f3   :  { %v2677_v11 = vadd.f32 %v3602_v14, %v2589_v6 }
 0x1f5   :  { %v2694_v62 = vsel %vm2693_vm0, %v2677_v11, 0.0  ;;  %v2716_v23 = vmul.f32 %v2677_v11, %v2677_v11 }
 0x1f6   :  { %v2695_v12 = vadd.f32 %v2694_v62, %v2692_v17 }
 0x1f7   :  { %v2728_v29 = vsel %vm2693_vm0, %v2716_v23, 0.0 }
 0x1f8   :  { %v2696_v63 = vrot.slane %v2695_v12, 4  ;;  %v2729_v30 = vadd.f32 %v2728_v29, %v2727_v21 }
 0x1fa   :  { %v2697_v22 = vadd.f32 %v2696_v63, %v2695_v12  ;;  %v2730_v32 = vrot.slane %v2729_v30, 4 }
 0x1fc   :  { %v2698_v35 = vrot.slane %v2697_v22, 2  ;;  %v2731_v56 = vadd.f32 %v2730_v32, %v2729_v30 }
 0x1fe   :  { %v2699_v38 = vadd.f32 %v2698_v35, %v2697_v22  ;;  %v2732_v61 = vrot.slane %v2731_v56, 2 }
 0x200   :  { %v2700_v28 = vrot.slane %v2699_v38, 1  ;;  %v2733_v9 = vadd.f32 %v2732_v61, %v2731_v56 }
 0x202   :  { %v2701_v15 = vadd.f32 %v2700_v28, %v2699_v38  ;;  %v2734_v44 = vrot.slane %v2733_v9, 1 }
 0x204   :  { %v2703_v31 = vmul.f32 0.010204081, %v2701_v15  ;;  %v2735_v51 = vadd.f32 %v2734_v44, %v2733_v9 }
 0x206   :  { %v2736_v47 = vmul.f32 0.010204081, %v2735_v51  ;;  %v2737_v48 = vmul.f32 %v2703_v31, %v2703_v31 }
 0x208   :  { %v2738_v37 = vsub.f32 %v2736_v47, %v2737_v48 }
 0x20a   :  { %v2740_v16 = vadd.f32 1e-05, %v2738_v37 }
 0x20c   :  { %3946 = vrsqrt.f32 %v2740_v16 }
 0x216   :  { %v3947_v10 = vpop.eup %3946 }
 0x217   :  { %v2742_v58 = vmul.f32 %v3947_v10, %v2739_v45 }
 0x219   :  { %v2744_v50 = vmul.f32 %v2742_v58, %v2703_v31  ;;  %v2750_v46 = vrot.slane %v2742_v58, %v2749_v5 }
 0x21b   :  { %v2745_v60 = vsub.f32 %v2743_v27, %v2744_v50  ;;  %v2752_v18 = vmul.f32 %v2750_v46, %v4900_v0  ;;  %v2753_v53 = vmul.f32 %v2750_v46, %v4903_v54  ;;  %v2754_v34 = vmul.f32 %v2750_v46, %v4912_v24 }
 0x21c   :  { %v2755_v36 = vmul.f32 %v2750_v46, %v4918_v19  ;;  %v2756_v41 = vmul.f32 %v2750_v46, %v4924_v52  ;;  %v2757_v3 = vmul.f32 %v2750_v46, %v4930_v57  ;;  %v2758_v59 = vmul.f32 %v2750_v46, %v4936_v4 }
 0x21d   :  { %v2759_v7 = vmul.f32 %v2750_v46, %v4942_v2  ;;  %v2760_v8 = vmul.f32 %v2750_v46, %v4948_v39  ;;  %v2761_v17 = vmul.f32 %v2750_v46, %v4954_v42  ;;  %v2762_v0 = vmul.f32 %v2750_v46, %v4960_v25 }
 0x21e   :  { %v2763_v54 = vmul.f32 %v2750_v46, %v4966_v55  ;;  %v2764_v43 = vmul.f32 %v2750_v46, %v2677_v11  ;;  %v2769_v24 = vrot.slane %v2745_v60, %v2749_v5 }
 0x220   :  { %v2771_v1 = vadd.f32 %v2769_v24, %v2752_v18  ;;  %v2772_v19 = vadd.f32 %v2769_v24, %v2753_v53  ;;  %v2773_v13 = vadd.f32 %v2769_v24, %v2754_v34  ;;  %v2774_v52 = vadd.f32 %v2769_v24, %v2755_v36 }
 0x221   :  { %v2775_v26 = vadd.f32 %v2769_v24, %v2756_v41  ;;  %v2776_v57 = vadd.f32 %v2769_v24, %v2757_v3  ;;  %v2777_v14 = vadd.f32 %v2769_v24, %v2758_v59  ;;  %v2778_v4 = vadd.f32 %v2769_v24, %v2759_v7 }
 0x222   :  { %v2779_v49 = vadd.f32 %v2769_v24, %v2760_v8  ;;  %v2780_v2 = vadd.f32 %v2769_v24, %v2761_v17  ;;  %v2781_v20 = vadd.f32 %v2769_v24, %v2762_v0  ;;  %v2782_v39 = vadd.f32 %v2769_v24, %v2763_v54 }
 0x223   :  { %v2783_v21 = vadd.f32 %v2769_v24, %v2764_v43  ;;  %v2784_v42 = vmax.f32 %v2771_v1, 0.0  ;;  %v2785_v6 = vmax.f32 %v2772_v19, 0.0  ;;  %v2786_v25 = vmax.f32 %v2773_v13, 0.0 }
 0x224   :  { %v2787_v62 = vmax.f32 %v2774_v52, 0.0  ;;  %v2788_v55 = vmax.f32 %v2775_v26, 0.0  ;;  %v2789_v11 = vmax.f32 %v2776_v57, 0.0  ;;  %v2790_v23 = vmax.f32 %v2777_v14, 0.0 }
 0x225   :  { %v2791_v12 = vmax.f32 %v2778_v4, 0.0  ;;  %v2792_v29 = vmax.f32 %v2779_v49, 0.0  ;;  %v2793_v63 = vmax.f32 %v2780_v2, 0.0  ;;  %v2794_v30 = vmax.f32 %v2781_v20, 0.0  ;;  %2797 = vst [vmem:[%s5033_s4] sm:$0xff] %v2784_v42  ;;  %2798 = vst [vmem:[%s5033_s4 + $0x8] sm:$0xff] %v2785_v6 }
 0x226   :  { %2799 = vst [vmem:[%s5033_s4 + $0x10] sm:$0xff] %v2786_v25  ;;  %v2795_v22 = vmax.f32 %v2782_v39, 0.0  ;;  %v2796_v32 = vmax.f32 %v2783_v21, 0.0  ;;  %2800 = vst [vmem:[%s5033_s4 + $0x18] sm:$0xff] %v2787_v62 }
 0x227   :  { %2801 = vst [vmem:[%s5033_s4 + $0x20] sm:$0xff] %v2788_v55  ;;  %2802 = vst [vmem:[%s5033_s4 + $0x28] sm:$0xff] %v2789_v11 }
 0x228   :  { %2803 = vst [vmem:[%s5033_s4 + $0x30] sm:$0xff] %v2790_v23  ;;  %2804 = vst [vmem:[%s5033_s4 + $0x38] sm:$0xff] %v2791_v12 }
 0x229   :  { %2805 = vst [vmem:[%s5033_s4 + $0x40] sm:$0xff] %v2792_v29  ;;  %2806 = vst [vmem:[%s5033_s4 + $0x48] sm:$0xff] %v2793_v63 }
 0x22a   :  { %2807 = vst [vmem:[%s5033_s4 + $0x50] sm:$0xff] %v2794_v30  ;;  %2808 = vst [vmem:[%s5033_s4 + $0x58] sm:$0xff] %v2795_v22 }
 0x22b   :  { %2809 = vst [vmem:[%s5033_s4 + $0x60] sm:$0x3] %v2796_v32 }

// kernel: generator_forward.8
= control target key start
LH: loop header
LB: loop body
LE: loop exit
PB: predicated region body
PF: predicated region fallthrough
CT: control target
= control target key end

     0   :  { %v7070_v0 = vmov 0   ;;  %vm5266_vm0 = vcmask 523264   ;;  %s9528_s1 = inlined_call_operand.vmem [shape: bf16[2048,64], index: 1, kind: input, shape index: {}]   ;;  %s9529_s0 = inlined_call_operand.vmem [shape: bf16[392,2048], index: 0, kind: input, shape index: {}]   ;;  %s9530_s2 = inlined_call_operand.vmem [shape: f32[1,64], index: 2, kind: input, shape index: {}]   ;;  %s9531_s3 = inlined_call_operand.vmem [shape: f32[1,64], index: 3, kind: input, shape index: {}]   ;;  %s9532_s4 = inlined_call_operand.vmem [shape: f32[392,64], index: 4, kind: output, shape index: {}]  }
   0x1   :  { %3410 = vmatprep.subr.bf16.mxu1 %v7070_v0  ;;  %4338 = vmatprep.subr.bf16.mxu0 %v7070_v0  ;;  %v6924_v1 = vld [vmem:[%s9528_s1] sm:$0xff]   ;;  %v6926_v3 = vld [vmem:[%s9528_s1 + $0x8] sm:$0xff]   ;;  %v6928_v5 = vld [vmem:[%s9528_s1 + $0x10] sm:$0xff]  }
   0x2   :  { %v6925_v2 = vld [vmem:[%s9528_s1 + $0x200] sm:$0xff]   ;;  %3411 = vmatpush1.bf16.msra.mxu1 %v6924_v1  ;;  %v6927_v4 = vld [vmem:[%s9528_s1 + $0x208] sm:$0xff]   ;;  %v6929_v6 = vld [vmem:[%s9528_s1 + $0x210] sm:$0xff]  }
   0x3   :  { %4339 = vmatpush1.bf16.msra.mxu0 %v6925_v2  ;;  %3412 = vmatprep.subr.bf16.mxu1 %v7070_v0  ;;  %v6930_v7 = vld [vmem:[%s9528_s1 + $0x18] sm:$0xff]   ;;  %v6932_v9 = vld [vmem:[%s9528_s1 + $0x20] sm:$0xff]   ;;  %v6934_v11 = vld [vmem:[%s9528_s1 + $0x28] sm:$0xff]  }
   0x4   :  { %4340 = vmatprep.subr.bf16.mxu0 %v7070_v0  ;;  %v6931_v8 = vld [vmem:[%s9528_s1 + $0x218] sm:$0xff]   ;;  %v6933_v10 = vld [vmem:[%s9528_s1 + $0x220] sm:$0xff]   ;;  %v6935_v12 = vld [vmem:[%s9528_s1 + $0x228] sm:$0xff]  }
   0x5   :  { %v6936_v13 = vld [vmem:[%s9528_s1 + $0x30] sm:$0xff]   ;;  %v6938_v15 = vld [vmem:[%s9528_s1 + $0x38] sm:$0xff]   ;;  %v6940_v17 = vld [vmem:[%s9528_s1 + $0x40] sm:$0xff]  }
   0x6   :  { %3413 = vmatpush1.bf16.msra.mxu1 %v6926_v3  ;;  %v6937_v14 = vld [vmem:[%s9528_s1 + $0x230] sm:$0xff]   ;;  %v6939_v16 = vld [vmem:[%s9528_s1 + $0x238] sm:$0xff]   ;;  %v6941_v18 = vld [vmem:[%s9528_s1 + $0x240] sm:$0xff]  }
   0x7   :  { %4341 = vmatpush1.bf16.msra.mxu0 %v6927_v4  ;;  %3414 = vmatprep.subr.bf16.mxu1 %v7070_v0  ;;  %v7171_v19 = vld [vmem:[%s9529_s0] sm:$0xff]  ;;  %v6942_v24 = vld [vmem:[%s9528_s1 + $0x48] sm:$0xff]   ;;  %v6944_v27 = vld [vmem:[%s9528_s1 + $0x50] sm:$0xff]  }
   0x8   :  { %4342 = vmatprep.subr.bf16.mxu0 %v7070_v0  ;;  %v7176_v20 = vld [vmem:[%s9529_s0 + $0x40] sm:$0xff]  ;;  %v6943_v26 = vld [vmem:[%s9528_s1 + $0x248] sm:$0xff]   ;;  %v6945_v28 = vld [vmem:[%s9528_s1 + $0x250] sm:$0xff]  }
   0x9   :  { %v7181_v21 = vld [vmem:[%s9529_s0 + $0x20] sm:$0xff]  ;;  %v5747_v22 = vcombine.high %v7171_v19, %v7176_v20  ;;  %v6946_v29 = vld [vmem:[%s9528_s1 + $0x58] sm:$0xff]   ;;  %v6950_v33 = vld [vmem:[%s9528_s1 + $0x68] sm:$0xff]   ;;  %v5746_v41 = vcombine.low %v7171_v19, %v7176_v20 }
   0xa   :  { %3415 = vmatpush1.bf16.msra.mxu1 %v6928_v5  ;;  %v30_v23 = vld [vmem:[%s9529_s0 + $0x60] sm:$0xff]  ;;  %v6947_v30 = vld [vmem:[%s9528_s1 + $0x258] sm:$0xff]   ;;  %v6951_v34 = vld [vmem:[%s9528_s1 + $0x268] sm:$0xff]  }
   0xb   :  { %4343 = vmatpush1.bf16.msra.mxu0 %v6929_v6  ;;  %3416 = vmatprep.subr.bf16.mxu1 %v7070_v0  ;;  %v5755_v25 = vcombine.high %v7181_v21, %v30_v23  ;;  %v6948_v31 = vld [vmem:[%s9528_s1 + $0x60] sm:$0xff]   ;;  %v6952_v35 = vld [vmem:[%s9528_s1 + $0x70] sm:$0xff]   ;;  %v6954_v37 = vld [vmem:[%s9528_s1 + $0x78] sm:$0xff]   ;;  %v5754_v44 = vcombine.low %v7181_v21, %v30_v23 }
   0xc   :  { %4344 = vmatprep.subr.bf16.mxu0 %v7070_v0  ;;  %3442 = vmatprep.mubr.bf16.mxu1 %v5747_v22  ;;  %v6949_v32 = vld [vmem:[%s9528_s1 + $0x260] sm:$0xff]   ;;  %v6953_v36 = vld [vmem:[%s9528_s1 + $0x270] sm:$0xff]   ;;  %v6955_v38 = vld [vmem:[%s9528_s1 + $0x278] sm:$0xff]  }
   0xd   :  { %4370 = vmatprep.mubr.bf16.mxu0 %v5755_v25  ;;  %v34_v39 = vld [vmem:[%s9529_s0 + $0x80] sm:$0xff]  ;;  %v6958_v49 = vld [vmem:[%s9528_s1 + $0x88] sm:$0xff]   ;;  %v6960_v59 = vld [vmem:[%s9528_s1 + $0x90] sm:$0xff]  }
   0xe   :  { %3417 = vmatpush1.bf16.msra.mxu1 %v6930_v7  ;;  %v42_v40 = vld [vmem:[%s9529_s0 + $0xc0] sm:$0xff]  ;;  %v6959_v50 = vld [vmem:[%s9528_s1 + $0x288] sm:$0xff]   ;;  %v6961_v60 = vld [vmem:[%s9528_s1 + $0x290] sm:$0xff]  }
   0xf   :  { %4345 = vmatpush1.bf16.msra.mxu0 %v6931_v8  ;;  %3418 = vmatprep.subr.bf16.mxu1 %v7070_v0  ;;  %v38_v42 = vld [vmem:[%s9529_s0 + $0xa0] sm:$0xff]  ;;  %v5763_v47 = vcombine.high %v34_v39, %v42_v40  ;;  %v5762_v55 = vcombine.low %v34_v39, %v42_v40  ;;  %v6962_v63 = vld [vmem:[%s9528_s1 + $0x98] sm:$0xff]   ;;  %v6969_v20 = vld [vmem:[%s9528_s1 + $0x2b0] sm:$0xff]  }
  0x10   :  { %4346 = vmatprep.subr.bf16.mxu0 %v7070_v0  ;;  %v46_v43 = vld [vmem:[%s9529_s0 + $0xe0] sm:$0xff]  ;;  %v6963_v3 = vld [vmem:[%s9528_s1 + $0x298] sm:$0xff]   ;;  %v6975_v39 = vld [vmem:[%s9528_s1 + $0x2c8] sm:$0xff]  }
  0x11   :  { %v6956_v45 = vld [vmem:[%s9528_s1 + $0x80] sm:$0xff]   ;;  %v5771_v48 = vcombine.high %v38_v42, %v46_v43  ;;  %v5770_v56 = vcombine.low %v38_v42, %v46_v43 }
  0x12   :  { %3419 = vmatpush1.bf16.msra.mxu1 %v6932_v9  ;;  %v6957_v46 = vld [vmem:[%s9528_s1 + $0x280] sm:$0xff]  }
  0x13   :  { %4347 = vmatpush1.bf16.msra.mxu0 %v6933_v10  ;;  %3420 = vmatprep.subr.bf16.mxu1 %v7070_v0  ;;  %v50_v51 = vld [vmem:[%s9529_s0 + $0x100] sm:$0xff] }
  0x14   :  { %4348 = vmatprep.subr.bf16.mxu0 %v7070_v0  ;;  %v58_v52 = vld [vmem:[%s9529_s0 + $0x140] sm:$0xff] }
  0x15   :  { %v54_v53 = vld [vmem:[%s9529_s0 + $0x120] sm:$0xff]  ;;  %v5779_v57 = vcombine.high %v50_v51, %v58_v52  ;;  %v5778_v4 = vcombine.low %v50_v51, %v58_v52  ;;  %v6979_v51 = vld [vmem:[%s9528_s1 + $0x2d8] sm:$0xff]  }
  0x16   :  { %3421 = vmatpush1.bf16.msra.mxu1 %v6934_v11  ;;  %v62_v54 = vld [vmem:[%s9529_s0 + $0x160] sm:$0xff] }
  0x17   :  { %4349 = vmatpush1.bf16.msra.mxu0 %v6935_v12  ;;  %3422 = vmatprep.subr.bf16.mxu1 %v7070_v0  ;;  %v5787_v58 = vcombine.high %v54_v53, %v62_v54  ;;  %v66_v61 = vld [vmem:[%s9529_s0 + $0x180] sm:$0xff]  ;;  %v5786_v5 = vcombine.low %v54_v53, %v62_v54 }
  0x18   :  { %4350 = vmatprep.subr.bf16.mxu0 %v7070_v0  ;;  %v74_v62 = vld [vmem:[%s9529_s0 + $0x1c0] sm:$0xff] }
  0x19   :  { %v70_v1 = vld [vmem:[%s9529_s0 + $0x1a0] sm:$0xff]  ;;  %v5795_v6 = vcombine.high %v66_v61, %v74_v62 }
  0x1a   :  { %3423 = vmatpush1.bf16.msra.mxu1 %v6936_v13  ;;  %v78_v2 = vld [vmem:[%s9529_s0 + $0x1e0] sm:$0xff] }
  0x1b   :  { %4351 = vmatpush1.bf16.msra.mxu0 %v6937_v14  ;;  %3424 = vmatprep.subr.bf16.mxu1 %v7070_v0  ;;  %v5803_v7 = vcombine.high %v70_v1, %v78_v2  ;;  %v6964_v8 = vld [vmem:[%s9528_s1 + $0xa0] sm:$0xff]   ;;  %v6966_v14 = vld [vmem:[%s9528_s1 + $0xa8] sm:$0xff]  }
  0x1c   :  { %4352 = vmatprep.subr.bf16.mxu0 %v7070_v0  ;;  %v6965_v9 = vld [vmem:[%s9528_s1 + $0x2a0] sm:$0xff]  }
  0x1d   :  { %v82_v10 = vld [vmem:[%s9529_s0 + $0x200] sm:$0xff] }
  0x1e   :  { %3425 = vmatpush1.bf16.msra.mxu1 %v6938_v15  ;;  %v90_v11 = vld [vmem:[%s9529_s0 + $0x240] sm:$0xff]  ;;  %v6967_v15 = vld [vmem:[%s9528_s1 + $0x2a8] sm:$0xff]  }
  0x1f   :  { %4353 = vmatpush1.bf16.msra.mxu0 %v6939_v16  ;;  %3426 = vmatprep.subr.bf16.mxu1 %v7070_v0  ;;  %v86_v12 = vld [vmem:[%s9529_s0 + $0x220] sm:$0xff]  ;;  %v5794_v16 = vcombine.low %v66_v61, %v74_v62  ;;  %v5811_v19 = vcombine.high %v82_v10, %v90_v11  ;;  %v6982_v62 = vld [vmem:[%s9528_s1 + $0xe8] sm:$0xff]  }
  0x20   :  { %4354 = vmatprep.subr.bf16.mxu0 %v7070_v0  ;;  %v94_v13 = vld [vmem:[%s9529_s0 + $0x260] sm:$0xff] }
  0x21   :  { %v5819_v21 = vcombine.high %v86_v12, %v94_v13  ;;  %v98_v22 = vld [vmem:[%s9529_s0 + $0x280] sm:$0xff] }
  0x22   :  { %3427 = vmatpush1.bf16.msra.mxu1 %v6940_v17  ;;  %v6968_v17 = vld [vmem:[%s9528_s1 + $0xb0] sm:$0xff]   ;;  %v106_v23 = vld [vmem:[%s9529_s0 + $0x2c0] sm:$0xff] }
  0x23   :  { %4355 = vmatpush1.bf16.msra.mxu0 %v6941_v18  ;;  %3428 = vmatprep.subr.bf16.mxu1 %v7070_v0  ;;  %v5802_v18 = vcombine.low %v70_v1, %v78_v2  ;;  %v110_v25 = vld [vmem:[%s9529_s0 + $0x2e0] sm:$0xff]  ;;  %v5826_v40 = vcombine.low %v98_v22, %v106_v23  ;;  %v6984_v2 = vld [vmem:[%s9528_s1 + $0xf0] sm:$0xff]  }
  0x24   :  { %4356 = vmatprep.subr.bf16.mxu0 %v7070_v0  ;;  %v6980_v53 = vld [vmem:[%s9528_s1 + $0xe0] sm:$0xff]  }
  0x25   :  { %v158_v61 = vld [vmem:[%s9529_s0 + $0x460] sm:$0xff] }
  0x26   :  { %3429 = vmatpush1.bf16.msra.mxu1 %v6942_v24  ;;  %v102_v24 = vld [vmem:[%s9529_s0 + $0x2a0] sm:$0xff] }
  0x27   :  { %4357 = vmatpush1.bf16.msra.mxu0 %v6943_v26  ;;  %3430 = vmatprep.subr.bf16.mxu1 %v7070_v0  ;;  %v6970_v26 = vld [vmem:[%s9528_s1 + $0xb8] sm:$0xff]   ;;  %v5834_v42 = vcombine.low %v102_v24, %v110_v25 }
  0x28   :  { %4358 = vmatprep.subr.bf16.mxu0 %v7070_v0 }
  0x2a   :  { %3431 = vmatpush1.bf16.msra.mxu1 %v6944_v27  ;;  %v6971_v27 = vld [vmem:[%s9528_s1 + $0x2b8] sm:$0xff]  }
  0x2b   :  { %4359 = vmatpush1.bf16.msra.mxu0 %v6945_v28  ;;  %3432 = vmatprep.subr.bf16.mxu1 %v7070_v0  ;;  %v5810_v28 = vcombine.low %v82_v10, %v90_v11  ;;  %v174_v10 = vld [vmem:[%s9529_s0 + $0x4e0] sm:$0xff]  ;;  %v6986_v11 = vld [vmem:[%s9528_s1 + $0xf8] sm:$0xff]  }
  0x2c   :  { %4360 = vmatprep.subr.bf16.mxu0 %v7070_v0 }
  0x2e   :  { %3433 = vmatpush1.bf16.msra.mxu1 %v6946_v29  ;;  %v6972_v29 = vld [vmem:[%s9528_s1 + $0xc0] sm:$0xff]  }
  0x2f   :  { %4361 = vmatpush1.bf16.msra.mxu0 %v6947_v30  ;;  %3434 = vmatprep.subr.bf16.mxu1 %v7070_v0  ;;  %v5818_v30 = vcombine.low %v86_v12, %v94_v13  ;;  %v6987_v12 = vld [vmem:[%s9528_s1 + $0x2f8] sm:$0xff]  }
  0x30   :  { %4362 = vmatprep.subr.bf16.mxu0 %v7070_v0 }
  0x32   :  { %3435 = vmatpush1.bf16.msra.mxu1 %v6948_v31  ;;  %v5827_v31 = vcombine.high %v98_v22, %v106_v23 }
  0x33   :  { %4363 = vmatpush1.bf16.msra.mxu0 %v6949_v32  ;;  %3436 = vmatprep.subr.bf16.mxu1 %v7070_v0  ;;  %v6973_v32 = vld [vmem:[%s9528_s1 + $0x2c0] sm:$0xff]  }
  0x34   :  { %4364 = vmatprep.subr.bf16.mxu0 %v7070_v0 }
  0x36   :  { %3437 = vmatpush1.bf16.msra.mxu1 %v6950_v33  ;;  %v5835_v33 = vcombine.high %v102_v24, %v110_v25  ;;  %v194_v25 = vld [vmem:[%s9529_s0 + $0x580] sm:$0xff] }
  0x37   :  { %4365 = vmatpush1.bf16.msra.mxu0 %v6951_v34  ;;  %3438 = vmatprep.subr.bf16.mxu1 %v7070_v0  ;;  %v114_v34 = vld [vmem:[%s9529_s0 + $0x300] sm:$0xff] }
  0x38   :  { %4366 = vmatprep.subr.bf16.mxu0 %v7070_v0 }
  0x3a   :  { %3439 = vmatpush1.bf16.msra.mxu1 %v6952_v35  ;;  %v122_v35 = vld [vmem:[%s9529_s0 + $0x340] sm:$0xff] }
  0x3b   :  { %4367 = vmatpush1.bf16.msra.mxu0 %v6953_v36  ;;  %3440 = vmatprep.subr.bf16.mxu1 %v7070_v0  ;;  %v118_v36 = vld [vmem:[%s9529_s0 + $0x320] sm:$0xff]  ;;  %v5843_v43 = vcombine.high %v114_v34, %v122_v35  ;;  %v5842_v52 = vcombine.low %v114_v34, %v122_v35 }
  0x3c   :  { %4368 = vmatprep.subr.bf16.mxu0 %v7070_v0  ;;  %v218_v34 = vld [vmem:[%s9529_s0 + $0x640] sm:$0xff] }
  0x3d   :  { %v214_v35 = vld [vmem:[%s9529_s0 + $0x620] sm:$0xff] }
  0x3e   :  { %3441 = vmatpush1.bf16.msra.mxu1 %v6954_v37  ;;  %v126_v37 = vld [vmem:[%s9529_s0 + $0x360] sm:$0xff] }
  0x3f   :  { %4369 = vmatpush1.bf16.msra.mxu0 %v6955_v38  ;;  %3642 = vmatprep.subr.bf16.mxu1 %v7070_v0  ;;  %v6974_v38 = vld [vmem:[%s9528_s1 + $0xc8] sm:$0xff]   ;;  %v5850_v54 = vcombine.low %v118_v36, %v126_v37 }
  0x40   :  { %4570 = vmatprep.subr.bf16.mxu0 %v7070_v0 }
  0x41   :  { %3443 = vmatmul.mubr.bf16.vlgmr.msra.gmra.mrb[0].mxu1 %v5746_v41  ;;  %v6976_v41 = vld [vmem:[%s9528_s1 + $0xd0] sm:$0xff]  }
  0x42   :  { %4371 = vmatmul.mubr.bf16.vlgmr.msra.gmra.mrb[0].mxu0 %v5754_v44  ;;  %3643 = vmatpush1.bf16.msra.mxu1 %v6956_v45  ;;  %v6977_v44 = vld [vmem:[%s9528_s1 + $0x2d0] sm:$0xff]   ;;  %v5851_v45 = vcombine.high %v118_v36, %v126_v37  ;;  %v222_v36 = vld [vmem:[%s9529_s0 + $0x660] sm:$0xff] }
  0x43   :  { %4571 = vmatpush1.bf16.msra.mxu0 %v6957_v46  ;;  %3450 = vmatprep.mubr.bf16.mxu1 %v5763_v47  ;;  %v130_v46 = vld [vmem:[%s9529_s0 + $0x380] sm:$0xff] }
  0x44   :  { %4378 = vmatprep.mubr.bf16.mxu0 %v5771_v48  ;;  %3644 = vmatprep.subr.bf16.mxu1 %v7070_v0  ;;  %v138_v47 = vld [vmem:[%s9529_s0 + $0x3c0] sm:$0xff] }
  0x45   :  { %4572 = vmatprep.subr.bf16.mxu0 %v7070_v0  ;;  %v134_v48 = vld [vmem:[%s9529_s0 + $0x3a0] sm:$0xff]  ;;  %v5858_v1 = vcombine.low %v130_v46, %v138_v47 }
  0x46   :  { %3645 = vmatpush1.bf16.msra.mxu1 %v6958_v49  ;;  %v142_v49 = vld [vmem:[%s9529_s0 + $0x3e0] sm:$0xff] }
  0x47   :  { %4573 = vmatpush1.bf16.msra.mxu0 %v6959_v50  ;;  %3646 = vmatprep.subr.bf16.mxu1 %v7070_v0  ;;  %v6978_v50 = vld [vmem:[%s9528_s1 + $0xd8] sm:$0xff]  }
  0x48   :  { %4574 = vmatprep.subr.bf16.mxu0 %v7070_v0 }
  0x49   :  { %3451 = vmatmul.mubr.bf16.gmra.mrb[4].mxu1 %v5762_v55  ;;  %v5859_v55 = vcombine.high %v130_v46, %v138_v47  ;;  %v5946_v46 = vcombine.low %v214_v35, %v222_v36 }
  0x4a   :  { %4379 = vmatmul.mubr.bf16.gmra.mrb[4].mxu0 %v5770_v56  ;;  %3458 = vmatprep.mubr.bf16.mxu1 %v5779_v57  ;;  %v6981_v56 = vld [vmem:[%s9528_s1 + $0x2e0] sm:$0xff]   ;;  %v5867_v57 = vcombine.high %v134_v48, %v142_v49 }
  0x4b   :  { %4386 = vmatprep.mubr.bf16.mxu0 %v5787_v58  ;;  %3647 = vmatpush1.bf16.msra.mxu1 %v6960_v59  ;;  %v146_v58 = vld [vmem:[%s9529_s0 + $0x400] sm:$0xff] }
  0x4c   :  { %4575 = vmatpush1.bf16.msra.mxu0 %v6961_v60  ;;  %3648 = vmatprep.subr.bf16.mxu1 %v7070_v0  ;;  %v154_v59 = vld [vmem:[%s9529_s0 + $0x440] sm:$0xff] }
  0x4d   :  { %4576 = vmatprep.subr.bf16.mxu0 %v7070_v0  ;;  %v150_v60 = vld [vmem:[%s9529_s0 + $0x420] sm:$0xff]  ;;  %v5874_v13 = vcombine.low %v146_v58, %v154_v59 }
  0x4f   :  { %3649 = vmatpush1.bf16.msra.mxu1 %v6962_v63  ;;  %v6983_v63 = vld [vmem:[%s9528_s1 + $0x2e8] sm:$0xff]  }
  0x50   :  { %4577 = vmatpush1.bf16.msra.mxu0 %v6963_v3  ;;  %3650 = vmatprep.subr.bf16.mxu1 %v7070_v0  ;;  %v5866_v3 = vcombine.low %v134_v48, %v142_v49  ;;  %v242_v49 = vld [vmem:[%s9529_s0 + $0x700] sm:$0xff] }
  0x51   :  { %3459 = vmatmul.mubr.bf16.gmra.mrb[8].mxu1 %v5778_v4  ;;  %4578 = vmatprep.subr.bf16.mxu0 %v7070_v0  ;;  %v5875_v4 = vcombine.high %v146_v58, %v154_v59  ;;  %v266_v58 = vld [vmem:[%s9529_s0 + $0x7c0] sm:$0xff] }
  0x52   :  { %4387 = vmatmul.mubr.bf16.gmra.mrb[8].mxu0 %v5786_v5  ;;  %3466 = vmatprep.mubr.bf16.mxu1 %v5795_v6  ;;  %v6985_v5 = vld [vmem:[%s9528_s1 + $0x2f0] sm:$0xff]   ;;  %v5883_v6 = vcombine.high %v150_v60, %v158_v61  ;;  %v262_v59 = vld [vmem:[%s9529_s0 + $0x7a0] sm:$0xff] }
  0x53   :  { %4394 = vmatprep.mubr.bf16.mxu0 %v5803_v7  ;;  %3651 = vmatpush1.bf16.msra.mxu1 %v6964_v8  ;;  %v162_v7 = vld [vmem:[%s9529_s0 + $0x480] sm:$0xff] }
  0x54   :  { %4579 = vmatpush1.bf16.msra.mxu0 %v6965_v9  ;;  %3652 = vmatprep.subr.bf16.mxu1 %v7070_v0  ;;  %v170_v8 = vld [vmem:[%s9529_s0 + $0x4c0] sm:$0xff] }
  0x55   :  { %4580 = vmatprep.subr.bf16.mxu0 %v7070_v0  ;;  %v166_v9 = vld [vmem:[%s9529_s0 + $0x4a0] sm:$0xff] }
  0x56   :  { %v5898_v22 = vcombine.low %v166_v9, %v174_v10 }
  0x57   :  { %3653 = vmatpush1.bf16.msra.mxu1 %v6966_v14  ;;  %v5882_v14 = vcombine.low %v150_v60, %v158_v61  ;;  %v270_v60 = vld [vmem:[%s9529_s0 + $0x7e0] sm:$0xff] }
  0x58   :  { %4581 = vmatpush1.bf16.msra.mxu0 %v6967_v15  ;;  %3654 = vmatprep.subr.bf16.mxu1 %v7070_v0  ;;  %v5891_v15 = vcombine.high %v162_v7, %v170_v8 }
  0x59   :  { %3467 = vmatmul.mubr.bf16.gmra.mrb[12].mxu1 %v5794_v16  ;;  %4582 = vmatprep.subr.bf16.mxu0 %v7070_v0  ;;  %v5899_v16 = vcombine.high %v166_v9, %v174_v10  ;;  %v290_v10 = vld [vmem:[%s9529_s0 + $0x880] sm:$0xff] }
  0x5a   :  { %4395 = vmatmul.mubr.bf16.gmra.mrb[12].mxu0 %v5802_v18  ;;  %3474 = vmatprep.mubr.bf16.mxu1 %v5811_v19  ;;  %v186_v18 = vld [vmem:[%s9529_s0 + $0x540] sm:$0xff] }
  0x5b   :  { %4402 = vmatprep.mubr.bf16.mxu0 %v5819_v21  ;;  %3655 = vmatpush1.bf16.msra.mxu1 %v6968_v17  ;;  %v178_v17 = vld [vmem:[%s9529_s0 + $0x500] sm:$0xff]  ;;  %v5890_v21 = vcombine.low %v162_v7, %v170_v8  ;;  %v5994_v7 = vcombine.low %v262_v59, %v270_v60 }
  0x5c   :  { %4583 = vmatpush1.bf16.msra.mxu0 %v6969_v20  ;;  %3656 = vmatprep.subr.bf16.mxu1 %v7070_v0  ;;  %v182_v19 = vld [vmem:[%s9529_s0 + $0x520] sm:$0xff]  ;;  %v5907_v23 = vcombine.high %v178_v17, %v186_v18 }
  0x5d   :  { %4584 = vmatprep.subr.bf16.mxu0 %v7070_v0  ;;  %v190_v20 = vld [vmem:[%s9529_s0 + $0x560] sm:$0xff] }
  0x5e   :  { %v5915_v24 = vcombine.high %v182_v19, %v190_v20 }
  0x5f   :  { %3657 = vmatpush1.bf16.msra.mxu1 %v6970_v26  ;;  %v202_v26 = vld [vmem:[%s9529_s0 + $0x5c0] sm:$0xff] }
  0x60   :  { %4585 = vmatpush1.bf16.msra.mxu0 %v6971_v27  ;;  %3658 = vmatprep.subr.bf16.mxu1 %v7070_v0  ;;  %v198_v27 = vld [vmem:[%s9529_s0 + $0x5a0] sm:$0xff]  ;;  %v5922_v37 = vcombine.low %v194_v25, %v202_v26 }
  0x61   :  { %3475 = vmatmul.mubr.bf16.gmra.mrb[16].mxu1 %v5810_v28  ;;  %4586 = vmatprep.subr.bf16.mxu0 %v7070_v0  ;;  %v206_v28 = vld [vmem:[%s9529_s0 + $0x5e0] sm:$0xff] }
  0x62   :  { %4403 = vmatmul.mubr.bf16.gmra.mrb[16].mxu0 %v5818_v30  ;;  %3482 = vmatprep.mubr.bf16.mxu1 %v5827_v31  ;;  %v5914_v30 = vcombine.low %v182_v19, %v190_v20  ;;  %v5923_v31 = vcombine.high %v194_v25, %v202_v26  ;;  %v314_v19 = vld [vmem:[%s9529_s0 + $0x940] sm:$0xff] }
  0x63   :  { %4410 = vmatprep.mubr.bf16.mxu0 %v5835_v33  ;;  %3659 = vmatpush1.bf16.msra.mxu1 %v6972_v29  ;;  %v5906_v29 = vcombine.low %v178_v17, %v186_v18  ;;  %v210_v33 = vld [vmem:[%s9529_s0 + $0x600] sm:$0xff] }
  0x64   :  { %4587 = vmatpush1.bf16.msra.mxu0 %v6973_v32  ;;  %3660 = vmatprep.subr.bf16.mxu1 %v7070_v0  ;;  %v5931_v32 = vcombine.high %v198_v27, %v206_v28  ;;  %v306_v18 = vld [vmem:[%s9529_s0 + $0x900] sm:$0xff] }
  0x65   :  { %4588 = vmatprep.subr.bf16.mxu0 %v7070_v0  ;;  %v310_v20 = vld [vmem:[%s9529_s0 + $0x920] sm:$0xff] }
  0x66   :  { %v322_v26 = vld [vmem:[%s9529_s0 + $0x980] sm:$0xff] }
  0x67   :  { %3661 = vmatpush1.bf16.msra.mxu1 %v6974_v38  ;;  %v5930_v38 = vcombine.low %v198_v27, %v206_v28  ;;  %v330_v27 = vld [vmem:[%s9529_s0 + $0x9c0] sm:$0xff] }
  0x68   :  { %4589 = vmatpush1.bf16.msra.mxu0 %v6975_v39  ;;  %3662 = vmatprep.subr.bf16.mxu1 %v7070_v0  ;;  %v5939_v39 = vcombine.high %v210_v33, %v218_v34  ;;  %v326_v28 = vld [vmem:[%s9529_s0 + $0x9a0] sm:$0xff] }
  0x69   :  { %3483 = vmatmul.mubr.bf16.gmra.mrb[20].mxu1 %v5826_v40  ;;  %4590 = vmatprep.subr.bf16.mxu0 %v7070_v0  ;;  %v5947_v40 = vcombine.high %v214_v35, %v222_v36  ;;  %v346_v35 = vld [vmem:[%s9529_s0 + $0xa40] sm:$0xff] }
  0x6a   :  { %4411 = vmatmul.mubr.bf16.gmra.mrb[20].mxu0 %v5834_v42  ;;  %3490 = vmatprep.mubr.bf16.mxu1 %v5843_v43  ;;  %v234_v42 = vld [vmem:[%s9529_s0 + $0x6c0] sm:$0xff] }
  0x6b   :  { %4418 = vmatprep.mubr.bf16.mxu0 %v5851_v45  ;;  %3663 = vmatpush1.bf16.msra.mxu1 %v6976_v41  ;;  %v226_v41 = vld [vmem:[%s9529_s0 + $0x680] sm:$0xff]  ;;  %v5938_v45 = vcombine.low %v210_v33, %v218_v34 }
  0x6c   :  { %4591 = vmatpush1.bf16.msra.mxu0 %v6977_v44  ;;  %3664 = vmatprep.subr.bf16.mxu1 %v7070_v0  ;;  %v230_v43 = vld [vmem:[%s9529_s0 + $0x6a0] sm:$0xff]  ;;  %v5955_v47 = vcombine.high %v226_v41, %v234_v42 }
  0x6d   :  { %4592 = vmatprep.subr.bf16.mxu0 %v7070_v0  ;;  %v238_v44 = vld [vmem:[%s9529_s0 + $0x6e0] sm:$0xff] }
  0x6e   :  { %v5963_v48 = vcombine.high %v230_v43, %v238_v44  ;;  %v338_v34 = vld [vmem:[%s9529_s0 + $0xa00] sm:$0xff] }
  0x6f   :  { %3665 = vmatpush1.bf16.msra.mxu1 %v6978_v50  ;;  %v250_v50 = vld [vmem:[%s9529_s0 + $0x740] sm:$0xff] }
  0x70   :  { %4593 = vmatpush1.bf16.msra.mxu0 %v6979_v51  ;;  %3666 = vmatprep.subr.bf16.mxu1 %v7070_v0  ;;  %v246_v51 = vld [vmem:[%s9529_s0 + $0x720] sm:$0xff]  ;;  %v5970_v61 = vcombine.low %v242_v49, %v250_v50 }
  0x71   :  { %3491 = vmatmul.mubr.bf16.gmra.mrb[24].mxu1 %v5842_v52  ;;  %4594 = vmatprep.subr.bf16.mxu0 %v7070_v0  ;;  %v254_v52 = vld [vmem:[%s9529_s0 + $0x760] sm:$0xff] }
  0x72   :  { %4419 = vmatmul.mubr.bf16.gmra.mrb[24].mxu0 %v5850_v54  ;;  %3498 = vmatprep.mubr.bf16.mxu1 %v5859_v55  ;;  %v5962_v54 = vcombine.low %v230_v43, %v238_v44  ;;  %v5971_v55 = vcombine.high %v242_v49, %v250_v50  ;;  %v342_v36 = vld [vmem:[%s9529_s0 + $0xa20] sm:$0xff] }
  0x73   :  { %4426 = vmatprep.mubr.bf16.mxu0 %v5867_v57  ;;  %3667 = vmatpush1.bf16.msra.mxu1 %v6980_v53  ;;  %v5954_v53 = vcombine.low %v226_v41, %v234_v42  ;;  %v258_v57 = vld [vmem:[%s9529_s0 + $0x780] sm:$0xff] }
  0x74   :  { %4595 = vmatpush1.bf16.msra.mxu0 %v6981_v56  ;;  %3668 = vmatprep.subr.bf16.mxu1 %v7070_v0  ;;  %v5979_v56 = vcombine.high %v246_v51, %v254_v52  ;;  %v354_v42 = vld [vmem:[%s9529_s0 + $0xa80] sm:$0xff] }
  0x75   :  { %4596 = vmatprep.subr.bf16.mxu0 %v7070_v0  ;;  %v362_v43 = vld [vmem:[%s9529_s0 + $0xac0] sm:$0xff] }
  0x76   :  { %v358_v44 = vld [vmem:[%s9529_s0 + $0xaa0] sm:$0xff] }
  0x77   :  { %3669 = vmatpush1.bf16.msra.mxu1 %v6982_v62  ;;  %v5978_v62 = vcombine.low %v246_v51, %v254_v52  ;;  %v370_v50 = vld [vmem:[%s9529_s0 + $0xb00] sm:$0xff] }
  0x78   :  { %4597 = vmatpush1.bf16.msra.mxu0 %v6983_v63  ;;  %3670 = vmatprep.subr.bf16.mxu1 %v7070_v0  ;;  %v5987_v63 = vcombine.high %v258_v57, %v266_v58  ;;  %v378_v51 = vld [vmem:[%s9529_s0 + $0xb40] sm:$0xff] }
  0x79   :  { %3499 = vmatmul.mubr.bf16.gmra.mrb[28].mxu1 %v5858_v1  ;;  %4598 = vmatprep.subr.bf16.mxu0 %v7070_v0  ;;  %v5995_v1 = vcombine.high %v262_v59, %v270_v60  ;;  %v374_v52 = vld [vmem:[%s9529_s0 + $0xb20] sm:$0xff] }
  0x7a   :  { %4427 = vmatmul.mubr.bf16.gmra.mrb[28].mxu0 %v5866_v3  ;;  %3506 = vmatprep.mubr.bf16.mxu1 %v5875_v4  ;;  %v282_v3 = vld [vmem:[%s9529_s0 + $0x840] sm:$0xff] }
  0x7b   :  { %4434 = vmatprep.mubr.bf16.mxu0 %v5883_v6  ;;  %3671 = vmatpush1.bf16.msra.mxu1 %v6984_v2  ;;  %v274_v2 = vld [vmem:[%s9529_s0 + $0x800] sm:$0xff]  ;;  %v5986_v6 = vcombine.low %v258_v57, %v266_v58 }
  0x7c   :  { %4599 = vmatpush1.bf16.msra.mxu0 %v6985_v5  ;;  %3672 = vmatprep.subr.bf16.mxu1 %v7070_v0  ;;  %v278_v4 = vld [vmem:[%s9529_s0 + $0x820] sm:$0xff]  ;;  %v6003_v8 = vcombine.high %v274_v2, %v282_v3 }
  0x7d   :  { %4600 = vmatprep.subr.bf16.mxu0 %v7070_v0  ;;  %v286_v5 = vld [vmem:[%s9529_s0 + $0x860] sm:$0xff] }
  0x7e   :  { %v6011_v9 = vcombine.high %v278_v4, %v286_v5  ;;  %v386_v58 = vld [vmem:[%s9529_s0 + $0xb80] sm:$0xff] }
  0x7f   :  { %3673 = vmatpush1.bf16.msra.mxu1 %v6986_v11  ;;  %v298_v11 = vld [vmem:[%s9529_s0 + $0x8c0] sm:$0xff] }
  0x80   :  { %4601 = vmatpush1.bf16.msra.mxu0 %v6987_v12  ;;  %3874 = vmatprep.subr.bf16.mxu1 %v7070_v0  ;;  %v294_v12 = vld [vmem:[%s9529_s0 + $0x8a0] sm:$0xff] }
  0x81   :  { %3507 = vmatmul.mubr.bf16.gmra.mrb[32].mxu1 %v5874_v13  ;;  %4802 = vmatprep.subr.bf16.mxu0 %v7070_v0  ;;  %v302_v13 = vld [vmem:[%s9529_s0 + $0x8e0] sm:$0xff] }
  0x82   :  { %4435 = vmatmul.mubr.bf16.gmra.mrb[32].mxu0 %v5882_v14  ;;  %3514 = vmatprep.mubr.bf16.mxu1 %v5891_v15  ;;  %v6002_v14 = vcombine.low %v274_v2, %v282_v3  ;;  %v6010_v15 = vcombine.low %v278_v4, %v286_v5  ;;  %v6027_v17 = vcombine.high %v294_v12, %v302_v13  ;;  %v394_v59 = vld [vmem:[%s9529_s0 + $0xbc0] sm:$0xff] }
  0x83   :  { %4442 = vmatprep.mubr.bf16.mxu0 %v5899_v16  ;;  %v6019_v16 = vcombine.high %v290_v10, %v298_v11  ;;  %v390_v60 = vld [vmem:[%s9529_s0 + $0xba0] sm:$0xff]  ;;  %v6114_v5 = vcombine.low %v386_v58, %v394_v59 }
  0x84   :  { %v402_v3 = vld [vmem:[%s9529_s0 + $0xc00] sm:$0xff] }
  0x85   :  { %v406_v4 = vld [vmem:[%s9529_s0 + $0xc20] sm:$0xff] }
  0x89   :  { %3515 = vmatmul.mubr.bf16.gmra.mrb[36].mxu1 %v5890_v21  ;;  %v318_v21 = vld [vmem:[%s9529_s0 + $0x960] sm:$0xff] }
  0x8a   :  { %4443 = vmatmul.mubr.bf16.gmra.mrb[36].mxu0 %v5898_v22  ;;  %3522 = vmatprep.mubr.bf16.mxu1 %v5907_v23  ;;  %v6018_v22 = vcombine.low %v290_v10, %v298_v11  ;;  %v6026_v23 = vcombine.low %v294_v12, %v302_v13  ;;  %v6043_v25 = vcombine.high %v310_v20, %v318_v21  ;;  %v27_v10 = vld [vmem:[%s9529_s0 + $0x48] sm:$0xff] }
  0x8b   :  { %4450 = vmatprep.mubr.bf16.mxu0 %v5915_v24  ;;  %v6035_v24 = vcombine.high %v306_v18, %v314_v19  ;;  %v23_v11 = vld [vmem:[%s9529_s0 + $0x28] sm:$0xff]  ;;  %v6130_v13 = vcombine.low %v402_v3, %v402_v3 }
  0x8c   :  { %v31_v12 = vld [vmem:[%s9529_s0 + $0x68] sm:$0xff] }
  0x91   :  { %3523 = vmatmul.mubr.bf16.gmra.mrb[40].mxu1 %v5906_v29  ;;  %v334_v29 = vld [vmem:[%s9529_s0 + $0x9e0] sm:$0xff] }
  0x92   :  { %4451 = vmatmul.mubr.bf16.gmra.mrb[40].mxu0 %v5914_v30  ;;  %3530 = vmatprep.mubr.bf16.mxu1 %v5923_v31  ;;  %v6034_v30 = vcombine.low %v306_v18, %v314_v19  ;;  %v6042_v31 = vcombine.low %v310_v20, %v318_v21  ;;  %v6059_v33 = vcombine.high %v326_v28, %v334_v29  ;;  %v43_v18 = vld [vmem:[%s9529_s0 + $0xc8] sm:$0xff] }
  0x93   :  { %4458 = vmatprep.mubr.bf16.mxu0 %v5931_v32  ;;  %v6051_v32 = vcombine.high %v322_v26, %v330_v27  ;;  %v39_v20 = vld [vmem:[%s9529_s0 + $0xa8] sm:$0xff] }
  0x94   :  { %v47_v21 = vld [vmem:[%s9529_s0 + $0xe8] sm:$0xff] }
  0x99   :  { %3531 = vmatmul.mubr.bf16.gmra.mrb[44].mxu1 %v5922_v37  ;;  %v350_v37 = vld [vmem:[%s9529_s0 + $0xa60] sm:$0xff] }
  0x9a   :  { %4459 = vmatmul.mubr.bf16.gmra.mrb[44].mxu0 %v5930_v38  ;;  %3538 = vmatprep.mubr.bf16.mxu1 %v5939_v39  ;;  %v6050_v38 = vcombine.low %v322_v26, %v330_v27  ;;  %v6058_v39 = vcombine.low %v326_v28, %v334_v29  ;;  %v6075_v41 = vcombine.high %v342_v36, %v350_v37  ;;  %v6994_v27 = vld [vmem:[%s9528_s1 + $0x108] sm:$0xff]  }
  0x9b   :  { %4466 = vmatprep.mubr.bf16.mxu0 %v5947_v40  ;;  %v6067_v40 = vcombine.high %v338_v34, %v346_v35  ;;  %v5773_v26 = vcombine.high %v39_v20, %v47_v21  ;;  %v6995_v28 = vld [vmem:[%s9528_s1 + $0x308] sm:$0xff]  }
  0x9c   :  { %v51_v29 = vld [vmem:[%s9529_s0 + $0x108] sm:$0xff] }
  0xa1   :  { %3539 = vmatmul.mubr.bf16.gmra.mrb[48].mxu1 %v5938_v45  ;;  %v366_v45 = vld [vmem:[%s9529_s0 + $0xae0] sm:$0xff] }
  0xa2   :  { %4467 = vmatmul.mubr.bf16.gmra.mrb[48].mxu0 %v5946_v46  ;;  %3546 = vmatprep.mubr.bf16.mxu1 %v5955_v47  ;;  %v6066_v46 = vcombine.low %v338_v34, %v346_v35  ;;  %v6074_v47 = vcombine.low %v342_v36, %v350_v37  ;;  %v6091_v49 = vcombine.high %v358_v44, %v366_v45  ;;  %v6996_v37 = vld [vmem:[%s9528_s1 + $0x110] sm:$0xff]  }
  0xa3   :  { %4474 = vmatprep.mubr.bf16.mxu0 %v5963_v48  ;;  %v6083_v48 = vcombine.high %v354_v42, %v362_v43  ;;  %v5772_v34 = vcombine.low %v39_v20, %v47_v21 }
  0xa9   :  { %3547 = vmatmul.mubr.bf16.gmra.mrb[52].mxu1 %v5954_v53  ;;  %v382_v53 = vld [vmem:[%s9529_s0 + $0xb60] sm:$0xff] }
  0xaa   :  { %4475 = vmatmul.mubr.bf16.gmra.mrb[52].mxu0 %v5962_v54  ;;  %3554 = vmatprep.mubr.bf16.mxu1 %v5971_v55  ;;  %v6082_v54 = vcombine.low %v354_v42, %v362_v43  ;;  %v6090_v55 = vcombine.low %v358_v44, %v366_v45  ;;  %v6107_v57 = vcombine.high %v374_v52, %v382_v53  ;;  %v71_v42 = vld [vmem:[%s9529_s0 + $0x1a8] sm:$0xff]  ;;  %v6999_v44 = vld [vmem:[%s9528_s1 + $0x318] sm:$0xff]  }
  0xab   :  { %4482 = vmatprep.mubr.bf16.mxu0 %v5979_v56  ;;  %v6099_v56 = vcombine.high %v370_v50, %v378_v51  ;;  %v79_v43 = vld [vmem:[%s9529_s0 + $0x1e8] sm:$0xff] }
  0xb1   :  { %3555 = vmatmul.mubr.bf16.gmra.mrb[56].mxu1 %v5970_v61  ;;  %v398_v61 = vld [vmem:[%s9529_s0 + $0xbe0] sm:$0xff] }
  0xb2   :  { %4483 = vmatmul.mubr.bf16.gmra.mrb[56].mxu0 %v5978_v62  ;;  %3562 = vmatprep.mubr.bf16.mxu1 %v5987_v63  ;;  %v6098_v62 = vcombine.low %v370_v50, %v378_v51  ;;  %v6106_v63 = vcombine.low %v374_v52, %v382_v53  ;;  %v6123_v2 = vcombine.high %v390_v60, %v398_v61  ;;  %v7001_v50 = vld [vmem:[%s9528_s1 + $0x320] sm:$0xff]   ;;  %v83_v51 = vld [vmem:[%s9529_s0 + $0x208] sm:$0xff] }
  0xb3   :  { %4490 = vmatprep.mubr.bf16.mxu0 %v5995_v1  ;;  %v6115_v1 = vcombine.high %v386_v58, %v394_v59  ;;  %v91_v52 = vld [vmem:[%s9529_s0 + $0x248] sm:$0xff]  ;;  %v5804_v58 = vcombine.low %v71_v42, %v79_v43 }
  0xb4   :  { %v7002_v53 = vld [vmem:[%s9528_s1 + $0x128] sm:$0xff]   ;;  %v5813_v59 = vcombine.high %v83_v51, %v91_v52 }
  0xb9   :  { %3563 = vmatmul.mubr.bf16.gmra.mrb[60].mxu1 %v5986_v6  ;;  %v6122_v6 = vcombine.low %v390_v60, %v398_v61  ;;  %v7004_v61 = vld [vmem:[%s9528_s1 + $0x130] sm:$0xff]  }
  0xba   :  { %4491 = vmatmul.mubr.bf16.gmra.mrb[60].mxu0 %v5994_v7  ;;  %3570 = vmatprep.mubr.bf16.mxu1 %v6003_v8  ;;  %v6131_v7 = vcombine.high %v402_v3, %v402_v3  ;;  %v6139_v8 = vcombine.high %v406_v4, %v406_v4  ;;  %v103_v3 = vld [vmem:[%s9529_s0 + $0x2a8] sm:$0xff] }
  0xbb   :  { %4498 = vmatprep.mubr.bf16.mxu0 %v6011_v9  ;;  %v19_v9 = vld [vmem:[%s9529_s0 + $0x8] sm:$0xff] }
  0xbc   :  { %v5748_v19 = vcombine.low %v19_v9, %v27_v10 }
  0xc1   :  { %3571 = vmatmul.mubr.bf16.gmra.mrb[64].mxu1 %v6002_v14  ;;  %v6138_v14 = vcombine.low %v406_v4, %v406_v4  ;;  %v111_v4 = vld [vmem:[%s9529_s0 + $0x2e8] sm:$0xff] }
  0xc2   :  { %4499 = vmatmul.mubr.bf16.gmra.mrb[64].mxu0 %v6010_v15  ;;  %3578 = vmatprep.mubr.bf16.mxu1 %v6019_v16  ;;  %v5749_v15 = vcombine.high %v19_v9, %v27_v10  ;;  %v5757_v16 = vcombine.high %v23_v11, %v31_v12  ;;  %v5837_v9 = vcombine.high %v103_v3, %v111_v4  ;;  %v7008_v10 = vld [vmem:[%s9528_s1 + $0x140] sm:$0xff]  }
  0xc3   :  { %4506 = vmatprep.mubr.bf16.mxu0 %v6027_v17  ;;  %v35_v17 = vld [vmem:[%s9529_s0 + $0x88] sm:$0xff] }
  0xc9   :  { %3579 = vmatmul.mubr.bf16.gmra.mrb[68].mxu1 %v6018_v22  ;;  %v5756_v22 = vcombine.low %v23_v11, %v31_v12  ;;  %v7009_v11 = vld [vmem:[%s9528_s1 + $0x340] sm:$0xff]   ;;  %v115_v12 = vld [vmem:[%s9529_s0 + $0x308] sm:$0xff] }
  0xca   :  { %4507 = vmatmul.mubr.bf16.gmra.mrb[68].mxu0 %v6026_v23  ;;  %3586 = vmatprep.mubr.bf16.mxu1 %v6035_v24  ;;  %v6992_v23 = vld [vmem:[%s9528_s1 + $0x100] sm:$0xff]  }
  0xcb   :  { %4514 = vmatprep.mubr.bf16.mxu0 %v6043_v25  ;;  %v6993_v24 = vld [vmem:[%s9528_s1 + $0x300] sm:$0xff]   ;;  %v5765_v25 = vcombine.high %v35_v17, %v43_v18 }
  0xd1   :  { %3587 = vmatmul.mubr.bf16.gmra.mrb[72].mxu1 %v6034_v30  ;;  %v59_v30 = vld [vmem:[%s9529_s0 + $0x148] sm:$0xff] }
  0xd2   :  { %4515 = vmatmul.mubr.bf16.gmra.mrb[72].mxu0 %v6042_v31  ;;  %3594 = vmatprep.mubr.bf16.mxu1 %v6051_v32  ;;  %v55_v31 = vld [vmem:[%s9529_s0 + $0x128] sm:$0xff]  ;;  %v5781_v35 = vcombine.high %v51_v29, %v59_v30  ;;  %v5780_v45 = vcombine.low %v51_v29, %v59_v30  ;;  %v7015_v29 = vld [vmem:[%s9528_s1 + $0x358] sm:$0xff]  }
  0xd3   :  { %4522 = vmatprep.mubr.bf16.mxu0 %v6059_v33  ;;  %v63_v32 = vld [vmem:[%s9529_s0 + $0x168] sm:$0xff]  ;;  %v5764_v33 = vcombine.low %v35_v17, %v43_v18 }
  0xd4   :  { %v5789_v36 = vcombine.high %v55_v31, %v63_v32  ;;  %v7011_v17 = vld [vmem:[%s9528_s1 + $0x348] sm:$0xff]  }
  0xd9   :  { %3595 = vmatmul.mubr.bf16.gmra.mrb[76].mxu1 %v6050_v38  ;;  %v6997_v38 = vld [vmem:[%s9528_s1 + $0x310] sm:$0xff]  }
  0xda   :  { %4523 = vmatmul.mubr.bf16.gmra.mrb[76].mxu0 %v6058_v39  ;;  %3602 = vmatprep.mubr.bf16.mxu1 %v6067_v40  ;;  %v67_v39 = vld [vmem:[%s9529_s0 + $0x188] sm:$0xff] }
  0xdb   :  { %4530 = vmatprep.mubr.bf16.mxu0 %v6075_v41  ;;  %v75_v40 = vld [vmem:[%s9529_s0 + $0x1c8] sm:$0xff]  ;;  %v6998_v41 = vld [vmem:[%s9528_s1 + $0x118] sm:$0xff]  }
  0xe1   :  { %3603 = vmatmul.mubr.bf16.gmra.mrb[80].mxu1 %v6066_v46  ;;  %v5788_v46 = vcombine.low %v55_v31, %v63_v32 }
  0xe2   :  { %4531 = vmatmul.mubr.bf16.gmra.mrb[80].mxu0 %v6074_v47  ;;  %3610 = vmatprep.mubr.bf16.mxu1 %v6083_v48  ;;  %v5797_v47 = vcombine.high %v67_v39, %v75_v40  ;;  %v5805_v48 = vcombine.high %v71_v42, %v79_v43 }
  0xe3   :  { %4538 = vmatprep.mubr.bf16.mxu0 %v6091_v49  ;;  %v7000_v49 = vld [vmem:[%s9528_s1 + $0x120] sm:$0xff]  }
  0xe9   :  { %3611 = vmatmul.mubr.bf16.gmra.mrb[84].mxu1 %v6082_v54  ;;  %v87_v54 = vld [vmem:[%s9529_s0 + $0x228] sm:$0xff] }
  0xea   :  { %4539 = vmatmul.mubr.bf16.gmra.mrb[84].mxu0 %v6090_v55  ;;  %3618 = vmatprep.mubr.bf16.mxu1 %v6099_v56  ;;  %v95_v55 = vld [vmem:[%s9529_s0 + $0x268] sm:$0xff] }
  0xeb   :  { %4546 = vmatprep.mubr.bf16.mxu0 %v6107_v57  ;;  %v7003_v56 = vld [vmem:[%s9528_s1 + $0x328] sm:$0xff]   ;;  %v5796_v57 = vcombine.low %v67_v39, %v75_v40  ;;  %v5821_v60 = vcombine.high %v87_v54, %v95_v55 }
  0xec   :  { %v151_v39 = vld [vmem:[%s9529_s0 + $0x428] sm:$0xff] }
  0xed   :  { %v159_v40 = vld [vmem:[%s9529_s0 + $0x468] sm:$0xff] }
  0xf1   :  { %3619 = vmatmul.mubr.bf16.gmra.mrb[88].mxu1 %v6098_v62  ;;  %v7005_v62 = vld [vmem:[%s9528_s1 + $0x330] sm:$0xff]  }
  0xf2   :  { %4547 = vmatmul.mubr.bf16.gmra.mrb[88].mxu0 %v6106_v63  ;;  %3626 = vmatprep.mubr.bf16.mxu1 %v6115_v1  ;;  %v99_v63 = vld [vmem:[%s9529_s0 + $0x288] sm:$0xff] }
  0xf3   :  { %4554 = vmatprep.mubr.bf16.mxu0 %v6123_v2  ;;  %v107_v1 = vld [vmem:[%s9529_s0 + $0x2c8] sm:$0xff]  ;;  %v7006_v2 = vld [vmem:[%s9528_s1 + $0x138] sm:$0xff]  }
  0xf4   :  { %v5828_v18 = vcombine.low %v99_v63, %v107_v1 }
  0xf9   :  { %3627 = vmatmul.mubr.bf16.gmra.mrb[92].mxu1 %v6114_v5  ;;  %v7007_v5 = vld [vmem:[%s9528_s1 + $0x338] sm:$0xff]  }
  0xfa   :  { %4555 = vmatmul.mubr.bf16.gmra.mrb[92].mxu0 %v6122_v6  ;;  %3634 = vmatprep.mubr.bf16.mxu1 %v6131_v7  ;;  %v5812_v6 = vcombine.low %v83_v51, %v91_v52  ;;  %v5820_v7 = vcombine.low %v87_v54, %v95_v55  ;;  %v167_v51 = vld [vmem:[%s9529_s0 + $0x4a8] sm:$0xff]  ;;  %v5884_v55 = vcombine.low %v151_v39, %v159_v40 }
  0xfb   :  { %4562 = vmatprep.mubr.bf16.mxu0 %v6139_v8  ;;  %v5829_v8 = vcombine.high %v99_v63, %v107_v1  ;;  %v175_v52 = vld [vmem:[%s9529_s0 + $0x4e8] sm:$0xff] }
  0xfc   :  { %v5900_v63 = vcombine.low %v167_v51, %v175_v52 }
 0x101   :  { %3635 = vmatmul.mubr.bf16.gmra.mrb[96].mxu1 %v6130_v13  ;;  %v123_v13 = vld [vmem:[%s9529_s0 + $0x348] sm:$0xff] }
 0x102   :  { %4563 = vmatmul.mubr.bf16.gmra.mrb[96].mxu0 %v6138_v14  ;;  %3674 = vmatprep.mubr.bf16.mxu1 %v5749_v15  ;;  %v7010_v14 = vld [vmem:[%s9528_s1 + $0x148] sm:$0xff]   ;;  %v5845_v20 = vcombine.high %v115_v12, %v123_v13  ;;  %v5844_v30 = vcombine.low %v115_v12, %v123_v13 }
 0x103   :  { %4602 = vmatprep.mubr.bf16.mxu0 %v5757_v16  ;;  %v119_v15 = vld [vmem:[%s9529_s0 + $0x328] sm:$0xff] }
 0x104   :  { %v127_v16 = vld [vmem:[%s9529_s0 + $0x368] sm:$0xff] }
 0x105   :  { %v5853_v21 = vcombine.high %v119_v15, %v127_v16  ;;  %v5852_v31 = vcombine.low %v119_v15, %v127_v16  ;;  %v219_v12 = vld [vmem:[%s9529_s0 + $0x648] sm:$0xff] }
 0x106   :  { %v215_v13 = vld [vmem:[%s9529_s0 + $0x628] sm:$0xff] }
 0x109   :  { %3675 = vmatmul.mubr.bf16.vlgmr.msra.gmra.mrb[0].mxu1 %v5748_v19  ;;  %v5836_v19 = vcombine.low %v103_v3, %v111_v4  ;;  %v195_v3 = vld [vmem:[%s9529_s0 + $0x588] sm:$0xff] }
 0x10a   :  { %4603 = vmatmul.mubr.bf16.vlgmr.msra.gmra.mrb[0].mxu0 %v5756_v22  ;;  %3875 = vmatpush1.bf16.msra.mxu1 %v6992_v23  ;;  %v7012_v22 = vld [vmem:[%s9528_s1 + $0x150] sm:$0xff]   ;;  %v203_v4 = vld [vmem:[%s9529_s0 + $0x5c8] sm:$0xff] }
 0x10b   :  { %4803 = vmatpush1.bf16.msra.mxu0 %v6993_v24  ;;  %3682 = vmatprep.mubr.bf16.mxu1 %v5765_v25  ;;  %v7013_v23 = vld [vmem:[%s9528_s1 + $0x350] sm:$0xff]   ;;  %v131_v24 = vld [vmem:[%s9529_s0 + $0x388] sm:$0xff]  ;;  %v5924_v15 = vcombine.low %v195_v3, %v203_v4 }
 0x10c   :  { %4610 = vmatprep.mubr.bf16.mxu0 %v5773_v26  ;;  %3876 = vmatprep.subr.bf16.mxu1 %v7070_v0  ;;  %v139_v25 = vld [vmem:[%s9529_s0 + $0x3c8] sm:$0xff]  ;;  %v7014_v26 = vld [vmem:[%s9528_s1 + $0x158] sm:$0xff]  }
 0x10d   :  { %4804 = vmatprep.subr.bf16.mxu0 %v7070_v0  ;;  %v5861_v32 = vcombine.high %v131_v24, %v139_v25  ;;  %v5860_v42 = vcombine.low %v131_v24, %v139_v25 }
 0x10e   :  { %3877 = vmatpush1.bf16.msra.mxu1 %v6994_v27  ;;  %v135_v27 = vld [vmem:[%s9529_s0 + $0x3a8] sm:$0xff] }
 0x10f   :  { %4805 = vmatpush1.bf16.msra.mxu0 %v6995_v28  ;;  %3878 = vmatprep.subr.bf16.mxu1 %v7070_v0  ;;  %v143_v28 = vld [vmem:[%s9529_s0 + $0x3e8] sm:$0xff] }
 0x110   :  { %4806 = vmatprep.subr.bf16.mxu0 %v7070_v0  ;;  %v5868_v43 = vcombine.low %v135_v27, %v143_v28 }
 0x111   :  { %3683 = vmatmul.mubr.bf16.gmra.mrb[4].mxu1 %v5764_v33  ;;  %v5869_v33 = vcombine.high %v135_v27, %v143_v28  ;;  %v243_v27 = vld [vmem:[%s9529_s0 + $0x708] sm:$0xff] }
 0x112   :  { %4611 = vmatmul.mubr.bf16.gmra.mrb[4].mxu0 %v5772_v34  ;;  %3690 = vmatprep.mubr.bf16.mxu1 %v5781_v35  ;;  %v7016_v34 = vld [vmem:[%s9528_s1 + $0x160] sm:$0xff]   ;;  %v251_v28 = vld [vmem:[%s9529_s0 + $0x748] sm:$0xff] }
 0x113   :  { %4618 = vmatprep.mubr.bf16.mxu0 %v5789_v36  ;;  %3879 = vmatpush1.bf16.msra.mxu1 %v6996_v37  ;;  %v7017_v35 = vld [vmem:[%s9528_s1 + $0x360] sm:$0xff]   ;;  %v147_v36 = vld [vmem:[%s9529_s0 + $0x408] sm:$0xff] }
 0x114   :  { %4807 = vmatpush1.bf16.msra.mxu0 %v6997_v38  ;;  %3880 = vmatprep.subr.bf16.mxu1 %v7070_v0  ;;  %v155_v37 = vld [vmem:[%s9529_s0 + $0x448] sm:$0xff] }
 0x115   :  { %4808 = vmatprep.subr.bf16.mxu0 %v7070_v0  ;;  %v7018_v38 = vld [vmem:[%s9528_s1 + $0x168] sm:$0xff]   ;;  %v5876_v54 = vcombine.low %v147_v36, %v155_v37 }
 0x117   :  { %3881 = vmatpush1.bf16.msra.mxu1 %v6998_v41  ;;  %v7019_v41 = vld [vmem:[%s9528_s1 + $0x368] sm:$0xff]  }
 0x118   :  { %4809 = vmatpush1.bf16.msra.mxu0 %v6999_v44  ;;  %3882 = vmatprep.subr.bf16.mxu1 %v7070_v0  ;;  %v5877_v44 = vcombine.high %v147_v36, %v155_v37  ;;  %v267_v36 = vld [vmem:[%s9529_s0 + $0x7c8] sm:$0xff] }
 0x119   :  { %3691 = vmatmul.mubr.bf16.gmra.mrb[8].mxu1 %v5780_v45  ;;  %4810 = vmatprep.subr.bf16.mxu0 %v7070_v0  ;;  %v5885_v45 = vcombine.high %v151_v39, %v159_v40  ;;  %v263_v37 = vld [vmem:[%s9529_s0 + $0x7a8] sm:$0xff]  ;;  %v5972_v39 = vcombine.low %v243_v27, %v251_v28 }
 0x11a   :  { %4619 = vmatmul.mubr.bf16.gmra.mrb[8].mxu0 %v5788_v46  ;;  %3698 = vmatprep.mubr.bf16.mxu1 %v5797_v47  ;;  %v7020_v46 = vld [vmem:[%s9528_s1 + $0x170] sm:$0xff]  }
 0x11b   :  { %4626 = vmatprep.mubr.bf16.mxu0 %v5805_v48  ;;  %3883 = vmatpush1.bf16.msra.mxu1 %v7000_v49  ;;  %v7021_v47 = vld [vmem:[%s9528_s1 + $0x370] sm:$0xff]   ;;  %v163_v48 = vld [vmem:[%s9529_s0 + $0x488] sm:$0xff] }
 0x11c   :  { %4811 = vmatpush1.bf16.msra.mxu0 %v7001_v50  ;;  %3884 = vmatprep.subr.bf16.mxu1 %v7070_v0  ;;  %v171_v49 = vld [vmem:[%s9529_s0 + $0x4c8] sm:$0xff]  ;;  %v7022_v50 = vld [vmem:[%s9528_s1 + $0x178] sm:$0xff]  }
 0x11d   :  { %4812 = vmatprep.subr.bf16.mxu0 %v7070_v0 }
 0x11f   :  { %3885 = vmatpush1.bf16.msra.mxu1 %v7002_v53  ;;  %v7023_v53 = vld [vmem:[%s9528_s1 + $0x378] sm:$0xff]  }
 0x120   :  { %4813 = vmatpush1.bf16.msra.mxu0 %v7003_v56  ;;  %3886 = vmatprep.subr.bf16.mxu1 %v7070_v0  ;;  %v5893_v56 = vcombine.high %v163_v48, %v171_v49 }
 0x121   :  { %3699 = vmatmul.mubr.bf16.gmra.mrb[12].mxu1 %v5796_v57  ;;  %4814 = vmatprep.subr.bf16.mxu0 %v7070_v0  ;;  %v5901_v57 = vcombine.high %v167_v51, %v175_v52  ;;  %v291_v51 = vld [vmem:[%s9529_s0 + $0x888] sm:$0xff] }
 0x122   :  { %4627 = vmatmul.mubr.bf16.gmra.mrb[12].mxu0 %v5804_v58  ;;  %3706 = vmatprep.mubr.bf16.mxu1 %v5813_v59  ;;  %v179_v58 = vld [vmem:[%s9529_s0 + $0x508] sm:$0xff] }
 0x123   :  { %4634 = vmatprep.mubr.bf16.mxu0 %v5821_v60  ;;  %3887 = vmatpush1.bf16.msra.mxu1 %v7004_v61  ;;  %v187_v59 = vld [vmem:[%s9529_s0 + $0x548] sm:$0xff] }
 0x124   :  { %4815 = vmatpush1.bf16.msra.mxu0 %v7005_v62  ;;  %3888 = vmatprep.subr.bf16.mxu1 %v7070_v0  ;;  %v183_v60 = vld [vmem:[%s9529_s0 + $0x528] sm:$0xff]  ;;  %v5892_v62 = vcombine.low %v163_v48, %v171_v49  ;;  %v5909_v1 = vcombine.high %v179_v58, %v187_v59 }
 0x125   :  { %4816 = vmatprep.subr.bf16.mxu0 %v7070_v0  ;;  %v191_v61 = vld [vmem:[%s9529_s0 + $0x568] sm:$0xff] }
 0x126   :  { %v299_v52 = vld [vmem:[%s9529_s0 + $0x8c8] sm:$0xff] }
 0x127   :  { %3889 = vmatpush1.bf16.msra.mxu1 %v7006_v2  ;;  %v5917_v2 = vcombine.high %v183_v60, %v191_v61 }
 0x128   :  { %4817 = vmatpush1.bf16.msra.mxu0 %v7007_v5  ;;  %3890 = vmatprep.subr.bf16.mxu1 %v7070_v0  ;;  %v199_v5 = vld [vmem:[%s9529_s0 + $0x5a8] sm:$0xff] }
 0x129   :  { %3707 = vmatmul.mubr.bf16.gmra.mrb[16].mxu1 %v5812_v6  ;;  %4818 = vmatprep.subr.bf16.mxu0 %v7070_v0  ;;  %v207_v6 = vld [vmem:[%s9529_s0 + $0x5e8] sm:$0xff] }
 0x12a   :  { %4635 = vmatmul.mubr.bf16.gmra.mrb[16].mxu0 %v5820_v7  ;;  %3714 = vmatprep.mubr.bf16.mxu1 %v5829_v8  ;;  %v5908_v7 = vcombine.low %v179_v58, %v187_v59  ;;  %v5916_v8 = vcombine.low %v183_v60, %v191_v61  ;;  %v5932_v16 = vcombine.low %v199_v5, %v207_v6  ;;  %v307_v59 = vld [vmem:[%s9529_s0 + $0x908] sm:$0xff] }
 0x12b   :  { %4642 = vmatprep.mubr.bf16.mxu0 %v5837_v9  ;;  %3891 = vmatpush1.bf16.msra.mxu1 %v7008_v10  ;;  %v5925_v9 = vcombine.high %v195_v3, %v203_v4  ;;  %v5933_v10 = vcombine.high %v199_v5, %v207_v6  ;;  %v315_v60 = vld [vmem:[%s9529_s0 + $0x948] sm:$0xff] }
 0x12c   :  { %4819 = vmatpush1.bf16.msra.mxu0 %v7009_v11  ;;  %3892 = vmatprep.subr.bf16.mxu1 %v7070_v0  ;;  %v211_v11 = vld [vmem:[%s9529_s0 + $0x608] sm:$0xff] }
 0x12d   :  { %4820 = vmatprep.subr.bf16.mxu0 %v7070_v0  ;;  %v311_v61 = vld [vmem:[%s9529_s0 + $0x928] sm:$0xff] }
 0x12e   :  { %v323_v4 = vld [vmem:[%s9529_s0 + $0x988] sm:$0xff] }
 0x12f   :  { %3893 = vmatpush1.bf16.msra.mxu1 %v7010_v14  ;;  %v223_v14 = vld [vmem:[%s9529_s0 + $0x668] sm:$0xff] }
 0x130   :  { %4821 = vmatpush1.bf16.msra.mxu0 %v7011_v17  ;;  %3894 = vmatprep.subr.bf16.mxu1 %v7070_v0  ;;  %v5941_v17 = vcombine.high %v211_v11, %v219_v12  ;;  %v5948_v24 = vcombine.low %v215_v13, %v223_v14  ;;  %v331_v5 = vld [vmem:[%s9529_s0 + $0x9c8] sm:$0xff] }
 0x131   :  { %3715 = vmatmul.mubr.bf16.gmra.mrb[20].mxu1 %v5828_v18  ;;  %4822 = vmatprep.subr.bf16.mxu0 %v7070_v0  ;;  %v5949_v18 = vcombine.high %v215_v13, %v223_v14  ;;  %v327_v6 = vld [vmem:[%s9529_s0 + $0x9a8] sm:$0xff] }
 0x132   :  { %4643 = vmatmul.mubr.bf16.gmra.mrb[20].mxu0 %v5836_v19  ;;  %3722 = vmatprep.mubr.bf16.mxu1 %v5845_v20  ;;  %v227_v19 = vld [vmem:[%s9529_s0 + $0x688] sm:$0xff] }
 0x133   :  { %4650 = vmatprep.mubr.bf16.mxu0 %v5853_v21  ;;  %3895 = vmatpush1.bf16.msra.mxu1 %v7012_v22  ;;  %v235_v20 = vld [vmem:[%s9529_s0 + $0x6c8] sm:$0xff] }
 0x134   :  { %4823 = vmatpush1.bf16.msra.mxu0 %v7013_v23  ;;  %3896 = vmatprep.subr.bf16.mxu1 %v7070_v0  ;;  %v231_v21 = vld [vmem:[%s9529_s0 + $0x6a8] sm:$0xff]  ;;  %v5940_v23 = vcombine.low %v211_v11, %v219_v12  ;;  %v5957_v25 = vcombine.high %v227_v19, %v235_v20 }
 0x135   :  { %4824 = vmatprep.subr.bf16.mxu0 %v7070_v0  ;;  %v239_v22 = vld [vmem:[%s9529_s0 + $0x6e8] sm:$0xff] }
 0x136   :  { %v339_v12 = vld [vmem:[%s9529_s0 + $0xa08] sm:$0xff] }
 0x137   :  { %3897 = vmatpush1.bf16.msra.mxu1 %v7014_v26  ;;  %v5965_v26 = vcombine.high %v231_v21, %v239_v22  ;;  %v347_v13 = vld [vmem:[%s9529_s0 + $0xa48] sm:$0xff] }
 0x138   :  { %4825 = vmatpush1.bf16.msra.mxu0 %v7015_v29  ;;  %3898 = vmatprep.subr.bf16.mxu1 %v7070_v0  ;;  %v247_v29 = vld [vmem:[%s9529_s0 + $0x728] sm:$0xff] }
 0x139   :  { %3723 = vmatmul.mubr.bf16.gmra.mrb[24].mxu1 %v5844_v30  ;;  %4826 = vmatprep.subr.bf16.mxu0 %v7070_v0  ;;  %v255_v30 = vld [vmem:[%s9529_s0 + $0x768] sm:$0xff] }
 0x13a   :  { %4651 = vmatmul.mubr.bf16.gmra.mrb[24].mxu0 %v5852_v31  ;;  %3730 = vmatprep.mubr.bf16.mxu1 %v5861_v32  ;;  %v5956_v31 = vcombine.low %v227_v19, %v235_v20  ;;  %v5964_v32 = vcombine.low %v231_v21, %v239_v22  ;;  %v5980_v40 = vcombine.low %v247_v29, %v255_v30  ;;  %v343_v14 = vld [vmem:[%s9529_s0 + $0xa28] sm:$0xff] }
 0x13b   :  { %4658 = vmatprep.mubr.bf16.mxu0 %v5869_v33  ;;  %3899 = vmatpush1.bf16.msra.mxu1 %v7016_v34  ;;  %v5973_v33 = vcombine.high %v243_v27, %v251_v28  ;;  %v5981_v34 = vcombine.high %v247_v29, %v255_v30  ;;  %v355_v20 = vld [vmem:[%s9529_s0 + $0xa88] sm:$0xff] }
 0x13c   :  { %4827 = vmatpush1.bf16.msra.mxu0 %v7017_v35  ;;  %3900 = vmatprep.subr.bf16.mxu1 %v7070_v0  ;;  %v259_v35 = vld [vmem:[%s9529_s0 + $0x788] sm:$0xff] }
 0x13d   :  { %4828 = vmatprep.subr.bf16.mxu0 %v7070_v0  ;;  %v363_v21 = vld [vmem:[%s9529_s0 + $0xac8] sm:$0xff] }
 0x13e   :  { %v359_v22 = vld [vmem:[%s9529_s0 + $0xaa8] sm:$0xff] }
 0x13f   :  { %3901 = vmatpush1.bf16.msra.mxu1 %v7018_v38  ;;  %v271_v38 = vld [vmem:[%s9529_s0 + $0x7e8] sm:$0xff] }
 0x140   :  { %4829 = vmatpush1.bf16.msra.mxu0 %v7019_v41  ;;  %3902 = vmatprep.subr.bf16.mxu1 %v7070_v0  ;;  %v5989_v41 = vcombine.high %v259_v35, %v267_v36  ;;  %v5996_v48 = vcombine.low %v263_v37, %v271_v38  ;;  %v371_v28 = vld [vmem:[%s9529_s0 + $0xb08] sm:$0xff] }
 0x141   :  { %3731 = vmatmul.mubr.bf16.gmra.mrb[28].mxu1 %v5860_v42  ;;  %4830 = vmatprep.subr.bf16.mxu0 %v7070_v0  ;;  %v5997_v42 = vcombine.high %v263_v37, %v271_v38  ;;  %v379_v29 = vld [vmem:[%s9529_s0 + $0xb48] sm:$0xff] }
 0x142   :  { %4659 = vmatmul.mubr.bf16.gmra.mrb[28].mxu0 %v5868_v43  ;;  %3738 = vmatprep.mubr.bf16.mxu1 %v5877_v44  ;;  %v275_v43 = vld [vmem:[%s9529_s0 + $0x808] sm:$0xff] }
 0x143   :  { %4666 = vmatprep.mubr.bf16.mxu0 %v5885_v45  ;;  %3903 = vmatpush1.bf16.msra.mxu1 %v7020_v46  ;;  %v283_v44 = vld [vmem:[%s9529_s0 + $0x848] sm:$0xff] }
 0x144   :  { %4831 = vmatpush1.bf16.msra.mxu0 %v7021_v47  ;;  %3904 = vmatprep.subr.bf16.mxu1 %v7070_v0  ;;  %v279_v45 = vld [vmem:[%s9529_s0 + $0x828] sm:$0xff]  ;;  %v5988_v47 = vcombine.low %v259_v35, %v267_v36  ;;  %v6005_v49 = vcombine.high %v275_v43, %v283_v44 }
 0x145   :  { %4832 = vmatprep.subr.bf16.mxu0 %v7070_v0  ;;  %v287_v46 = vld [vmem:[%s9529_s0 + $0x868] sm:$0xff] }
 0x146   :  { %v375_v30 = vld [vmem:[%s9529_s0 + $0xb28] sm:$0xff] }
 0x147   :  { %3905 = vmatpush1.bf16.msra.mxu1 %v7022_v50  ;;  %v6013_v50 = vcombine.high %v279_v45, %v287_v46  ;;  %v387_v36 = vld [vmem:[%s9529_s0 + $0xb88] sm:$0xff] }
 0x148   :  { %4833 = vmatpush1.bf16.msra.mxu0 %v7023_v53  ;;  %4106 = vmatprep.subr.bf16.mxu1 %v7070_v0  ;;  %v295_v53 = vld [vmem:[%s9529_s0 + $0x8a8] sm:$0xff] }
 0x149   :  { %3739 = vmatmul.mubr.bf16.gmra.mrb[32].mxu1 %v5876_v54  ;;  %5034 = vmatprep.subr.bf16.mxu0 %v7070_v0  ;;  %v303_v54 = vld [vmem:[%s9529_s0 + $0x8e8] sm:$0xff] }
 0x14a   :  { %4667 = vmatmul.mubr.bf16.gmra.mrb[32].mxu0 %v5884_v55  ;;  %3746 = vmatprep.mubr.bf16.mxu1 %v5893_v56  ;;  %v6004_v55 = vcombine.low %v275_v43, %v283_v44  ;;  %v6012_v56 = vcombine.low %v279_v45, %v287_v46  ;;  %v6029_v58 = vcombine.high %v295_v53, %v303_v54  ;;  %v395_v37 = vld [vmem:[%s9529_s0 + $0xbc8] sm:$0xff] }
 0x14b   :  { %4674 = vmatprep.mubr.bf16.mxu0 %v5901_v57  ;;  %v6021_v57 = vcombine.high %v291_v51, %v299_v52  ;;  %v391_v38 = vld [vmem:[%s9529_s0 + $0xba8] sm:$0xff]  ;;  %v6116_v46 = vcombine.low %v387_v36, %v395_v37 }
 0x14c   :  { %v403_v44 = vld [vmem:[%s9529_s0 + $0xc08] sm:$0xff] }
 0x14d   :  { %v407_v45 = vld [vmem:[%s9529_s0 + $0xc28] sm:$0xff] }
 0x151   :  { %3747 = vmatmul.mubr.bf16.gmra.mrb[36].mxu1 %v5892_v62  ;;  %v319_v62 = vld [vmem:[%s9529_s0 + $0x968] sm:$0xff] }
 0x152   :  { %4675 = vmatmul.mubr.bf16.gmra.mrb[36].mxu0 %v5900_v63  ;;  %3754 = vmatprep.mubr.bf16.mxu1 %v5909_v1  ;;  %v6020_v63 = vcombine.low %v291_v51, %v299_v52  ;;  %v6028_v1 = vcombine.low %v295_v53, %v303_v54  ;;  %v6045_v3 = vcombine.high %v311_v61, %v319_v62  ;;  %v28_v51 = vld [vmem:[%s9529_s0 + $0x50] sm:$0xff] }
 0x153   :  { %4682 = vmatprep.mubr.bf16.mxu0 %v5917_v2  ;;  %v6037_v2 = vcombine.high %v307_v59, %v315_v60  ;;  %v24_v52 = vld [vmem:[%s9529_s0 + $0x30] sm:$0xff]  ;;  %v6132_v54 = vcombine.low %v403_v44, %v403_v44 }
 0x154   :  { %v32_v53 = vld [vmem:[%s9529_s0 + $0x70] sm:$0xff] }
 0x159   :  { %3755 = vmatmul.mubr.bf16.gmra.mrb[40].mxu1 %v5908_v7  ;;  %v335_v7 = vld [vmem:[%s9529_s0 + $0x9e8] sm:$0xff] }
 0x15a   :  { %4683 = vmatmul.mubr.bf16.gmra.mrb[40].mxu0 %v5916_v8  ;;  %3762 = vmatprep.mubr.bf16.mxu1 %v5925_v9  ;;  %v6036_v8 = vcombine.low %v307_v59, %v315_v60  ;;  %v6044_v9 = vcombine.low %v311_v61, %v319_v62  ;;  %v6061_v11 = vcombine.high %v327_v6, %v335_v7  ;;  %v44_v59 = vld [vmem:[%s9529_s0 + $0xd0] sm:$0xff] }
 0x15b   :  { %4690 = vmatprep.mubr.bf16.mxu0 %v5933_v10  ;;  %v6053_v10 = vcombine.high %v323_v4, %v331_v5  ;;  %v40_v61 = vld [vmem:[%s9529_s0 + $0xb0] sm:$0xff] }
 0x15c   :  { %v48_v62 = vld [vmem:[%s9529_s0 + $0xf0] sm:$0xff] }
 0x161   :  { %3763 = vmatmul.mubr.bf16.gmra.mrb[44].mxu1 %v5924_v15  ;;  %v351_v15 = vld [vmem:[%s9529_s0 + $0xa68] sm:$0xff] }
 0x162   :  { %4691 = vmatmul.mubr.bf16.gmra.mrb[44].mxu0 %v5932_v16  ;;  %3770 = vmatprep.mubr.bf16.mxu1 %v5941_v17  ;;  %v6052_v16 = vcombine.low %v323_v4, %v331_v5  ;;  %v6060_v17 = vcombine.low %v327_v6, %v335_v7  ;;  %v6077_v19 = vcombine.high %v343_v14, %v351_v15  ;;  %v7030_v5 = vld [vmem:[%s9528_s1 + $0x188] sm:$0xff]   ;;  %v52_v7 = vld [vmem:[%s9529_s0 + $0x110] sm:$0xff] }
 0x163   :  { %4698 = vmatprep.mubr.bf16.mxu0 %v5949_v18  ;;  %v6069_v18 = vcombine.high %v339_v12, %v347_v13  ;;  %v5775_v4 = vcombine.high %v40_v61, %v48_v62  ;;  %v7031_v6 = vld [vmem:[%s9528_s1 + $0x388] sm:$0xff]  }
 0x169   :  { %3771 = vmatmul.mubr.bf16.gmra.mrb[48].mxu1 %v5940_v23  ;;  %v367_v23 = vld [vmem:[%s9529_s0 + $0xae8] sm:$0xff] }
 0x16a   :  { %4699 = vmatmul.mubr.bf16.gmra.mrb[48].mxu0 %v5948_v24  ;;  %3778 = vmatprep.mubr.bf16.mxu1 %v5957_v25  ;;  %v6068_v24 = vcombine.low %v339_v12, %v347_v13  ;;  %v6076_v25 = vcombine.low %v343_v14, %v351_v15  ;;  %v6093_v27 = vcombine.high %v359_v22, %v367_v23  ;;  %v7032_v15 = vld [vmem:[%s9528_s1 + $0x190] sm:$0xff]  }
 0x16b   :  { %4706 = vmatprep.mubr.bf16.mxu0 %v5965_v26  ;;  %v6085_v26 = vcombine.high %v355_v20, %v363_v21  ;;  %v5774_v12 = vcombine.low %v40_v61, %v48_v62 }
 0x171   :  { %3779 = vmatmul.mubr.bf16.gmra.mrb[52].mxu1 %v5956_v31  ;;  %v383_v31 = vld [vmem:[%s9529_s0 + $0xb68] sm:$0xff] }
 0x172   :  { %4707 = vmatmul.mubr.bf16.gmra.mrb[52].mxu0 %v5964_v32  ;;  %3786 = vmatprep.mubr.bf16.mxu1 %v5973_v33  ;;  %v6084_v32 = vcombine.low %v355_v20, %v363_v21  ;;  %v6092_v33 = vcombine.low %v359_v22, %v367_v23  ;;  %v6109_v35 = vcombine.high %v375_v30, %v383_v31  ;;  %v72_v20 = vld [vmem:[%s9529_s0 + $0x1b0] sm:$0xff]  ;;  %v7035_v22 = vld [vmem:[%s9528_s1 + $0x398] sm:$0xff]  }
 0x173   :  { %4714 = vmatprep.mubr.bf16.mxu0 %v5981_v34  ;;  %v6101_v34 = vcombine.high %v371_v28, %v379_v29  ;;  %v80_v21 = vld [vmem:[%s9529_s0 + $0x1f0] sm:$0xff] }
 0x179   :  { %3787 = vmatmul.mubr.bf16.gmra.mrb[56].mxu1 %v5972_v39  ;;  %v399_v39 = vld [vmem:[%s9529_s0 + $0xbe8] sm:$0xff] }
 0x17a   :  { %4715 = vmatmul.mubr.bf16.gmra.mrb[56].mxu0 %v5980_v40  ;;  %3794 = vmatprep.mubr.bf16.mxu1 %v5989_v41  ;;  %v6100_v40 = vcombine.low %v371_v28, %v379_v29  ;;  %v6108_v41 = vcombine.low %v375_v30, %v383_v31  ;;  %v6125_v43 = vcombine.high %v391_v38, %v399_v39  ;;  %v7037_v28 = vld [vmem:[%s9528_s1 + $0x3a0] sm:$0xff]   ;;  %v84_v29 = vld [vmem:[%s9529_s0 + $0x210] sm:$0xff]  ;;  %v7038_v31 = vld [vmem:[%s9528_s1 + $0x1a8] sm:$0xff]  }
 0x17b   :  { %4722 = vmatprep.mubr.bf16.mxu0 %v5997_v42  ;;  %v6117_v42 = vcombine.high %v387_v36, %v395_v37  ;;  %v92_v30 = vld [vmem:[%s9529_s0 + $0x250] sm:$0xff]  ;;  %v5806_v36 = vcombine.low %v72_v20, %v80_v21 }
 0x17c   :  { %v5815_v37 = vcombine.high %v84_v29, %v92_v30 }
 0x181   :  { %3795 = vmatmul.mubr.bf16.gmra.mrb[60].mxu1 %v5988_v47  ;;  %v6124_v47 = vcombine.low %v391_v38, %v399_v39  ;;  %v7040_v39 = vld [vmem:[%s9528_s1 + $0x1b0] sm:$0xff]  }
 0x182   :  { %4723 = vmatmul.mubr.bf16.gmra.mrb[60].mxu0 %v5996_v48  ;;  %3802 = vmatprep.mubr.bf16.mxu1 %v6005_v49  ;;  %v6133_v48 = vcombine.high %v403_v44, %v403_v44  ;;  %v6141_v49 = vcombine.high %v407_v45, %v407_v45  ;;  %v104_v44 = vld [vmem:[%s9529_s0 + $0x2b0] sm:$0xff] }
 0x183   :  { %4730 = vmatprep.mubr.bf16.mxu0 %v6013_v50  ;;  %v20_v50 = vld [vmem:[%s9529_s0 + $0x10] sm:$0xff] }
 0x184   :  { %v5750_v60 = vcombine.low %v20_v50, %v28_v51 }
 0x189   :  { %3803 = vmatmul.mubr.bf16.gmra.mrb[64].mxu1 %v6004_v55  ;;  %v6140_v55 = vcombine.low %v407_v45, %v407_v45  ;;  %v112_v45 = vld [vmem:[%s9529_s0 + $0x2f0] sm:$0xff] }
 0x18a   :  { %4731 = vmatmul.mubr.bf16.gmra.mrb[64].mxu0 %v6012_v56  ;;  %3810 = vmatprep.mubr.bf16.mxu1 %v6021_v57  ;;  %v5751_v56 = vcombine.high %v20_v50, %v28_v51  ;;  %v5759_v57 = vcombine.high %v24_v52, %v32_v53  ;;  %v5839_v50 = vcombine.high %v104_v44, %v112_v45  ;;  %v7044_v51 = vld [vmem:[%s9528_s1 + $0x1c0] sm:$0xff]  }
 0x18b   :  { %4738 = vmatprep.mubr.bf16.mxu0 %v6029_v58  ;;  %v36_v58 = vld [vmem:[%s9529_s0 + $0x90] sm:$0xff] }
 0x191   :  { %3811 = vmatmul.mubr.bf16.gmra.mrb[68].mxu1 %v6020_v63  ;;  %v5758_v63 = vcombine.low %v24_v52, %v32_v53  ;;  %v7045_v52 = vld [vmem:[%s9528_s1 + $0x3c0] sm:$0xff]   ;;  %v116_v53 = vld [vmem:[%s9529_s0 + $0x310] sm:$0xff] }
 0x192   :  { %4739 = vmatmul.mubr.bf16.gmra.mrb[68].mxu0 %v6028_v1  ;;  %3818 = vmatprep.mubr.bf16.mxu1 %v6037_v2  ;;  %v7028_v1 = vld [vmem:[%s9528_s1 + $0x180] sm:$0xff]  }
 0x193   :  { %4746 = vmatprep.mubr.bf16.mxu0 %v6045_v3  ;;  %v7029_v2 = vld [vmem:[%s9528_s1 + $0x380] sm:$0xff]   ;;  %v5767_v3 = vcombine.high %v36_v58, %v44_v59 }
 0x199   :  { %3819 = vmatmul.mubr.bf16.gmra.mrb[72].mxu1 %v6036_v8  ;;  %v60_v8 = vld [vmem:[%s9529_s0 + $0x150] sm:$0xff] }
 0x19a   :  { %4747 = vmatmul.mubr.bf16.gmra.mrb[72].mxu0 %v6044_v9  ;;  %3826 = vmatprep.mubr.bf16.mxu1 %v6053_v10  ;;  %v56_v9 = vld [vmem:[%s9529_s0 + $0x130] sm:$0xff]  ;;  %v5783_v13 = vcombine.high %v52_v7, %v60_v8  ;;  %v5782_v23 = vcombine.low %v52_v7, %v60_v8  ;;  %v7051_v7 = vld [vmem:[%s9528_s1 + $0x3d8] sm:$0xff]  }
 0x19b   :  { %4754 = vmatprep.mubr.bf16.mxu0 %v6061_v11  ;;  %v64_v10 = vld [vmem:[%s9529_s0 + $0x170] sm:$0xff]  ;;  %v5766_v11 = vcombine.low %v36_v58, %v44_v59  ;;  %v7047_v58 = vld [vmem:[%s9528_s1 + $0x3c8] sm:$0xff]  }
 0x19c   :  { %v5791_v14 = vcombine.high %v56_v9, %v64_v10 }
 0x1a1   :  { %3827 = vmatmul.mubr.bf16.gmra.mrb[76].mxu1 %v6052_v16  ;;  %v7033_v16 = vld [vmem:[%s9528_s1 + $0x390] sm:$0xff]  }
 0x1a2   :  { %4755 = vmatmul.mubr.bf16.gmra.mrb[76].mxu0 %v6060_v17  ;;  %3834 = vmatprep.mubr.bf16.mxu1 %v6069_v18  ;;  %v68_v17 = vld [vmem:[%s9529_s0 + $0x190] sm:$0xff] }
 0x1a3   :  { %4762 = vmatprep.mubr.bf16.mxu0 %v6077_v19  ;;  %v76_v18 = vld [vmem:[%s9529_s0 + $0x1d0] sm:$0xff]  ;;  %v7034_v19 = vld [vmem:[%s9528_s1 + $0x198] sm:$0xff]  }
 0x1a9   :  { %3835 = vmatmul.mubr.bf16.gmra.mrb[80].mxu1 %v6068_v24  ;;  %v5790_v24 = vcombine.low %v56_v9, %v64_v10 }
 0x1aa   :  { %4763 = vmatmul.mubr.bf16.gmra.mrb[80].mxu0 %v6076_v25  ;;  %3842 = vmatprep.mubr.bf16.mxu1 %v6085_v26  ;;  %v5799_v25 = vcombine.high %v68_v17, %v76_v18  ;;  %v5807_v26 = vcombine.high %v72_v20, %v80_v21 }
 0x1ab   :  { %4770 = vmatprep.mubr.bf16.mxu0 %v6093_v27  ;;  %v7036_v27 = vld [vmem:[%s9528_s1 + $0x1a0] sm:$0xff]  }
 0x1b1   :  { %3843 = vmatmul.mubr.bf16.gmra.mrb[84].mxu1 %v6084_v32  ;;  %v88_v32 = vld [vmem:[%s9529_s0 + $0x230] sm:$0xff] }
 0x1b2   :  { %4771 = vmatmul.mubr.bf16.gmra.mrb[84].mxu0 %v6092_v33  ;;  %3850 = vmatprep.mubr.bf16.mxu1 %v6101_v34  ;;  %v96_v33 = vld [vmem:[%s9529_s0 + $0x270] sm:$0xff]  ;;  %v7039_v34 = vld [vmem:[%s9528_s1 + $0x3a8] sm:$0xff]  }
 0x1b3   :  { %4778 = vmatprep.mubr.bf16.mxu0 %v6109_v35  ;;  %v5798_v35 = vcombine.low %v68_v17, %v76_v18  ;;  %v5823_v38 = vcombine.high %v88_v32, %v96_v33  ;;  %v152_v17 = vld [vmem:[%s9529_s0 + $0x430] sm:$0xff] }
 0x1b4   :  { %v160_v18 = vld [vmem:[%s9529_s0 + $0x470] sm:$0xff] }
 0x1b9   :  { %3851 = vmatmul.mubr.bf16.gmra.mrb[88].mxu1 %v6100_v40  ;;  %v7041_v40 = vld [vmem:[%s9528_s1 + $0x3b0] sm:$0xff]  }
 0x1ba   :  { %4779 = vmatmul.mubr.bf16.gmra.mrb[88].mxu0 %v6108_v41  ;;  %3858 = vmatprep.mubr.bf16.mxu1 %v6117_v42  ;;  %v100_v41 = vld [vmem:[%s9529_s0 + $0x290] sm:$0xff] }
 0x1bb   :  { %4786 = vmatprep.mubr.bf16.mxu0 %v6125_v43  ;;  %v108_v42 = vld [vmem:[%s9529_s0 + $0x2d0] sm:$0xff]  ;;  %v7042_v43 = vld [vmem:[%s9528_s1 + $0x1b8] sm:$0xff]  }
 0x1bc   :  { %v5830_v59 = vcombine.low %v100_v41, %v108_v42 }
 0x1c1   :  { %3859 = vmatmul.mubr.bf16.gmra.mrb[92].mxu1 %v6116_v46  ;;  %v7043_v46 = vld [vmem:[%s9528_s1 + $0x3b8] sm:$0xff]  }
 0x1c2   :  { %4787 = vmatmul.mubr.bf16.gmra.mrb[92].mxu0 %v6124_v47  ;;  %3866 = vmatprep.mubr.bf16.mxu1 %v6133_v48  ;;  %v5814_v47 = vcombine.low %v84_v29, %v92_v30  ;;  %v5822_v48 = vcombine.low %v88_v32, %v96_v33  ;;  %v168_v29 = vld [vmem:[%s9529_s0 + $0x4b0] sm:$0xff]  ;;  %v5886_v33 = vcombine.low %v152_v17, %v160_v18 }
 0x1c3   :  { %4794 = vmatprep.mubr.bf16.mxu0 %v6141_v49  ;;  %v5831_v49 = vcombine.high %v100_v41, %v108_v42  ;;  %v176_v30 = vld [vmem:[%s9529_s0 + $0x4f0] sm:$0xff] }
 0x1c9   :  { %3867 = vmatmul.mubr.bf16.gmra.mrb[96].mxu1 %v6132_v54  ;;  %v124_v54 = vld [vmem:[%s9529_s0 + $0x350] sm:$0xff] }
 0x1ca   :  { %4795 = vmatmul.mubr.bf16.gmra.mrb[96].mxu0 %v6140_v55  ;;  %3906 = vmatprep.mubr.bf16.mxu1 %v5751_v56  ;;  %v7046_v55 = vld [vmem:[%s9528_s1 + $0x1c8] sm:$0xff]   ;;  %v120_v56 = vld [vmem:[%s9529_s0 + $0x330] sm:$0xff]  ;;  %v5847_v61 = vcombine.high %v116_v53, %v124_v54  ;;  %v5846_v8 = vcombine.low %v116_v53, %v124_v54 }
 0x1cb   :  { %4834 = vmatprep.mubr.bf16.mxu0 %v5759_v57  ;;  %v128_v57 = vld [vmem:[%s9529_s0 + $0x370] sm:$0xff] }
 0x1cc   :  { %v5855_v62 = vcombine.high %v120_v56, %v128_v57  ;;  %v5854_v9 = vcombine.low %v120_v56, %v128_v57  ;;  %v216_v53 = vld [vmem:[%s9529_s0 + $0x630] sm:$0xff] }
 0x1cd   :  { %v224_v54 = vld [vmem:[%s9529_s0 + $0x670] sm:$0xff] }
 0x1d1   :  { %3907 = vmatmul.mubr.bf16.vlgmr.msra.gmra.mrb[0].mxu1 %v5750_v60  ;;  %v5838_v60 = vcombine.low %v104_v44, %v112_v45  ;;  %v204_v44 = vld [vmem:[%s9529_s0 + $0x5d0] sm:$0xff] }
 0x1d2   :  { %4835 = vmatmul.mubr.bf16.vlgmr.msra.gmra.mrb[0].mxu0 %v5758_v63  ;;  %4107 = vmatpush1.bf16.msra.mxu1 %v7028_v1  ;;  %v7048_v63 = vld [vmem:[%s9528_s1 + $0x1d0] sm:$0xff]  }
 0x1d3   :  { %5035 = vmatpush1.bf16.msra.mxu0 %v7029_v2  ;;  %3914 = vmatprep.mubr.bf16.mxu1 %v5767_v3  ;;  %v7049_v1 = vld [vmem:[%s9528_s1 + $0x3d0] sm:$0xff]  }
 0x1d4   :  { %4842 = vmatprep.mubr.bf16.mxu0 %v5775_v4  ;;  %4108 = vmatprep.subr.bf16.mxu1 %v7070_v0  ;;  %v132_v2 = vld [vmem:[%s9529_s0 + $0x390] sm:$0xff]  ;;  %v7050_v4 = vld [vmem:[%s9528_s1 + $0x1d8] sm:$0xff]  }
 0x1d5   :  { %5036 = vmatprep.subr.bf16.mxu0 %v7070_v0  ;;  %v140_v3 = vld [vmem:[%s9529_s0 + $0x3d0] sm:$0xff] }
 0x1d6   :  { %4109 = vmatpush1.bf16.msra.mxu1 %v7030_v5  ;;  %v136_v5 = vld [vmem:[%s9529_s0 + $0x3b0] sm:$0xff]  ;;  %v5863_v10 = vcombine.high %v132_v2, %v140_v3  ;;  %v5862_v20 = vcombine.low %v132_v2, %v140_v3 }
 0x1d7   :  { %5037 = vmatpush1.bf16.msra.mxu0 %v7031_v6  ;;  %4110 = vmatprep.subr.bf16.mxu1 %v7070_v0  ;;  %v144_v6 = vld [vmem:[%s9529_s0 + $0x3f0] sm:$0xff] }
 0x1d8   :  { %5038 = vmatprep.subr.bf16.mxu0 %v7070_v0  ;;  %v5870_v21 = vcombine.low %v136_v5, %v144_v6  ;;  %v200_v45 = vld [vmem:[%s9529_s0 + $0x5b0] sm:$0xff] }
 0x1d9   :  { %3915 = vmatmul.mubr.bf16.gmra.mrb[4].mxu1 %v5766_v11  ;;  %v5871_v11 = vcombine.high %v136_v5, %v144_v6  ;;  %v252_v5 = vld [vmem:[%s9529_s0 + $0x750] sm:$0xff] }
 0x1da   :  { %4843 = vmatmul.mubr.bf16.gmra.mrb[4].mxu0 %v5774_v12  ;;  %3922 = vmatprep.mubr.bf16.mxu1 %v5783_v13  ;;  %v7052_v12 = vld [vmem:[%s9528_s1 + $0x1e0] sm:$0xff]   ;;  %v248_v6 = vld [vmem:[%s9529_s0 + $0x730] sm:$0xff] }
 0x1db   :  { %4850 = vmatprep.mubr.bf16.mxu0 %v5791_v14  ;;  %4111 = vmatpush1.bf16.msra.mxu1 %v7032_v15  ;;  %v7053_v13 = vld [vmem:[%s9528_s1 + $0x3e0] sm:$0xff]   ;;  %v148_v14 = vld [vmem:[%s9529_s0 + $0x410] sm:$0xff] }
 0x1dc   :  { %5039 = vmatpush1.bf16.msra.mxu0 %v7033_v16  ;;  %4112 = vmatprep.subr.bf16.mxu1 %v7070_v0  ;;  %v156_v15 = vld [vmem:[%s9529_s0 + $0x450] sm:$0xff]  ;;  %v7054_v16 = vld [vmem:[%s9528_s1 + $0x1e8] sm:$0xff]  }
 0x1dd   :  { %5040 = vmatprep.subr.bf16.mxu0 %v7070_v0  ;;  %v5878_v32 = vcombine.low %v148_v14, %v156_v15 }
 0x1df   :  { %4113 = vmatpush1.bf16.msra.mxu1 %v7034_v19  ;;  %v7055_v19 = vld [vmem:[%s9528_s1 + $0x3e8] sm:$0xff]  }
 0x1e0   :  { %5041 = vmatpush1.bf16.msra.mxu0 %v7035_v22  ;;  %4114 = vmatprep.subr.bf16.mxu1 %v7070_v0  ;;  %v5879_v22 = vcombine.high %v148_v14, %v156_v15  ;;  %v264_v14 = vld [vmem:[%s9529_s0 + $0x7b0] sm:$0xff] }
 0x1e1   :  { %3923 = vmatmul.mubr.bf16.gmra.mrb[8].mxu1 %v5782_v23  ;;  %5042 = vmatprep.subr.bf16.mxu0 %v7070_v0  ;;  %v5887_v23 = vcombine.high %v152_v17, %v160_v18  ;;  %v272_v15 = vld [vmem:[%s9529_s0 + $0x7f0] sm:$0xff] }
 0x1e2   :  { %4851 = vmatmul.mubr.bf16.gmra.mrb[8].mxu0 %v5790_v24  ;;  %3930 = vmatprep.mubr.bf16.mxu1 %v5799_v25  ;;  %v7056_v24 = vld [vmem:[%s9528_s1 + $0x1f0] sm:$0xff]  }
 0x1e3   :  { %4858 = vmatprep.mubr.bf16.mxu0 %v5807_v26  ;;  %4115 = vmatpush1.bf16.msra.mxu1 %v7036_v27  ;;  %v7057_v25 = vld [vmem:[%s9528_s1 + $0x3f0] sm:$0xff]  }
 0x1e4   :  { %5043 = vmatpush1.bf16.msra.mxu0 %v7037_v28  ;;  %4116 = vmatprep.subr.bf16.mxu1 %v7070_v0  ;;  %v164_v26 = vld [vmem:[%s9529_s0 + $0x490] sm:$0xff]  ;;  %v7058_v28 = vld [vmem:[%s9528_s1 + $0x1f8] sm:$0xff]  }
 0x1e5   :  { %5044 = vmatprep.subr.bf16.mxu0 %v7070_v0  ;;  %v172_v27 = vld [vmem:[%s9529_s0 + $0x4d0] sm:$0xff] }
 0x1e7   :  { %4117 = vmatpush1.bf16.msra.mxu1 %v7038_v31  ;;  %v7059_v31 = vld [vmem:[%s9528_s1 + $0x3f8] sm:$0xff]  }
 0x1e8   :  { %5045 = vmatpush1.bf16.msra.mxu0 %v7039_v34  ;;  %4118 = vmatprep.subr.bf16.mxu1 %v7070_v0  ;;  %v5895_v34 = vcombine.high %v164_v26, %v172_v27 }
 0x1e9   :  { %3931 = vmatmul.mubr.bf16.gmra.mrb[12].mxu1 %v5798_v35  ;;  %5046 = vmatprep.subr.bf16.mxu0 %v7070_v0  ;;  %v5903_v35 = vcombine.high %v168_v29, %v176_v30 }
 0x1ea   :  { %4859 = vmatmul.mubr.bf16.gmra.mrb[12].mxu0 %v5806_v36  ;;  %3938 = vmatprep.mubr.bf16.mxu1 %v5815_v37  ;;  %v180_v36 = vld [vmem:[%s9529_s0 + $0x510] sm:$0xff] }
 0x1eb   :  { %4866 = vmatprep.mubr.bf16.mxu0 %v5823_v38  ;;  %4119 = vmatpush1.bf16.msra.mxu1 %v7040_v39  ;;  %v188_v37 = vld [vmem:[%s9529_s0 + $0x550] sm:$0xff]  ;;  %v5894_v39 = vcombine.low %v164_v26, %v172_v27 }
 0x1ec   :  { %5047 = vmatpush1.bf16.msra.mxu0 %v7041_v40  ;;  %4120 = vmatprep.subr.bf16.mxu1 %v7070_v0  ;;  %v192_v38 = vld [vmem:[%s9529_s0 + $0x570] sm:$0xff]  ;;  %v5902_v40 = vcombine.low %v168_v29, %v176_v30  ;;  %v5911_v41 = vcombine.high %v180_v36, %v188_v37 }
 0x1ed   :  { %5048 = vmatprep.subr.bf16.mxu0 %v7070_v0  ;;  %v300_v29 = vld [vmem:[%s9529_s0 + $0x8d0] sm:$0xff] }
 0x1ee   :  { %v296_v30 = vld [vmem:[%s9529_s0 + $0x8b0] sm:$0xff] }
 0x1ef   :  { %4121 = vmatpush1.bf16.msra.mxu1 %v7042_v43  ;;  %v196_v43 = vld [vmem:[%s9529_s0 + $0x590] sm:$0xff] }
 0x1f0   :  { %5049 = vmatpush1.bf16.msra.mxu0 %v7043_v46  ;;  %4122 = vmatprep.subr.bf16.mxu1 %v7070_v0  ;;  %v208_v46 = vld [vmem:[%s9529_s0 + $0x5f0] sm:$0xff] }
 0x1f1   :  { %3939 = vmatmul.mubr.bf16.gmra.mrb[16].mxu1 %v5814_v47  ;;  %5050 = vmatprep.subr.bf16.mxu0 %v7070_v0  ;;  %v5910_v47 = vcombine.low %v180_v36, %v188_v37  ;;  %v5934_v56 = vcombine.low %v200_v45, %v208_v46  ;;  %v308_v36 = vld [vmem:[%s9529_s0 + $0x910] sm:$0xff] }
 0x1f2   :  { %4867 = vmatmul.mubr.bf16.gmra.mrb[16].mxu0 %v5822_v48  ;;  %3946 = vmatprep.mubr.bf16.mxu1 %v5831_v49  ;;  %v5927_v49 = vcombine.high %v196_v43, %v204_v44  ;;  %v316_v37 = vld [vmem:[%s9529_s0 + $0x950] sm:$0xff] }
 0x1f3   :  { %4874 = vmatprep.mubr.bf16.mxu0 %v5839_v50  ;;  %4123 = vmatpush1.bf16.msra.mxu1 %v7044_v51  ;;  %v5935_v50 = vcombine.high %v200_v45, %v208_v46  ;;  %v212_v51 = vld [vmem:[%s9529_s0 + $0x610] sm:$0xff] }
 0x1f4   :  { %5051 = vmatpush1.bf16.msra.mxu0 %v7045_v52  ;;  %4124 = vmatprep.subr.bf16.mxu1 %v7070_v0  ;;  %v220_v52 = vld [vmem:[%s9529_s0 + $0x650] sm:$0xff] }
 0x1f5   :  { %5052 = vmatprep.subr.bf16.mxu0 %v7070_v0  ;;  %v5943_v57 = vcombine.high %v212_v51, %v220_v52  ;;  %v328_v45 = vld [vmem:[%s9529_s0 + $0x9b0] sm:$0xff] }
 0x1f6   :  { %v336_v46 = vld [vmem:[%s9529_s0 + $0x9f0] sm:$0xff] }
 0x1f7   :  { %4125 = vmatpush1.bf16.msra.mxu1 %v7046_v55  ;;  %v5926_v55 = vcombine.low %v196_v43, %v204_v44  ;;  %v324_v43 = vld [vmem:[%s9529_s0 + $0x990] sm:$0xff] }
 0x1f8   :  { %5053 = vmatpush1.bf16.msra.mxu0 %v7047_v58  ;;  %4126 = vmatprep.subr.bf16.mxu1 %v7070_v0  ;;  %v5951_v58 = vcombine.high %v216_v53, %v224_v54  ;;  %v332_v44 = vld [vmem:[%s9529_s0 + $0x9d0] sm:$0xff] }
 0x1f9   :  { %3947 = vmatmul.mubr.bf16.gmra.mrb[20].mxu1 %v5830_v59  ;;  %5054 = vmatprep.subr.bf16.mxu0 %v7070_v0  ;;  %v228_v59 = vld [vmem:[%s9529_s0 + $0x690] sm:$0xff] }
 0x1fa   :  { %4875 = vmatmul.mubr.bf16.gmra.mrb[20].mxu0 %v5838_v60  ;;  %3954 = vmatprep.mubr.bf16.mxu1 %v5847_v61  ;;  %v236_v60 = vld [vmem:[%s9529_s0 + $0x6d0] sm:$0xff] }
 0x1fb   :  { %4882 = vmatprep.mubr.bf16.mxu0 %v5855_v62  ;;  %4127 = vmatpush1.bf16.msra.mxu1 %v7048_v63  ;;  %v232_v61 = vld [vmem:[%s9529_s0 + $0x6b0] sm:$0xff]  ;;  %v5942_v63 = vcombine.low %v212_v51, %v220_v52  ;;  %v5959_v2 = vcombine.high %v228_v59, %v236_v60 }
 0x1fc   :  { %5055 = vmatpush1.bf16.msra.mxu0 %v7049_v1  ;;  %4128 = vmatprep.subr.bf16.mxu1 %v7070_v0  ;;  %v240_v62 = vld [vmem:[%s9529_s0 + $0x6f0] sm:$0xff]  ;;  %v5950_v1 = vcombine.low %v216_v53, %v224_v54 }
 0x1fd   :  { %5056 = vmatprep.subr.bf16.mxu0 %v7070_v0  ;;  %v5967_v3 = vcombine.high %v232_v61, %v240_v62  ;;  %v340_v51 = vld [vmem:[%s9529_s0 + $0xa10] sm:$0xff] }
 0x1fe   :  { %v348_v52 = vld [vmem:[%s9529_s0 + $0xa50] sm:$0xff] }
 0x1ff   :  { %4129 = vmatpush1.bf16.msra.mxu1 %v7050_v4  ;;  %v244_v4 = vld [vmem:[%s9529_s0 + $0x710] sm:$0xff] }
 0x200   :  { %5057 = vmatpush1.bf16.msra.mxu0 %v7051_v7  ;;  %4130 = vmatprep.subr.bf16.mxu1 %v7070_v0  ;;  %v256_v7 = vld [vmem:[%s9529_s0 + $0x770] sm:$0xff] }
 0x201   :  { %3955 = vmatmul.mubr.bf16.gmra.mrb[24].mxu1 %v5846_v8  ;;  %5058 = vmatprep.subr.bf16.mxu0 %v7070_v0  ;;  %v5958_v8 = vcombine.low %v228_v59, %v236_v60  ;;  %v5982_v17 = vcombine.low %v248_v6, %v256_v7  ;;  %v344_v53 = vld [vmem:[%s9529_s0 + $0xa30] sm:$0xff] }
 0x202   :  { %4883 = vmatmul.mubr.bf16.gmra.mrb[24].mxu0 %v5854_v9  ;;  %3962 = vmatprep.mubr.bf16.mxu1 %v5863_v10  ;;  %v5966_v9 = vcombine.low %v232_v61, %v240_v62  ;;  %v5975_v10 = vcombine.high %v244_v4, %v252_v5  ;;  %v352_v54 = vld [vmem:[%s9529_s0 + $0xa70] sm:$0xff] }
 0x203   :  { %4890 = vmatprep.mubr.bf16.mxu0 %v5871_v11  ;;  %4131 = vmatpush1.bf16.msra.mxu1 %v7052_v12  ;;  %v5983_v11 = vcombine.high %v248_v6, %v256_v7  ;;  %v260_v12 = vld [vmem:[%s9529_s0 + $0x790] sm:$0xff] }
 0x204   :  { %5059 = vmatpush1.bf16.msra.mxu0 %v7053_v13  ;;  %4132 = vmatprep.subr.bf16.mxu1 %v7070_v0  ;;  %v268_v13 = vld [vmem:[%s9529_s0 + $0x7d0] sm:$0xff] }
 0x205   :  { %5060 = vmatprep.subr.bf16.mxu0 %v7070_v0  ;;  %v5991_v18 = vcombine.high %v260_v12, %v268_v13  ;;  %v356_v59 = vld [vmem:[%s9529_s0 + $0xa90] sm:$0xff] }
 0x206   :  { %v364_v60 = vld [vmem:[%s9529_s0 + $0xad0] sm:$0xff] }
 0x207   :  { %4133 = vmatpush1.bf16.msra.mxu1 %v7054_v16  ;;  %v5974_v16 = vcombine.low %v244_v4, %v252_v5  ;;  %v360_v61 = vld [vmem:[%s9529_s0 + $0xab0] sm:$0xff] }
 0x208   :  { %5061 = vmatpush1.bf16.msra.mxu0 %v7055_v19  ;;  %4134 = vmatprep.subr.bf16.mxu1 %v7070_v0  ;;  %v5999_v19 = vcombine.high %v264_v14, %v272_v15  ;;  %v368_v62 = vld [vmem:[%s9529_s0 + $0xaf0] sm:$0xff] }
 0x209   :  { %3963 = vmatmul.mubr.bf16.gmra.mrb[28].mxu1 %v5862_v20  ;;  %5062 = vmatprep.subr.bf16.mxu0 %v7070_v0  ;;  %v276_v20 = vld [vmem:[%s9529_s0 + $0x810] sm:$0xff] }
 0x20a   :  { %4891 = vmatmul.mubr.bf16.gmra.mrb[28].mxu0 %v5870_v21  ;;  %3970 = vmatprep.mubr.bf16.mxu1 %v5879_v22  ;;  %v284_v21 = vld [vmem:[%s9529_s0 + $0x850] sm:$0xff] }
 0x20b   :  { %4898 = vmatprep.mubr.bf16.mxu0 %v5887_v23  ;;  %4135 = vmatpush1.bf16.msra.mxu1 %v7056_v24  ;;  %v280_v22 = vld [vmem:[%s9529_s0 + $0x830] sm:$0xff]  ;;  %v5990_v24 = vcombine.low %v260_v12, %v268_v13  ;;  %v6007_v26 = vcombine.high %v276_v20, %v284_v21 }
 0x20c   :  { %5063 = vmatpush1.bf16.msra.mxu0 %v7057_v25  ;;  %4136 = vmatprep.subr.bf16.mxu1 %v7070_v0  ;;  %v288_v23 = vld [vmem:[%s9529_s0 + $0x870] sm:$0xff]  ;;  %v5998_v25 = vcombine.low %v264_v14, %v272_v15 }
 0x20d   :  { %5064 = vmatprep.subr.bf16.mxu0 %v7070_v0  ;;  %v184_v0 = vld [vmem:[%s9529_s0 + $0x530] sm:$0xff]  ;;  %v6015_v27 = vcombine.high %v280_v22, %v288_v23 }
 0x20e   :  { %v5919_v42 = vcombine.high %v184_v0, %v192_v38  ;;  %v5918_v48 = vcombine.low %v184_v0, %v192_v38  ;;  %v312_v0 = vld [vmem:[%s9529_s0 + $0x930] sm:$0xff] }
 0x20f   :  { %4137 = vmatpush1.bf16.msra.mxu1 %v7058_v28  ;;  %v292_v28 = vld [vmem:[%s9529_s0 + $0x890] sm:$0xff] }
 0x210   :  { %5065 = vmatpush1.bf16.msra.mxu0 %v7059_v31  ;;  %v304_v31 = vld [vmem:[%s9529_s0 + $0x8f0] sm:$0xff] }
 0x211   :  { %3971 = vmatmul.mubr.bf16.gmra.mrb[32].mxu1 %v5878_v32  ;;  %v6006_v32 = vcombine.low %v276_v20, %v284_v21  ;;  %v320_v38 = vld [vmem:[%s9529_s0 + $0x970] sm:$0xff] }
 0x212   :  { %4899 = vmatmul.mubr.bf16.gmra.mrb[32].mxu0 %v5886_v33  ;;  %3978 = vmatprep.mubr.bf16.mxu1 %v5895_v34  ;;  %v6014_v33 = vcombine.low %v280_v22, %v288_v23  ;;  %v6023_v34 = vcombine.high %v292_v28, %v300_v29  ;;  %v372_v4 = vld [vmem:[%s9529_s0 + $0xb10] sm:$0xff] }
 0x213   :  { %4906 = vmatprep.mubr.bf16.mxu0 %v5903_v35  ;;  %v6031_v35 = vcombine.high %v296_v30, %v304_v31  ;;  %v380_v5 = vld [vmem:[%s9529_s0 + $0xb50] sm:$0xff] }
 0x214   :  { %v376_v6 = vld [vmem:[%s9529_s0 + $0xb30] sm:$0xff] }
 0x215   :  { %v384_v7 = vld [vmem:[%s9529_s0 + $0xb70] sm:$0xff] }
 0x216   :  { %v388_v12 = vld [vmem:[%s9529_s0 + $0xb90] sm:$0xff] }
 0x217   :  { %v396_v13 = vld [vmem:[%s9529_s0 + $0xbd0] sm:$0xff] }
 0x218   :  { %v392_v14 = vld [vmem:[%s9529_s0 + $0xbb0] sm:$0xff]  ;;  %v6118_v22 = vcombine.low %v388_v12, %v396_v13 }
 0x219   :  { %3979 = vmatmul.mubr.bf16.gmra.mrb[36].mxu1 %v5894_v39  ;;  %v6022_v39 = vcombine.low %v292_v28, %v300_v29  ;;  %v400_v15 = vld [vmem:[%s9529_s0 + $0xbf0] sm:$0xff]  ;;  %v25_v28 = vld [vmem:[%s9529_s0 + $0x38] sm:$0xff] }
 0x21a   :  { %4907 = vmatmul.mubr.bf16.gmra.mrb[36].mxu0 %v5902_v40  ;;  %3986 = vmatprep.mubr.bf16.mxu1 %v5911_v41  ;;  %v6030_v40 = vcombine.low %v296_v30, %v304_v31  ;;  %v6039_v41 = vcombine.high %v308_v36, %v316_v37  ;;  %v404_v20 = vld [vmem:[%s9529_s0 + $0xc10] sm:$0xff]  ;;  %v6126_v23 = vcombine.low %v392_v14, %v400_v15  ;;  %v33_v29 = vld [vmem:[%s9529_s0 + $0x78] sm:$0xff] }
 0x21b   :  { %4914 = vmatprep.mubr.bf16.mxu0 %v5919_v42  ;;  %v6047_v42 = vcombine.high %v312_v0, %v320_v38  ;;  %v408_v21 = vld [vmem:[%s9529_s0 + $0xc30] sm:$0xff]  ;;  %v6134_v30 = vcombine.low %v404_v20, %v404_v20 }
 0x21c   :  { %v6142_v31 = vcombine.low %v408_v21, %v408_v21 }
 0x221   :  { %3987 = vmatmul.mubr.bf16.gmra.mrb[40].mxu1 %v5910_v47  ;;  %v6038_v47 = vcombine.low %v308_v36, %v316_v37  ;;  %v41_v36 = vld [vmem:[%s9529_s0 + $0xb8] sm:$0xff] }
 0x222   :  { %4915 = vmatmul.mubr.bf16.gmra.mrb[40].mxu0 %v5918_v48  ;;  %3994 = vmatprep.mubr.bf16.mxu1 %v5927_v49  ;;  %v6046_v48 = vcombine.low %v312_v0, %v320_v38  ;;  %v6055_v49 = vcombine.high %v324_v43, %v332_v44  ;;  %v49_v37 = vld [vmem:[%s9529_s0 + $0xf8] sm:$0xff]  ;;  %v5760_v38 = vcombine.low %v25_v28, %v33_v29 }
 0x223   :  { %4922 = vmatprep.mubr.bf16.mxu0 %v5935_v50  ;;  %v6063_v50 = vcombine.high %v328_v45, %v336_v46 }
 0x229   :  { %3995 = vmatmul.mubr.bf16.gmra.mrb[44].mxu1 %v5926_v55  ;;  %v6054_v55 = vcombine.low %v324_v43, %v332_v44  ;;  %v57_v43 = vld [vmem:[%s9529_s0 + $0x138] sm:$0xff] }
 0x22a   :  { %4923 = vmatmul.mubr.bf16.gmra.mrb[44].mxu0 %v5934_v56  ;;  %4002 = vmatprep.mubr.bf16.mxu1 %v5943_v57  ;;  %v6062_v56 = vcombine.low %v328_v45, %v336_v46  ;;  %v6071_v57 = vcombine.high %v340_v51, %v348_v52  ;;  %v65_v44 = vld [vmem:[%s9529_s0 + $0x178] sm:$0xff]  ;;  %v5776_v46 = vcombine.low %v41_v36, %v49_v37 }
 0x22b   :  { %4930 = vmatprep.mubr.bf16.mxu0 %v5951_v58  ;;  %v6079_v58 = vcombine.high %v344_v53, %v352_v54 }
 0x231   :  { %4003 = vmatmul.mubr.bf16.gmra.mrb[48].mxu1 %v5942_v63  ;;  %v6070_v63 = vcombine.low %v340_v51, %v348_v52  ;;  %v73_v51 = vld [vmem:[%s9529_s0 + $0x1b8] sm:$0xff] }
 0x232   :  { %4931 = vmatmul.mubr.bf16.gmra.mrb[48].mxu0 %v5950_v1  ;;  %4010 = vmatprep.mubr.bf16.mxu1 %v5959_v2  ;;  %v6078_v1 = vcombine.low %v344_v53, %v352_v54  ;;  %v6087_v2 = vcombine.high %v356_v59, %v364_v60  ;;  %v81_v52 = vld [vmem:[%s9529_s0 + $0x1f8] sm:$0xff]  ;;  %v5792_v54 = vcombine.low %v57_v43, %v65_v44 }
 0x233   :  { %4938 = vmatprep.mubr.bf16.mxu0 %v5967_v3  ;;  %v6095_v3 = vcombine.high %v360_v61, %v368_v62 }
 0x239   :  { %4011 = vmatmul.mubr.bf16.gmra.mrb[52].mxu1 %v5958_v8  ;;  %v6086_v8 = vcombine.low %v356_v59, %v364_v60  ;;  %v89_v59 = vld [vmem:[%s9529_s0 + $0x238] sm:$0xff] }
 0x23a   :  { %4939 = vmatmul.mubr.bf16.gmra.mrb[52].mxu0 %v5966_v9  ;;  %4018 = vmatprep.mubr.bf16.mxu1 %v5975_v10  ;;  %v6094_v9 = vcombine.low %v360_v61, %v368_v62  ;;  %v6103_v10 = vcombine.high %v372_v4, %v380_v5  ;;  %v97_v60 = vld [vmem:[%s9529_s0 + $0x278] sm:$0xff]  ;;  %v5808_v62 = vcombine.low %v73_v51, %v81_v52 }
 0x23b   :  { %4946 = vmatprep.mubr.bf16.mxu0 %v5983_v11  ;;  %v6111_v11 = vcombine.high %v376_v6, %v384_v7 }
 0x241   :  { %4019 = vmatmul.mubr.bf16.gmra.mrb[56].mxu1 %v5974_v16  ;;  %v6102_v16 = vcombine.low %v372_v4, %v380_v5  ;;  %v105_v4 = vld [vmem:[%s9529_s0 + $0x2b8] sm:$0xff] }
 0x242   :  { %4947 = vmatmul.mubr.bf16.gmra.mrb[56].mxu0 %v5982_v17  ;;  %4026 = vmatprep.mubr.bf16.mxu1 %v5991_v18  ;;  %v6110_v17 = vcombine.low %v376_v6, %v384_v7  ;;  %v6119_v18 = vcombine.high %v388_v12, %v396_v13  ;;  %v113_v5 = vld [vmem:[%s9529_s0 + $0x2f8] sm:$0xff]  ;;  %v5824_v7 = vcombine.low %v89_v59, %v97_v60 }
 0x243   :  { %4954 = vmatprep.mubr.bf16.mxu0 %v5999_v19  ;;  %v6127_v19 = vcombine.high %v392_v14, %v400_v15  ;;  %v121_v12 = vld [vmem:[%s9529_s0 + $0x338] sm:$0xff]  ;;  %v5840_v15 = vcombine.low %v105_v4, %v113_v5 }
 0x244   :  { %v129_v13 = vld [vmem:[%s9529_s0 + $0x378] sm:$0xff] }
 0x249   :  { %4027 = vmatmul.mubr.bf16.gmra.mrb[60].mxu1 %v5990_v24  ;;  %v6135_v24 = vcombine.high %v404_v20, %v404_v20  ;;  %v137_v20 = vld [vmem:[%s9529_s0 + $0x3b8] sm:$0xff] }
 0x24a   :  { %4955 = vmatmul.mubr.bf16.gmra.mrb[60].mxu0 %v5998_v25  ;;  %4034 = vmatprep.mubr.bf16.mxu1 %v6007_v26  ;;  %v6143_v25 = vcombine.high %v408_v21, %v408_v21  ;;  %v21_v26 = vld [vmem:[%s9529_s0 + $0x18] sm:$0xff] }
 0x24b   :  { %4962 = vmatprep.mubr.bf16.mxu0 %v6015_v27  ;;  %v29_v27 = vld [vmem:[%s9529_s0 + $0x58] sm:$0xff] }
 0x24c   :  { %v5752_v0 = vcombine.low %v21_v26, %v29_v27  ;;  %v145_v21 = vld [vmem:[%s9529_s0 + $0x3f8] sm:$0xff] }
 0x251   :  { %4035 = vmatmul.mubr.bf16.gmra.mrb[64].mxu1 %v6006_v32  ;;  %v5753_v32 = vcombine.high %v21_v26, %v29_v27  ;;  %v149_v26 = vld [vmem:[%s9529_s0 + $0x418] sm:$0xff] }
 0x252   :  { %4963 = vmatmul.mubr.bf16.gmra.mrb[64].mxu0 %v6014_v33  ;;  %4042 = vmatprep.mubr.bf16.mxu1 %v6023_v34  ;;  %v5761_v33 = vcombine.high %v25_v28, %v33_v29  ;;  %v37_v34 = vld [vmem:[%s9529_s0 + $0x98] sm:$0xff] }
 0x253   :  { %4970 = vmatprep.mubr.bf16.mxu0 %v6031_v35  ;;  %v45_v35 = vld [vmem:[%s9529_s0 + $0xd8] sm:$0xff] }
 0x254   :  { %v5768_v45 = vcombine.low %v37_v34, %v45_v35  ;;  %v157_v27 = vld [vmem:[%s9529_s0 + $0x458] sm:$0xff] }
 0x255   :  { %v153_v28 = vld [vmem:[%s9529_s0 + $0x438] sm:$0xff] }
 0x256   :  { %v161_v29 = vld [vmem:[%s9529_s0 + $0x478] sm:$0xff] }
 0x259   :  { %4043 = vmatmul.mubr.bf16.gmra.mrb[68].mxu1 %v6022_v39  ;;  %v5769_v39 = vcombine.high %v37_v34, %v45_v35  ;;  %v165_v34 = vld [vmem:[%s9529_s0 + $0x498] sm:$0xff] }
 0x25a   :  { %4971 = vmatmul.mubr.bf16.gmra.mrb[68].mxu0 %v6030_v40  ;;  %4050 = vmatprep.mubr.bf16.mxu1 %v6039_v41  ;;  %v5777_v40 = vcombine.high %v41_v36, %v49_v37  ;;  %v53_v41 = vld [vmem:[%s9529_s0 + $0x118] sm:$0xff] }
 0x25b   :  { %4978 = vmatprep.mubr.bf16.mxu0 %v6047_v42  ;;  %v61_v42 = vld [vmem:[%s9529_s0 + $0x158] sm:$0xff] }
 0x25c   :  { %v5784_v53 = vcombine.low %v53_v41, %v61_v42  ;;  %v173_v35 = vld [vmem:[%s9529_s0 + $0x4d8] sm:$0xff] }
 0x25d   :  { %v169_v36 = vld [vmem:[%s9529_s0 + $0x4b8] sm:$0xff] }
 0x25e   :  { %v177_v37 = vld [vmem:[%s9529_s0 + $0x4f8] sm:$0xff] }
 0x261   :  { %4051 = vmatmul.mubr.bf16.gmra.mrb[72].mxu1 %v6038_v47  ;;  %v5785_v47 = vcombine.high %v53_v41, %v61_v42  ;;  %v181_v41 = vld [vmem:[%s9529_s0 + $0x518] sm:$0xff] }
 0x262   :  { %4979 = vmatmul.mubr.bf16.gmra.mrb[72].mxu0 %v6046_v48  ;;  %4058 = vmatprep.mubr.bf16.mxu1 %v6055_v49  ;;  %v5793_v48 = vcombine.high %v57_v43, %v65_v44  ;;  %v69_v49 = vld [vmem:[%s9529_s0 + $0x198] sm:$0xff] }
 0x263   :  { %4986 = vmatprep.mubr.bf16.mxu0 %v6063_v50  ;;  %v77_v50 = vld [vmem:[%s9529_s0 + $0x1d8] sm:$0xff] }
 0x264   :  { %v5800_v61 = vcombine.low %v69_v49, %v77_v50  ;;  %v189_v42 = vld [vmem:[%s9529_s0 + $0x558] sm:$0xff] }
 0x265   :  { %v185_v43 = vld [vmem:[%s9529_s0 + $0x538] sm:$0xff] }
 0x266   :  { %v193_v44 = vld [vmem:[%s9529_s0 + $0x578] sm:$0xff] }
 0x269   :  { %4059 = vmatmul.mubr.bf16.gmra.mrb[76].mxu1 %v6054_v55  ;;  %v5801_v55 = vcombine.high %v69_v49, %v77_v50  ;;  %v197_v49 = vld [vmem:[%s9529_s0 + $0x598] sm:$0xff] }
 0x26a   :  { %4987 = vmatmul.mubr.bf16.gmra.mrb[76].mxu0 %v6062_v56  ;;  %4066 = vmatprep.mubr.bf16.mxu1 %v6071_v57  ;;  %v5809_v56 = vcombine.high %v73_v51, %v81_v52  ;;  %v85_v57 = vld [vmem:[%s9529_s0 + $0x218] sm:$0xff] }
 0x26b   :  { %4994 = vmatprep.mubr.bf16.mxu0 %v6079_v58  ;;  %v93_v58 = vld [vmem:[%s9529_s0 + $0x258] sm:$0xff] }
 0x26c   :  { %v5816_v6 = vcombine.low %v85_v57, %v93_v58  ;;  %v205_v50 = vld [vmem:[%s9529_s0 + $0x5d8] sm:$0xff] }
 0x26d   :  { %v201_v51 = vld [vmem:[%s9529_s0 + $0x5b8] sm:$0xff] }
 0x26e   :  { %v209_v52 = vld [vmem:[%s9529_s0 + $0x5f8] sm:$0xff] }
 0x271   :  { %4067 = vmatmul.mubr.bf16.gmra.mrb[80].mxu1 %v6070_v63  ;;  %v5817_v63 = vcombine.high %v85_v57, %v93_v58  ;;  %v213_v57 = vld [vmem:[%s9529_s0 + $0x618] sm:$0xff] }
 0x272   :  { %4995 = vmatmul.mubr.bf16.gmra.mrb[80].mxu0 %v6078_v1  ;;  %4074 = vmatprep.mubr.bf16.mxu1 %v6087_v2  ;;  %v5825_v1 = vcombine.high %v89_v59, %v97_v60  ;;  %v101_v2 = vld [vmem:[%s9529_s0 + $0x298] sm:$0xff] }
 0x273   :  { %5002 = vmatprep.mubr.bf16.mxu0 %v6095_v3  ;;  %v109_v3 = vld [vmem:[%s9529_s0 + $0x2d8] sm:$0xff] }
 0x274   :  { %v5832_v14 = vcombine.low %v101_v2, %v109_v3  ;;  %v221_v58 = vld [vmem:[%s9529_s0 + $0x658] sm:$0xff] }
 0x275   :  { %v217_v59 = vld [vmem:[%s9529_s0 + $0x638] sm:$0xff] }
 0x276   :  { %v225_v60 = vld [vmem:[%s9529_s0 + $0x678] sm:$0xff] }
 0x279   :  { %4075 = vmatmul.mubr.bf16.gmra.mrb[84].mxu1 %v6086_v8  ;;  %v5833_v8 = vcombine.high %v101_v2, %v109_v3  ;;  %v229_v2 = vld [vmem:[%s9529_s0 + $0x698] sm:$0xff] }
 0x27a   :  { %5003 = vmatmul.mubr.bf16.gmra.mrb[84].mxu0 %v6094_v9  ;;  %4082 = vmatprep.mubr.bf16.mxu1 %v6103_v10  ;;  %v5841_v9 = vcombine.high %v105_v4, %v113_v5  ;;  %v117_v10 = vld [vmem:[%s9529_s0 + $0x318] sm:$0xff] }
 0x27b   :  { %5010 = vmatprep.mubr.bf16.mxu0 %v6111_v11  ;;  %v125_v11 = vld [vmem:[%s9529_s0 + $0x358] sm:$0xff] }
 0x27c   :  { %v237_v3 = vld [vmem:[%s9529_s0 + $0x6d8] sm:$0xff] }
 0x27d   :  { %v233_v4 = vld [vmem:[%s9529_s0 + $0x6b8] sm:$0xff] }
 0x27e   :  { %v241_v5 = vld [vmem:[%s9529_s0 + $0x6f8] sm:$0xff] }
 0x281   :  { %4083 = vmatmul.mubr.bf16.gmra.mrb[88].mxu1 %v6102_v16  ;;  %v5849_v16 = vcombine.high %v117_v10, %v125_v11 }
 0x282   :  { %5011 = vmatmul.mubr.bf16.gmra.mrb[88].mxu0 %v6110_v17  ;;  %4090 = vmatprep.mubr.bf16.mxu1 %v6119_v18  ;;  %v5857_v17 = vcombine.high %v121_v12, %v129_v13  ;;  %v133_v18 = vld [vmem:[%s9529_s0 + $0x398] sm:$0xff] }
 0x283   :  { %5018 = vmatprep.mubr.bf16.mxu0 %v6127_v19  ;;  %v141_v19 = vld [vmem:[%s9529_s0 + $0x3d8] sm:$0xff] }
 0x289   :  { %4091 = vmatmul.mubr.bf16.gmra.mrb[92].mxu1 %v6118_v22  ;;  %v5848_v22 = vcombine.low %v117_v10, %v125_v11  ;;  %v245_v10 = vld [vmem:[%s9529_s0 + $0x718] sm:$0xff] }
 0x28a   :  { %5019 = vmatmul.mubr.bf16.gmra.mrb[92].mxu0 %v6126_v23  ;;  %4098 = vmatprep.mubr.bf16.mxu1 %v6135_v24  ;;  %v5856_v23 = vcombine.low %v121_v12, %v129_v13  ;;  %v5865_v24 = vcombine.high %v133_v18, %v141_v19  ;;  %v253_v11 = vld [vmem:[%s9529_s0 + $0x758] sm:$0xff] }
 0x28b   :  { %5026 = vmatprep.mubr.bf16.mxu0 %v6143_v25  ;;  %v5873_v25 = vcombine.high %v137_v20, %v145_v21  ;;  %v249_v12 = vld [vmem:[%s9529_s0 + $0x738] sm:$0xff] }
 0x28c   :  { %v257_v13 = vld [vmem:[%s9529_s0 + $0x778] sm:$0xff] }
 0x291   :  { %4099 = vmatmul.mubr.bf16.gmra.mrb[96].mxu1 %v6134_v30  ;;  %v5864_v30 = vcombine.low %v133_v18, %v141_v19  ;;  %v261_v18 = vld [vmem:[%s9529_s0 + $0x798] sm:$0xff] }
 0x292   :  { %5027 = vmatmul.mubr.bf16.gmra.mrb[96].mxu0 %v6142_v31  ;;  %4138 = vmatprep.mubr.bf16.mxu1 %v5753_v32  ;;  %v5872_v31 = vcombine.low %v137_v20, %v145_v21  ;;  %v5881_v32 = vcombine.high %v149_v26, %v157_v27  ;;  %v269_v19 = vld [vmem:[%s9529_s0 + $0x7d8] sm:$0xff] }
 0x293   :  { %5066 = vmatprep.mubr.bf16.mxu0 %v5761_v33  ;;  %v5889_v33 = vcombine.high %v153_v28, %v161_v29  ;;  %v265_v20 = vld [vmem:[%s9529_s0 + $0x7b8] sm:$0xff] }
 0x294   :  { %v273_v21 = vld [vmem:[%s9529_s0 + $0x7f8] sm:$0xff] }
 0x299   :  { %4139 = vmatmul.mubr.bf16.vlgmr.msra.gmra.mrb[0].mxu1 %v5752_v0  ;;  %v5880_v0 = vcombine.low %v149_v26, %v157_v27  ;;  %v277_v26 = vld [vmem:[%s9529_s0 + $0x818] sm:$0xff] }
 0x29a   :  { %5067 = vmatmul.mubr.bf16.vlgmr.msra.gmra.mrb[0].mxu0 %v5760_v38  ;;  %4146 = vmatprep.mubr.bf16.mxu1 %v5769_v39  ;;  %v5888_v38 = vcombine.low %v153_v28, %v161_v29  ;;  %v5897_v39 = vcombine.high %v165_v34, %v173_v35  ;;  %v285_v27 = vld [vmem:[%s9529_s0 + $0x858] sm:$0xff] }
 0x29b   :  { %5074 = vmatprep.mubr.bf16.mxu0 %v5777_v40  ;;  %v5905_v40 = vcombine.high %v169_v36, %v177_v37  ;;  %v281_v28 = vld [vmem:[%s9529_s0 + $0x838] sm:$0xff] }
 0x29c   :  { %v289_v29 = vld [vmem:[%s9529_s0 + $0x878] sm:$0xff] }
 0x2a1   :  { %4147 = vmatmul.mubr.bf16.gmra.mrb[4].mxu1 %v5768_v45  ;;  %v5896_v45 = vcombine.low %v165_v34, %v173_v35  ;;  %v293_v34 = vld [vmem:[%s9529_s0 + $0x898] sm:$0xff] }
 0x2a2   :  { %5075 = vmatmul.mubr.bf16.gmra.mrb[4].mxu0 %v5776_v46  ;;  %4154 = vmatprep.mubr.bf16.mxu1 %v5785_v47  ;;  %v5904_v46 = vcombine.low %v169_v36, %v177_v37  ;;  %v5913_v47 = vcombine.high %v181_v41, %v189_v42  ;;  %v301_v35 = vld [vmem:[%s9529_s0 + $0x8d8] sm:$0xff] }
 0x2a3   :  { %5082 = vmatprep.mubr.bf16.mxu0 %v5793_v48  ;;  %v5921_v48 = vcombine.high %v185_v43, %v193_v44  ;;  %v297_v36 = vld [vmem:[%s9529_s0 + $0x8b8] sm:$0xff] }
 0x2a4   :  { %v305_v37 = vld [vmem:[%s9529_s0 + $0x8f8] sm:$0xff] }
 0x2a9   :  { %4155 = vmatmul.mubr.bf16.gmra.mrb[8].mxu1 %v5784_v53  ;;  %v5912_v53 = vcombine.low %v181_v41, %v189_v42  ;;  %v309_v41 = vld [vmem:[%s9529_s0 + $0x918] sm:$0xff] }
 0x2aa   :  { %5083 = vmatmul.mubr.bf16.gmra.mrb[8].mxu0 %v5792_v54  ;;  %4162 = vmatprep.mubr.bf16.mxu1 %v5801_v55  ;;  %v5920_v54 = vcombine.low %v185_v43, %v193_v44  ;;  %v5929_v55 = vcombine.high %v197_v49, %v205_v50  ;;  %v317_v42 = vld [vmem:[%s9529_s0 + $0x958] sm:$0xff] }
 0x2ab   :  { %5090 = vmatprep.mubr.bf16.mxu0 %v5809_v56  ;;  %v5937_v56 = vcombine.high %v201_v51, %v209_v52  ;;  %v313_v43 = vld [vmem:[%s9529_s0 + $0x938] sm:$0xff] }
 0x2ac   :  { %v321_v44 = vld [vmem:[%s9529_s0 + $0x978] sm:$0xff] }
 0x2b1   :  { %4163 = vmatmul.mubr.bf16.gmra.mrb[12].mxu1 %v5800_v61  ;;  %v5928_v61 = vcombine.low %v197_v49, %v205_v50  ;;  %v325_v49 = vld [vmem:[%s9529_s0 + $0x998] sm:$0xff] }
 0x2b2   :  { %5091 = vmatmul.mubr.bf16.gmra.mrb[12].mxu0 %v5808_v62  ;;  %4170 = vmatprep.mubr.bf16.mxu1 %v5817_v63  ;;  %v5936_v62 = vcombine.low %v201_v51, %v209_v52  ;;  %v5945_v63 = vcombine.high %v213_v57, %v221_v58  ;;  %v333_v50 = vld [vmem:[%s9529_s0 + $0x9d8] sm:$0xff] }
 0x2b3   :  { %5098 = vmatprep.mubr.bf16.mxu0 %v5825_v1  ;;  %v5953_v1 = vcombine.high %v217_v59, %v225_v60  ;;  %v329_v51 = vld [vmem:[%s9529_s0 + $0x9b8] sm:$0xff] }
 0x2b4   :  { %v337_v52 = vld [vmem:[%s9529_s0 + $0x9f8] sm:$0xff] }
 0x2b9   :  { %4171 = vmatmul.mubr.bf16.gmra.mrb[16].mxu1 %v5816_v6  ;;  %v5944_v6 = vcombine.low %v213_v57, %v221_v58  ;;  %v341_v57 = vld [vmem:[%s9529_s0 + $0xa18] sm:$0xff] }
 0x2ba   :  { %5099 = vmatmul.mubr.bf16.gmra.mrb[16].mxu0 %v5824_v7  ;;  %4178 = vmatprep.mubr.bf16.mxu1 %v5833_v8  ;;  %v5952_v7 = vcombine.low %v217_v59, %v225_v60  ;;  %v5961_v8 = vcombine.high %v229_v2, %v237_v3  ;;  %v349_v58 = vld [vmem:[%s9529_s0 + $0xa58] sm:$0xff] }
 0x2bb   :  { %5106 = vmatprep.mubr.bf16.mxu0 %v5841_v9  ;;  %v5969_v9 = vcombine.high %v233_v4, %v241_v5  ;;  %v345_v59 = vld [vmem:[%s9529_s0 + $0xa38] sm:$0xff] }
 0x2bc   :  { %v353_v60 = vld [vmem:[%s9529_s0 + $0xa78] sm:$0xff] }
 0x2c1   :  { %4179 = vmatmul.mubr.bf16.gmra.mrb[20].mxu1 %v5832_v14  ;;  %v5960_v14 = vcombine.low %v229_v2, %v237_v3  ;;  %v357_v2 = vld [vmem:[%s9529_s0 + $0xa98] sm:$0xff] }
 0x2c2   :  { %5107 = vmatmul.mubr.bf16.gmra.mrb[20].mxu0 %v5840_v15  ;;  %4186 = vmatprep.mubr.bf16.mxu1 %v5849_v16  ;;  %v5968_v15 = vcombine.low %v233_v4, %v241_v5  ;;  %v5977_v16 = vcombine.high %v245_v10, %v253_v11  ;;  %v365_v3 = vld [vmem:[%s9529_s0 + $0xad8] sm:$0xff] }
 0x2c3   :  { %5114 = vmatprep.mubr.bf16.mxu0 %v5857_v17  ;;  %v5985_v17 = vcombine.high %v249_v12, %v257_v13  ;;  %v361_v4 = vld [vmem:[%s9529_s0 + $0xab8] sm:$0xff] }
 0x2c4   :  { %v369_v5 = vld [vmem:[%s9529_s0 + $0xaf8] sm:$0xff] }
 0x2c9   :  { %4187 = vmatmul.mubr.bf16.gmra.mrb[24].mxu1 %v5848_v22  ;;  %v5976_v22 = vcombine.low %v245_v10, %v253_v11  ;;  %v373_v10 = vld [vmem:[%s9529_s0 + $0xb18] sm:$0xff] }
 0x2ca   :  { %5115 = vmatmul.mubr.bf16.gmra.mrb[24].mxu0 %v5856_v23  ;;  %4194 = vmatprep.mubr.bf16.mxu1 %v5865_v24  ;;  %v5984_v23 = vcombine.low %v249_v12, %v257_v13  ;;  %v5993_v24 = vcombine.high %v261_v18, %v269_v19  ;;  %v381_v11 = vld [vmem:[%s9529_s0 + $0xb58] sm:$0xff] }
 0x2cb   :  { %5122 = vmatprep.mubr.bf16.mxu0 %v5873_v25  ;;  %v6001_v25 = vcombine.high %v265_v20, %v273_v21  ;;  %v377_v12 = vld [vmem:[%s9529_s0 + $0xb38] sm:$0xff] }
 0x2cc   :  { %v385_v13 = vld [vmem:[%s9529_s0 + $0xb78] sm:$0xff] }
 0x2d1   :  { %4195 = vmatmul.mubr.bf16.gmra.mrb[28].mxu1 %v5864_v30  ;;  %v5992_v30 = vcombine.low %v261_v18, %v269_v19  ;;  %v389_v18 = vld [vmem:[%s9529_s0 + $0xb98] sm:$0xff] }
 0x2d2   :  { %5123 = vmatmul.mubr.bf16.gmra.mrb[28].mxu0 %v5872_v31  ;;  %4202 = vmatprep.mubr.bf16.mxu1 %v5881_v32  ;;  %v6000_v31 = vcombine.low %v265_v20, %v273_v21  ;;  %v6009_v32 = vcombine.high %v277_v26, %v285_v27  ;;  %v397_v19 = vld [vmem:[%s9529_s0 + $0xbd8] sm:$0xff] }
 0x2d3   :  { %5130 = vmatprep.mubr.bf16.mxu0 %v5889_v33  ;;  %v6017_v33 = vcombine.high %v281_v28, %v289_v29  ;;  %v393_v20 = vld [vmem:[%s9529_s0 + $0xbb8] sm:$0xff] }
 0x2d4   :  { %v401_v21 = vld [vmem:[%s9529_s0 + $0xbf8] sm:$0xff] }
 0x2d9   :  { %4203 = vmatmul.mubr.bf16.gmra.mrb[32].mxu1 %v5880_v0  ;;  %v6008_v0 = vcombine.low %v277_v26, %v285_v27  ;;  %v405_v26 = vld [vmem:[%s9529_s0 + $0xc18] sm:$0xff] }
 0x2da   :  { %5131 = vmatmul.mubr.bf16.gmra.mrb[32].mxu0 %v5888_v38  ;;  %4210 = vmatprep.mubr.bf16.mxu1 %v5897_v39  ;;  %v6016_v38 = vcombine.low %v281_v28, %v289_v29  ;;  %v6025_v39 = vcombine.high %v293_v34, %v301_v35  ;;  %v409_v27 = vld [vmem:[%s9529_s0 + $0xc38] sm:$0xff]  ;;  %v6120_v28 = vcombine.low %v389_v18, %v397_v19 }
 0x2db   :  { %5138 = vmatprep.mubr.bf16.mxu0 %v5905_v40  ;;  %v6033_v40 = vcombine.high %v297_v36, %v305_v37  ;;  %v6128_v29 = vcombine.low %v393_v20, %v401_v21 }
 0x2e1   :  { %4211 = vmatmul.mubr.bf16.gmra.mrb[36].mxu1 %v5896_v45  ;;  %v6024_v45 = vcombine.low %v293_v34, %v301_v35 }
 0x2e2   :  { %5139 = vmatmul.mubr.bf16.gmra.mrb[36].mxu0 %v5904_v46  ;;  %4218 = vmatprep.mubr.bf16.mxu1 %v5913_v47  ;;  %v6032_v46 = vcombine.low %v297_v36, %v305_v37  ;;  %v6041_v47 = vcombine.high %v309_v41, %v317_v42 }
 0x2e3   :  { %5146 = vmatprep.mubr.bf16.mxu0 %v5921_v48  ;;  %v6049_v48 = vcombine.high %v313_v43, %v321_v44 }
 0x2e9   :  { %4219 = vmatmul.mubr.bf16.gmra.mrb[40].mxu1 %v5912_v53  ;;  %v6040_v53 = vcombine.low %v309_v41, %v317_v42 }
 0x2ea   :  { %5147 = vmatmul.mubr.bf16.gmra.mrb[40].mxu0 %v5920_v54  ;;  %4226 = vmatprep.mubr.bf16.mxu1 %v5929_v55  ;;  %v6048_v54 = vcombine.low %v313_v43, %v321_v44  ;;  %v6057_v55 = vcombine.high %v325_v49, %v333_v50 }
 0x2eb   :  { %5154 = vmatprep.mubr.bf16.mxu0 %v5937_v56  ;;  %v6065_v56 = vcombine.high %v329_v51, %v337_v52 }
 0x2f1   :  { %4227 = vmatmul.mubr.bf16.gmra.mrb[44].mxu1 %v5928_v61  ;;  %v6056_v61 = vcombine.low %v325_v49, %v333_v50 }
 0x2f2   :  { %5155 = vmatmul.mubr.bf16.gmra.mrb[44].mxu0 %v5936_v62  ;;  %4234 = vmatprep.mubr.bf16.mxu1 %v5945_v63  ;;  %v6064_v62 = vcombine.low %v329_v51, %v337_v52  ;;  %v6073_v63 = vcombine.high %v341_v57, %v349_v58 }
 0x2f3   :  { %5162 = vmatprep.mubr.bf16.mxu0 %v5953_v1  ;;  %v6081_v1 = vcombine.high %v345_v59, %v353_v60 }
 0x2f9   :  { %4235 = vmatmul.mubr.bf16.gmra.mrb[48].mxu1 %v5944_v6  ;;  %v6072_v6 = vcombine.low %v341_v57, %v349_v58 }
 0x2fa   :  { %5163 = vmatmul.mubr.bf16.gmra.mrb[48].mxu0 %v5952_v7  ;;  %4242 = vmatprep.mubr.bf16.mxu1 %v5961_v8  ;;  %v6080_v7 = vcombine.low %v345_v59, %v353_v60  ;;  %v6089_v8 = vcombine.high %v357_v2, %v365_v3 }
 0x2fb   :  { %5170 = vmatprep.mubr.bf16.mxu0 %v5969_v9  ;;  %v6097_v9 = vcombine.high %v361_v4, %v369_v5 }
 0x301   :  { %4243 = vmatmul.mubr.bf16.gmra.mrb[52].mxu1 %v5960_v14  ;;  %v6088_v14 = vcombine.low %v357_v2, %v365_v3 }
 0x302   :  { %5171 = vmatmul.mubr.bf16.gmra.mrb[52].mxu0 %v5968_v15  ;;  %4250 = vmatprep.mubr.bf16.mxu1 %v5977_v16  ;;  %v6096_v15 = vcombine.low %v361_v4, %v369_v5  ;;  %v6105_v16 = vcombine.high %v373_v10, %v381_v11 }
 0x303   :  { %5178 = vmatprep.mubr.bf16.mxu0 %v5985_v17  ;;  %v6113_v17 = vcombine.high %v377_v12, %v385_v13 }
 0x309   :  { %4251 = vmatmul.mubr.bf16.gmra.mrb[56].mxu1 %v5976_v22  ;;  %v6104_v22 = vcombine.low %v373_v10, %v381_v11 }
 0x30a   :  { %5179 = vmatmul.mubr.bf16.gmra.mrb[56].mxu0 %v5984_v23  ;;  %4258 = vmatprep.mubr.bf16.mxu1 %v5993_v24  ;;  %v6112_v23 = vcombine.low %v377_v12, %v385_v13  ;;  %v6121_v24 = vcombine.high %v389_v18, %v397_v19 }
 0x30b   :  { %5186 = vmatprep.mubr.bf16.mxu0 %v6001_v25  ;;  %v6129_v25 = vcombine.high %v393_v20, %v401_v21 }
 0x311   :  { %4259 = vmatmul.mubr.bf16.gmra.mrb[60].mxu1 %v5992_v30  ;;  %v6137_v30 = vcombine.high %v405_v26, %v405_v26 }
 0x312   :  { %5187 = vmatmul.mubr.bf16.gmra.mrb[60].mxu0 %v6000_v31  ;;  %4266 = vmatprep.mubr.bf16.mxu1 %v6009_v32  ;;  %v6145_v31 = vcombine.high %v409_v27, %v409_v27  ;;  %v6136_v32 = vcombine.low %v405_v26, %v405_v26 }
 0x313   :  { %5194 = vmatprep.mubr.bf16.mxu0 %v6017_v33  ;;  %v6144_v33 = vcombine.low %v409_v27, %v409_v27 }
 0x319   :  { %4267 = vmatmul.mubr.bf16.gmra.mrb[64].mxu1 %v6008_v0 }
 0x31a   :  { %5195 = vmatmul.mubr.bf16.gmra.mrb[64].mxu0 %v6016_v38  ;;  %4274 = vmatprep.mubr.bf16.mxu1 %v6025_v39 }
 0x31b   :  { %5202 = vmatprep.mubr.bf16.mxu0 %v6033_v40 }
 0x321   :  { %4275 = vmatmul.mubr.bf16.gmra.mrb[68].mxu1 %v6024_v45 }
 0x322   :  { %5203 = vmatmul.mubr.bf16.gmra.mrb[68].mxu0 %v6032_v46  ;;  %4282 = vmatprep.mubr.bf16.mxu1 %v6041_v47 }
 0x323   :  { %5210 = vmatprep.mubr.bf16.mxu0 %v6049_v48 }
 0x329   :  { %4283 = vmatmul.mubr.bf16.gmra.mrb[72].mxu1 %v6040_v53 }
 0x32a   :  { %5211 = vmatmul.mubr.bf16.gmra.mrb[72].mxu0 %v6048_v54  ;;  %4290 = vmatprep.mubr.bf16.mxu1 %v6057_v55 }
 0x32b   :  { %5218 = vmatprep.mubr.bf16.mxu0 %v6065_v56 }
 0x331   :  { %4291 = vmatmul.mubr.bf16.gmra.mrb[76].mxu1 %v6056_v61 }
 0x332   :  { %5219 = vmatmul.mubr.bf16.gmra.mrb[76].mxu0 %v6064_v62  ;;  %4298 = vmatprep.mubr.bf16.mxu1 %v6073_v63 }
 0x333   :  { %5226 = vmatprep.mubr.bf16.mxu0 %v6081_v1 }
 0x339   :  { %4299 = vmatmul.mubr.bf16.gmra.mrb[80].mxu1 %v6072_v6 }
 0x33a   :  { %5227 = vmatmul.mubr.bf16.gmra.mrb[80].mxu0 %v6080_v7  ;;  %4306 = vmatprep.mubr.bf16.mxu1 %v6089_v8 }
 0x33b   :  { %5234 = vmatprep.mubr.bf16.mxu0 %v6097_v9 }
 0x341   :  { %4307 = vmatmul.mubr.bf16.gmra.mrb[84].mxu1 %v6088_v14 }
 0x342   :  { %5235 = vmatmul.mubr.bf16.gmra.mrb[84].mxu0 %v6096_v15  ;;  %4314 = vmatprep.mubr.bf16.mxu1 %v6105_v16 }
 0x343   :  { %5242 = vmatprep.mubr.bf16.mxu0 %v6113_v17 }
 0x349   :  { %4315 = vmatmul.mubr.bf16.gmra.mrb[88].mxu1 %v6104_v22 }
 0x34a   :  { %5243 = vmatmul.mubr.bf16.gmra.mrb[88].mxu0 %v6112_v23  ;;  %4322 = vmatprep.mubr.bf16.mxu1 %v6121_v24 }
 0x34b   :  { %5250 = vmatprep.mubr.bf16.mxu0 %v6129_v25 }
 0x351   :  { %4323 = vmatmul.mubr.bf16.gmra.mrb[92].mxu1 %v6120_v28 }
 0x352   :  { %5251 = vmatmul.mubr.bf16.gmra.mrb[92].mxu0 %v6128_v29  ;;  %4330 = vmatprep.mubr.bf16.mxu1 %v6137_v30 }
 0x353   :  { %5258 = vmatprep.mubr.bf16.mxu0 %v6145_v31 }
 0x359   :  { %4331 = vmatmul.mubr.bf16.gmra.mrb[96].mxu1 %v6136_v32 }
 0x35a   :  { %5259 = vmatmul.mubr.bf16.gmra.mrb[96].mxu0 %v6144_v33 }
 0x36c   :  { %v4140_v34 = vpop.f32.mrb[0].mxu1 }
 0x36d   :  { %v5068_v35 = vpop.f32.mrb[0].mxu0  ;;  %v4142_v36 = vpop.f32.mrb[1].mxu1 }
 0x36e   :  { %v8796_v37 = vadd.f32 %v5068_v35, %v4140_v34  ;;  %v5070_v0 = vpop.f32.mrb[1].mxu0  ;;  %v4143_v38 = vpop.f32.mrb[2].mxu1 }
 0x36f   :  { %v5071_v39 = vpop.f32.mrb[2].mxu0  ;;  %v4145_v40 = vpop.f32.mrb[3].mxu1 }
 0x370   :  { %v8798_v41 = vadd.f32 %v5071_v39, %v4143_v38  ;;  %v5073_v42 = vpop.f32.mrb[3].mxu0  ;;  %v5372_v31 = vmul.f32 %v8796_v37, %v8796_v37  ;;  %v5267_v0 = vsel %vm5266_vm0, %v8796_v37, 0.0 }
 0x372   :  { %v5373_v30 = vmul.f32 %v8798_v41, %v8798_v41  ;;  %v5268_v32 = vsel %vm5266_vm0, %v8798_v41, 0.0 }
 0x374   :  { %v4148_v43 = vpop.f32.mrb[4].mxu1  ;;  %v5422_v38 = vsel %vm5266_vm0, %v5373_v30, 0.0 }
 0x375   :  { %v5076_v44 = vpop.f32.mrb[4].mxu0  ;;  %v4150_v45 = vpop.f32.mrb[5].mxu1 }
 0x376   :  { %v8800_v46 = vadd.f32 %v5076_v44, %v4148_v43  ;;  %v5078_v47 = vpop.f32.mrb[5].mxu0  ;;  %v4151_v48 = vpop.f32.mrb[6].mxu1  ;;  %v5269_v44 = vadd.f32 %v5268_v32, %v5267_v0 }
 0x377   :  { %v5079_v49 = vpop.f32.mrb[6].mxu0  ;;  %v4153_v50 = vpop.f32.mrb[7].mxu1 }
 0x378   :  { %v8802_v51 = vadd.f32 %v5079_v49, %v4151_v48  ;;  %v5081_v52 = vpop.f32.mrb[7].mxu0  ;;  %v5374_v33 = vmul.f32 %v8800_v46, %v8800_v46  ;;  %v5270_v39 = vsel %vm5266_vm0, %v8800_v46, 0.0  ;;  %v5421_v48 = vsel %vm5266_vm0, %v5372_v31, 0.0 }
 0x37a   :  { %v5424_v49 = vsel %vm5266_vm0, %v5374_v33, 0.0  ;;  %v5375_v50 = vmul.f32 %v8802_v51, %v8802_v51 }
 0x37c   :  { %v4156_v53 = vpop.f32.mrb[8].mxu1 }
 0x37d   :  { %v5084_v54 = vpop.f32.mrb[8].mxu0  ;;  %v4158_v55 = vpop.f32.mrb[9].mxu1 }
 0x37e   :  { %v8804_v56 = vadd.f32 %v5084_v54, %v4156_v53  ;;  %v5086_v57 = vpop.f32.mrb[9].mxu0  ;;  %v4159_v58 = vpop.f32.mrb[10].mxu1  ;;  %v5423_v54 = vadd.f32 %v5422_v38, %v5421_v48  ;;  %v5271_v55 = vadd.f32 %v5270_v39, %v5269_v44 }
 0x37f   :  { %v5087_v59 = vpop.f32.mrb[10].mxu0  ;;  %v4161_v60 = vpop.f32.mrb[11].mxu1  ;;  %v5272_v57 = vsel %vm5266_vm0, %v8802_v51, 0.0 }
 0x380   :  { %v8806_v61 = vadd.f32 %v5087_v59, %v4159_v58  ;;  %v5089_v62 = vpop.f32.mrb[11].mxu0  ;;  %v5376_v58 = vmul.f32 %v8804_v56, %v8804_v56  ;;  %v5425_v59 = vadd.f32 %v5424_v49, %v5423_v54  ;;  %v5426_v60 = vsel %vm5266_vm0, %v5375_v50, 0.0 }
 0x381   :  { %v5274_v62 = vsel %vm5266_vm0, %v8804_v56, 0.0 }
 0x384   :  { %v4164_v63 = vpop.f32.mrb[12].mxu1 }
 0x385   :  { %v5092_v1 = vpop.f32.mrb[12].mxu0  ;;  %v4166_v2 = vpop.f32.mrb[13].mxu1 }
 0x386   :  { %v8808_v3 = vadd.f32 %v5092_v1, %v4164_v63  ;;  %v5094_v4 = vpop.f32.mrb[13].mxu0  ;;  %v4167_v5 = vpop.f32.mrb[14].mxu1  ;;  %v5273_v1 = vadd.f32 %v5272_v57, %v5271_v55 }
 0x387   :  { %v5095_v6 = vpop.f32.mrb[14].mxu0  ;;  %v4169_v7 = vpop.f32.mrb[15].mxu1 }
 0x388   :  { %v8810_v8 = vadd.f32 %v5095_v6, %v4167_v5  ;;  %v5097_v9 = vpop.f32.mrb[15].mxu0  ;;  %v5428_v5 = vsel %vm5266_vm0, %v5376_v58, 0.0  ;;  %v5377_v6 = vmul.f32 %v8806_v61, %v8806_v61 }
 0x38c   :  { %v4172_v10 = vpop.f32.mrb[16].mxu1 }
 0x38d   :  { %v5100_v11 = vpop.f32.mrb[16].mxu0  ;;  %v4174_v12 = vpop.f32.mrb[17].mxu1 }
 0x38e   :  { %v8812_v13 = vadd.f32 %v5100_v11, %v4172_v10  ;;  %v5102_v14 = vpop.f32.mrb[17].mxu0  ;;  %v4175_v15 = vpop.f32.mrb[18].mxu1  ;;  %v5427_v11 = vadd.f32 %v5426_v60, %v5425_v59  ;;  %v5275_v12 = vadd.f32 %v5274_v62, %v5273_v1 }
 0x38f   :  { %v5103_v16 = vpop.f32.mrb[18].mxu0  ;;  %v4177_v17 = vpop.f32.mrb[19].mxu1 }
 0x390   :  { %v8814_v18 = vadd.f32 %v5103_v16, %v4175_v15  ;;  %v5105_v19 = vpop.f32.mrb[19].mxu0  ;;  %v5276_v16 = vsel %vm5266_vm0, %v8806_v61, 0.0  ;;  %v5378_v17 = vmul.f32 %v8808_v3, %v8808_v3 }
 0x392   :  { %v5284_v57 = vsel %vm5266_vm0, %v8814_v18, 0.0 }
 0x394   :  { %v4180_v20 = vpop.f32.mrb[20].mxu1 }
 0x395   :  { %v5108_v21 = vpop.f32.mrb[20].mxu0  ;;  %v4182_v22 = vpop.f32.mrb[21].mxu1 }
 0x396   :  { %v8816_v23 = vadd.f32 %v5108_v21, %v4180_v20  ;;  %v5110_v24 = vpop.f32.mrb[21].mxu0  ;;  %v4183_v25 = vpop.f32.mrb[22].mxu1  ;;  %v5429_v21 = vadd.f32 %v5428_v5, %v5427_v11  ;;  %v5430_v22 = vsel %vm5266_vm0, %v5377_v6, 0.0 }
 0x397   :  { %v5111_v26 = vpop.f32.mrb[22].mxu0  ;;  %v4185_v27 = vpop.f32.mrb[23].mxu1  ;;  %v5278_v24 = vsel %vm5266_vm0, %v8808_v3, 0.0 }
 0x398   :  { %v8818_v28 = vadd.f32 %v5111_v26, %v4183_v25  ;;  %v5113_v29 = vpop.f32.mrb[23].mxu0  ;;  %v5277_v25 = vadd.f32 %v5276_v16, %v5275_v12  ;;  %v5432_v26 = vsel %vm5266_vm0, %v5378_v17, 0.0  ;;  %v5379_v27 = vmul.f32 %v8810_v8, %v8810_v8 }
 0x399   :  { %v5431_v30 = vadd.f32 %v5430_v22, %v5429_v21  ;;  %v5382_v58 = vmul.f32 %v8816_v23, %v8816_v23 }
 0x39a   :  { %v5279_v31 = vadd.f32 %v5278_v24, %v5277_v25  ;;  %v5434_v44 = vsel %vm5266_vm0, %v5379_v27, 0.0  ;;  %v5288_v21 = vsel %vm5266_vm0, %v8818_v28, 0.0 }
 0x39b   :  { %v5433_v39 = vadd.f32 %v5432_v26, %v5431_v30  ;;  %v5440_v12 = vsel %vm5266_vm0, %v5382_v58, 0.0 }
 0x39c   :  { %v4188_v34 = vpop.f32.mrb[24].mxu1 }
 0x39d   :  { %v5116_v35 = vpop.f32.mrb[24].mxu0  ;;  %v4190_v36 = vpop.f32.mrb[25].mxu1  ;;  %v5435_v54 = vadd.f32 %v5434_v44, %v5433_v39 }
 0x39e   :  { %v8833_v40 = vadd.f32 %v5116_v35, %v4188_v34  ;;  %v5118_v42 = vpop.f32.mrb[25].mxu0  ;;  %v4191_v43 = vpop.f32.mrb[26].mxu1  ;;  %v5280_v34 = vsel %vm5266_vm0, %v8810_v8, 0.0  ;;  %v5380_v35 = vmul.f32 %v8812_v13, %v8812_v13 }
 0x39f   :  { %v5119_v45 = vpop.f32.mrb[26].mxu0  ;;  %v4193_v47 = vpop.f32.mrb[27].mxu1  ;;  %v5281_v49 = vadd.f32 %v5280_v34, %v5279_v31 }
 0x3a0   :  { %v8839_v52 = vadd.f32 %v5119_v45, %v4191_v43  ;;  %v5121_v53 = vpop.f32.mrb[27].mxu0  ;;  %v5282_v45 = vsel %vm5266_vm0, %v8812_v13, 0.0  ;;  %v5436_v50 = vsel %vm5266_vm0, %v5380_v35, 0.0  ;;  %v5384_v22 = vmul.f32 %v8833_v40, %v8833_v40 }
 0x3a1   :  { %v5381_v53 = vmul.f32 %v8814_v18, %v8814_v18  ;;  %v5283_v55 = vadd.f32 %v5282_v45, %v5281_v49  ;;  %v5437_v60 = vadd.f32 %v5436_v50, %v5435_v54  ;;  %v5290_v26 = vsel %vm5266_vm0, %v8833_v40, 0.0 }
 0x3a2   :  { %v5292_v44 = vsel %vm5266_vm0, %v8839_v52, 0.0 }
 0x3a3   :  { %v5438_v1 = vsel %vm5266_vm0, %v5381_v53, 0.0 }
 0x3a4   :  { %v4196_v63 = vpop.f32.mrb[28].mxu1  ;;  %v5439_v17 = vadd.f32 %v5438_v1, %v5437_v60 }
 0x3a5   :  { %v5124_v2 = vpop.f32.mrb[28].mxu0  ;;  %v4198_v4 = vpop.f32.mrb[29].mxu1 }
 0x3a6   :  { %v8851_v7 = vadd.f32 %v5124_v2, %v4196_v63  ;;  %v5126_v9 = vpop.f32.mrb[29].mxu0  ;;  %v4199_v10 = vpop.f32.mrb[30].mxu1  ;;  %v5286_v2 = vsel %vm5266_vm0, %v8816_v23, 0.0  ;;  %v5441_v24 = vadd.f32 %v5440_v12, %v5439_v17 }
 0x3a7   :  { %v5127_v14 = vpop.f32.mrb[30].mxu0  ;;  %v4201_v15 = vpop.f32.mrb[31].mxu1  ;;  %v5285_v9 = vadd.f32 %v5284_v57, %v5283_v55 }
 0x3a8   :  { %v8857_v19 = vadd.f32 %v5127_v14, %v4199_v10  ;;  %v5129_v20 = vpop.f32.mrb[31].mxu0  ;;  %v5383_v14 = vmul.f32 %v8818_v28, %v8818_v28  ;;  %v5386_v45 = vmul.f32 %v8851_v7, %v8851_v7  ;;  %v5294_v54 = vsel %vm5266_vm0, %v8851_v7, 0.0 }
 0x3a9   :  { %v5287_v20 = vadd.f32 %v5286_v2, %v5285_v9 }
 0x3aa   :  { %v5442_v25 = vsel %vm5266_vm0, %v5383_v14, 0.0  ;;  %v5448_v57 = vsel %vm5266_vm0, %v5386_v45, 0.0  ;;  %v5387_v58 = vmul.f32 %v8857_v19, %v8857_v19  ;;  %v5296_v2 = vsel %vm5266_vm0, %v8857_v19, 0.0 }
 0x3ac   :  { %v4204_v29 = vpop.f32.mrb[32].mxu1 }
 0x3ad   :  { %v5132_v32 = vpop.f32.mrb[32].mxu0  ;;  %v4206_v33 = vpop.f32.mrb[33].mxu1 }
 0x3ae   :  { %v8869_v36 = vadd.f32 %v5132_v32, %v4204_v29  ;;  %v5134_v0 = vpop.f32.mrb[33].mxu0  ;;  %v4207_v38 = vpop.f32.mrb[34].mxu1  ;;  %v5289_v29 = vadd.f32 %v5288_v21, %v5287_v20  ;;  %v5444_v32 = vsel %vm5266_vm0, %v5384_v22, 0.0  ;;  %v5385_v33 = vmul.f32 %v8839_v52, %v8839_v52 }
 0x3af   :  { %v5135_v42 = vpop.f32.mrb[34].mxu0  ;;  %v4209_v43 = vpop.f32.mrb[35].mxu1 }
 0x3b0   :  { %v8874_v47 = vadd.f32 %v5135_v42, %v4207_v38  ;;  %v5137_v48 = vpop.f32.mrb[35].mxu0  ;;  %v5443_v38 = vadd.f32 %v5442_v25, %v5441_v24  ;;  %v5291_v39 = vadd.f32 %v5290_v26, %v5289_v29  ;;  %v5446_v53 = vsel %vm5266_vm0, %v5385_v33, 0.0 }
 0x3b1   :  { %v5298_v17 = vsel %vm5266_vm0, %v8869_v36, 0.0 }
 0x3b2   :  { %v5445_v50 = vadd.f32 %v5444_v32, %v5443_v38  ;;  %v5293_v55 = vadd.f32 %v5292_v44, %v5291_v39  ;;  %v5389_v25 = vmul.f32 %v8874_v47, %v8874_v47  ;;  %v5300_v29 = vsel %vm5266_vm0, %v8874_v47, 0.0 }
 0x3b4   :  { %v4212_v59 = vpop.f32.mrb[36].mxu1  ;;  %v5447_v60 = vadd.f32 %v5446_v53, %v5445_v50 }
 0x3b5   :  { %v5140_v62 = vpop.f32.mrb[36].mxu0  ;;  %v4214_v63 = vpop.f32.mrb[37].mxu1 }
 0x3b6   :  { %v8886_v4 = vadd.f32 %v5140_v62, %v4212_v59  ;;  %v5142_v5 = vpop.f32.mrb[37].mxu0  ;;  %v4215_v6 = vpop.f32.mrb[38].mxu1  ;;  %v5295_v62 = vadd.f32 %v5294_v54, %v5293_v55 }
 0x3b7   :  { %v5143_v10 = vpop.f32.mrb[38].mxu0  ;;  %v4217_v11 = vpop.f32.mrb[39].mxu1  ;;  %v5388_v5 = vmul.f32 %v8869_v36, %v8869_v36 }
 0x3b8   :  { %v8891_v15 = vadd.f32 %v5143_v10, %v4215_v6  ;;  %v5145_v16 = vpop.f32.mrb[39].mxu0  ;;  %v5449_v11 = vadd.f32 %v5448_v57, %v5447_v60  ;;  %v5297_v22 = vadd.f32 %v5296_v2, %v5295_v62  ;;  %v5302_v38 = vsel %vm5266_vm0, %v8886_v4, 0.0 }
 0x3b9   :  { %v5450_v16 = vsel %vm5266_vm0, %v5387_v58, 0.0  ;;  %v5452_v24 = vsel %vm5266_vm0, %v5388_v5, 0.0 }
 0x3ba   :  { %v5451_v26 = vadd.f32 %v5450_v16, %v5449_v11  ;;  %v5391_v53 = vmul.f32 %v8891_v15, %v8891_v15 }
 0x3bc   :  { %v4220_v27 = vpop.f32.mrb[40].mxu1  ;;  %v5453_v32 = vadd.f32 %v5452_v24, %v5451_v26 }
 0x3bd   :  { %v5148_v30 = vpop.f32.mrb[40].mxu0  ;;  %v4222_v31 = vpop.f32.mrb[41].mxu1 }
 0x3be   :  { %v8903_v34 = vadd.f32 %v5148_v30, %v4220_v27  ;;  %v5150_v35 = vpop.f32.mrb[41].mxu0  ;;  %v4223_v0 = vpop.f32.mrb[42].mxu1  ;;  %v5299_v27 = vadd.f32 %v5298_v17, %v5297_v22  ;;  %v5390_v30 = vmul.f32 %v8886_v4, %v8886_v4 }
 0x3bf   :  { %v5151_v42 = vpop.f32.mrb[42].mxu0  ;;  %v4225_v43 = vpop.f32.mrb[43].mxu1 }
 0x3c0   :  { %v8909_v48 = vadd.f32 %v5151_v42, %v4223_v0  ;;  %v5153_v49 = vpop.f32.mrb[43].mxu0  ;;  %v5454_v0 = vsel %vm5266_vm0, %v5389_v25, 0.0  ;;  %v5301_v44 = vadd.f32 %v5300_v29, %v5299_v27  ;;  %v5456_v50 = vsel %vm5266_vm0, %v5390_v30, 0.0 }
 0x3c1   :  { %v5455_v57 = vadd.f32 %v5454_v0, %v5453_v32  ;;  %v5392_v60 = vmul.f32 %v8903_v34, %v8903_v34 }
 0x3c2   :  { %v5303_v58 = vadd.f32 %v5302_v38, %v5301_v44  ;;  %v5308_v26 = vsel %vm5266_vm0, %v8909_v48, 0.0 }
 0x3c3   :  { %v5457_v62 = vadd.f32 %v5456_v50, %v5455_v57  ;;  %v5460_v11 = vsel %vm5266_vm0, %v5392_v60, 0.0 }
 0x3c4   :  { %v4228_v59 = vpop.f32.mrb[44].mxu1 }
 0x3c5   :  { %v5156_v63 = vpop.f32.mrb[44].mxu0  ;;  %v4230_v1 = vpop.f32.mrb[45].mxu1 }
 0x3c6   :  { %v8921_v6 = vadd.f32 %v5156_v63, %v4228_v59  ;;  %v5158_v9 = vpop.f32.mrb[45].mxu0  ;;  %v4231_v10 = vpop.f32.mrb[46].mxu1  ;;  %v5304_v59 = vsel %vm5266_vm0, %v8891_v15, 0.0  ;;  %v5458_v63 = vsel %vm5266_vm0, %v5391_v53, 0.0  ;;  %v5306_v1 = vsel %vm5266_vm0, %v8903_v34, 0.0 }
 0x3c7   :  { %v5159_v12 = vpop.f32.mrb[46].mxu0  ;;  %v4233_v14 = vpop.f32.mrb[47].mxu1  ;;  %v5305_v5 = vadd.f32 %v5304_v59, %v5303_v58 }
 0x3c8   :  { %v8926_v20 = vadd.f32 %v5159_v12, %v4231_v10  ;;  %v5161_v21 = vpop.f32.mrb[47].mxu0  ;;  %v5393_v12 = vmul.f32 %v8909_v48, %v8909_v48  ;;  %v5394_v27 = vmul.f32 %v8921_v6, %v8921_v6 }
 0x3c9   :  { %v5459_v21 = vadd.f32 %v5458_v63, %v5457_v62  ;;  %v5307_v22 = vadd.f32 %v5306_v1, %v5305_v5 }
 0x3ca   :  { %v5462_v32 = vsel %vm5266_vm0, %v5393_v12, 0.0  ;;  %v5464_v0 = vsel %vm5266_vm0, %v5394_v27, 0.0  ;;  %v5395_v38 = vmul.f32 %v8926_v20, %v8926_v20  ;;  %v5312_v50 = vsel %vm5266_vm0, %v8926_v20, 0.0 }
 0x3cc   :  { %v4236_v31 = vpop.f32.mrb[48].mxu1  ;;  %v5466_v63 = vsel %vm5266_vm0, %v5395_v38, 0.0 }
 0x3cd   :  { %v5164_v33 = vpop.f32.mrb[48].mxu0  ;;  %v4238_v35 = vpop.f32.mrb[49].mxu1 }
 0x3ce   :  { %v8938_v39 = vadd.f32 %v5164_v33, %v4236_v31  ;;  %v5166_v42 = vpop.f32.mrb[49].mxu0  ;;  %v4239_v43 = vpop.f32.mrb[50].mxu1  ;;  %v5461_v31 = vadd.f32 %v5460_v11, %v5459_v21  ;;  %v5310_v33 = vsel %vm5266_vm0, %v8921_v6, 0.0  ;;  %v5309_v35 = vadd.f32 %v5308_v26, %v5307_v22 }
 0x3cf   :  { %v5167_v45 = vpop.f32.mrb[50].mxu0  ;;  %v4241_v49 = vpop.f32.mrb[51].mxu1 }
 0x3d0   :  { %v8943_v54 = vadd.f32 %v5167_v45, %v4239_v43  ;;  %v5169_v55 = vpop.f32.mrb[51].mxu0  ;;  %v5463_v43 = vadd.f32 %v5462_v32, %v5461_v31  ;;  %v5311_v44 = vadd.f32 %v5310_v33, %v5309_v35  ;;  %v5396_v53 = vmul.f32 %v8938_v39, %v8938_v39 }
 0x3d1   :  { %v5314_v1 = vsel %vm5266_vm0, %v8938_v39, 0.0 }
 0x3d2   :  { %v5465_v59 = vadd.f32 %v5464_v0, %v5463_v43  ;;  %v5397_v11 = vmul.f32 %v8943_v54, %v8943_v54 }
 0x3d4   :  { %v4244_v2 = vpop.f32.mrb[52].mxu1  ;;  %v5467_v12 = vadd.f32 %v5466_v63, %v5465_v59  ;;  %v5470_v27 = vsel %vm5266_vm0, %v5397_v11, 0.0 }
 0x3d5   :  { %v5172_v9 = vpop.f32.mrb[52].mxu0  ;;  %v4246_v10 = vpop.f32.mrb[53].mxu1 }
 0x3d6   :  { %v8955_v14 = vadd.f32 %v5172_v9, %v4244_v2  ;;  %v5174_v16 = vpop.f32.mrb[53].mxu0  ;;  %v4247_v17 = vpop.f32.mrb[54].mxu1  ;;  %v5313_v9 = vadd.f32 %v5312_v50, %v5311_v44  ;;  %v5468_v10 = vsel %vm5266_vm0, %v5396_v53, 0.0 }
 0x3d7   :  { %v5175_v24 = vpop.f32.mrb[54].mxu0  ;;  %v4249_v25 = vpop.f32.mrb[55].mxu1 }
 0x3d8   :  { %v8961_v29 = vadd.f32 %v5175_v24, %v4247_v17  ;;  %v5177_v30 = vpop.f32.mrb[55].mxu0  ;;  %v5315_v16 = vadd.f32 %v5314_v1, %v5313_v9  ;;  %v5316_v17 = vsel %vm5266_vm0, %v8943_v54, 0.0  ;;  %v5398_v21 = vmul.f32 %v8955_v14, %v8955_v14 }
 0x3d9   :  { %v5469_v24 = vadd.f32 %v5468_v10, %v5467_v12  ;;  %v5318_v30 = vsel %vm5266_vm0, %v8955_v14, 0.0 }
 0x3da   :  { %v5317_v35 = vadd.f32 %v5316_v17, %v5315_v16  ;;  %v5399_v43 = vmul.f32 %v8961_v29, %v8961_v29  ;;  %v5320_v53 = vsel %vm5266_vm0, %v8961_v29, 0.0 }
 0x3dc   :  { %v4252_v42 = vpop.f32.mrb[56].mxu1  ;;  %v5319_v50 = vadd.f32 %v5318_v30, %v5317_v35  ;;  %v5474_v59 = vsel %vm5266_vm0, %v5399_v43, 0.0 }
 0x3dd   :  { %v5180_v45 = vpop.f32.mrb[56].mxu0  ;;  %v4254_v49 = vpop.f32.mrb[57].mxu1 }
 0x3de   :  { %v8973_v55 = vadd.f32 %v5180_v45, %v4252_v42  ;;  %v5182_v57 = vpop.f32.mrb[57].mxu0  ;;  %v4255_v58 = vpop.f32.mrb[58].mxu1  ;;  %v5472_v42 = vsel %vm5266_vm0, %v5398_v21, 0.0  ;;  %v5471_v49 = vadd.f32 %v5470_v27, %v5469_v24  ;;  %v5321_v63 = vadd.f32 %v5320_v53, %v5319_v50 }
 0x3df   :  { %v5183_v60 = vpop.f32.mrb[58].mxu0  ;;  %v4257_v62 = vpop.f32.mrb[59].mxu1 }
 0x3e0   :  { %v8978_v2 = vadd.f32 %v5183_v60, %v4255_v58  ;;  %v5185_v5 = vpop.f32.mrb[59].mxu0  ;;  %v5400_v57 = vmul.f32 %v8973_v55, %v8973_v55  ;;  %v5473_v58 = vadd.f32 %v5472_v42, %v5471_v49  ;;  %v5322_v60 = vsel %vm5266_vm0, %v8973_v55, 0.0 }
 0x3e1   :  { %v5323_v21 = vadd.f32 %v5322_v60, %v5321_v63 }
 0x3e2   :  { %v5476_v9 = vsel %vm5266_vm0, %v5400_v57, 0.0  ;;  %v5401_v10 = vmul.f32 %v8978_v2, %v8978_v2  ;;  %v5475_v17 = vadd.f32 %v5474_v59, %v5473_v58 }
 0x3e4   :  { %v4260_v22 = vpop.f32.mrb[60].mxu1 }
 0x3e5   :  { %v5188_v25 = vpop.f32.mrb[60].mxu0  ;;  %v4262_v26 = vpop.f32.mrb[61].mxu1 }
 0x3e6   :  { %v8990_v31 = vadd.f32 %v5188_v25, %v4260_v22  ;;  %v5190_v32 = vpop.f32.mrb[61].mxu0  ;;  %v4263_v33 = vpop.f32.mrb[62].mxu1  ;;  %v5324_v25 = vsel %vm5266_vm0, %v8978_v2, 0.0 }
 0x3e7   :  { %v5191_v0 = vpop.f32.mrb[62].mxu0  ;;  %v4265_v38 = vpop.f32.mrb[63].mxu1  ;;  %v5477_v32 = vadd.f32 %v5476_v9, %v5475_v17 }
 0x3e8   :  { %v8995_v44 = vadd.f32 %v5191_v0, %v4263_v33  ;;  %v5193_v45 = vpop.f32.mrb[63].mxu0  ;;  %v5402_v26 = vmul.f32 %v8990_v31, %v8990_v31  ;;  %v5478_v33 = vsel %vm5266_vm0, %v5401_v10, 0.0  ;;  %v5326_v35 = vsel %vm5266_vm0, %v8990_v31, 0.0 }
 0x3e9   :  { %v5325_v0 = vadd.f32 %v5324_v25, %v5323_v21  ;;  %v5479_v45 = vadd.f32 %v5478_v33, %v5477_v32 }
 0x3ea   :  { %v5480_v38 = vsel %vm5266_vm0, %v5402_v26, 0.0  ;;  %v5403_v42 = vmul.f32 %v8995_v44, %v8995_v44  ;;  %v5328_v57 = vsel %vm5266_vm0, %v8995_v44, 0.0 }
 0x3eb   :  { %v5327_v49 = vadd.f32 %v5326_v35, %v5325_v0  ;;  %v5481_v63 = vadd.f32 %v5480_v38, %v5479_v45 }
 0x3ec   :  { %v4268_v62 = vpop.f32.mrb[64].mxu1  ;;  %v5482_v9 = vsel %vm5266_vm0, %v5403_v42, 0.0 }
 0x3ed   :  { %v5196_v1 = vpop.f32.mrb[64].mxu0  ;;  %v4270_v5 = vpop.f32.mrb[65].mxu1  ;;  %v5329_v17 = vadd.f32 %v5328_v57, %v5327_v49 }
 0x3ee   :  { %v9007_v11 = vadd.f32 %v5196_v1, %v4268_v62  ;;  %v5198_v12 = vpop.f32.mrb[65].mxu0  ;;  %v4271_v16 = vpop.f32.mrb[66].mxu1 }
 0x3ef   :  { %v5199_v22 = vpop.f32.mrb[66].mxu0  ;;  %v4273_v24 = vpop.f32.mrb[67].mxu1 }
 0x3f0   :  { %v9013_v27 = vadd.f32 %v5199_v22, %v4271_v16  ;;  %v5201_v30 = vpop.f32.mrb[67].mxu0  ;;  %v5404_v58 = vmul.f32 %v9007_v11, %v9007_v11  ;;  %v5330_v10 = vsel %vm5266_vm0, %v9007_v11, 0.0  ;;  %v5483_v24 = vadd.f32 %v5482_v9, %v5481_v63 }
 0x3f1   :  { %v5331_v25 = vadd.f32 %v5330_v10, %v5329_v17 }
 0x3f2   :  { %v5484_v21 = vsel %vm5266_vm0, %v5404_v58, 0.0  ;;  %v5405_v22 = vmul.f32 %v9013_v27, %v9013_v27  ;;  %v5332_v26 = vsel %vm5266_vm0, %v9013_v27, 0.0 }
 0x3f3   :  { %v5485_v33 = vadd.f32 %v5484_v21, %v5483_v24 }
 0x3f4   :  { %v4276_v43 = vpop.f32.mrb[68].mxu1  ;;  %v5486_v38 = vsel %vm5266_vm0, %v5405_v22, 0.0 }
 0x3f5   :  { %v5204_v50 = vpop.f32.mrb[68].mxu0  ;;  %v4278_v53 = vpop.f32.mrb[69].mxu1 }
 0x3f6   :  { %v9025_v59 = vadd.f32 %v5204_v50, %v4276_v43  ;;  %v5206_v60 = vpop.f32.mrb[69].mxu0  ;;  %v4279_v62 = vpop.f32.mrb[70].mxu1  ;;  %v5333_v50 = vadd.f32 %v5332_v26, %v5331_v25 }
 0x3f7   :  { %v5207_v1 = vpop.f32.mrb[70].mxu0  ;;  %v4281_v5 = vpop.f32.mrb[71].mxu1 }
 0x3f8   :  { %v9030_v12 = vadd.f32 %v5207_v1, %v4279_v62  ;;  %v5209_v16 = vpop.f32.mrb[71].mxu0  ;;  %v5406_v30 = vmul.f32 %v9025_v59, %v9025_v59  ;;  %v5334_v42 = vsel %vm5266_vm0, %v9025_v59, 0.0  ;;  %v5487_v1 = vadd.f32 %v5486_v38, %v5485_v33 }
 0x3f9   :  { %v5335_v5 = vadd.f32 %v5334_v42, %v5333_v50 }
 0x3fa   :  { %v5488_v58 = vsel %vm5266_vm0, %v5406_v30, 0.0  ;;  %v5407_v60 = vmul.f32 %v9030_v12, %v9030_v12  ;;  %v5336_v9 = vsel %vm5266_vm0, %v9030_v12, 0.0 }
 0x3fb   :  { %v5489_v16 = vadd.f32 %v5488_v58, %v5487_v1  ;;  %v5337_v24 = vadd.f32 %v5336_v9, %v5335_v5 }
 0x3fc   :  { %v4284_v32 = vpop.f32.mrb[72].mxu1  ;;  %v5490_v17 = vsel %vm5266_vm0, %v5407_v60, 0.0 }
 0x3fd   :  { %v5212_v35 = vpop.f32.mrb[72].mxu0  ;;  %v4286_v0 = vpop.f32.mrb[73].mxu1  ;;  %v5491_v38 = vadd.f32 %v5490_v17, %v5489_v16 }
 0x3fe   :  { %v9042_v43 = vadd.f32 %v5212_v35, %v4284_v32  ;;  %v5214_v45 = vpop.f32.mrb[73].mxu0  ;;  %v4287_v49 = vpop.f32.mrb[74].mxu1 }
 0x3ff   :  { %v5215_v53 = vpop.f32.mrb[74].mxu0  ;;  %v4289_v57 = vpop.f32.mrb[75].mxu1 }
 0x400   :  { %9541 = vst [vmem:[#allocation2_spill] sm:$0xff] %v9042_v43  ;;  %v9047_v62 = vadd.f32 %v5215_v53, %v4287_v49  ;;  %v5217_v63 = vpop.f32.mrb[75].mxu0  ;;  %v5408_v10 = vmul.f32 %v9042_v43, %v9042_v43  ;;  %v5338_v21 = vsel %vm5266_vm0, %v9042_v43, 0.0 }
 0x401   :  { %v5339_v42 = vadd.f32 %v5338_v21, %v5337_v24 }
 0x402   :  { %9542 = vst [vmem:[#allocation3_spill] sm:$0xff] %v9047_v62  ;;  %v5492_v30 = vsel %vm5266_vm0, %v5408_v10, 0.0  ;;  %v5409_v32 = vmul.f32 %v9047_v62, %v9047_v62  ;;  %v5340_v50 = vsel %vm5266_vm0, %v9047_v62, 0.0 }
 0x403   :  { %v5493_v60 = vadd.f32 %v5492_v30, %v5491_v38  ;;  %v5341_v5 = vadd.f32 %v5340_v50, %v5339_v42 }
 0x404   :  { %v4292_v22 = vpop.f32.mrb[76].mxu1  ;;  %v5494_v63 = vsel %vm5266_vm0, %v5409_v32, 0.0 }
 0x405   :  { %v5220_v25 = vpop.f32.mrb[76].mxu0  ;;  %v4294_v26 = vpop.f32.mrb[77].mxu1  ;;  %v5495_v17 = vadd.f32 %v5494_v63, %v5493_v60 }
 0x406   :  { %v9059_v33 = vadd.f32 %v5220_v25, %v4292_v22  ;;  %v5222_v35 = vpop.f32.mrb[77].mxu0  ;;  %v4295_v0 = vpop.f32.mrb[78].mxu1 }
 0x407   :  { %v5223_v45 = vpop.f32.mrb[78].mxu0  ;;  %v4297_v49 = vpop.f32.mrb[79].mxu1 }
 0x408   :  { %9543 = vst [vmem:[#allocation4_spill] sm:$0xff] %v9059_v33  ;;  %v5410_v53 = vmul.f32 %v9059_v33, %v9059_v33  ;;  %v9065_v57 = vadd.f32 %v5223_v45, %v4295_v0  ;;  %v5225_v58 = vpop.f32.mrb[79].mxu0  ;;  %v5342_v1 = vsel %vm5266_vm0, %v9059_v33, 0.0 }
 0x409   :  { %v5343_v21 = vadd.f32 %v5342_v1, %v5341_v5 }
 0x40a   :  { %9544 = vst [vmem:[#allocation5_spill] sm:$0xff] %v9065_v57  ;;  %v5496_v9 = vsel %vm5266_vm0, %v5410_v53, 0.0  ;;  %v5411_v10 = vmul.f32 %v9065_v57, %v9065_v57  ;;  %v5344_v25 = vsel %vm5266_vm0, %v9065_v57, 0.0 }
 0x40b   :  { %v5497_v35 = vadd.f32 %v5496_v9, %v5495_v17  ;;  %v5345_v58 = vadd.f32 %v5344_v25, %v5343_v21 }
 0x40c   :  { %v4300_v16 = vpop.f32.mrb[80].mxu1  ;;  %v5498_v42 = vsel %vm5266_vm0, %v5411_v10, 0.0 }
 0x40d   :  { %v5228_v22 = vpop.f32.mrb[80].mxu0  ;;  %v4302_v24 = vpop.f32.mrb[81].mxu1  ;;  %v5499_v1 = vadd.f32 %v5498_v42, %v5497_v35 }
 0x40e   :  { %v9075_v26 = vadd.f32 %v5228_v22, %v4300_v16  ;;  %v5230_v30 = vpop.f32.mrb[81].mxu0  ;;  %v4303_v32 = vpop.f32.mrb[82].mxu1 }
 0x40f   :  { %v5231_v0 = vpop.f32.mrb[82].mxu0  ;;  %v4305_v38 = vpop.f32.mrb[83].mxu1 }
 0x410   :  { %9545 = vst [vmem:[#allocation6_spill] sm:$0xff] %v9075_v26  ;;  %v5346_v45 = vsel %vm5266_vm0, %v9075_v26, 0.0  ;;  %v5412_v49 = vmul.f32 %v9075_v26, %v9075_v26  ;;  %v9082_v50 = vadd.f32 %v5231_v0, %v4303_v32  ;;  %v5233_v53 = vpop.f32.mrb[83].mxu0 }
 0x411   :  { %v5347_v5 = vadd.f32 %v5346_v45, %v5345_v58 }
 0x412   :  { %v5500_v60 = vsel %vm5266_vm0, %v5412_v49, 0.0  ;;  %v5413_v63 = vmul.f32 %v9082_v50, %v9082_v50  ;;  %v5348_v9 = vsel %vm5266_vm0, %v9082_v50, 0.0 }
 0x413   :  { %v5501_v16 = vadd.f32 %v5500_v60, %v5499_v1  ;;  %v5349_v25 = vadd.f32 %v5348_v9, %v5347_v5 }
 0x414   :  { %v4308_v10 = vpop.f32.mrb[84].mxu1  ;;  %v5502_v24 = vsel %vm5266_vm0, %v5413_v63, 0.0 }
 0x415   :  { %v5236_v17 = vpop.f32.mrb[84].mxu0  ;;  %v4310_v22 = vpop.f32.mrb[85].mxu1  ;;  %v5503_v53 = vadd.f32 %v5502_v24, %v5501_v16 }
 0x416   :  { %v9090_v30 = vadd.f32 %v5236_v17, %v4308_v10  ;;  %v5238_v32 = vpop.f32.mrb[85].mxu0  ;;  %v4311_v21 = vpop.f32.mrb[86].mxu1 }
 0x417   :  { %v5239_v0 = vpop.f32.mrb[86].mxu0  ;;  %v4313_v38 = vpop.f32.mrb[87].mxu1 }
 0x418   :  { %v5350_v35 = vsel %vm5266_vm0, %v9090_v30, 0.0  ;;  %v5414_v42 = vmul.f32 %v9090_v30, %v9090_v30  ;;  %v9096_v45 = vadd.f32 %v5239_v0, %v4311_v21  ;;  %v5241_v49 = vpop.f32.mrb[87].mxu0 }
 0x419   :  { %v5351_v58 = vadd.f32 %v5350_v35, %v5349_v25 }
 0x41a   :  { %v5504_v60 = vsel %vm5266_vm0, %v5414_v42, 0.0  ;;  %v5352_v63 = vsel %vm5266_vm0, %v9096_v45, 0.0  ;;  %v5415_v1 = vmul.f32 %v9096_v45, %v9096_v45 }
 0x41b   :  { %v5505_v5 = vadd.f32 %v5504_v60, %v5503_v53  ;;  %v5353_v9 = vadd.f32 %v5352_v63, %v5351_v58 }
 0x41c   :  { %v5506_v10 = vsel %vm5266_vm0, %v5415_v1, 0.0  ;;  %v4316_v17 = vpop.f32.mrb[88].mxu1 }
 0x41d   :  { %v5507_v22 = vadd.f32 %v5506_v10, %v5505_v5  ;;  %v5244_v32 = vpop.f32.mrb[88].mxu0  ;;  %v4318_v21 = vpop.f32.mrb[89].mxu1 }
 0x41e   :  { %v9104_v0 = vadd.f32 %v5244_v32, %v4316_v17  ;;  %v5246_v16 = vpop.f32.mrb[89].mxu0  ;;  %v4319_v24 = vpop.f32.mrb[90].mxu1 }
 0x41f   :  { %v5247_v25 = vpop.f32.mrb[90].mxu0  ;;  %v4321_v38 = vpop.f32.mrb[91].mxu1 }
 0x420   :  { %v5354_v35 = vsel %vm5266_vm0, %v9104_v0, 0.0  ;;  %v5416_v42 = vmul.f32 %v9104_v0, %v9104_v0  ;;  %v9110_v49 = vadd.f32 %v5247_v25, %v4319_v24  ;;  %v5249_v53 = vpop.f32.mrb[91].mxu0 }
 0x421   :  { %v5355_v58 = vadd.f32 %v5354_v35, %v5353_v9 }
 0x422   :  { %v5508_v60 = vsel %vm5266_vm0, %v5416_v42, 0.0  ;;  %v5356_v63 = vsel %vm5266_vm0, %v9110_v49, 0.0  ;;  %v5417_v1 = vmul.f32 %v9110_v49, %v9110_v49 }
 0x423   :  { %v5509_v5 = vadd.f32 %v5508_v60, %v5507_v22  ;;  %v5357_v10 = vadd.f32 %v5356_v63, %v5355_v58 }
 0x424   :  { %v5510_v17 = vsel %vm5266_vm0, %v5417_v1, 0.0  ;;  %v4324_v32 = vpop.f32.mrb[92].mxu1 }
 0x425   :  { %v5511_v21 = vadd.f32 %v5510_v17, %v5509_v5  ;;  %v5252_v16 = vpop.f32.mrb[92].mxu0  ;;  %v4326_v38 = vpop.f32.mrb[93].mxu1 }
 0x426   :  { %v9118_v24 = vadd.f32 %v5252_v16, %v4324_v32  ;;  %v5254_v25 = vpop.f32.mrb[93].mxu0  ;;  %v4327_v9 = vpop.f32.mrb[94].mxu1 }
 0x427   :  { %v5255_v35 = vpop.f32.mrb[94].mxu0  ;;  %v4329_v42 = vpop.f32.mrb[95].mxu1 }
 0x428   :  { %9546 = vst [vmem:[#allocation7_spill] sm:$0xff] %v9118_v24  ;;  %v5358_v53 = vsel %vm5266_vm0, %v9118_v24, 0.0  ;;  %v5418_v26 = vmul.f32 %v9118_v24, %v9118_v24  ;;  %v9124_v22 = vadd.f32 %v5255_v35, %v4327_v9  ;;  %v5257_v58 = vpop.f32.mrb[95].mxu0 }
 0x429   :  { %v5359_v60 = vadd.f32 %v5358_v53, %v5357_v10 }
 0x42a   :  { %9547 = vst [vmem:[#allocation8_spill] sm:$0xff] %v9124_v22  ;;  %v5512_v63 = vsel %vm5266_vm0, %v5418_v26, 0.0  ;;  %v5360_v1 = vsel %vm5266_vm0, %v9124_v22, 0.0  ;;  %v5419_v5 = vmul.f32 %v9124_v22, %v9124_v22 }
 0x42b   :  { %v5513_v17 = vadd.f32 %v5512_v63, %v5511_v21  ;;  %v5361_v32 = vadd.f32 %v5360_v1, %v5359_v60 }
 0x42c   :  { %v5514_v16 = vsel %vm5266_vm0, %v5419_v5, 0.0  ;;  %v4332_v38 = vpop.f32.mrb[96].mxu1 }
 0x42d   :  { %v5515_v25 = vadd.f32 %v5514_v16, %v5513_v17  ;;  %v5260_v42 = vpop.f32.mrb[96].mxu0  ;;  %v4334_v57 = vpop.f32.mrb[97].mxu1 }
 0x42e   :  { %v9132_v9 = vadd.f32 %v5260_v42, %v4332_v38  ;;  %v5262_v35 = vpop.f32.mrb[97].mxu0  ;;  %v4335_v10 = vpop.f32.mrb[98].mxu1 }
 0x42f   :  { %v5263_v53 = vpop.f32.mrb[98].mxu0  ;;  %v4336_v26 = vpop.f32.mrb[99].mxu1 }
 0x430   :  { %9548 = vst [vmem:[#allocation9_spill] sm:$0xff] %v9132_v9  ;;  %v5362_v58 = vsel %vm5266_vm0, %v9132_v9, 0.0  ;;  %v5420_v33 = vmul.f32 %v9132_v9, %v9132_v9  ;;  %v5264_v21 = vpop.f32.mrb[99].mxu0 }
 0x431   :  { %v5363_v60 = vadd.f32 %v5362_v58, %v5361_v32 }
 0x432   :  { %v5516_v63 = vsel %vm5266_vm0, %v5420_v33, 0.0  ;;  %v5535_v33 = vlaneseq }
 0x433   :  { %v5364_v1 = vrot.slane %v5363_v60, 4  ;;  %v5517_v5 = vadd.f32 %v5516_v63, %v5515_v25  ;;  %v5527_v25 = vld [vmem:[%s9530_s2] sm:$0x1] }
 0x434   :  { %v5536_v58 = vshrl.u32 %v5535_v33, 7 }
 0x435   :  { %v5365_v17 = vadd.f32 %v5364_v1, %v5363_v60  ;;  %v5518_v57 = vrot.slane %v5517_v5, 4 }
 0x436   :  { %v5537_v60 = vsub.s32 0, %v5536_v58 }
 0x437   :  { %v5366_v16 = vrot.slane %v5365_v17, 2  ;;  %v5519_v38 = vadd.f32 %v5518_v57, %v5517_v5  ;;  %v5531_v5 = vld [vmem:[%s9531_s3] sm:$0x1]  ;;  %v9552_v33 = vld [vmem:[#allocation9_spill] sm:$0xff] }
 0x439   :  { %v5367_v42 = vadd.f32 %v5366_v16, %v5365_v17  ;;  %v5520_v35 = vrot.slane %v5519_v38, 2 }
 0x43b   :  { %v5368_v10 = vrot.slane %v5367_v42, 1  ;;  %v5521_v53 = vadd.f32 %v5520_v35, %v5519_v38 }
 0x43d   :  { %v5369_v26 = vadd.f32 %v5368_v10, %v5367_v42  ;;  %v5522_v62 = vrot.slane %v5521_v53, 1 }
 0x43f   :  { %v5371_v22 = vmul.f32 0.0025510204, %v5369_v26  ;;  %v5523_v43 = vadd.f32 %v5522_v62, %v5521_v53  ;;  %v9549_v26 = vld [vmem:[#allocation7_spill] sm:$0xff] }
 0x441   :  { %v5524_v24 = vmul.f32 0.0025510204, %v5523_v43  ;;  %v5525_v9 = vmul.f32 %v5371_v22, %v5371_v22 }
 0x443   :  { %v5526_v21 = vsub.f32 %v5524_v24, %v5525_v9 }
 0x445   :  { %v5528_v32 = vadd.f32 1e-05, %v5526_v21  ;;  %v9550_v21 = vld [vmem:[#allocation2_spill] sm:$0xff] }
 0x447   :  { %7068 = vrsqrt.f32 %v5528_v32  ;;  %v9551_v32 = vld [vmem:[#allocation8_spill] sm:$0xff] }
 0x451   :  { %v7069_v63 = vpop.eup %7068 }
 0x452   :  { %v5530_v1 = vmul.f32 %v7069_v63, %v5527_v25 }
 0x454   :  { %v5532_v17 = vmul.f32 %v5530_v1, %v5371_v22  ;;  %v5538_v62 = vrot.slane %v5530_v1, %v5537_v60 }
 0x456   :  { %v5533_v43 = vsub.f32 %v5531_v5, %v5532_v17  ;;  %v5540_v24 = vmul.f32 %v8796_v37, %v5538_v62  ;;  %v5541_v9 = vmul.f32 %v8798_v41, %v5538_v62  ;;  %v5542_v57 = vmul.f32 %v8800_v46, %v5538_v62 }
 0x457   :  { %v5543_v16 = vmul.f32 %v8802_v51, %v5538_v62  ;;  %v5544_v38 = vmul.f32 %v8804_v56, %v5538_v62  ;;  %v5545_v42 = vmul.f32 %v8806_v61, %v5538_v62  ;;  %v5546_v35 = vmul.f32 %v8808_v3, %v5538_v62 }
 0x458   :  { %v5547_v10 = vmul.f32 %v8810_v8, %v5538_v62  ;;  %v5548_v22 = vmul.f32 %v8812_v13, %v5538_v62  ;;  %v5549_v53 = vmul.f32 %v8814_v18, %v5538_v62  ;;  %v5550_v37 = vmul.f32 %v8816_v23, %v5538_v62 }
 0x459   :  { %v5551_v41 = vmul.f32 %v8818_v28, %v5538_v62  ;;  %v5552_v46 = vmul.f32 %v8833_v40, %v5538_v62  ;;  %v5553_v51 = vmul.f32 %v8839_v52, %v5538_v62  ;;  %v5554_v56 = vmul.f32 %v8851_v7, %v5538_v62 }
 0x45a   :  { %v5555_v61 = vmul.f32 %v8857_v19, %v5538_v62  ;;  %v5556_v3 = vmul.f32 %v8869_v36, %v5538_v62  ;;  %v5557_v8 = vmul.f32 %v8874_v47, %v5538_v62  ;;  %v5558_v13 = vmul.f32 %v8886_v4, %v5538_v62 }
 0x45b   :  { %v5559_v18 = vmul.f32 %v8891_v15, %v5538_v62  ;;  %v5560_v23 = vmul.f32 %v8903_v34, %v5538_v62  ;;  %v5561_v28 = vmul.f32 %v8909_v48, %v5538_v62  ;;  %v5562_v40 = vmul.f32 %v8921_v6, %v5538_v62 }
 0x45c   :  { %v5563_v52 = vmul.f32 %v8926_v20, %v5538_v62  ;;  %v5564_v7 = vmul.f32 %v8938_v39, %v5538_v62  ;;  %v5565_v19 = vmul.f32 %v8943_v54, %v5538_v62  ;;  %v5566_v36 = vmul.f32 %v8955_v14, %v5538_v62 }
 0x45d   :  { %v5567_v47 = vmul.f32 %v8961_v29, %v5538_v62  ;;  %v5568_v4 = vmul.f32 %v8973_v55, %v5538_v62  ;;  %v5569_v15 = vmul.f32 %v8978_v2, %v5538_v62  ;;  %v5570_v34 = vmul.f32 %v8990_v31, %v5538_v62 }
 0x45e   :  { %v5571_v48 = vmul.f32 %v8995_v44, %v5538_v62  ;;  %v5572_v6 = vmul.f32 %v9007_v11, %v5538_v62  ;;  %v5573_v20 = vmul.f32 %v9013_v27, %v5538_v62  ;;  %v5574_v39 = vmul.f32 %v9025_v59, %v5538_v62 }
 0x45f   :  { %v5575_v54 = vmul.f32 %v9030_v12, %v5538_v62  ;;  %v5581_v14 = vmul.f32 %v9082_v50, %v5538_v62  ;;  %v5582_v29 = vmul.f32 %v9090_v30, %v5538_v62  ;;  %v5583_v55 = vmul.f32 %v9096_v45, %v5538_v62  ;;  %v9553_v12 = vld [vmem:[#allocation3_spill] sm:$0xff]  ;;  %v9554_v50 = vld [vmem:[#allocation4_spill] sm:$0xff]  ;;  %v9555_v30 = vld [vmem:[#allocation5_spill] sm:$0xff] }
 0x460   :  { %v5584_v2 = vmul.f32 %v9104_v0, %v5538_v62  ;;  %v5585_v31 = vmul.f32 %v9110_v49, %v5538_v62  ;;  %v5586_v44 = vmul.f32 %v9549_v26, %v5538_v62  ;;  %v5576_v11 = vmul.f32 %v9550_v21, %v5538_v62  ;;  %v9556_v45 = vld [vmem:[#allocation6_spill] sm:$0xff] }
 0x461   :  { %v5587_v27 = vmul.f32 %v9551_v32, %v5538_v62  ;;  %v5588_v59 = vmul.f32 %v9552_v33, %v5538_v62  ;;  %v5593_v58 = vrot.slane %v5533_v43, %v5537_v60  ;;  %v5577_v25 = vmul.f32 %v9553_v12, %v5538_v62 }
 0x462   :  { %v5578_v63 = vmul.f32 %v9554_v50, %v5538_v62  ;;  %v5579_v1 = vmul.f32 %v9555_v30, %v5538_v62  ;;  %v5580_v5 = vmul.f32 %v9556_v45, %v5538_v62 }
 0x463   :  { %v5595_v0 = vadd.f32 %v5593_v58, %v5540_v24  ;;  %v5596_v17 = vadd.f32 %v5593_v58, %v5541_v9  ;;  %v5597_v49 = vadd.f32 %v5593_v58, %v5542_v57  ;;  %v9194_v26 = vadd.f32 %v5593_v58, %v5543_v16 }
 0x464   :  { %v9196_v21 = vadd.f32 %v5593_v58, %v5544_v38  ;;  %v9198_v32 = vadd.f32 %v5593_v58, %v5545_v42  ;;  %v9200_v33 = vadd.f32 %v5593_v58, %v5546_v35  ;;  %v9202_v60 = vadd.f32 %v5593_v58, %v5547_v10 }
 0x465   :  { %v9204_v43 = vadd.f32 %v5593_v58, %v5548_v22  ;;  %v9206_v12 = vadd.f32 %v5593_v58, %v5549_v53  ;;  %v9208_v50 = vadd.f32 %v5593_v58, %v5550_v37  ;;  %v9210_v62 = vadd.f32 %v5593_v58, %v5551_v41 }
 0x466   :  { %v9212_v24 = vadd.f32 %v5593_v58, %v5552_v46  ;;  %v9214_v9 = vadd.f32 %v5593_v58, %v5553_v51  ;;  %v9216_v57 = vadd.f32 %v5593_v58, %v5554_v56  ;;  %v9218_v16 = vadd.f32 %v5593_v58, %v5555_v61 }
 0x467   :  { %v9220_v38 = vadd.f32 %v5593_v58, %v5556_v3  ;;  %v9222_v42 = vadd.f32 %v5593_v58, %v5557_v8  ;;  %v9224_v35 = vadd.f32 %v5593_v58, %v5558_v13  ;;  %v9226_v10 = vadd.f32 %v5593_v58, %v5559_v18 }
 0x468   :  { %v9228_v22 = vadd.f32 %v5593_v58, %v5560_v23  ;;  %v9230_v53 = vadd.f32 %v5593_v58, %v5561_v28  ;;  %v9232_v37 = vadd.f32 %v5593_v58, %v5562_v40  ;;  %v9234_v41 = vadd.f32 %v5593_v58, %v5563_v52 }
 0x469   :  { %v9236_v46 = vadd.f32 %v5593_v58, %v5564_v7  ;;  %v9238_v51 = vadd.f32 %v5593_v58, %v5565_v19  ;;  %v9240_v56 = vadd.f32 %v5593_v58, %v5566_v36  ;;  %v9242_v61 = vadd.f32 %v5593_v58, %v5567_v47 }
 0x46a   :  { %v9244_v3 = vadd.f32 %v5593_v58, %v5568_v4  ;;  %v9246_v8 = vadd.f32 %v5593_v58, %v5569_v15  ;;  %v9248_v13 = vadd.f32 %v5593_v58, %v5570_v34  ;;  %v9250_v18 = vadd.f32 %v5593_v58, %v5571_v48 }
 0x46b   :  { %v9252_v23 = vadd.f32 %v5593_v58, %v5572_v6  ;;  %v9254_v28 = vadd.f32 %v5593_v58, %v5573_v20  ;;  %v9256_v40 = vadd.f32 %v5593_v58, %v5574_v39  ;;  %v9258_v52 = vadd.f32 %v5593_v58, %v5575_v54 }
 0x46c   :  { %v9260_v7 = vadd.f32 %v5593_v58, %v5576_v11  ;;  %v9262_v19 = vadd.f32 %v5593_v58, %v5577_v25  ;;  %v9264_v36 = vadd.f32 %v5593_v58, %v5578_v63  ;;  %v9266_v47 = vadd.f32 %v5593_v58, %v5579_v1 }
 0x46d   :  { %v9268_v4 = vadd.f32 %v5593_v58, %v5580_v5  ;;  %v9270_v15 = vadd.f32 %v5593_v58, %v5581_v14  ;;  %v9272_v34 = vadd.f32 %v5593_v58, %v5582_v29  ;;  %v9274_v48 = vadd.f32 %v5593_v58, %v5583_v55 }
 0x46e   :  { %v9276_v6 = vadd.f32 %v5593_v58, %v5584_v2  ;;  %v9278_v20 = vadd.f32 %v5593_v58, %v5585_v31  ;;  %v9280_v39 = vadd.f32 %v5593_v58, %v5586_v44  ;;  %v9282_v54 = vadd.f32 %v5593_v58, %v5587_v27 }
 0x46f   :  { %v9284_v11 = vadd.f32 %v5593_v58, %v5588_v59  ;;  %v5644_v25 = vmax.f32 %v5595_v0, 0.0  ;;  %v5645_v63 = vmax.f32 %v5596_v17, 0.0  ;;  %v5646_v30 = vmax.f32 %v5597_v49, 0.0 }
 0x470   :  { %v5647_v14 = vmax.f32 %v9194_v26, 0.0  ;;  %v5648_v29 = vmax.f32 %v9196_v21, 0.0  ;;  %v5649_v55 = vmax.f32 %v9198_v32, 0.0  ;;  %v5650_v2 = vmax.f32 %v9200_v33, 0.0 }
 0x471   :  { %v5651_v31 = vmax.f32 %v9202_v60, 0.0  ;;  %v5652_v44 = vmax.f32 %v9204_v43, 0.0  ;;  %v5653_v27 = vmax.f32 %v9206_v12, 0.0  ;;  %v5654_v59 = vmax.f32 %v9208_v50, 0.0  ;;  %5693 = vst.msk [vmem:[%s9532_s4] sm:$0xff] %vm5266_vm0, %v5644_v25  ;;  %5694 = vst.msk [vmem:[%s9532_s4 + $0x8] sm:$0xff] %vm5266_vm0, %v5645_v63 }
 0x472   :  { %5695 = vst.msk [vmem:[%s9532_s4 + $0x10] sm:$0xff] %vm5266_vm0, %v5646_v30  ;;  %v5655_v58 = vmax.f32 %v9210_v62, 0.0  ;;  %v5656_v1 = vmax.f32 %v9212_v24, 0.0  ;;  %v5657_v45 = vmax.f32 %v9214_v9, 0.0  ;;  %v5658_v5 = vmax.f32 %v9216_v57, 0.0  ;;  %5696 = vst.msk [vmem:[%s9532_s4 + $0x18] sm:$0xff] %vm5266_vm0, %v5647_v14 }
 0x473   :  { %5697 = vst.msk [vmem:[%s9532_s4 + $0x20] sm:$0xff] %vm5266_vm0, %v5648_v29  ;;  %5698 = vst.msk [vmem:[%s9532_s4 + $0x28] sm:$0xff] %vm5266_vm0, %v5649_v55  ;;  %v5659_v0 = vmax.f32 %v9218_v16, 0.0  ;;  %v5660_v17 = vmax.f32 %v9220_v38, 0.0  ;;  %v5661_v49 = vmax.f32 %v9222_v42, 0.0  ;;  %v5662_v26 = vmax.f32 %v9224_v35, 0.0 }
 0x474   :  { %5699 = vst.msk [vmem:[%s9532_s4 + $0x30] sm:$0xff] %vm5266_vm0, %v5650_v2  ;;  %5700 = vst.msk [vmem:[%s9532_s4 + $0x38] sm:$0xff] %vm5266_vm0, %v5651_v31  ;;  %v5663_v21 = vmax.f32 %v9226_v10, 0.0  ;;  %v5664_v32 = vmax.f32 %v9228_v22, 0.0  ;;  %v5665_v33 = vmax.f32 %v9230_v53, 0.0  ;;  %v5666_v60 = vmax.f32 %v9232_v37, 0.0 }
 0x475   :  { %5701 = vst.msk [vmem:[%s9532_s4 + $0x40] sm:$0xff] %vm5266_vm0, %v5652_v44  ;;  %5702 = vst.msk [vmem:[%s9532_s4 + $0x48] sm:$0xff] %vm5266_vm0, %v5653_v27  ;;  %v5667_v43 = vmax.f32 %v9234_v41, 0.0  ;;  %v5668_v12 = vmax.f32 %v9236_v46, 0.0  ;;  %v5669_v50 = vmax.f32 %v9238_v51, 0.0  ;;  %v5670_v62 = vmax.f32 %v9240_v56, 0.0 }
 0x476   :  { %5703 = vst.msk [vmem:[%s9532_s4 + $0x50] sm:$0xff] %vm5266_vm0, %v5654_v59  ;;  %5704 = vst.msk [vmem:[%s9532_s4 + $0x58] sm:$0xff] %vm5266_vm0, %v5655_v58  ;;  %v5671_v24 = vmax.f32 %v9242_v61, 0.0  ;;  %v5672_v9 = vmax.f32 %v9244_v3, 0.0  ;;  %v5673_v57 = vmax.f32 %v9246_v8, 0.0  ;;  %v5674_v16 = vmax.f32 %v9248_v13, 0.0 }
 0x477   :  { %5705 = vst.msk [vmem:[%s9532_s4 + $0x60] sm:$0xff] %vm5266_vm0, %v5656_v1  ;;  %5706 = vst.msk [vmem:[%s9532_s4 + $0x68] sm:$0xff] %vm5266_vm0, %v5657_v45  ;;  %v5675_v38 = vmax.f32 %v9250_v18, 0.0  ;;  %v5676_v42 = vmax.f32 %v9252_v23, 0.0  ;;  %v5677_v35 = vmax.f32 %v9254_v28, 0.0  ;;  %v5678_v10 = vmax.f32 %v9256_v40, 0.0 }
 0x478   :  { %5707 = vst.msk [vmem:[%s9532_s4 + $0x70] sm:$0xff] %vm5266_vm0, %v5658_v5  ;;  %5708 = vst.msk [vmem:[%s9532_s4 + $0x78] sm:$0xff] %vm5266_vm0, %v5659_v0  ;;  %v5679_v22 = vmax.f32 %v9258_v52, 0.0  ;;  %v5680_v53 = vmax.f32 %v9260_v7, 0.0  ;;  %v5681_v37 = vmax.f32 %v9262_v19, 0.0  ;;  %v5682_v41 = vmax.f32 %v9264_v36, 0.0 }
 0x479   :  { %5709 = vst.msk [vmem:[%s9532_s4 + $0x80] sm:$0xff] %vm5266_vm0, %v5660_v17  ;;  %5710 = vst.msk [vmem:[%s9532_s4 + $0x88] sm:$0xff] %vm5266_vm0, %v5661_v49  ;;  %v5683_v46 = vmax.f32 %v9266_v47, 0.0  ;;  %v5684_v51 = vmax.f32 %v9268_v4, 0.0  ;;  %v5685_v56 = vmax.f32 %v9270_v15, 0.0  ;;  %v5686_v61 = vmax.f32 %v9272_v34, 0.0 }
 0x47a   :  { %5711 = vst.msk [vmem:[%s9532_s4 + $0x90] sm:$0xff] %vm5266_vm0, %v5662_v26  ;;  %5712 = vst.msk [vmem:[%s9532_s4 + $0x98] sm:$0xff] %vm5266_vm0, %v5663_v21  ;;  %v5687_v3 = vmax.f32 %v9274_v48, 0.0  ;;  %v5688_v8 = vmax.f32 %v9276_v6, 0.0  ;;  %v5689_v13 = vmax.f32 %v9278_v20, 0.0  ;;  %v5690_v18 = vmax.f32 %v9280_v39, 0.0 }
 0x47b   :  { %5713 = vst.msk [vmem:[%s9532_s4 + $0xa0] sm:$0xff] %vm5266_vm0, %v5664_v32  ;;  %5714 = vst.msk [vmem:[%s9532_s4 + $0xa8] sm:$0xff] %vm5266_vm0, %v5665_v33  ;;  %v5691_v23 = vmax.f32 %v9282_v54, 0.0  ;;  %v5692_v28 = vmax.f32 %v9284_v11, 0.0 }
 0x47c   :  { %5715 = vst.msk [vmem:[%s9532_s4 + $0xb0] sm:$0xff] %vm5266_vm0, %v5666_v60  ;;  %5716 = vst.msk [vmem:[%s9532_s4 + $0xb8] sm:$0xff] %vm5266_vm0, %v5667_v43 }
 0x47d   :  { %5717 = vst.msk [vmem:[%s9532_s4 + $0xc0] sm:$0xff] %vm5266_vm0, %v5668_v12  ;;  %5718 = vst.msk [vmem:[%s9532_s4 + $0xc8] sm:$0xff] %vm5266_vm0, %v5669_v50 }
 0x47e   :  { %5719 = vst.msk [vmem:[%s9532_s4 + $0xd0] sm:$0xff] %vm5266_vm0, %v5670_v62  ;;  %5720 = vst.msk [vmem:[%s9532_s4 + $0xd8] sm:$0xff] %vm5266_vm0, %v5671_v24 }
 0x47f   :  { %5721 = vst.msk [vmem:[%s9532_s4 + $0xe0] sm:$0xff] %vm5266_vm0, %v5672_v9  ;;  %5722 = vst.msk [vmem:[%s9532_s4 + $0xe8] sm:$0xff] %vm5266_vm0, %v5673_v57 }
 0x480   :  { %5723 = vst.msk [vmem:[%s9532_s4 + $0xf0] sm:$0xff] %vm5266_vm0, %v5674_v16  ;;  %5724 = vst.msk [vmem:[%s9532_s4 + $0xf8] sm:$0xff] %vm5266_vm0, %v5675_v38 }
 0x481   :  { %5725 = vst.msk [vmem:[%s9532_s4 + $0x100] sm:$0xff] %vm5266_vm0, %v5676_v42  ;;  %5726 = vst.msk [vmem:[%s9532_s4 + $0x108] sm:$0xff] %vm5266_vm0, %v5677_v35 }
 0x482   :  { %5727 = vst.msk [vmem:[%s9532_s4 + $0x110] sm:$0xff] %vm5266_vm0, %v5678_v10  ;;  %5728 = vst.msk [vmem:[%s9532_s4 + $0x118] sm:$0xff] %vm5266_vm0, %v5679_v22 }
 0x483   :  { %5729 = vst.msk [vmem:[%s9532_s4 + $0x120] sm:$0xff] %vm5266_vm0, %v5680_v53  ;;  %5730 = vst.msk [vmem:[%s9532_s4 + $0x128] sm:$0xff] %vm5266_vm0, %v5681_v37 }
 0x484   :  { %5731 = vst.msk [vmem:[%s9532_s4 + $0x130] sm:$0xff] %vm5266_vm0, %v5682_v41  ;;  %5732 = vst.msk [vmem:[%s9532_s4 + $0x138] sm:$0xff] %vm5266_vm0, %v5683_v46 }
 0x485   :  { %5733 = vst.msk [vmem:[%s9532_s4 + $0x140] sm:$0xff] %vm5266_vm0, %v5684_v51  ;;  %5734 = vst.msk [vmem:[%s9532_s4 + $0x148] sm:$0xff] %vm5266_vm0, %v5685_v56 }
 0x486   :  { %5735 = vst.msk [vmem:[%s9532_s4 + $0x150] sm:$0xff] %vm5266_vm0, %v5686_v61  ;;  %5736 = vst.msk [vmem:[%s9532_s4 + $0x158] sm:$0xff] %vm5266_vm0, %v5687_v3 }
 0x487   :  { %5737 = vst.msk [vmem:[%s9532_s4 + $0x160] sm:$0xff] %vm5266_vm0, %v5688_v8  ;;  %5738 = vst.msk [vmem:[%s9532_s4 + $0x168] sm:$0xff] %vm5266_vm0, %v5689_v13 }
 0x488   :  { %5739 = vst.msk [vmem:[%s9532_s4 + $0x170] sm:$0xff] %vm5266_vm0, %v5690_v18  ;;  %5740 = vst.msk [vmem:[%s9532_s4 + $0x178] sm:$0xff] %vm5266_vm0, %v5691_v23 }
 0x489   :  { %5741 = vst.msk [vmem:[%s9532_s4 + $0x180] sm:$0xff] %vm5266_vm0, %v5692_v28 }

// kernel: generator_forward.9
= control target key start
LH: loop header
LB: loop body
LE: loop exit
PB: predicated region body
PF: predicated region fallthrough
CT: control target
= control target key end

     0   :  { %v8697_v36 = vmov 1966171168   ;;  %v914_v38 = vlaneseq  ;;  %s11338_s1 = inlined_call_operand.vmem [shape: bf16[1024,1568], index: 1, kind: input, shape index: {}]   ;;  %s11339_s0 = inlined_call_operand.vmem [shape: bf16[1,1024], index: 0, kind: input, shape index: {}]   ;;  %s11340_s2 = inlined_call_operand.vmem [shape: f32[1,1568], index: 2, kind: output, shape index: {}]  }
   0x1   :  { %v7454_v0 = vld [vmem:[%s11338_s1 + $0x4] ss:$52 sps:$4 sm:$0xff]   ;;  %v7456_v1 = vld [vmem:[%s11338_s1 + $0xc] ss:$52 sps:$4 sm:$0xff]   ;;  %v7459_v3 = vld [vmem:[%s11338_s1 + $0x8] ss:$52 sps:$4 sm:$0xff]   ;;  %v912_v37 = vunpack.c.l.s4 %v8697_v36 }
   0x2   :  { %5191 = vmatprep.subr.bf16.mxu0 %v7454_v0  ;;  %v7458_v2 = vld [vmem:[%s11338_s1] ss:$52 sps:$4 sm:$0xff]   ;;  %5355 = vmatprep.subr.bf16.mxu1 %v7456_v1  ;;  %v7464_v6 = vld [vmem:[%s11338_s1 + $0x68] ss:$52 sps:$4 sm:$0xff]   ;;  %v7465_v7 = vld [vmem:[%s11338_s1 + $0x70] ss:$52 sps:$4 sm:$0xff]  }
   0x3   :  { %v7460_v4 = vld [vmem:[%s11338_s1 + $0x6c] ss:$52 sps:$4 sm:$0xff]   ;;  %5192 = vmatpush1.bf16.msra.mxu0 %v7458_v2  ;;  %5356 = vmatpush1.bf16.msra.mxu1 %v7459_v3  ;;  %v7462_v5 = vld [vmem:[%s11338_s1 + $0x74] ss:$52 sps:$4 sm:$0xff]   ;;  %v7468_v9 = vld [vmem:[%s11338_s1 + $0xdc] ss:$52 sps:$4 sm:$0xff]   ;;  %v913_v42 = vunpack.c.0.s8 %v912_v37 }
   0x4   :  { %5193 = vmatprep.subr.bf16.mxu0 %v7460_v4  ;;  %5357 = vmatprep.subr.bf16.mxu1 %v7462_v5  ;;  %v7466_v8 = vld [vmem:[%s11338_s1 + $0xd4] ss:$52 sps:$4 sm:$0xff]   ;;  %v7470_v10 = vld [vmem:[%s11338_s1 + $0xd0] ss:$52 sps:$4 sm:$0xff]   ;;  %v7471_v11 = vld [vmem:[%s11338_s1 + $0xd8] ss:$52 sps:$4 sm:$0xff]  }
   0x5   :  { %v7472_v12 = vld [vmem:[%s11338_s1 + $0x13c] ss:$52 sps:$4 sm:$0xff]   ;;  %v7474_v13 = vld [vmem:[%s11338_s1 + $0x144] ss:$52 sps:$4 sm:$0xff]   ;;  %v7477_v15 = vld [vmem:[%s11338_s1 + $0x140] ss:$52 sps:$4 sm:$0xff]  }
   0x6   :  { %v7476_v14 = vld [vmem:[%s11338_s1 + $0x138] ss:$52 sps:$4 sm:$0xff]   ;;  %v7482_v18 = vld [vmem:[%s11338_s1 + $0x1a0] ss:$52 sps:$4 sm:$0xff]   ;;  %v7483_v19 = vld [vmem:[%s11338_s1 + $0x1a8] ss:$52 sps:$4 sm:$0xff]  }
   0x7   :  { %5194 = vmatpush1.bf16.msra.mxu0 %v7464_v6  ;;  %5358 = vmatpush1.bf16.msra.mxu1 %v7465_v7  ;;  %v7478_v16 = vld [vmem:[%s11338_s1 + $0x1a4] ss:$52 sps:$4 sm:$0xff]   ;;  %v7480_v17 = vld [vmem:[%s11338_s1 + $0x1ac] ss:$52 sps:$4 sm:$0xff]   ;;  %v7486_v21 = vld [vmem:[%s11338_s1 + $0x214] ss:$52 sps:$4 sm:$0xff]  }
   0x8   :  { %5195 = vmatprep.subr.bf16.mxu0 %v7466_v8  ;;  %5359 = vmatprep.subr.bf16.mxu1 %v7468_v9  ;;  %v7484_v20 = vld [vmem:[%s11338_s1 + $0x20c] ss:$52 sps:$4 sm:$0xff]   ;;  %v7488_v22 = vld [vmem:[%s11338_s1 + $0x208] ss:$52 sps:$4 sm:$0xff]   ;;  %v7489_v23 = vld [vmem:[%s11338_s1 + $0x210] ss:$52 sps:$4 sm:$0xff]  }
   0x9   :  { %v7490_v24 = vld [vmem:[%s11338_s1 + $0x274] ss:$52 sps:$4 sm:$0xff]   ;;  %v7492_v25 = vld [vmem:[%s11338_s1 + $0x27c] ss:$52 sps:$4 sm:$0xff]   ;;  %v7495_v27 = vld [vmem:[%s11338_s1 + $0x278] ss:$52 sps:$4 sm:$0xff]  }
   0xa   :  { %v7494_v26 = vld [vmem:[%s11338_s1 + $0x270] ss:$52 sps:$4 sm:$0xff]   ;;  %v7500_v30 = vld [vmem:[%s11338_s1 + $0x2d8] ss:$52 sps:$4 sm:$0xff]   ;;  %v7501_v31 = vld [vmem:[%s11338_s1 + $0x2e0] ss:$52 sps:$4 sm:$0xff]  }
   0xb   :  { %5196 = vmatpush1.bf16.msra.mxu0 %v7470_v10  ;;  %5360 = vmatpush1.bf16.msra.mxu1 %v7471_v11  ;;  %v7496_v28 = vld [vmem:[%s11338_s1 + $0x2dc] ss:$52 sps:$4 sm:$0xff]   ;;  %v7498_v29 = vld [vmem:[%s11338_s1 + $0x2e4] ss:$52 sps:$4 sm:$0xff]   ;;  %v7504_v33 = vld [vmem:[%s11338_s1 + $0x34c] ss:$52 sps:$4 sm:$0xff]  }
   0xc   :  { %5197 = vmatprep.subr.bf16.mxu0 %v7472_v12  ;;  %5361 = vmatprep.subr.bf16.mxu1 %v7474_v13  ;;  %v7502_v32 = vld [vmem:[%s11338_s1 + $0x344] ss:$52 sps:$4 sm:$0xff]   ;;  %v7506_v34 = vld [vmem:[%s11338_s1 + $0x340] ss:$52 sps:$4 sm:$0xff]   ;;  %v7507_v35 = vld [vmem:[%s11338_s1 + $0x348] ss:$52 sps:$4 sm:$0xff]  }
   0xd   :  { %v7508_v39 = vld [vmem:[%s11338_s1 + $0x3ac] ss:$52 sps:$4 sm:$0xff]   ;;  %v7510_v40 = vld [vmem:[%s11338_s1 + $0x3b4] ss:$52 sps:$4 sm:$0xff]   ;;  %v915_v43 = vshrl.u32 %v914_v38, 7  ;;  %vm6454_vm0 = vcmp.lt.s32.totalorder %v914_v38, 544 }
   0xe   :  { %v7512_v41 = vld [vmem:[%s11338_s1 + $0x3a8] ss:$52 sps:$4 sm:$0xff]   ;;  %v7513_v44 = vld [vmem:[%s11338_s1 + $0x3b0] ss:$52 sps:$4 sm:$0xff]   ;;  %v7519_v48 = vld [vmem:[%s11338_s1 + $0x418] ss:$52 sps:$4 sm:$0xff]  }
   0xf   :  { %5198 = vmatpush1.bf16.msra.mxu0 %v7476_v14  ;;  %5362 = vmatpush1.bf16.msra.mxu1 %v7477_v15  ;;  %v7514_v45 = vld [vmem:[%s11338_s1 + $0x414] ss:$52 sps:$4 sm:$0xff]   ;;  %v7516_v46 = vld [vmem:[%s11338_s1 + $0x41c] ss:$52 sps:$4 sm:$0xff]   ;;  %v8846_v49 = vsub.s32 %v913_v42, %v915_v43  ;;  %v7522_v51 = vld [vmem:[%s11338_s1 + $0x484] ss:$52 sps:$4 sm:$0xff]  }
  0x10   :  { %5199 = vmatprep.subr.bf16.mxu0 %v7478_v16  ;;  %5363 = vmatprep.subr.bf16.mxu1 %v7480_v17  ;;  %v7518_v47 = vld [vmem:[%s11338_s1 + $0x410] ss:$52 sps:$4 sm:$0xff]   ;;  %v7524_v53 = vld [vmem:[%s11338_s1 + $0x478] ss:$52 sps:$4 sm:$0xff]   ;;  %v7525_v55 = vld [vmem:[%s11338_s1 + $0x480] ss:$52 sps:$4 sm:$0xff]  }
  0x11   :  { %v7520_v50 = vld [vmem:[%s11338_s1 + $0x47c] ss:$52 sps:$4 sm:$0xff]   ;;  %v8857_v52 = vld [vmem:[%s11339_s0] sm:$0xff]  ;;  %v7534_v63 = vld [vmem:[%s11338_s1 + $0x554] ss:$52 sps:$4 sm:$0xff]  }
  0x12   :  { %v917_v54 = vrot.slane %v8857_v52, %v8846_v49  ;;  %v7526_v56 = vld [vmem:[%s11338_s1 + $0x4e4] ss:$52 sps:$4 sm:$0xff]   ;;  %v7528_v57 = vld [vmem:[%s11338_s1 + $0x4ec] ss:$52 sps:$4 sm:$0xff]   ;;  %v7531_v61 = vld [vmem:[%s11338_s1 + $0x4e8] ss:$52 sps:$4 sm:$0xff]  }
  0x13   :  { %5200 = vmatpush1.bf16.msra.mxu0 %v7482_v18  ;;  %5364 = vmatpush1.bf16.msra.mxu1 %v7483_v19  ;;  %v7530_v59 = vld [vmem:[%s11338_s1 + $0x4e0] ss:$52 sps:$4 sm:$0xff]   ;;  %v7536_v0 = vld [vmem:[%s11338_s1 + $0x548] ss:$52 sps:$4 sm:$0xff]   ;;  %v7537_v1 = vld [vmem:[%s11338_s1 + $0x550] ss:$52 sps:$4 sm:$0xff]  }
  0x14   :  { %5201 = vmatprep.subr.bf16.mxu0 %v7484_v20  ;;  %5365 = vmatprep.subr.bf16.mxu1 %v7486_v21  ;;  %v925_v58 = vcombine.high %v917_v54, %v917_v54  ;;  %v7532_v62 = vld [vmem:[%s11338_s1 + $0x54c] ss:$52 sps:$4 sm:$0xff]   ;;  %v7538_v2 = vld [vmem:[%s11338_s1 + $0x5b4] ss:$52 sps:$4 sm:$0xff]   ;;  %v7540_v3 = vld [vmem:[%s11338_s1 + $0x5bc] ss:$52 sps:$4 sm:$0xff]   ;;  %v8930_v13 = vrot.slane %v917_v54, %v8846_v49 }
  0x15   :  { %v7542_v4 = vld [vmem:[%s11338_s1 + $0x5b0] ss:$52 sps:$4 sm:$0xff]   ;;  %v7543_v5 = vld [vmem:[%s11338_s1 + $0x5b8] ss:$52 sps:$4 sm:$0xff]   ;;  %v7549_v9 = vld [vmem:[%s11338_s1 + $0x620] ss:$52 sps:$4 sm:$0xff]  }
  0x16   :  { %v8877_v60 = vrot.slane %v925_v58, %v8846_v49  ;;  %v7544_v6 = vld [vmem:[%s11338_s1 + $0x61c] ss:$52 sps:$4 sm:$0xff]   ;;  %v7546_v7 = vld [vmem:[%s11338_s1 + $0x624] ss:$52 sps:$4 sm:$0xff]   ;;  %v7555_v11 = vld [vmem:[%s11338_s1 + $0x68c] ss:$52 sps:$4 sm:$0xff]  }
  0x17   :  { %5202 = vmatpush1.bf16.msra.mxu0 %v7488_v22  ;;  %5366 = vmatpush1.bf16.msra.mxu1 %v7489_v23  ;;  %v7548_v8 = vld [vmem:[%s11338_s1 + $0x618] ss:$52 sps:$4 sm:$0xff]   ;;  %v7550_v12 = vld [vmem:[%s11338_s1 + $0x680] ss:$52 sps:$4 sm:$0xff]   ;;  %v7553_v14 = vld [vmem:[%s11338_s1 + $0x688] ss:$52 sps:$4 sm:$0xff]  }
  0x18   :  { %5203 = vmatprep.subr.bf16.mxu0 %v7490_v24  ;;  %5367 = vmatprep.subr.bf16.mxu1 %v7492_v25  ;;  %v7552_v10 = vld [vmem:[%s11338_s1 + $0x684] ss:$52 sps:$4 sm:$0xff]   ;;  %v7558_v15 = vld [vmem:[%s11338_s1 + $0x6ec] ss:$52 sps:$4 sm:$0xff]   ;;  %v7561_v16 = vld [vmem:[%s11338_s1 + $0x6f4] ss:$52 sps:$4 sm:$0xff]   ;;  %v8943_v17 = vcombine.high %v8877_v60, %v8877_v60 }
  0x19   :  { %5223 = vmatprep.mubr.bf16.mxu0 %v8877_v60  ;;  %5387 = vmatprep.mubr.bf16.mxu1 %v8877_v60  ;;  %v7556_v18 = vld [vmem:[%s11338_s1 + $0x6e8] ss:$52 sps:$4 sm:$0xff]   ;;  %v7559_v19 = vld [vmem:[%s11338_s1 + $0x6f0] ss:$52 sps:$4 sm:$0xff]   ;;  %v7565_v23 = vld [vmem:[%s11338_s1 + $0x758] ss:$52 sps:$4 sm:$0xff]  }
  0x1a   :  { %v7564_v20 = vld [vmem:[%s11338_s1 + $0x754] ss:$52 sps:$4 sm:$0xff]   ;;  %v7567_v21 = vld [vmem:[%s11338_s1 + $0x75c] ss:$52 sps:$4 sm:$0xff]   ;;  %v7573_v25 = vld [vmem:[%s11338_s1 + $0x7c4] ss:$52 sps:$4 sm:$0xff]  }
  0x1b   :  { %5204 = vmatpush1.bf16.msra.mxu0 %v7494_v26  ;;  %5368 = vmatpush1.bf16.msra.mxu1 %v7495_v27  ;;  %v7562_v22 = vld [vmem:[%s11338_s1 + $0x750] ss:$52 sps:$4 sm:$0xff]   ;;  %v7568_v26 = vld [vmem:[%s11338_s1 + $0x7b8] ss:$52 sps:$4 sm:$0xff]   ;;  %v7571_v27 = vld [vmem:[%s11338_s1 + $0x7c0] ss:$52 sps:$4 sm:$0xff]  }
  0x1c   :  { %5205 = vmatprep.subr.bf16.mxu0 %v7496_v28  ;;  %5369 = vmatprep.subr.bf16.mxu1 %v7498_v29  ;;  %v7570_v24 = vld [vmem:[%s11338_s1 + $0x7bc] ss:$52 sps:$4 sm:$0xff]   ;;  %v7576_v28 = vld [vmem:[%s11338_s1 + $0x824] ss:$52 sps:$4 sm:$0xff]   ;;  %v7579_v29 = vld [vmem:[%s11338_s1 + $0x82c] ss:$52 sps:$4 sm:$0xff]  }
  0x1d   :  { %v7588_v36 = vld [vmem:[%s11338_s1 + $0x8f4] ss:$52 sps:$4 sm:$0xff]   ;;  %v7591_v37 = vld [vmem:[%s11338_s1 + $0x8fc] ss:$52 sps:$4 sm:$0xff]   ;;  %v7597_v42 = vld [vmem:[%s11338_s1 + $0x964] ss:$52 sps:$4 sm:$0xff]  }
  0x1e   :  { %v7592_v43 = vld [vmem:[%s11338_s1 + $0x958] ss:$52 sps:$4 sm:$0xff]   ;;  %v7607_v54 = vld [vmem:[%s11338_s1 + $0xa30] ss:$52 sps:$4 sm:$0xff]  }
  0x1f   :  { %5206 = vmatpush1.bf16.msra.mxu0 %v7500_v30  ;;  %5370 = vmatpush1.bf16.msra.mxu1 %v7501_v31  ;;  %v7574_v30 = vld [vmem:[%s11338_s1 + $0x820] ss:$52 sps:$4 sm:$0xff]   ;;  %v7577_v31 = vld [vmem:[%s11338_s1 + $0x828] ss:$52 sps:$4 sm:$0xff]   ;;  %v7613_v58 = vld [vmem:[%s11338_s1 + $0xa98] ss:$52 sps:$4 sm:$0xff]  }
  0x20   :  { %5207 = vmatprep.subr.bf16.mxu0 %v7502_v32  ;;  %5371 = vmatprep.subr.bf16.mxu1 %v7504_v33  ;;  %v7582_v32 = vld [vmem:[%s11338_s1 + $0x88c] ss:$52 sps:$4 sm:$0xff]   ;;  %v7585_v33 = vld [vmem:[%s11338_s1 + $0x894] ss:$52 sps:$4 sm:$0xff]  }
  0x23   :  { %5208 = vmatpush1.bf16.msra.mxu0 %v7506_v34  ;;  %5372 = vmatpush1.bf16.msra.mxu1 %v7507_v35  ;;  %v7580_v34 = vld [vmem:[%s11338_s1 + $0x888] ss:$52 sps:$4 sm:$0xff]   ;;  %v7583_v35 = vld [vmem:[%s11338_s1 + $0x890] ss:$52 sps:$4 sm:$0xff]  }
  0x24   :  { %5209 = vmatprep.subr.bf16.mxu0 %v7508_v39  ;;  %5373 = vmatprep.subr.bf16.mxu1 %v7510_v40  ;;  %v7586_v39 = vld [vmem:[%s11338_s1 + $0x8f0] ss:$52 sps:$4 sm:$0xff]   ;;  %v7589_v40 = vld [vmem:[%s11338_s1 + $0x8f8] ss:$52 sps:$4 sm:$0xff]  }
  0x27   :  { %5210 = vmatpush1.bf16.msra.mxu0 %v7512_v41  ;;  %5374 = vmatpush1.bf16.msra.mxu1 %v7513_v44  ;;  %v7594_v41 = vld [vmem:[%s11338_s1 + $0x95c] ss:$52 sps:$4 sm:$0xff]   ;;  %v7595_v44 = vld [vmem:[%s11338_s1 + $0x960] ss:$52 sps:$4 sm:$0xff]  }
  0x28   :  { %5211 = vmatprep.subr.bf16.mxu0 %v7514_v45  ;;  %5375 = vmatprep.subr.bf16.mxu1 %v7516_v46  ;;  %v7600_v45 = vld [vmem:[%s11338_s1 + $0x9c4] ss:$52 sps:$4 sm:$0xff]   ;;  %v7603_v46 = vld [vmem:[%s11338_s1 + $0x9cc] ss:$52 sps:$4 sm:$0xff]  }
  0x2b   :  { %5212 = vmatpush1.bf16.msra.mxu0 %v7518_v47  ;;  %5376 = vmatpush1.bf16.msra.mxu1 %v7519_v48  ;;  %v7598_v47 = vld [vmem:[%s11338_s1 + $0x9c0] ss:$52 sps:$4 sm:$0xff]   ;;  %v7601_v48 = vld [vmem:[%s11338_s1 + $0x9c8] ss:$52 sps:$4 sm:$0xff]  }
  0x2c   :  { %5213 = vmatprep.subr.bf16.mxu0 %v7520_v50  ;;  %5377 = vmatprep.subr.bf16.mxu1 %v7522_v51  ;;  %v7606_v50 = vld [vmem:[%s11338_s1 + $0xa2c] ss:$52 sps:$4 sm:$0xff]   ;;  %v7609_v51 = vld [vmem:[%s11338_s1 + $0xa34] ss:$52 sps:$4 sm:$0xff]  }
  0x2f   :  { %5214 = vmatpush1.bf16.msra.mxu0 %v7524_v53  ;;  %5378 = vmatpush1.bf16.msra.mxu1 %v7525_v55  ;;  %v7604_v53 = vld [vmem:[%s11338_s1 + $0xa28] ss:$52 sps:$4 sm:$0xff]  }
  0x30   :  { %5215 = vmatprep.subr.bf16.mxu0 %v7526_v56  ;;  %5379 = vmatprep.subr.bf16.mxu1 %v7528_v57  ;;  %v7612_v55 = vld [vmem:[%s11338_s1 + $0xa94] ss:$52 sps:$4 sm:$0xff]   ;;  %v7615_v56 = vld [vmem:[%s11338_s1 + $0xa9c] ss:$52 sps:$4 sm:$0xff]  }
  0x31   :  { %v7610_v57 = vld [vmem:[%s11338_s1 + $0xa90] ss:$52 sps:$4 sm:$0xff]  }
  0x33   :  { %5216 = vmatpush1.bf16.msra.mxu0 %v7530_v59  ;;  %5380 = vmatpush1.bf16.msra.mxu1 %v7531_v61  ;;  %v7618_v59 = vld [vmem:[%s11338_s1 + $0xafc] ss:$52 sps:$4 sm:$0xff]   ;;  %v7621_v61 = vld [vmem:[%s11338_s1 + $0xb04] ss:$52 sps:$4 sm:$0xff]  }
  0x34   :  { %5217 = vmatprep.subr.bf16.mxu0 %v7532_v62  ;;  %5381 = vmatprep.subr.bf16.mxu1 %v7534_v63  ;;  %v7616_v62 = vld [vmem:[%s11338_s1 + $0xaf8] ss:$52 sps:$4 sm:$0xff]   ;;  %v7619_v63 = vld [vmem:[%s11338_s1 + $0xb00] ss:$52 sps:$4 sm:$0xff]  }
  0x37   :  { %5218 = vmatpush1.bf16.msra.mxu0 %v7536_v0  ;;  %5382 = vmatpush1.bf16.msra.mxu1 %v7537_v1  ;;  %v7624_v0 = vld [vmem:[%s11338_s1 + $0xb64] ss:$52 sps:$4 sm:$0xff]   ;;  %v7627_v1 = vld [vmem:[%s11338_s1 + $0xb6c] ss:$52 sps:$4 sm:$0xff]  }
  0x38   :  { %5219 = vmatprep.subr.bf16.mxu0 %v7538_v2  ;;  %5383 = vmatprep.subr.bf16.mxu1 %v7540_v3  ;;  %v7622_v2 = vld [vmem:[%s11338_s1 + $0xb60] ss:$52 sps:$4 sm:$0xff]   ;;  %v7625_v3 = vld [vmem:[%s11338_s1 + $0xb68] ss:$52 sps:$4 sm:$0xff]  }
  0x3b   :  { %5220 = vmatpush1.bf16.msra.mxu0 %v7542_v4  ;;  %5384 = vmatpush1.bf16.msra.mxu1 %v7543_v5  ;;  %v7630_v4 = vld [vmem:[%s11338_s1 + $0xbcc] ss:$52 sps:$4 sm:$0xff]   ;;  %v7633_v5 = vld [vmem:[%s11338_s1 + $0xbd4] ss:$52 sps:$4 sm:$0xff]  }
  0x3c   :  { %5221 = vmatprep.subr.bf16.mxu0 %v7544_v6  ;;  %5385 = vmatprep.subr.bf16.mxu1 %v7546_v7  ;;  %v7628_v6 = vld [vmem:[%s11338_s1 + $0xbc8] ss:$52 sps:$4 sm:$0xff]   ;;  %v7631_v7 = vld [vmem:[%s11338_s1 + $0xbd0] ss:$52 sps:$4 sm:$0xff]  }
  0x3f   :  { %5222 = vmatpush1.bf16.msra.mxu0 %v7548_v8  ;;  %5386 = vmatpush1.bf16.msra.mxu1 %v7549_v9  ;;  %v7636_v8 = vld [vmem:[%s11338_s1 + $0xc34] ss:$52 sps:$4 sm:$0xff]   ;;  %v7639_v9 = vld [vmem:[%s11338_s1 + $0xc3c] ss:$52 sps:$4 sm:$0xff]  }
  0x40   :  { %5232 = vmatprep.subr.bf16.mxu0 %v7552_v10  ;;  %5396 = vmatprep.subr.bf16.mxu1 %v7555_v11  ;;  %v910_v10 = vcombine.high %v8857_v52, %v8857_v52  ;;  %v7634_v11 = vld [vmem:[%s11338_s1 + $0xc30] ss:$52 sps:$4 sm:$0xff]  }
  0x41   :  { %v7645_v52 = vld [vmem:[%s11338_s1 + $0xca4] ss:$52 sps:$4 sm:$0xff]  }
  0x42   :  { %5224 = vmatmul.mubr.bf16.vlgmr.msra.gmra.mrb[0].mxu0 %v8930_v13  ;;  %5388 = vmatmul.mubr.bf16.vlgmr.msra.gmra.mrb[0].mxu1 %v8930_v13 }
  0x43   :  { %5233 = vmatpush1.bf16.msra.mxu0 %v7550_v12  ;;  %5397 = vmatpush1.bf16.msra.mxu1 %v7553_v14  ;;  %v7637_v12 = vld [vmem:[%s11338_s1 + $0xc38] ss:$52 sps:$4 sm:$0xff]   ;;  %v7642_v14 = vld [vmem:[%s11338_s1 + $0xc9c] ss:$52 sps:$4 sm:$0xff]  }
  0x44   :  { %5234 = vmatprep.subr.bf16.mxu0 %v7558_v15  ;;  %5398 = vmatprep.subr.bf16.mxu1 %v7561_v16  ;;  %v9120_v15 = vrot.slane %v910_v10, %v8846_v49  ;;  %v7640_v16 = vld [vmem:[%s11338_s1 + $0xc98] ss:$52 sps:$4 sm:$0xff]  }
  0x45   :  { %5264 = vmatprep.mubr.bf16.mxu0 %v8943_v17  ;;  %5428 = vmatprep.mubr.bf16.mxu1 %v8943_v17  ;;  %v7720_v10 = vld [vmem:[%s11338_s1 + $0x11e4] ss:$52 sps:$4 sm:$0xff]  }
  0x47   :  { %5235 = vmatpush1.bf16.msra.mxu0 %v7556_v18  ;;  %5399 = vmatpush1.bf16.msra.mxu1 %v7559_v19  ;;  %v7643_v18 = vld [vmem:[%s11338_s1 + $0xca0] ss:$52 sps:$4 sm:$0xff]   ;;  %v7648_v19 = vld [vmem:[%s11338_s1 + $0xd04] ss:$52 sps:$4 sm:$0xff]  }
  0x48   :  { %5236 = vmatprep.subr.bf16.mxu0 %v7564_v20  ;;  %5400 = vmatprep.subr.bf16.mxu1 %v7567_v21  ;;  %v7651_v20 = vld [vmem:[%s11338_s1 + $0xd0c] ss:$52 sps:$4 sm:$0xff]   ;;  %v926_v21 = vcombine.high %v9120_v15, %v9120_v15 }
  0x4b   :  { %5237 = vmatpush1.bf16.msra.mxu0 %v7562_v22  ;;  %5401 = vmatpush1.bf16.msra.mxu1 %v7565_v23  ;;  %v7646_v22 = vld [vmem:[%s11338_s1 + $0xd00] ss:$52 sps:$4 sm:$0xff]   ;;  %v9141_v23 = vcombine.high %v8930_v13, %v8930_v13 }
  0x4c   :  { %5238 = vmatprep.subr.bf16.mxu0 %v7570_v24  ;;  %5402 = vmatprep.subr.bf16.mxu1 %v7573_v25  ;;  %v7649_v24 = vld [vmem:[%s11338_s1 + $0xd08] ss:$52 sps:$4 sm:$0xff]   ;;  %v7654_v25 = vld [vmem:[%s11338_s1 + $0xd6c] ss:$52 sps:$4 sm:$0xff]  }
  0x4f   :  { %5239 = vmatpush1.bf16.msra.mxu0 %v7568_v26  ;;  %5403 = vmatpush1.bf16.msra.mxu1 %v7571_v27  ;;  %v7657_v26 = vld [vmem:[%s11338_s1 + $0xd74] ss:$52 sps:$4 sm:$0xff]   ;;  %v9153_v27 = vrot.slane %v926_v21, %v8846_v49  ;;  %v7735_v21 = vld [vmem:[%s11338_s1 + $0x12bc] ss:$52 sps:$4 sm:$0xff]  }
  0x50   :  { %5240 = vmatprep.subr.bf16.mxu0 %v7576_v28  ;;  %5404 = vmatprep.subr.bf16.mxu1 %v7579_v29  ;;  %v7652_v28 = vld [vmem:[%s11338_s1 + $0xd68] ss:$52 sps:$4 sm:$0xff]   ;;  %v7655_v29 = vld [vmem:[%s11338_s1 + $0xd70] ss:$52 sps:$4 sm:$0xff]  }
  0x53   :  { %5241 = vmatpush1.bf16.msra.mxu0 %v7574_v30  ;;  %5405 = vmatpush1.bf16.msra.mxu1 %v7577_v31  ;;  %v7660_v30 = vld [vmem:[%s11338_s1 + $0xdd4] ss:$52 sps:$4 sm:$0xff]   ;;  %v7663_v31 = vld [vmem:[%s11338_s1 + $0xddc] ss:$52 sps:$4 sm:$0xff]  }
  0x54   :  { %5242 = vmatprep.subr.bf16.mxu0 %v7582_v32  ;;  %5406 = vmatprep.subr.bf16.mxu1 %v7585_v33  ;;  %v7658_v32 = vld [vmem:[%s11338_s1 + $0xdd0] ss:$52 sps:$4 sm:$0xff]   ;;  %v7661_v33 = vld [vmem:[%s11338_s1 + $0xdd8] ss:$52 sps:$4 sm:$0xff]  }
  0x57   :  { %5243 = vmatpush1.bf16.msra.mxu0 %v7580_v34  ;;  %5407 = vmatpush1.bf16.msra.mxu1 %v7583_v35  ;;  %v7666_v34 = vld [vmem:[%s11338_s1 + $0xe3c] ss:$52 sps:$4 sm:$0xff]   ;;  %v7669_v35 = vld [vmem:[%s11338_s1 + $0xe44] ss:$52 sps:$4 sm:$0xff]  }
  0x58   :  { %5244 = vmatprep.subr.bf16.mxu0 %v7588_v36  ;;  %5408 = vmatprep.subr.bf16.mxu1 %v7591_v37  ;;  %v7664_v36 = vld [vmem:[%s11338_s1 + $0xe38] ss:$52 sps:$4 sm:$0xff]   ;;  %v7667_v37 = vld [vmem:[%s11338_s1 + $0xe40] ss:$52 sps:$4 sm:$0xff]  }
  0x5b   :  { %5245 = vmatpush1.bf16.msra.mxu0 %v7586_v39  ;;  %5409 = vmatpush1.bf16.msra.mxu1 %v7589_v40  ;;  %v7672_v39 = vld [vmem:[%s11338_s1 + $0xea4] ss:$52 sps:$4 sm:$0xff]   ;;  %v7675_v40 = vld [vmem:[%s11338_s1 + $0xeac] ss:$52 sps:$4 sm:$0xff]  }
  0x5c   :  { %5246 = vmatprep.subr.bf16.mxu0 %v7594_v41  ;;  %5410 = vmatprep.subr.bf16.mxu1 %v7597_v42  ;;  %v7670_v41 = vld [vmem:[%s11338_s1 + $0xea0] ss:$52 sps:$4 sm:$0xff]   ;;  %v7673_v42 = vld [vmem:[%s11338_s1 + $0xea8] ss:$52 sps:$4 sm:$0xff]  }
  0x5f   :  { %5247 = vmatpush1.bf16.msra.mxu0 %v7592_v43  ;;  %5411 = vmatpush1.bf16.msra.mxu1 %v7595_v44  ;;  %v7678_v43 = vld [vmem:[%s11338_s1 + $0xf0c] ss:$52 sps:$4 sm:$0xff]   ;;  %v7681_v44 = vld [vmem:[%s11338_s1 + $0xf14] ss:$52 sps:$4 sm:$0xff]  }
  0x60   :  { %5248 = vmatprep.subr.bf16.mxu0 %v7600_v45  ;;  %5412 = vmatprep.subr.bf16.mxu1 %v7603_v46  ;;  %v7676_v45 = vld [vmem:[%s11338_s1 + $0xf08] ss:$52 sps:$4 sm:$0xff]   ;;  %v7679_v46 = vld [vmem:[%s11338_s1 + $0xf10] ss:$52 sps:$4 sm:$0xff]  }
  0x63   :  { %5249 = vmatpush1.bf16.msra.mxu0 %v7598_v47  ;;  %5413 = vmatpush1.bf16.msra.mxu1 %v7601_v48  ;;  %v7684_v47 = vld [vmem:[%s11338_s1 + $0xf74] ss:$52 sps:$4 sm:$0xff]   ;;  %v7687_v48 = vld [vmem:[%s11338_s1 + $0xf7c] ss:$52 sps:$4 sm:$0xff]  }
  0x64   :  { %5250 = vmatprep.subr.bf16.mxu0 %v7606_v50  ;;  %5414 = vmatprep.subr.bf16.mxu1 %v7609_v51  ;;  %v7682_v50 = vld [vmem:[%s11338_s1 + $0xf70] ss:$52 sps:$4 sm:$0xff]   ;;  %v7685_v51 = vld [vmem:[%s11338_s1 + $0xf78] ss:$52 sps:$4 sm:$0xff]  }
  0x67   :  { %5251 = vmatpush1.bf16.msra.mxu0 %v7604_v53  ;;  %5415 = vmatpush1.bf16.msra.mxu1 %v7607_v54  ;;  %v7690_v53 = vld [vmem:[%s11338_s1 + $0xfdc] ss:$52 sps:$4 sm:$0xff]   ;;  %v7693_v54 = vld [vmem:[%s11338_s1 + $0xfe4] ss:$52 sps:$4 sm:$0xff]  }
  0x68   :  { %5252 = vmatprep.subr.bf16.mxu0 %v7612_v55  ;;  %5416 = vmatprep.subr.bf16.mxu1 %v7615_v56  ;;  %v7688_v55 = vld [vmem:[%s11338_s1 + $0xfd8] ss:$52 sps:$4 sm:$0xff]   ;;  %v7691_v56 = vld [vmem:[%s11338_s1 + $0xfe0] ss:$52 sps:$4 sm:$0xff]  }
  0x6b   :  { %5253 = vmatpush1.bf16.msra.mxu0 %v7610_v57  ;;  %5417 = vmatpush1.bf16.msra.mxu1 %v7613_v58  ;;  %v7696_v57 = vld [vmem:[%s11338_s1 + $0x1044] ss:$52 sps:$4 sm:$0xff]   ;;  %v7699_v58 = vld [vmem:[%s11338_s1 + $0x104c] ss:$52 sps:$4 sm:$0xff]  }
  0x6c   :  { %5254 = vmatprep.subr.bf16.mxu0 %v7618_v59  ;;  %5418 = vmatprep.subr.bf16.mxu1 %v7621_v61  ;;  %v7694_v59 = vld [vmem:[%s11338_s1 + $0x1040] ss:$52 sps:$4 sm:$0xff]   ;;  %v7697_v61 = vld [vmem:[%s11338_s1 + $0x1048] ss:$52 sps:$4 sm:$0xff]  }
  0x6f   :  { %5255 = vmatpush1.bf16.msra.mxu0 %v7616_v62  ;;  %5419 = vmatpush1.bf16.msra.mxu1 %v7619_v63  ;;  %v7702_v62 = vld [vmem:[%s11338_s1 + $0x10ac] ss:$52 sps:$4 sm:$0xff]   ;;  %v7705_v63 = vld [vmem:[%s11338_s1 + $0x10b4] ss:$52 sps:$4 sm:$0xff]  }
  0x70   :  { %5256 = vmatprep.subr.bf16.mxu0 %v7624_v0  ;;  %5420 = vmatprep.subr.bf16.mxu1 %v7627_v1  ;;  %v7700_v0 = vld [vmem:[%s11338_s1 + $0x10a8] ss:$52 sps:$4 sm:$0xff]   ;;  %v7703_v1 = vld [vmem:[%s11338_s1 + $0x10b0] ss:$52 sps:$4 sm:$0xff]  }
  0x73   :  { %5257 = vmatpush1.bf16.msra.mxu0 %v7622_v2  ;;  %5421 = vmatpush1.bf16.msra.mxu1 %v7625_v3  ;;  %v7708_v2 = vld [vmem:[%s11338_s1 + $0x1114] ss:$52 sps:$4 sm:$0xff]   ;;  %v7711_v3 = vld [vmem:[%s11338_s1 + $0x111c] ss:$52 sps:$4 sm:$0xff]  }
  0x74   :  { %5258 = vmatprep.subr.bf16.mxu0 %v7630_v4  ;;  %5422 = vmatprep.subr.bf16.mxu1 %v7633_v5  ;;  %v7706_v4 = vld [vmem:[%s11338_s1 + $0x1110] ss:$52 sps:$4 sm:$0xff]   ;;  %v7709_v5 = vld [vmem:[%s11338_s1 + $0x1118] ss:$52 sps:$4 sm:$0xff]  }
  0x77   :  { %5259 = vmatpush1.bf16.msra.mxu0 %v7628_v6  ;;  %5423 = vmatpush1.bf16.msra.mxu1 %v7631_v7  ;;  %v7714_v6 = vld [vmem:[%s11338_s1 + $0x117c] ss:$52 sps:$4 sm:$0xff]   ;;  %v7717_v7 = vld [vmem:[%s11338_s1 + $0x1184] ss:$52 sps:$4 sm:$0xff]  }
  0x78   :  { %5260 = vmatprep.subr.bf16.mxu0 %v7636_v8  ;;  %5424 = vmatprep.subr.bf16.mxu1 %v7639_v9  ;;  %v7712_v8 = vld [vmem:[%s11338_s1 + $0x1178] ss:$52 sps:$4 sm:$0xff]   ;;  %v7715_v9 = vld [vmem:[%s11338_s1 + $0x1180] ss:$52 sps:$4 sm:$0xff]  }
  0x7b   :  { %5261 = vmatpush1.bf16.msra.mxu0 %v7634_v11  ;;  %5425 = vmatpush1.bf16.msra.mxu1 %v7637_v12  ;;  %v7723_v11 = vld [vmem:[%s11338_s1 + $0x11ec] ss:$52 sps:$4 sm:$0xff]  }
  0x7c   :  { %5262 = vmatprep.subr.bf16.mxu0 %v7642_v14  ;;  %5426 = vmatprep.subr.bf16.mxu1 %v7645_v52  ;;  %v7718_v12 = vld [vmem:[%s11338_s1 + $0x11e0] ss:$52 sps:$4 sm:$0xff]   ;;  %v7721_v14 = vld [vmem:[%s11338_s1 + $0x11e8] ss:$52 sps:$4 sm:$0xff]  }
  0x7d   :  { %v7726_v52 = vld [vmem:[%s11338_s1 + $0x124c] ss:$52 sps:$4 sm:$0xff]  }
  0x7f   :  { %5263 = vmatpush1.bf16.msra.mxu0 %v7640_v16  ;;  %5427 = vmatpush1.bf16.msra.mxu1 %v7643_v18  ;;  %v7729_v16 = vld [vmem:[%s11338_s1 + $0x1254] ss:$52 sps:$4 sm:$0xff]  }
  0x80   :  { %5273 = vmatprep.subr.bf16.mxu0 %v7648_v19  ;;  %5437 = vmatprep.subr.bf16.mxu1 %v7651_v20  ;;  %v7724_v18 = vld [vmem:[%s11338_s1 + $0x1248] ss:$52 sps:$4 sm:$0xff]   ;;  %v7727_v19 = vld [vmem:[%s11338_s1 + $0x1250] ss:$52 sps:$4 sm:$0xff]  }
  0x81   :  { %v7732_v20 = vld [vmem:[%s11338_s1 + $0x12b4] ss:$52 sps:$4 sm:$0xff]  }
  0x82   :  { %5265 = vmatmul.mubr.bf16.vlgmr.msra.gmra.mrb[0].mxu0 %v9141_v23  ;;  %5429 = vmatmul.mubr.bf16.vlgmr.msra.gmra.mrb[0].mxu1 %v9141_v23 }
  0x83   :  { %5274 = vmatpush1.bf16.msra.mxu0 %v7646_v22  ;;  %5438 = vmatpush1.bf16.msra.mxu1 %v7649_v24  ;;  %v7730_v22 = vld [vmem:[%s11338_s1 + $0x12b0] ss:$52 sps:$4 sm:$0xff]   ;;  %v7733_v24 = vld [vmem:[%s11338_s1 + $0x12b8] ss:$52 sps:$4 sm:$0xff]  }
  0x84   :  { %5275 = vmatprep.subr.bf16.mxu0 %v7654_v25  ;;  %5439 = vmatprep.subr.bf16.mxu1 %v7657_v26  ;;  %v7738_v25 = vld [vmem:[%s11338_s1 + $0x131c] ss:$52 sps:$4 sm:$0xff]   ;;  %v7741_v26 = vld [vmem:[%s11338_s1 + $0x1324] ss:$52 sps:$4 sm:$0xff]  }
  0x85   :  { %5305 = vmatprep.mubr.bf16.mxu0 %v9153_v27  ;;  %5469 = vmatprep.mubr.bf16.mxu1 %v9153_v27 }
  0x87   :  { %5276 = vmatpush1.bf16.msra.mxu0 %v7652_v28  ;;  %5440 = vmatpush1.bf16.msra.mxu1 %v7655_v29  ;;  %v7736_v28 = vld [vmem:[%s11338_s1 + $0x1318] ss:$52 sps:$4 sm:$0xff]   ;;  %v7739_v29 = vld [vmem:[%s11338_s1 + $0x1320] ss:$52 sps:$4 sm:$0xff]  }
  0x88   :  { %5277 = vmatprep.subr.bf16.mxu0 %v7660_v30  ;;  %5441 = vmatprep.subr.bf16.mxu1 %v7663_v31  ;;  %v7745_v30 = vld [vmem:[%s11338_s1 + $0x1384] ss:$52 sps:$4 sm:$0xff]   ;;  %v7748_v31 = vld [vmem:[%s11338_s1 + $0x138c] ss:$52 sps:$4 sm:$0xff]  }
  0x8b   :  { %5278 = vmatpush1.bf16.msra.mxu0 %v7658_v32  ;;  %5442 = vmatpush1.bf16.msra.mxu1 %v7661_v33  ;;  %v7743_v32 = vld [vmem:[%s11338_s1 + $0x1380] ss:$52 sps:$4 sm:$0xff]   ;;  %v9344_v33 = vrot.slane %v9120_v15, %v8846_v49  ;;  %v9357_v15 = vcombine.high %v9153_v27, %v9153_v27 }
  0x8c   :  { %5279 = vmatprep.subr.bf16.mxu0 %v7666_v34  ;;  %5443 = vmatprep.subr.bf16.mxu1 %v7669_v35  ;;  %v7746_v34 = vld [vmem:[%s11338_s1 + $0x1388] ss:$52 sps:$4 sm:$0xff]   ;;  %v7751_v35 = vld [vmem:[%s11338_s1 + $0x13ec] ss:$52 sps:$4 sm:$0xff]  }
  0x8f   :  { %5280 = vmatpush1.bf16.msra.mxu0 %v7664_v36  ;;  %5444 = vmatpush1.bf16.msra.mxu1 %v7667_v37  ;;  %v7754_v36 = vld [vmem:[%s11338_s1 + $0x13f4] ss:$52 sps:$4 sm:$0xff]  }
  0x90   :  { %5281 = vmatprep.subr.bf16.mxu0 %v7672_v39  ;;  %5445 = vmatprep.subr.bf16.mxu1 %v7675_v40  ;;  %v7749_v37 = vld [vmem:[%s11338_s1 + $0x13e8] ss:$52 sps:$4 sm:$0xff]   ;;  %v7752_v39 = vld [vmem:[%s11338_s1 + $0x13f0] ss:$52 sps:$4 sm:$0xff]  }
  0x91   :  { %v7757_v40 = vld [vmem:[%s11338_s1 + $0x1454] ss:$52 sps:$4 sm:$0xff]  }
  0x93   :  { %5282 = vmatpush1.bf16.msra.mxu0 %v7670_v41  ;;  %5446 = vmatpush1.bf16.msra.mxu1 %v7673_v42  ;;  %v7760_v41 = vld [vmem:[%s11338_s1 + $0x145c] ss:$52 sps:$4 sm:$0xff]  }
  0x94   :  { %5283 = vmatprep.subr.bf16.mxu0 %v7678_v43  ;;  %5447 = vmatprep.subr.bf16.mxu1 %v7681_v44  ;;  %v7755_v42 = vld [vmem:[%s11338_s1 + $0x1450] ss:$52 sps:$4 sm:$0xff]   ;;  %v7758_v43 = vld [vmem:[%s11338_s1 + $0x1458] ss:$52 sps:$4 sm:$0xff]  }
  0x95   :  { %v7763_v44 = vld [vmem:[%s11338_s1 + $0x14bc] ss:$52 sps:$4 sm:$0xff]  }
  0x97   :  { %5284 = vmatpush1.bf16.msra.mxu0 %v7676_v45  ;;  %5448 = vmatpush1.bf16.msra.mxu1 %v7679_v46  ;;  %v7766_v45 = vld [vmem:[%s11338_s1 + $0x14c4] ss:$52 sps:$4 sm:$0xff]  }
  0x98   :  { %5285 = vmatprep.subr.bf16.mxu0 %v7684_v47  ;;  %5449 = vmatprep.subr.bf16.mxu1 %v7687_v48  ;;  %v7761_v46 = vld [vmem:[%s11338_s1 + $0x14b8] ss:$52 sps:$4 sm:$0xff]   ;;  %v7764_v47 = vld [vmem:[%s11338_s1 + $0x14c0] ss:$52 sps:$4 sm:$0xff]  }
  0x99   :  { %v7769_v48 = vld [vmem:[%s11338_s1 + $0x1524] ss:$52 sps:$4 sm:$0xff]  }
  0x9b   :  { %5286 = vmatpush1.bf16.msra.mxu0 %v7682_v50  ;;  %5450 = vmatpush1.bf16.msra.mxu1 %v7685_v51  ;;  %v7772_v50 = vld [vmem:[%s11338_s1 + $0x152c] ss:$52 sps:$4 sm:$0xff]  }
  0x9c   :  { %5287 = vmatprep.subr.bf16.mxu0 %v7690_v53  ;;  %5451 = vmatprep.subr.bf16.mxu1 %v7693_v54  ;;  %v7767_v51 = vld [vmem:[%s11338_s1 + $0x1520] ss:$52 sps:$4 sm:$0xff]   ;;  %v7770_v53 = vld [vmem:[%s11338_s1 + $0x1528] ss:$52 sps:$4 sm:$0xff]  }
  0x9d   :  { %v7775_v54 = vld [vmem:[%s11338_s1 + $0x158c] ss:$52 sps:$4 sm:$0xff]  }
  0x9f   :  { %5288 = vmatpush1.bf16.msra.mxu0 %v7688_v55  ;;  %5452 = vmatpush1.bf16.msra.mxu1 %v7691_v56  ;;  %v7778_v55 = vld [vmem:[%s11338_s1 + $0x1594] ss:$52 sps:$4 sm:$0xff]  }
  0xa0   :  { %5289 = vmatprep.subr.bf16.mxu0 %v7696_v57  ;;  %5453 = vmatprep.subr.bf16.mxu1 %v7699_v58  ;;  %v7773_v56 = vld [vmem:[%s11338_s1 + $0x1588] ss:$52 sps:$4 sm:$0xff]   ;;  %v7776_v57 = vld [vmem:[%s11338_s1 + $0x1590] ss:$52 sps:$4 sm:$0xff]  }
  0xa1   :  { %v7781_v58 = vld [vmem:[%s11338_s1 + $0x15f4] ss:$52 sps:$4 sm:$0xff]  }
  0xa3   :  { %5290 = vmatpush1.bf16.msra.mxu0 %v7694_v59  ;;  %5454 = vmatpush1.bf16.msra.mxu1 %v7697_v61  ;;  %v7784_v59 = vld [vmem:[%s11338_s1 + $0x15fc] ss:$52 sps:$4 sm:$0xff]  }
  0xa4   :  { %5291 = vmatprep.subr.bf16.mxu0 %v7702_v62  ;;  %5455 = vmatprep.subr.bf16.mxu1 %v7705_v63  ;;  %v7779_v61 = vld [vmem:[%s11338_s1 + $0x15f0] ss:$52 sps:$4 sm:$0xff]   ;;  %v7782_v62 = vld [vmem:[%s11338_s1 + $0x15f8] ss:$52 sps:$4 sm:$0xff]  }
  0xa5   :  { %v7787_v63 = vld [vmem:[%s11338_s1 + $0x165c] ss:$52 sps:$4 sm:$0xff]  }
  0xa7   :  { %5292 = vmatpush1.bf16.msra.mxu0 %v7700_v0  ;;  %5456 = vmatpush1.bf16.msra.mxu1 %v7703_v1  ;;  %v7790_v0 = vld [vmem:[%s11338_s1 + $0x1664] ss:$52 sps:$4 sm:$0xff]  }
  0xa8   :  { %5293 = vmatprep.subr.bf16.mxu0 %v7708_v2  ;;  %5457 = vmatprep.subr.bf16.mxu1 %v7711_v3  ;;  %v7785_v1 = vld [vmem:[%s11338_s1 + $0x1658] ss:$52 sps:$4 sm:$0xff]   ;;  %v7788_v2 = vld [vmem:[%s11338_s1 + $0x1660] ss:$52 sps:$4 sm:$0xff]  }
  0xa9   :  { %v7793_v3 = vld [vmem:[%s11338_s1 + $0x16c4] ss:$52 sps:$4 sm:$0xff]  }
  0xab   :  { %5294 = vmatpush1.bf16.msra.mxu0 %v7706_v4  ;;  %5458 = vmatpush1.bf16.msra.mxu1 %v7709_v5  ;;  %v7796_v4 = vld [vmem:[%s11338_s1 + $0x16cc] ss:$52 sps:$4 sm:$0xff]  }
  0xac   :  { %5295 = vmatprep.subr.bf16.mxu0 %v7714_v6  ;;  %5459 = vmatprep.subr.bf16.mxu1 %v7717_v7  ;;  %v7791_v5 = vld [vmem:[%s11338_s1 + $0x16c0] ss:$52 sps:$4 sm:$0xff]   ;;  %v7794_v6 = vld [vmem:[%s11338_s1 + $0x16c8] ss:$52 sps:$4 sm:$0xff]  }
  0xad   :  { %v7799_v7 = vld [vmem:[%s11338_s1 + $0x172c] ss:$52 sps:$4 sm:$0xff]  }
  0xaf   :  { %5296 = vmatpush1.bf16.msra.mxu0 %v7712_v8  ;;  %5460 = vmatpush1.bf16.msra.mxu1 %v7715_v9  ;;  %v7802_v8 = vld [vmem:[%s11338_s1 + $0x1734] ss:$52 sps:$4 sm:$0xff]  }
  0xb0   :  { %5297 = vmatprep.subr.bf16.mxu0 %v7720_v10  ;;  %5461 = vmatprep.subr.bf16.mxu1 %v7723_v11  ;;  %v7797_v9 = vld [vmem:[%s11338_s1 + $0x1728] ss:$52 sps:$4 sm:$0xff]   ;;  %v7800_v10 = vld [vmem:[%s11338_s1 + $0x1730] ss:$52 sps:$4 sm:$0xff]  }
  0xb1   :  { %v7805_v11 = vld [vmem:[%s11338_s1 + $0x1794] ss:$52 sps:$4 sm:$0xff]  }
  0xb3   :  { %5298 = vmatpush1.bf16.msra.mxu0 %v7718_v12  ;;  %5462 = vmatpush1.bf16.msra.mxu1 %v7721_v14  ;;  %v7808_v12 = vld [vmem:[%s11338_s1 + $0x179c] ss:$52 sps:$4 sm:$0xff]  }
  0xb4   :  { %5299 = vmatprep.subr.bf16.mxu0 %v7726_v52  ;;  %5463 = vmatprep.subr.bf16.mxu1 %v7729_v16  ;;  %v7803_v14 = vld [vmem:[%s11338_s1 + $0x1790] ss:$52 sps:$4 sm:$0xff]   ;;  %v7806_v52 = vld [vmem:[%s11338_s1 + $0x1798] ss:$52 sps:$4 sm:$0xff]  }
  0xb5   :  { %v7811_v16 = vld [vmem:[%s11338_s1 + $0x17fc] ss:$52 sps:$4 sm:$0xff]  }
  0xb7   :  { %5300 = vmatpush1.bf16.msra.mxu0 %v7724_v18  ;;  %5464 = vmatpush1.bf16.msra.mxu1 %v7727_v19  ;;  %v7814_v18 = vld [vmem:[%s11338_s1 + $0x1804] ss:$52 sps:$4 sm:$0xff]  }
  0xb8   :  { %5301 = vmatprep.subr.bf16.mxu0 %v7732_v20  ;;  %5465 = vmatprep.subr.bf16.mxu1 %v7735_v21  ;;  %v7809_v19 = vld [vmem:[%s11338_s1 + $0x17f8] ss:$52 sps:$4 sm:$0xff]   ;;  %v7812_v20 = vld [vmem:[%s11338_s1 + $0x1800] ss:$52 sps:$4 sm:$0xff]  }
  0xb9   :  { %v7817_v21 = vld [vmem:[%s11338_s1 + $0x1864] ss:$52 sps:$4 sm:$0xff]  }
  0xbb   :  { %5302 = vmatpush1.bf16.msra.mxu0 %v7730_v22  ;;  %5466 = vmatpush1.bf16.msra.mxu1 %v7733_v24  ;;  %v7820_v22 = vld [vmem:[%s11338_s1 + $0x186c] ss:$52 sps:$4 sm:$0xff]  }
  0xbc   :  { %5303 = vmatprep.subr.bf16.mxu0 %v7738_v25  ;;  %5467 = vmatprep.subr.bf16.mxu1 %v7741_v26  ;;  %v7815_v24 = vld [vmem:[%s11338_s1 + $0x1860] ss:$52 sps:$4 sm:$0xff]   ;;  %v7818_v25 = vld [vmem:[%s11338_s1 + $0x1868] ss:$52 sps:$4 sm:$0xff]  }
  0xbd   :  { %v7823_v26 = vld [vmem:[%s11338_s1 + $0x18cc] ss:$52 sps:$4 sm:$0xff]  }
  0xbf   :  { %5304 = vmatpush1.bf16.msra.mxu0 %v7736_v28  ;;  %5468 = vmatpush1.bf16.msra.mxu1 %v7739_v29  ;;  %v7826_v28 = vld [vmem:[%s11338_s1 + $0x18d4] ss:$52 sps:$4 sm:$0xff]  }
  0xc0   :  { %5314 = vmatprep.subr.bf16.mxu0 %v7745_v30  ;;  %5478 = vmatprep.subr.bf16.mxu1 %v7748_v31  ;;  %v7821_v29 = vld [vmem:[%s11338_s1 + $0x18c8] ss:$52 sps:$4 sm:$0xff]   ;;  %v7824_v30 = vld [vmem:[%s11338_s1 + $0x18d0] ss:$52 sps:$4 sm:$0xff]  }
  0xc1   :  { %v7829_v31 = vld [vmem:[%s11338_s1 + $0x1934] ss:$52 sps:$4 sm:$0xff]  }
  0xc2   :  { %5306 = vmatmul.mubr.bf16.vlgmr.msra.gmra.mrb[0].mxu0 %v9344_v33  ;;  %5470 = vmatmul.mubr.bf16.vlgmr.msra.gmra.mrb[0].mxu1 %v9344_v33 }
  0xc3   :  { %5315 = vmatpush1.bf16.msra.mxu0 %v7743_v32  ;;  %5479 = vmatpush1.bf16.msra.mxu1 %v7746_v34  ;;  %v7832_v32 = vld [vmem:[%s11338_s1 + $0x193c] ss:$52 sps:$4 sm:$0xff]  }
  0xc4   :  { %5316 = vmatprep.subr.bf16.mxu0 %v7751_v35  ;;  %5480 = vmatprep.subr.bf16.mxu1 %v7754_v36  ;;  %v7827_v34 = vld [vmem:[%s11338_s1 + $0x1930] ss:$52 sps:$4 sm:$0xff]   ;;  %v7830_v35 = vld [vmem:[%s11338_s1 + $0x1938] ss:$52 sps:$4 sm:$0xff]  }
  0xc5   :  { %5346 = vmatprep.mubr.bf16.mxu0 %v9357_v15  ;;  %5510 = vmatprep.mubr.bf16.mxu1 %v9357_v15  ;;  %v7835_v36 = vld [vmem:[%s11338_s1 + $0x199c] ss:$52 sps:$4 sm:$0xff]  }
  0xc7   :  { %5317 = vmatpush1.bf16.msra.mxu0 %v7749_v37  ;;  %5481 = vmatpush1.bf16.msra.mxu1 %v7752_v39  ;;  %v7838_v37 = vld [vmem:[%s11338_s1 + $0x19a4] ss:$52 sps:$4 sm:$0xff]  }
  0xc8   :  { %5318 = vmatprep.subr.bf16.mxu0 %v7757_v40  ;;  %5482 = vmatprep.subr.bf16.mxu1 %v7760_v41  ;;  %v7833_v39 = vld [vmem:[%s11338_s1 + $0x1998] ss:$52 sps:$4 sm:$0xff]   ;;  %v7836_v40 = vld [vmem:[%s11338_s1 + $0x19a0] ss:$52 sps:$4 sm:$0xff]  }
  0xc9   :  { %v7841_v41 = vld [vmem:[%s11338_s1 + $0x14] ss:$52 sps:$4 sm:$0xff]  }
  0xcb   :  { %5319 = vmatpush1.bf16.msra.mxu0 %v7755_v42  ;;  %5483 = vmatpush1.bf16.msra.mxu1 %v7758_v43  ;;  %v7844_v42 = vld [vmem:[%s11338_s1 + $0x1c] ss:$52 sps:$4 sm:$0xff]   ;;  %v9545_v43 = vcombine.high %v9344_v33, %v9344_v33 }
  0xcc   :  { %5320 = vmatprep.subr.bf16.mxu0 %v7763_v44  ;;  %5484 = vmatprep.subr.bf16.mxu1 %v7766_v45  ;;  %v7839_v44 = vld [vmem:[%s11338_s1 + $0x10] ss:$52 sps:$4 sm:$0xff]   ;;  %v7842_v45 = vld [vmem:[%s11338_s1 + $0x18] ss:$52 sps:$4 sm:$0xff]  }
  0xcf   :  { %5321 = vmatpush1.bf16.msra.mxu0 %v7761_v46  ;;  %5485 = vmatpush1.bf16.msra.mxu1 %v7764_v47  ;;  %v7847_v46 = vld [vmem:[%s11338_s1 + $0x7c] ss:$52 sps:$4 sm:$0xff]   ;;  %v7850_v47 = vld [vmem:[%s11338_s1 + $0x84] ss:$52 sps:$4 sm:$0xff]  }
  0xd0   :  { %5322 = vmatprep.subr.bf16.mxu0 %v7769_v48  ;;  %5486 = vmatprep.subr.bf16.mxu1 %v7772_v50  ;;  %v7845_v48 = vld [vmem:[%s11338_s1 + $0x78] ss:$52 sps:$4 sm:$0xff]   ;;  %v7848_v50 = vld [vmem:[%s11338_s1 + $0x80] ss:$52 sps:$4 sm:$0xff]  }
  0xd3   :  { %5323 = vmatpush1.bf16.msra.mxu0 %v7767_v51  ;;  %5487 = vmatpush1.bf16.msra.mxu1 %v7770_v53  ;;  %v7853_v51 = vld [vmem:[%s11338_s1 + $0xe4] ss:$52 sps:$4 sm:$0xff]   ;;  %v7856_v53 = vld [vmem:[%s11338_s1 + $0xec] ss:$52 sps:$4 sm:$0xff]  }
  0xd4   :  { %5324 = vmatprep.subr.bf16.mxu0 %v7775_v54  ;;  %5488 = vmatprep.subr.bf16.mxu1 %v7778_v55  ;;  %v7851_v54 = vld [vmem:[%s11338_s1 + $0xe0] ss:$52 sps:$4 sm:$0xff]   ;;  %v7854_v55 = vld [vmem:[%s11338_s1 + $0xe8] ss:$52 sps:$4 sm:$0xff]  }
  0xd7   :  { %5325 = vmatpush1.bf16.msra.mxu0 %v7773_v56  ;;  %5489 = vmatpush1.bf16.msra.mxu1 %v7776_v57  ;;  %v7859_v56 = vld [vmem:[%s11338_s1 + $0x14c] ss:$52 sps:$4 sm:$0xff]   ;;  %v7862_v57 = vld [vmem:[%s11338_s1 + $0x154] ss:$52 sps:$4 sm:$0xff]  }
  0xd8   :  { %5326 = vmatprep.subr.bf16.mxu0 %v7781_v58  ;;  %5490 = vmatprep.subr.bf16.mxu1 %v7784_v59  ;;  %v7857_v58 = vld [vmem:[%s11338_s1 + $0x148] ss:$52 sps:$4 sm:$0xff]   ;;  %v7860_v59 = vld [vmem:[%s11338_s1 + $0x150] ss:$52 sps:$4 sm:$0xff]  }
  0xdb   :  { %5327 = vmatpush1.bf16.msra.mxu0 %v7779_v61  ;;  %5491 = vmatpush1.bf16.msra.mxu1 %v7782_v62  ;;  %v7865_v61 = vld [vmem:[%s11338_s1 + $0x1b4] ss:$52 sps:$4 sm:$0xff]   ;;  %v7868_v62 = vld [vmem:[%s11338_s1 + $0x1bc] ss:$52 sps:$4 sm:$0xff]  }
  0xdc   :  { %5328 = vmatprep.subr.bf16.mxu0 %v7787_v63  ;;  %5492 = vmatprep.subr.bf16.mxu1 %v7790_v0  ;;  %v7863_v63 = vld [vmem:[%s11338_s1 + $0x1b0] ss:$52 sps:$4 sm:$0xff]   ;;  %v7866_v0 = vld [vmem:[%s11338_s1 + $0x1b8] ss:$52 sps:$4 sm:$0xff]  }
  0xdf   :  { %5329 = vmatpush1.bf16.msra.mxu0 %v7785_v1  ;;  %5493 = vmatpush1.bf16.msra.mxu1 %v7788_v2  ;;  %v7871_v1 = vld [vmem:[%s11338_s1 + $0x21c] ss:$52 sps:$4 sm:$0xff]   ;;  %v7874_v2 = vld [vmem:[%s11338_s1 + $0x224] ss:$52 sps:$4 sm:$0xff]  }
  0xe0   :  { %5330 = vmatprep.subr.bf16.mxu0 %v7793_v3  ;;  %5494 = vmatprep.subr.bf16.mxu1 %v7796_v4  ;;  %v7869_v3 = vld [vmem:[%s11338_s1 + $0x218] ss:$52 sps:$4 sm:$0xff]   ;;  %v7872_v4 = vld [vmem:[%s11338_s1 + $0x220] ss:$52 sps:$4 sm:$0xff]  }
  0xe3   :  { %5331 = vmatpush1.bf16.msra.mxu0 %v7791_v5  ;;  %5495 = vmatpush1.bf16.msra.mxu1 %v7794_v6  ;;  %v7877_v5 = vld [vmem:[%s11338_s1 + $0x284] ss:$52 sps:$4 sm:$0xff]   ;;  %v7880_v6 = vld [vmem:[%s11338_s1 + $0x28c] ss:$52 sps:$4 sm:$0xff]  }
  0xe4   :  { %5332 = vmatprep.subr.bf16.mxu0 %v7799_v7  ;;  %5496 = vmatprep.subr.bf16.mxu1 %v7802_v8  ;;  %v7875_v7 = vld [vmem:[%s11338_s1 + $0x280] ss:$52 sps:$4 sm:$0xff]   ;;  %v7878_v8 = vld [vmem:[%s11338_s1 + $0x288] ss:$52 sps:$4 sm:$0xff]  }
  0xe7   :  { %5333 = vmatpush1.bf16.msra.mxu0 %v7797_v9  ;;  %5497 = vmatpush1.bf16.msra.mxu1 %v7800_v10  ;;  %v7883_v9 = vld [vmem:[%s11338_s1 + $0x2ec] ss:$52 sps:$4 sm:$0xff]   ;;  %v7886_v10 = vld [vmem:[%s11338_s1 + $0x2f4] ss:$52 sps:$4 sm:$0xff]  }
  0xe8   :  { %5334 = vmatprep.subr.bf16.mxu0 %v7805_v11  ;;  %5498 = vmatprep.subr.bf16.mxu1 %v7808_v12  ;;  %v7881_v11 = vld [vmem:[%s11338_s1 + $0x2e8] ss:$52 sps:$4 sm:$0xff]   ;;  %v7884_v12 = vld [vmem:[%s11338_s1 + $0x2f0] ss:$52 sps:$4 sm:$0xff]  }
  0xeb   :  { %5335 = vmatpush1.bf16.msra.mxu0 %v7803_v14  ;;  %5499 = vmatpush1.bf16.msra.mxu1 %v7806_v52  ;;  %v7889_v14 = vld [vmem:[%s11338_s1 + $0x354] ss:$52 sps:$4 sm:$0xff]   ;;  %v7892_v52 = vld [vmem:[%s11338_s1 + $0x35c] ss:$52 sps:$4 sm:$0xff]  }
  0xec   :  { %5336 = vmatprep.subr.bf16.mxu0 %v7811_v16  ;;  %5500 = vmatprep.subr.bf16.mxu1 %v7814_v18  ;;  %v7887_v16 = vld [vmem:[%s11338_s1 + $0x350] ss:$52 sps:$4 sm:$0xff]   ;;  %v7890_v18 = vld [vmem:[%s11338_s1 + $0x358] ss:$52 sps:$4 sm:$0xff]  }
  0xef   :  { %5337 = vmatpush1.bf16.msra.mxu0 %v7809_v19  ;;  %5501 = vmatpush1.bf16.msra.mxu1 %v7812_v20  ;;  %v7895_v19 = vld [vmem:[%s11338_s1 + $0x3bc] ss:$52 sps:$4 sm:$0xff]   ;;  %v7898_v20 = vld [vmem:[%s11338_s1 + $0x3c4] ss:$52 sps:$4 sm:$0xff]  }
  0xf0   :  { %5338 = vmatprep.subr.bf16.mxu0 %v7817_v21  ;;  %5502 = vmatprep.subr.bf16.mxu1 %v7820_v22  ;;  %v7893_v21 = vld [vmem:[%s11338_s1 + $0x3b8] ss:$52 sps:$4 sm:$0xff]   ;;  %v7896_v22 = vld [vmem:[%s11338_s1 + $0x3c0] ss:$52 sps:$4 sm:$0xff]  }
  0xf3   :  { %5339 = vmatpush1.bf16.msra.mxu0 %v7815_v24  ;;  %5503 = vmatpush1.bf16.msra.mxu1 %v7818_v25  ;;  %v7901_v24 = vld [vmem:[%s11338_s1 + $0x424] ss:$52 sps:$4 sm:$0xff]   ;;  %v7904_v25 = vld [vmem:[%s11338_s1 + $0x42c] ss:$52 sps:$4 sm:$0xff]  }
  0xf4   :  { %5340 = vmatprep.subr.bf16.mxu0 %v7823_v26  ;;  %5504 = vmatprep.subr.bf16.mxu1 %v7826_v28  ;;  %v7899_v26 = vld [vmem:[%s11338_s1 + $0x420] ss:$52 sps:$4 sm:$0xff]   ;;  %v7902_v28 = vld [vmem:[%s11338_s1 + $0x428] ss:$52 sps:$4 sm:$0xff]  }
  0xf7   :  { %5341 = vmatpush1.bf16.msra.mxu0 %v7821_v29  ;;  %5505 = vmatpush1.bf16.msra.mxu1 %v7824_v30  ;;  %v7907_v29 = vld [vmem:[%s11338_s1 + $0x48c] ss:$52 sps:$4 sm:$0xff]   ;;  %v7910_v30 = vld [vmem:[%s11338_s1 + $0x494] ss:$52 sps:$4 sm:$0xff]  }
  0xf8   :  { %5342 = vmatprep.subr.bf16.mxu0 %v7829_v31  ;;  %5506 = vmatprep.subr.bf16.mxu1 %v7832_v32  ;;  %v7905_v31 = vld [vmem:[%s11338_s1 + $0x488] ss:$52 sps:$4 sm:$0xff]   ;;  %v7908_v32 = vld [vmem:[%s11338_s1 + $0x490] ss:$52 sps:$4 sm:$0xff]  }
  0xfb   :  { %5343 = vmatpush1.bf16.msra.mxu0 %v7827_v34  ;;  %5507 = vmatpush1.bf16.msra.mxu1 %v7830_v35  ;;  %v7913_v34 = vld [vmem:[%s11338_s1 + $0x4f4] ss:$52 sps:$4 sm:$0xff]   ;;  %v7916_v35 = vld [vmem:[%s11338_s1 + $0x4fc] ss:$52 sps:$4 sm:$0xff]  }
  0xfc   :  { %5344 = vmatprep.subr.bf16.mxu0 %v7835_v36  ;;  %5508 = vmatprep.subr.bf16.mxu1 %v7838_v37  ;;  %v7911_v36 = vld [vmem:[%s11338_s1 + $0x4f0] ss:$52 sps:$4 sm:$0xff]   ;;  %v7914_v37 = vld [vmem:[%s11338_s1 + $0x4f8] ss:$52 sps:$4 sm:$0xff]  }
  0xff   :  { %5345 = vmatpush1.bf16.msra.mxu0 %v7833_v39  ;;  %5509 = vmatpush1.bf16.msra.mxu1 %v7836_v40  ;;  %v7919_v39 = vld [vmem:[%s11338_s1 + $0x55c] ss:$52 sps:$4 sm:$0xff]   ;;  %v7922_v40 = vld [vmem:[%s11338_s1 + $0x564] ss:$52 sps:$4 sm:$0xff]  }
 0x100   :  { %5519 = vmatprep.subr.bf16.mxu0 %v7841_v41  ;;  %5683 = vmatprep.subr.bf16.mxu1 %v7844_v42  ;;  %v7917_v41 = vld [vmem:[%s11338_s1 + $0x558] ss:$52 sps:$4 sm:$0xff]   ;;  %v7920_v42 = vld [vmem:[%s11338_s1 + $0x560] ss:$52 sps:$4 sm:$0xff]  }
 0x102   :  { %5347 = vmatmul.mubr.bf16.vlgmr.msra.gmra.mrb[0].mxu0 %v9545_v43  ;;  %5511 = vmatmul.mubr.bf16.vlgmr.msra.gmra.mrb[0].mxu1 %v9545_v43 }
 0x103   :  { %5520 = vmatpush1.bf16.msra.mxu0 %v7839_v44  ;;  %5684 = vmatpush1.bf16.msra.mxu1 %v7842_v45  ;;  %v7925_v44 = vld [vmem:[%s11338_s1 + $0x5c4] ss:$52 sps:$4 sm:$0xff]   ;;  %v7928_v45 = vld [vmem:[%s11338_s1 + $0x5cc] ss:$52 sps:$4 sm:$0xff]  }
 0x104   :  { %5521 = vmatprep.subr.bf16.mxu0 %v7847_v46  ;;  %5685 = vmatprep.subr.bf16.mxu1 %v7850_v47  ;;  %v7923_v46 = vld [vmem:[%s11338_s1 + $0x5c0] ss:$52 sps:$4 sm:$0xff]   ;;  %v7926_v47 = vld [vmem:[%s11338_s1 + $0x5c8] ss:$52 sps:$4 sm:$0xff]  }
 0x105   :  { %5551 = vmatprep.mubr.bf16.mxu0 %v8877_v60  ;;  %5715 = vmatprep.mubr.bf16.mxu1 %v8877_v60 }
 0x107   :  { %5522 = vmatpush1.bf16.msra.mxu0 %v7845_v48  ;;  %5686 = vmatpush1.bf16.msra.mxu1 %v7848_v50  ;;  %v7931_v48 = vld [vmem:[%s11338_s1 + $0x62c] ss:$52 sps:$4 sm:$0xff]   ;;  %v7934_v50 = vld [vmem:[%s11338_s1 + $0x634] ss:$52 sps:$4 sm:$0xff]  }
 0x108   :  { %5523 = vmatprep.subr.bf16.mxu0 %v7853_v51  ;;  %5687 = vmatprep.subr.bf16.mxu1 %v7856_v53  ;;  %v7929_v51 = vld [vmem:[%s11338_s1 + $0x628] ss:$52 sps:$4 sm:$0xff]   ;;  %v7932_v53 = vld [vmem:[%s11338_s1 + $0x630] ss:$52 sps:$4 sm:$0xff]  }
 0x10b   :  { %5524 = vmatpush1.bf16.msra.mxu0 %v7851_v54  ;;  %5688 = vmatpush1.bf16.msra.mxu1 %v7854_v55  ;;  %v7937_v54 = vld [vmem:[%s11338_s1 + $0x694] ss:$52 sps:$4 sm:$0xff]   ;;  %v7940_v55 = vld [vmem:[%s11338_s1 + $0x69c] ss:$52 sps:$4 sm:$0xff]  }
 0x10c   :  { %5525 = vmatprep.subr.bf16.mxu0 %v7859_v56  ;;  %5689 = vmatprep.subr.bf16.mxu1 %v7862_v57  ;;  %v7935_v56 = vld [vmem:[%s11338_s1 + $0x690] ss:$52 sps:$4 sm:$0xff]   ;;  %v7938_v57 = vld [vmem:[%s11338_s1 + $0x698] ss:$52 sps:$4 sm:$0xff]  }
 0x10f   :  { %5526 = vmatpush1.bf16.msra.mxu0 %v7857_v58  ;;  %5690 = vmatpush1.bf16.msra.mxu1 %v7860_v59  ;;  %v7943_v58 = vld [vmem:[%s11338_s1 + $0x6fc] ss:$52 sps:$4 sm:$0xff]   ;;  %v7946_v59 = vld [vmem:[%s11338_s1 + $0x704] ss:$52 sps:$4 sm:$0xff]  }
 0x110   :  { %5527 = vmatprep.subr.bf16.mxu0 %v7865_v61  ;;  %5691 = vmatprep.subr.bf16.mxu1 %v7868_v62  ;;  %v7941_v61 = vld [vmem:[%s11338_s1 + $0x6f8] ss:$52 sps:$4 sm:$0xff]   ;;  %v7944_v62 = vld [vmem:[%s11338_s1 + $0x700] ss:$52 sps:$4 sm:$0xff]  }
 0x113   :  { %5528 = vmatpush1.bf16.msra.mxu0 %v7863_v63  ;;  %5692 = vmatpush1.bf16.msra.mxu1 %v7866_v0  ;;  %v7949_v63 = vld [vmem:[%s11338_s1 + $0x764] ss:$52 sps:$4 sm:$0xff]   ;;  %v7952_v0 = vld [vmem:[%s11338_s1 + $0x76c] ss:$52 sps:$4 sm:$0xff]  }
 0x114   :  { %5529 = vmatprep.subr.bf16.mxu0 %v7871_v1  ;;  %5693 = vmatprep.subr.bf16.mxu1 %v7874_v2  ;;  %v7947_v1 = vld [vmem:[%s11338_s1 + $0x760] ss:$52 sps:$4 sm:$0xff]   ;;  %v7950_v2 = vld [vmem:[%s11338_s1 + $0x768] ss:$52 sps:$4 sm:$0xff]  }
 0x117   :  { %5530 = vmatpush1.bf16.msra.mxu0 %v7869_v3  ;;  %5694 = vmatpush1.bf16.msra.mxu1 %v7872_v4  ;;  %v7955_v3 = vld [vmem:[%s11338_s1 + $0x7cc] ss:$52 sps:$4 sm:$0xff]   ;;  %v7958_v4 = vld [vmem:[%s11338_s1 + $0x7d4] ss:$52 sps:$4 sm:$0xff]  }
 0x118   :  { %5531 = vmatprep.subr.bf16.mxu0 %v7877_v5  ;;  %5695 = vmatprep.subr.bf16.mxu1 %v7880_v6  ;;  %v7953_v5 = vld [vmem:[%s11338_s1 + $0x7c8] ss:$52 sps:$4 sm:$0xff]   ;;  %v7956_v6 = vld [vmem:[%s11338_s1 + $0x7d0] ss:$52 sps:$4 sm:$0xff]  }
 0x11b   :  { %5532 = vmatpush1.bf16.msra.mxu0 %v7875_v7  ;;  %5696 = vmatpush1.bf16.msra.mxu1 %v7878_v8  ;;  %v7961_v7 = vld [vmem:[%s11338_s1 + $0x834] ss:$52 sps:$4 sm:$0xff]   ;;  %v7964_v8 = vld [vmem:[%s11338_s1 + $0x83c] ss:$52 sps:$4 sm:$0xff]  }
 0x11c   :  { %5533 = vmatprep.subr.bf16.mxu0 %v7883_v9  ;;  %5697 = vmatprep.subr.bf16.mxu1 %v7886_v10  ;;  %v7959_v9 = vld [vmem:[%s11338_s1 + $0x830] ss:$52 sps:$4 sm:$0xff]   ;;  %v7962_v10 = vld [vmem:[%s11338_s1 + $0x838] ss:$52 sps:$4 sm:$0xff]  }
 0x11f   :  { %5534 = vmatpush1.bf16.msra.mxu0 %v7881_v11  ;;  %5698 = vmatpush1.bf16.msra.mxu1 %v7884_v12  ;;  %v7967_v11 = vld [vmem:[%s11338_s1 + $0x89c] ss:$52 sps:$4 sm:$0xff]   ;;  %v7970_v12 = vld [vmem:[%s11338_s1 + $0x8a4] ss:$52 sps:$4 sm:$0xff]  }
 0x120   :  { %5535 = vmatprep.subr.bf16.mxu0 %v7889_v14  ;;  %5699 = vmatprep.subr.bf16.mxu1 %v7892_v52  ;;  %v7965_v14 = vld [vmem:[%s11338_s1 + $0x898] ss:$52 sps:$4 sm:$0xff]   ;;  %v7968_v52 = vld [vmem:[%s11338_s1 + $0x8a0] ss:$52 sps:$4 sm:$0xff]  }
 0x123   :  { %5536 = vmatpush1.bf16.msra.mxu0 %v7887_v16  ;;  %5700 = vmatpush1.bf16.msra.mxu1 %v7890_v18  ;;  %v7973_v16 = vld [vmem:[%s11338_s1 + $0x904] ss:$52 sps:$4 sm:$0xff]   ;;  %v7976_v18 = vld [vmem:[%s11338_s1 + $0x90c] ss:$52 sps:$4 sm:$0xff]  }
 0x124   :  { %5537 = vmatprep.subr.bf16.mxu0 %v7895_v19  ;;  %5701 = vmatprep.subr.bf16.mxu1 %v7898_v20  ;;  %v7971_v19 = vld [vmem:[%s11338_s1 + $0x900] ss:$52 sps:$4 sm:$0xff]   ;;  %v7974_v20 = vld [vmem:[%s11338_s1 + $0x908] ss:$52 sps:$4 sm:$0xff]  }
 0x127   :  { %5538 = vmatpush1.bf16.msra.mxu0 %v7893_v21  ;;  %5702 = vmatpush1.bf16.msra.mxu1 %v7896_v22  ;;  %v7979_v21 = vld [vmem:[%s11338_s1 + $0x96c] ss:$52 sps:$4 sm:$0xff]   ;;  %v7982_v22 = vld [vmem:[%s11338_s1 + $0x974] ss:$52 sps:$4 sm:$0xff]  }
 0x128   :  { %5539 = vmatprep.subr.bf16.mxu0 %v7901_v24  ;;  %5703 = vmatprep.subr.bf16.mxu1 %v7904_v25  ;;  %v7977_v24 = vld [vmem:[%s11338_s1 + $0x968] ss:$52 sps:$4 sm:$0xff]   ;;  %v7980_v25 = vld [vmem:[%s11338_s1 + $0x970] ss:$52 sps:$4 sm:$0xff]  }
 0x12b   :  { %5540 = vmatpush1.bf16.msra.mxu0 %v7899_v26  ;;  %5704 = vmatpush1.bf16.msra.mxu1 %v7902_v28  ;;  %v7985_v26 = vld [vmem:[%s11338_s1 + $0x9d4] ss:$52 sps:$4 sm:$0xff]   ;;  %v7988_v28 = vld [vmem:[%s11338_s1 + $0x9dc] ss:$52 sps:$4 sm:$0xff]  }
 0x12c   :  { %5541 = vmatprep.subr.bf16.mxu0 %v7907_v29  ;;  %5705 = vmatprep.subr.bf16.mxu1 %v7910_v30  ;;  %v7983_v29 = vld [vmem:[%s11338_s1 + $0x9d0] ss:$52 sps:$4 sm:$0xff]   ;;  %v7986_v30 = vld [vmem:[%s11338_s1 + $0x9d8] ss:$52 sps:$4 sm:$0xff]  }
 0x12f   :  { %5542 = vmatpush1.bf16.msra.mxu0 %v7905_v31  ;;  %5706 = vmatpush1.bf16.msra.mxu1 %v7908_v32  ;;  %v7991_v31 = vld [vmem:[%s11338_s1 + $0xa3c] ss:$52 sps:$4 sm:$0xff]   ;;  %v7994_v32 = vld [vmem:[%s11338_s1 + $0xa44] ss:$52 sps:$4 sm:$0xff]  }
 0x130   :  { %5543 = vmatprep.subr.bf16.mxu0 %v7913_v34  ;;  %5707 = vmatprep.subr.bf16.mxu1 %v7916_v35  ;;  %v7989_v34 = vld [vmem:[%s11338_s1 + $0xa38] ss:$52 sps:$4 sm:$0xff]   ;;  %v7992_v35 = vld [vmem:[%s11338_s1 + $0xa40] ss:$52 sps:$4 sm:$0xff]  }
 0x133   :  { %5544 = vmatpush1.bf16.msra.mxu0 %v7911_v36  ;;  %5708 = vmatpush1.bf16.msra.mxu1 %v7914_v37  ;;  %v7997_v36 = vld [vmem:[%s11338_s1 + $0xaa4] ss:$52 sps:$4 sm:$0xff]   ;;  %v8000_v37 = vld [vmem:[%s11338_s1 + $0xaac] ss:$52 sps:$4 sm:$0xff]  }
 0x134   :  { %5545 = vmatprep.subr.bf16.mxu0 %v7919_v39  ;;  %5709 = vmatprep.subr.bf16.mxu1 %v7922_v40  ;;  %v7995_v39 = vld [vmem:[%s11338_s1 + $0xaa0] ss:$52 sps:$4 sm:$0xff]   ;;  %v7998_v40 = vld [vmem:[%s11338_s1 + $0xaa8] ss:$52 sps:$4 sm:$0xff]  }
 0x137   :  { %5546 = vmatpush1.bf16.msra.mxu0 %v7917_v41  ;;  %5710 = vmatpush1.bf16.msra.mxu1 %v7920_v42  ;;  %v8003_v41 = vld [vmem:[%s11338_s1 + $0xb0c] ss:$52 sps:$4 sm:$0xff]   ;;  %v8006_v42 = vld [vmem:[%s11338_s1 + $0xb14] ss:$52 sps:$4 sm:$0xff]  }
 0x138   :  { %5547 = vmatprep.subr.bf16.mxu0 %v7925_v44  ;;  %5711 = vmatprep.subr.bf16.mxu1 %v7928_v45  ;;  %v8001_v44 = vld [vmem:[%s11338_s1 + $0xb08] ss:$52 sps:$4 sm:$0xff]   ;;  %v8004_v45 = vld [vmem:[%s11338_s1 + $0xb10] ss:$52 sps:$4 sm:$0xff]  }
 0x13b   :  { %5548 = vmatpush1.bf16.msra.mxu0 %v7923_v46  ;;  %5712 = vmatpush1.bf16.msra.mxu1 %v7926_v47  ;;  %v8009_v46 = vld [vmem:[%s11338_s1 + $0xb74] ss:$52 sps:$4 sm:$0xff]   ;;  %v8012_v47 = vld [vmem:[%s11338_s1 + $0xb7c] ss:$52 sps:$4 sm:$0xff]  }
 0x13c   :  { %5549 = vmatprep.subr.bf16.mxu0 %v7931_v48  ;;  %5713 = vmatprep.subr.bf16.mxu1 %v7934_v50  ;;  %v8007_v48 = vld [vmem:[%s11338_s1 + $0xb70] ss:$52 sps:$4 sm:$0xff]   ;;  %v8010_v50 = vld [vmem:[%s11338_s1 + $0xb78] ss:$52 sps:$4 sm:$0xff]  }
 0x13f   :  { %5550 = vmatpush1.bf16.msra.mxu0 %v7929_v51  ;;  %5714 = vmatpush1.bf16.msra.mxu1 %v7932_v53  ;;  %v8015_v51 = vld [vmem:[%s11338_s1 + $0xbdc] ss:$52 sps:$4 sm:$0xff]   ;;  %v8018_v53 = vld [vmem:[%s11338_s1 + $0xbe4] ss:$52 sps:$4 sm:$0xff]  }
 0x140   :  { %5560 = vmatprep.subr.bf16.mxu0 %v7937_v54  ;;  %5724 = vmatprep.subr.bf16.mxu1 %v7940_v55  ;;  %v8013_v54 = vld [vmem:[%s11338_s1 + $0xbd8] ss:$52 sps:$4 sm:$0xff]   ;;  %v8016_v55 = vld [vmem:[%s11338_s1 + $0xbe0] ss:$52 sps:$4 sm:$0xff]  }
 0x142   :  { %5552 = vmatmul.mubr.bf16.vlgmr.msra.gmra.mrb[4].mxu0 %v8930_v13  ;;  %5716 = vmatmul.mubr.bf16.vlgmr.msra.gmra.mrb[4].mxu1 %v8930_v13 }
 0x143   :  { %5561 = vmatpush1.bf16.msra.mxu0 %v7935_v56  ;;  %5725 = vmatpush1.bf16.msra.mxu1 %v7938_v57  ;;  %v8021_v56 = vld [vmem:[%s11338_s1 + $0xc44] ss:$52 sps:$4 sm:$0xff]   ;;  %v8024_v57 = vld [vmem:[%s11338_s1 + $0xc4c] ss:$52 sps:$4 sm:$0xff]  }
 0x144   :  { %5562 = vmatprep.subr.bf16.mxu0 %v7943_v58  ;;  %5726 = vmatprep.subr.bf16.mxu1 %v7946_v59  ;;  %v8019_v58 = vld [vmem:[%s11338_s1 + $0xc40] ss:$52 sps:$4 sm:$0xff]   ;;  %v8022_v59 = vld [vmem:[%s11338_s1 + $0xc48] ss:$52 sps:$4 sm:$0xff]  }
 0x145   :  { %5592 = vmatprep.mubr.bf16.mxu0 %v8943_v17  ;;  %5756 = vmatprep.mubr.bf16.mxu1 %v8943_v17 }
 0x147   :  { %5563 = vmatpush1.bf16.msra.mxu0 %v7941_v61  ;;  %5727 = vmatpush1.bf16.msra.mxu1 %v7944_v62  ;;  %v8027_v61 = vld [vmem:[%s11338_s1 + $0xcac] ss:$52 sps:$4 sm:$0xff]   ;;  %v8030_v62 = vld [vmem:[%s11338_s1 + $0xcb4] ss:$52 sps:$4 sm:$0xff]  }
 0x148   :  { %5564 = vmatprep.subr.bf16.mxu0 %v7949_v63  ;;  %5728 = vmatprep.subr.bf16.mxu1 %v7952_v0  ;;  %v8025_v63 = vld [vmem:[%s11338_s1 + $0xca8] ss:$52 sps:$4 sm:$0xff]   ;;  %v8028_v0 = vld [vmem:[%s11338_s1 + $0xcb0] ss:$52 sps:$4 sm:$0xff]  }
 0x14b   :  { %5565 = vmatpush1.bf16.msra.mxu0 %v7947_v1  ;;  %5729 = vmatpush1.bf16.msra.mxu1 %v7950_v2  ;;  %v8033_v1 = vld [vmem:[%s11338_s1 + $0xd14] ss:$52 sps:$4 sm:$0xff]   ;;  %v8036_v2 = vld [vmem:[%s11338_s1 + $0xd1c] ss:$52 sps:$4 sm:$0xff]  }
 0x14c   :  { %5566 = vmatprep.subr.bf16.mxu0 %v7955_v3  ;;  %5730 = vmatprep.subr.bf16.mxu1 %v7958_v4  ;;  %v8031_v3 = vld [vmem:[%s11338_s1 + $0xd10] ss:$52 sps:$4 sm:$0xff]   ;;  %v8034_v4 = vld [vmem:[%s11338_s1 + $0xd18] ss:$52 sps:$4 sm:$0xff]  }
 0x14f   :  { %5567 = vmatpush1.bf16.msra.mxu0 %v7953_v5  ;;  %5731 = vmatpush1.bf16.msra.mxu1 %v7956_v6  ;;  %v8039_v5 = vld [vmem:[%s11338_s1 + $0xd7c] ss:$52 sps:$4 sm:$0xff]   ;;  %v8042_v6 = vld [vmem:[%s11338_s1 + $0xd84] ss:$52 sps:$4 sm:$0xff]  }
 0x150   :  { %5568 = vmatprep.subr.bf16.mxu0 %v7961_v7  ;;  %5732 = vmatprep.subr.bf16.mxu1 %v7964_v8  ;;  %v8037_v7 = vld [vmem:[%s11338_s1 + $0xd78] ss:$52 sps:$4 sm:$0xff]   ;;  %v8040_v8 = vld [vmem:[%s11338_s1 + $0xd80] ss:$52 sps:$4 sm:$0xff]  }
 0x153   :  { %5569 = vmatpush1.bf16.msra.mxu0 %v7959_v9  ;;  %5733 = vmatpush1.bf16.msra.mxu1 %v7962_v10  ;;  %v8045_v9 = vld [vmem:[%s11338_s1 + $0xde4] ss:$52 sps:$4 sm:$0xff]   ;;  %v8048_v10 = vld [vmem:[%s11338_s1 + $0xdec] ss:$52 sps:$4 sm:$0xff]  }
 0x154   :  { %5570 = vmatprep.subr.bf16.mxu0 %v7967_v11  ;;  %5734 = vmatprep.subr.bf16.mxu1 %v7970_v12  ;;  %v8043_v11 = vld [vmem:[%s11338_s1 + $0xde0] ss:$52 sps:$4 sm:$0xff]   ;;  %v8046_v12 = vld [vmem:[%s11338_s1 + $0xde8] ss:$52 sps:$4 sm:$0xff]  }
 0x157   :  { %5571 = vmatpush1.bf16.msra.mxu0 %v7965_v14  ;;  %5735 = vmatpush1.bf16.msra.mxu1 %v7968_v52  ;;  %v8051_v14 = vld [vmem:[%s11338_s1 + $0xe4c] ss:$52 sps:$4 sm:$0xff]   ;;  %v8054_v52 = vld [vmem:[%s11338_s1 + $0xe54] ss:$52 sps:$4 sm:$0xff]  }
 0x158   :  { %5572 = vmatprep.subr.bf16.mxu0 %v7973_v16  ;;  %5736 = vmatprep.subr.bf16.mxu1 %v7976_v18  ;;  %v8049_v16 = vld [vmem:[%s11338_s1 + $0xe48] ss:$52 sps:$4 sm:$0xff]   ;;  %v8052_v18 = vld [vmem:[%s11338_s1 + $0xe50] ss:$52 sps:$4 sm:$0xff]  }
 0x15b   :  { %5573 = vmatpush1.bf16.msra.mxu0 %v7971_v19  ;;  %5737 = vmatpush1.bf16.msra.mxu1 %v7974_v20  ;;  %v8057_v19 = vld [vmem:[%s11338_s1 + $0xeb4] ss:$52 sps:$4 sm:$0xff]   ;;  %v8060_v20 = vld [vmem:[%s11338_s1 + $0xebc] ss:$52 sps:$4 sm:$0xff]  }
 0x15c   :  { %5574 = vmatprep.subr.bf16.mxu0 %v7979_v21  ;;  %5738 = vmatprep.subr.bf16.mxu1 %v7982_v22  ;;  %v8055_v21 = vld [vmem:[%s11338_s1 + $0xeb0] ss:$52 sps:$4 sm:$0xff]   ;;  %v8058_v22 = vld [vmem:[%s11338_s1 + $0xeb8] ss:$52 sps:$4 sm:$0xff]  }
 0x15f   :  { %5575 = vmatpush1.bf16.msra.mxu0 %v7977_v24  ;;  %5739 = vmatpush1.bf16.msra.mxu1 %v7980_v25  ;;  %v8063_v24 = vld [vmem:[%s11338_s1 + $0xf1c] ss:$52 sps:$4 sm:$0xff]   ;;  %v8066_v25 = vld [vmem:[%s11338_s1 + $0xf24] ss:$52 sps:$4 sm:$0xff]  }
 0x160   :  { %5576 = vmatprep.subr.bf16.mxu0 %v7985_v26  ;;  %5740 = vmatprep.subr.bf16.mxu1 %v7988_v28  ;;  %v8061_v26 = vld [vmem:[%s11338_s1 + $0xf18] ss:$52 sps:$4 sm:$0xff]   ;;  %v8064_v28 = vld [vmem:[%s11338_s1 + $0xf20] ss:$52 sps:$4 sm:$0xff]  }
 0x163   :  { %5577 = vmatpush1.bf16.msra.mxu0 %v7983_v29  ;;  %5741 = vmatpush1.bf16.msra.mxu1 %v7986_v30  ;;  %v8069_v29 = vld [vmem:[%s11338_s1 + $0xf84] ss:$52 sps:$4 sm:$0xff]   ;;  %v8072_v30 = vld [vmem:[%s11338_s1 + $0xf8c] ss:$52 sps:$4 sm:$0xff]  }
 0x164   :  { %5578 = vmatprep.subr.bf16.mxu0 %v7991_v31  ;;  %5742 = vmatprep.subr.bf16.mxu1 %v7994_v32  ;;  %v8067_v31 = vld [vmem:[%s11338_s1 + $0xf80] ss:$52 sps:$4 sm:$0xff]   ;;  %v8070_v32 = vld [vmem:[%s11338_s1 + $0xf88] ss:$52 sps:$4 sm:$0xff]  }
 0x167   :  { %5579 = vmatpush1.bf16.msra.mxu0 %v7989_v34  ;;  %5743 = vmatpush1.bf16.msra.mxu1 %v7992_v35  ;;  %v8075_v34 = vld [vmem:[%s11338_s1 + $0xfec] ss:$52 sps:$4 sm:$0xff]   ;;  %v8078_v35 = vld [vmem:[%s11338_s1 + $0xff4] ss:$52 sps:$4 sm:$0xff]  }
 0x168   :  { %5580 = vmatprep.subr.bf16.mxu0 %v7997_v36  ;;  %5744 = vmatprep.subr.bf16.mxu1 %v8000_v37  ;;  %v8073_v36 = vld [vmem:[%s11338_s1 + $0xfe8] ss:$52 sps:$4 sm:$0xff]   ;;  %v8076_v37 = vld [vmem:[%s11338_s1 + $0xff0] ss:$52 sps:$4 sm:$0xff]  }
 0x16b   :  { %5581 = vmatpush1.bf16.msra.mxu0 %v7995_v39  ;;  %5745 = vmatpush1.bf16.msra.mxu1 %v7998_v40  ;;  %v8081_v39 = vld [vmem:[%s11338_s1 + $0x1054] ss:$52 sps:$4 sm:$0xff]   ;;  %v8084_v40 = vld [vmem:[%s11338_s1 + $0x105c] ss:$52 sps:$4 sm:$0xff]  }
 0x16c   :  { %5582 = vmatprep.subr.bf16.mxu0 %v8003_v41  ;;  %5746 = vmatprep.subr.bf16.mxu1 %v8006_v42  ;;  %v8079_v41 = vld [vmem:[%s11338_s1 + $0x1050] ss:$52 sps:$4 sm:$0xff]   ;;  %v8082_v42 = vld [vmem:[%s11338_s1 + $0x1058] ss:$52 sps:$4 sm:$0xff]  }
 0x16f   :  { %5583 = vmatpush1.bf16.msra.mxu0 %v8001_v44  ;;  %5747 = vmatpush1.bf16.msra.mxu1 %v8004_v45  ;;  %v8087_v44 = vld [vmem:[%s11338_s1 + $0x10bc] ss:$52 sps:$4 sm:$0xff]   ;;  %v8090_v45 = vld [vmem:[%s11338_s1 + $0x10c4] ss:$52 sps:$4 sm:$0xff]  }
 0x170   :  { %5584 = vmatprep.subr.bf16.mxu0 %v8009_v46  ;;  %5748 = vmatprep.subr.bf16.mxu1 %v8012_v47  ;;  %v8085_v46 = vld [vmem:[%s11338_s1 + $0x10b8] ss:$52 sps:$4 sm:$0xff]   ;;  %v8088_v47 = vld [vmem:[%s11338_s1 + $0x10c0] ss:$52 sps:$4 sm:$0xff]  }
 0x173   :  { %5585 = vmatpush1.bf16.msra.mxu0 %v8007_v48  ;;  %5749 = vmatpush1.bf16.msra.mxu1 %v8010_v50  ;;  %v8093_v48 = vld [vmem:[%s11338_s1 + $0x1124] ss:$52 sps:$4 sm:$0xff]   ;;  %v8096_v50 = vld [vmem:[%s11338_s1 + $0x112c] ss:$52 sps:$4 sm:$0xff]  }
 0x174   :  { %5586 = vmatprep.subr.bf16.mxu0 %v8015_v51  ;;  %5750 = vmatprep.subr.bf16.mxu1 %v8018_v53  ;;  %v8091_v51 = vld [vmem:[%s11338_s1 + $0x1120] ss:$52 sps:$4 sm:$0xff]   ;;  %v8094_v53 = vld [vmem:[%s11338_s1 + $0x1128] ss:$52 sps:$4 sm:$0xff]  }
 0x177   :  { %5587 = vmatpush1.bf16.msra.mxu0 %v8013_v54  ;;  %5751 = vmatpush1.bf16.msra.mxu1 %v8016_v55  ;;  %v8099_v54 = vld [vmem:[%s11338_s1 + $0x118c] ss:$52 sps:$4 sm:$0xff]   ;;  %v8102_v55 = vld [vmem:[%s11338_s1 + $0x1194] ss:$52 sps:$4 sm:$0xff]  }
 0x178   :  { %5588 = vmatprep.subr.bf16.mxu0 %v8021_v56  ;;  %5752 = vmatprep.subr.bf16.mxu1 %v8024_v57  ;;  %v8097_v56 = vld [vmem:[%s11338_s1 + $0x1188] ss:$52 sps:$4 sm:$0xff]   ;;  %v8100_v57 = vld [vmem:[%s11338_s1 + $0x1190] ss:$52 sps:$4 sm:$0xff]  }
 0x17b   :  { %5589 = vmatpush1.bf16.msra.mxu0 %v8019_v58  ;;  %5753 = vmatpush1.bf16.msra.mxu1 %v8022_v59  ;;  %v8105_v58 = vld [vmem:[%s11338_s1 + $0x11f4] ss:$52 sps:$4 sm:$0xff]   ;;  %v8108_v59 = vld [vmem:[%s11338_s1 + $0x11fc] ss:$52 sps:$4 sm:$0xff]  }
 0x17c   :  { %5590 = vmatprep.subr.bf16.mxu0 %v8027_v61  ;;  %5754 = vmatprep.subr.bf16.mxu1 %v8030_v62  ;;  %v8103_v61 = vld [vmem:[%s11338_s1 + $0x11f0] ss:$52 sps:$4 sm:$0xff]   ;;  %v8106_v62 = vld [vmem:[%s11338_s1 + $0x11f8] ss:$52 sps:$4 sm:$0xff]  }
 0x17f   :  { %5591 = vmatpush1.bf16.msra.mxu0 %v8025_v63  ;;  %5755 = vmatpush1.bf16.msra.mxu1 %v8028_v0  ;;  %v8111_v63 = vld [vmem:[%s11338_s1 + $0x125c] ss:$52 sps:$4 sm:$0xff]   ;;  %v8114_v0 = vld [vmem:[%s11338_s1 + $0x1264] ss:$52 sps:$4 sm:$0xff]  }
 0x180   :  { %5601 = vmatprep.subr.bf16.mxu0 %v8033_v1  ;;  %5765 = vmatprep.subr.bf16.mxu1 %v8036_v2  ;;  %v8109_v1 = vld [vmem:[%s11338_s1 + $0x1258] ss:$52 sps:$4 sm:$0xff]   ;;  %v8112_v2 = vld [vmem:[%s11338_s1 + $0x1260] ss:$52 sps:$4 sm:$0xff]  }
 0x182   :  { %5593 = vmatmul.mubr.bf16.vlgmr.msra.gmra.mrb[4].mxu0 %v9141_v23  ;;  %5757 = vmatmul.mubr.bf16.vlgmr.msra.gmra.mrb[4].mxu1 %v9141_v23 }
 0x183   :  { %5602 = vmatpush1.bf16.msra.mxu0 %v8031_v3  ;;  %5766 = vmatpush1.bf16.msra.mxu1 %v8034_v4  ;;  %v8117_v3 = vld [vmem:[%s11338_s1 + $0x12c4] ss:$52 sps:$4 sm:$0xff]   ;;  %v8120_v4 = vld [vmem:[%s11338_s1 + $0x12cc] ss:$52 sps:$4 sm:$0xff]  }
 0x184   :  { %5603 = vmatprep.subr.bf16.mxu0 %v8039_v5  ;;  %5767 = vmatprep.subr.bf16.mxu1 %v8042_v6  ;;  %v8115_v5 = vld [vmem:[%s11338_s1 + $0x12c0] ss:$52 sps:$4 sm:$0xff]   ;;  %v8118_v6 = vld [vmem:[%s11338_s1 + $0x12c8] ss:$52 sps:$4 sm:$0xff]  }
 0x185   :  { %5633 = vmatprep.mubr.bf16.mxu0 %v9153_v27  ;;  %5797 = vmatprep.mubr.bf16.mxu1 %v9153_v27 }
 0x187   :  { %5604 = vmatpush1.bf16.msra.mxu0 %v8037_v7  ;;  %5768 = vmatpush1.bf16.msra.mxu1 %v8040_v8  ;;  %v8123_v7 = vld [vmem:[%s11338_s1 + $0x132c] ss:$52 sps:$4 sm:$0xff]   ;;  %v8126_v8 = vld [vmem:[%s11338_s1 + $0x1334] ss:$52 sps:$4 sm:$0xff]  }
 0x188   :  { %5605 = vmatprep.subr.bf16.mxu0 %v8045_v9  ;;  %5769 = vmatprep.subr.bf16.mxu1 %v8048_v10  ;;  %v8121_v9 = vld [vmem:[%s11338_s1 + $0x1328] ss:$52 sps:$4 sm:$0xff]   ;;  %v8124_v10 = vld [vmem:[%s11338_s1 + $0x1330] ss:$52 sps:$4 sm:$0xff]  }
 0x18b   :  { %5606 = vmatpush1.bf16.msra.mxu0 %v8043_v11  ;;  %5770 = vmatpush1.bf16.msra.mxu1 %v8046_v12  ;;  %v8129_v11 = vld [vmem:[%s11338_s1 + $0x1394] ss:$52 sps:$4 sm:$0xff]   ;;  %v8132_v12 = vld [vmem:[%s11338_s1 + $0x139c] ss:$52 sps:$4 sm:$0xff]  }
 0x18c   :  { %5607 = vmatprep.subr.bf16.mxu0 %v8051_v14  ;;  %5771 = vmatprep.subr.bf16.mxu1 %v8054_v52  ;;  %v8127_v14 = vld [vmem:[%s11338_s1 + $0x1390] ss:$52 sps:$4 sm:$0xff]   ;;  %v8130_v52 = vld [vmem:[%s11338_s1 + $0x1398] ss:$52 sps:$4 sm:$0xff]  }
 0x18f   :  { %5608 = vmatpush1.bf16.msra.mxu0 %v8049_v16  ;;  %5772 = vmatpush1.bf16.msra.mxu1 %v8052_v18  ;;  %v8135_v16 = vld [vmem:[%s11338_s1 + $0x13fc] ss:$52 sps:$4 sm:$0xff]   ;;  %v8138_v18 = vld [vmem:[%s11338_s1 + $0x1404] ss:$52 sps:$4 sm:$0xff]  }
 0x190   :  { %5609 = vmatprep.subr.bf16.mxu0 %v8057_v19  ;;  %5773 = vmatprep.subr.bf16.mxu1 %v8060_v20  ;;  %v8133_v19 = vld [vmem:[%s11338_s1 + $0x13f8] ss:$52 sps:$4 sm:$0xff]   ;;  %v8136_v20 = vld [vmem:[%s11338_s1 + $0x1400] ss:$52 sps:$4 sm:$0xff]  }
 0x193   :  { %5610 = vmatpush1.bf16.msra.mxu0 %v8055_v21  ;;  %5774 = vmatpush1.bf16.msra.mxu1 %v8058_v22  ;;  %v8141_v21 = vld [vmem:[%s11338_s1 + $0x1464] ss:$52 sps:$4 sm:$0xff]   ;;  %v8144_v22 = vld [vmem:[%s11338_s1 + $0x146c] ss:$52 sps:$4 sm:$0xff]  }
 0x194   :  { %5611 = vmatprep.subr.bf16.mxu0 %v8063_v24  ;;  %5775 = vmatprep.subr.bf16.mxu1 %v8066_v25  ;;  %v8139_v24 = vld [vmem:[%s11338_s1 + $0x1460] ss:$52 sps:$4 sm:$0xff]   ;;  %v8142_v25 = vld [vmem:[%s11338_s1 + $0x1468] ss:$52 sps:$4 sm:$0xff]  }
 0x197   :  { %5612 = vmatpush1.bf16.msra.mxu0 %v8061_v26  ;;  %5776 = vmatpush1.bf16.msra.mxu1 %v8064_v28  ;;  %v8147_v26 = vld [vmem:[%s11338_s1 + $0x14cc] ss:$52 sps:$4 sm:$0xff]   ;;  %v8150_v28 = vld [vmem:[%s11338_s1 + $0x14d4] ss:$52 sps:$4 sm:$0xff]  }
 0x198   :  { %5613 = vmatprep.subr.bf16.mxu0 %v8069_v29  ;;  %5777 = vmatprep.subr.bf16.mxu1 %v8072_v30  ;;  %v8145_v29 = vld [vmem:[%s11338_s1 + $0x14c8] ss:$52 sps:$4 sm:$0xff]   ;;  %v8148_v30 = vld [vmem:[%s11338_s1 + $0x14d0] ss:$52 sps:$4 sm:$0xff]  }
 0x19b   :  { %5614 = vmatpush1.bf16.msra.mxu0 %v8067_v31  ;;  %5778 = vmatpush1.bf16.msra.mxu1 %v8070_v32  ;;  %v8153_v31 = vld [vmem:[%s11338_s1 + $0x1534] ss:$52 sps:$4 sm:$0xff]   ;;  %v8156_v32 = vld [vmem:[%s11338_s1 + $0x153c] ss:$52 sps:$4 sm:$0xff]  }
 0x19c   :  { %5615 = vmatprep.subr.bf16.mxu0 %v8075_v34  ;;  %5779 = vmatprep.subr.bf16.mxu1 %v8078_v35  ;;  %v8151_v34 = vld [vmem:[%s11338_s1 + $0x1530] ss:$52 sps:$4 sm:$0xff]   ;;  %v8154_v35 = vld [vmem:[%s11338_s1 + $0x1538] ss:$52 sps:$4 sm:$0xff]  }
 0x19f   :  { %5616 = vmatpush1.bf16.msra.mxu0 %v8073_v36  ;;  %5780 = vmatpush1.bf16.msra.mxu1 %v8076_v37  ;;  %v8159_v36 = vld [vmem:[%s11338_s1 + $0x159c] ss:$52 sps:$4 sm:$0xff]   ;;  %v8162_v37 = vld [vmem:[%s11338_s1 + $0x15a4] ss:$52 sps:$4 sm:$0xff]  }
 0x1a0   :  { %5617 = vmatprep.subr.bf16.mxu0 %v8081_v39  ;;  %5781 = vmatprep.subr.bf16.mxu1 %v8084_v40  ;;  %v8157_v39 = vld [vmem:[%s11338_s1 + $0x1598] ss:$52 sps:$4 sm:$0xff]   ;;  %v8160_v40 = vld [vmem:[%s11338_s1 + $0x15a0] ss:$52 sps:$4 sm:$0xff]  }
 0x1a3   :  { %5618 = vmatpush1.bf16.msra.mxu0 %v8079_v41  ;;  %5782 = vmatpush1.bf16.msra.mxu1 %v8082_v42  ;;  %v8165_v41 = vld [vmem:[%s11338_s1 + $0x1604] ss:$52 sps:$4 sm:$0xff]   ;;  %v8168_v42 = vld [vmem:[%s11338_s1 + $0x160c] ss:$52 sps:$4 sm:$0xff]  }
 0x1a4   :  { %5619 = vmatprep.subr.bf16.mxu0 %v8087_v44  ;;  %5783 = vmatprep.subr.bf16.mxu1 %v8090_v45 }
 0x1a7   :  { %5620 = vmatpush1.bf16.msra.mxu0 %v8085_v46  ;;  %5784 = vmatpush1.bf16.msra.mxu1 %v8088_v47 }
 0x1a8   :  { %5621 = vmatprep.subr.bf16.mxu0 %v8093_v48  ;;  %5785 = vmatprep.subr.bf16.mxu1 %v8096_v50 }
 0x1ab   :  { %5622 = vmatpush1.bf16.msra.mxu0 %v8091_v51  ;;  %5786 = vmatpush1.bf16.msra.mxu1 %v8094_v53  ;;  %v8163_v51 = vld [vmem:[%s11338_s1 + $0x1600] ss:$52 sps:$4 sm:$0xff]   ;;  %v8166_v53 = vld [vmem:[%s11338_s1 + $0x1608] ss:$52 sps:$4 sm:$0xff]  }
 0x1ac   :  { %5623 = vmatprep.subr.bf16.mxu0 %v8099_v54  ;;  %5787 = vmatprep.subr.bf16.mxu1 %v8102_v55 }
 0x1af   :  { %5624 = vmatpush1.bf16.msra.mxu0 %v8097_v56  ;;  %5788 = vmatpush1.bf16.msra.mxu1 %v8100_v57  ;;  %v8171_v56 = vld [vmem:[%s11338_s1 + $0x166c] ss:$52 sps:$4 sm:$0xff]   ;;  %v8174_v57 = vld [vmem:[%s11338_s1 + $0x1674] ss:$52 sps:$4 sm:$0xff]  }
 0x1b0   :  { %5625 = vmatprep.subr.bf16.mxu0 %v8105_v58  ;;  %5789 = vmatprep.subr.bf16.mxu1 %v8108_v59  ;;  %v8169_v58 = vld [vmem:[%s11338_s1 + $0x1668] ss:$52 sps:$4 sm:$0xff]   ;;  %v8172_v59 = vld [vmem:[%s11338_s1 + $0x1670] ss:$52 sps:$4 sm:$0xff]  }
 0x1b3   :  { %5626 = vmatpush1.bf16.msra.mxu0 %v8103_v61  ;;  %5790 = vmatpush1.bf16.msra.mxu1 %v8106_v62  ;;  %v8177_v61 = vld [vmem:[%s11338_s1 + $0x16d4] ss:$52 sps:$4 sm:$0xff]   ;;  %v8180_v62 = vld [vmem:[%s11338_s1 + $0x16dc] ss:$52 sps:$4 sm:$0xff]  }
 0x1b4   :  { %5627 = vmatprep.subr.bf16.mxu0 %v8111_v63  ;;  %5791 = vmatprep.subr.bf16.mxu1 %v8114_v0  ;;  %v8175_v63 = vld [vmem:[%s11338_s1 + $0x16d0] ss:$52 sps:$4 sm:$0xff]   ;;  %v8178_v0 = vld [vmem:[%s11338_s1 + $0x16d8] ss:$52 sps:$4 sm:$0xff]  }
 0x1b7   :  { %5628 = vmatpush1.bf16.msra.mxu0 %v8109_v1  ;;  %5792 = vmatpush1.bf16.msra.mxu1 %v8112_v2  ;;  %v8183_v2 = vld [vmem:[%s11338_s1 + $0x173c] ss:$52 sps:$4 sm:$0xff]  }
 0x1b8   :  { %5629 = vmatprep.subr.bf16.mxu0 %v8117_v3  ;;  %5793 = vmatprep.subr.bf16.mxu1 %v8120_v4  ;;  %v8186_v3 = vld [vmem:[%s11338_s1 + $0x1744] ss:$52 sps:$4 sm:$0xff]  }
 0x1bb   :  { %5630 = vmatpush1.bf16.msra.mxu0 %v8115_v5  ;;  %5794 = vmatpush1.bf16.msra.mxu1 %v8118_v6 }
 0x1bc   :  { %5631 = vmatprep.subr.bf16.mxu0 %v8123_v7  ;;  %5795 = vmatprep.subr.bf16.mxu1 %v8126_v8  ;;  %v8181_v8 = vld [vmem:[%s11338_s1 + $0x1738] ss:$52 sps:$4 sm:$0xff]  }
 0x1bf   :  { %5632 = vmatpush1.bf16.msra.mxu0 %v8121_v9  ;;  %5796 = vmatpush1.bf16.msra.mxu1 %v8124_v10  ;;  %v8184_v9 = vld [vmem:[%s11338_s1 + $0x1740] ss:$52 sps:$4 sm:$0xff]  }
 0x1c0   :  { %5642 = vmatprep.subr.bf16.mxu0 %v8129_v11  ;;  %5806 = vmatprep.subr.bf16.mxu1 %v8132_v12  ;;  %v8189_v11 = vld [vmem:[%s11338_s1 + $0x17a4] ss:$52 sps:$4 sm:$0xff]   ;;  %v8192_v12 = vld [vmem:[%s11338_s1 + $0x17ac] ss:$52 sps:$4 sm:$0xff]  }
 0x1c2   :  { %5634 = vmatmul.mubr.bf16.vlgmr.msra.gmra.mrb[4].mxu0 %v9344_v33  ;;  %5798 = vmatmul.mubr.bf16.vlgmr.msra.gmra.mrb[4].mxu1 %v9344_v33 }
 0x1c3   :  { %5643 = vmatpush1.bf16.msra.mxu0 %v8127_v14  ;;  %5807 = vmatpush1.bf16.msra.mxu1 %v8130_v52 }
 0x1c4   :  { %5644 = vmatprep.subr.bf16.mxu0 %v8135_v16  ;;  %5808 = vmatprep.subr.bf16.mxu1 %v8138_v18  ;;  %v8187_v16 = vld [vmem:[%s11338_s1 + $0x17a0] ss:$52 sps:$4 sm:$0xff]   ;;  %v8190_v18 = vld [vmem:[%s11338_s1 + $0x17a8] ss:$52 sps:$4 sm:$0xff]  }
 0x1c5   :  { %5674 = vmatprep.mubr.bf16.mxu0 %v9357_v15  ;;  %5838 = vmatprep.mubr.bf16.mxu1 %v9357_v15 }
 0x1c7   :  { %5645 = vmatpush1.bf16.msra.mxu0 %v8133_v19  ;;  %5809 = vmatpush1.bf16.msra.mxu1 %v8136_v20  ;;  %v8195_v20 = vld [vmem:[%s11338_s1 + $0x180c] ss:$52 sps:$4 sm:$0xff]  }
 0x1c8   :  { %5646 = vmatprep.subr.bf16.mxu0 %v8141_v21  ;;  %5810 = vmatprep.subr.bf16.mxu1 %v8144_v22  ;;  %v8198_v21 = vld [vmem:[%s11338_s1 + $0x1814] ss:$52 sps:$4 sm:$0xff]  }
 0x1c9   :  { %v8193_v22 = vld [vmem:[%s11338_s1 + $0x1808] ss:$52 sps:$4 sm:$0xff]  }
 0x1cb   :  { %5647 = vmatpush1.bf16.msra.mxu0 %v8139_v24  ;;  %5811 = vmatpush1.bf16.msra.mxu1 %v8142_v25  ;;  %v8196_v24 = vld [vmem:[%s11338_s1 + $0x1810] ss:$52 sps:$4 sm:$0xff]   ;;  %v8201_v25 = vld [vmem:[%s11338_s1 + $0x1874] ss:$52 sps:$4 sm:$0xff]  }
 0x1cc   :  { %5648 = vmatprep.subr.bf16.mxu0 %v8147_v26  ;;  %5812 = vmatprep.subr.bf16.mxu1 %v8150_v28  ;;  %v8204_v26 = vld [vmem:[%s11338_s1 + $0x187c] ss:$52 sps:$4 sm:$0xff]  }
 0x1cd   :  { %v8199_v28 = vld [vmem:[%s11338_s1 + $0x1870] ss:$52 sps:$4 sm:$0xff]  }
 0x1cf   :  { %5649 = vmatpush1.bf16.msra.mxu0 %v8145_v29  ;;  %5813 = vmatpush1.bf16.msra.mxu1 %v8148_v30  ;;  %v8202_v29 = vld [vmem:[%s11338_s1 + $0x1878] ss:$52 sps:$4 sm:$0xff]   ;;  %v8207_v30 = vld [vmem:[%s11338_s1 + $0x18dc] ss:$52 sps:$4 sm:$0xff]  }
 0x1d0   :  { %5650 = vmatprep.subr.bf16.mxu0 %v8153_v31  ;;  %5814 = vmatprep.subr.bf16.mxu1 %v8156_v32  ;;  %v8210_v31 = vld [vmem:[%s11338_s1 + $0x18e4] ss:$52 sps:$4 sm:$0xff]  }
 0x1d1   :  { %v8205_v32 = vld [vmem:[%s11338_s1 + $0x18d8] ss:$52 sps:$4 sm:$0xff]  }
 0x1d3   :  { %5651 = vmatpush1.bf16.msra.mxu0 %v8151_v34  ;;  %5815 = vmatpush1.bf16.msra.mxu1 %v8154_v35  ;;  %v8208_v34 = vld [vmem:[%s11338_s1 + $0x18e0] ss:$52 sps:$4 sm:$0xff]   ;;  %v8213_v35 = vld [vmem:[%s11338_s1 + $0x1944] ss:$52 sps:$4 sm:$0xff]  }
 0x1d4   :  { %5652 = vmatprep.subr.bf16.mxu0 %v8159_v36  ;;  %5816 = vmatprep.subr.bf16.mxu1 %v8162_v37  ;;  %v8216_v36 = vld [vmem:[%s11338_s1 + $0x194c] ss:$52 sps:$4 sm:$0xff]  }
 0x1d5   :  { %v5348_v44 = vpop.f32.mrb[0].mxu0  ;;  %v5512_v45 = vpop.f32.mrb[0].mxu1  ;;  %v8211_v37 = vld [vmem:[%s11338_s1 + $0x1940] ss:$52 sps:$4 sm:$0xff]  }
 0x1d6   :  { %8671 = vtanh.f32 %v5348_v44  ;;  %v5350_v46 = vpop.f32.mrb[1].mxu0  ;;  %v5514_v47 = vpop.f32.mrb[1].mxu1  ;;  %v8220_v44 = vld [vmem:[%s11338_s1 + $0x19b0] ss:$52 sps:$4 sm:$0xff]  }
 0x1d7   :  { %8673 = vtanh.f32 %v5512_v45  ;;  %v5352_v48 = vpop.f32.mrb[2].mxu0  ;;  %v5516_v50 = vpop.f32.mrb[2].mxu1  ;;  %5653 = vmatpush1.bf16.msra.mxu0 %v8157_v39  ;;  %5817 = vmatpush1.bf16.msra.mxu1 %v8160_v40  ;;  %v8214_v39 = vld [vmem:[%s11338_s1 + $0x1948] ss:$52 sps:$4 sm:$0xff]   ;;  %v8219_v40 = vld [vmem:[%s11338_s1 + $0x19ac] ss:$52 sps:$4 sm:$0xff]  }
 0x1d8   :  { %8675 = vtanh.f32 %v5350_v46  ;;  %v5353_v54 = vpop.f32.mrb[3].mxu0  ;;  %v5517_v55 = vpop.f32.mrb[3].mxu1  ;;  %5654 = vmatprep.subr.bf16.mxu0 %v8165_v41  ;;  %5818 = vmatprep.subr.bf16.mxu1 %v8168_v42  ;;  %v8222_v41 = vld [vmem:[%s11338_s1 + $0x19b4] ss:$52 sps:$4 sm:$0xff]   ;;  %v8225_v45 = vld [vmem:[%s11338_s1 + $0x24] ss:$52 sps:$4 sm:$0xff]  }
 0x1d9   :  { %8677 = vtanh.f32 %v5514_v47  ;;  %v8217_v42 = vld [vmem:[%s11338_s1 + $0x19a8] ss:$52 sps:$4 sm:$0xff]   ;;  %v8228_v46 = vld [vmem:[%s11338_s1 + $0x2c] ss:$52 sps:$4 sm:$0xff]   ;;  %v8232_v54 = vld [vmem:[%s11338_s1 + $0x90] ss:$52 sps:$4 sm:$0xff]  }
 0x1da   :  { %v8223_v47 = vld [vmem:[%s11338_s1 + $0x20] ss:$52 sps:$4 sm:$0xff]   ;;  %v8226_v48 = vld [vmem:[%s11338_s1 + $0x28] ss:$52 sps:$4 sm:$0xff]  }
 0x1db   :  { %5655 = vmatpush1.bf16.msra.mxu0 %v8163_v51  ;;  %5819 = vmatpush1.bf16.msra.mxu1 %v8166_v53  ;;  %v8231_v50 = vld [vmem:[%s11338_s1 + $0x8c] ss:$52 sps:$4 sm:$0xff]   ;;  %v8234_v51 = vld [vmem:[%s11338_s1 + $0x94] ss:$52 sps:$4 sm:$0xff]  }
 0x1dc   :  { %5656 = vmatprep.subr.bf16.mxu0 %v8171_v56  ;;  %5820 = vmatprep.subr.bf16.mxu1 %v8174_v57  ;;  %v8229_v53 = vld [vmem:[%s11338_s1 + $0x88] ss:$52 sps:$4 sm:$0xff]   ;;  %v8235_v57 = vld [vmem:[%s11338_s1 + $0xf0] ss:$52 sps:$4 sm:$0xff]  }
 0x1dd   :  { %v8237_v55 = vld [vmem:[%s11338_s1 + $0xf4] ss:$52 sps:$4 sm:$0xff]   ;;  %v8240_v56 = vld [vmem:[%s11338_s1 + $0xfc] ss:$52 sps:$4 sm:$0xff]  }
 0x1df   :  { %5657 = vmatpush1.bf16.msra.mxu0 %v8169_v58  ;;  %5821 = vmatpush1.bf16.msra.mxu1 %v8172_v59  ;;  %v8238_v58 = vld [vmem:[%s11338_s1 + $0xf8] ss:$52 sps:$4 sm:$0xff]   ;;  %v8243_v59 = vld [vmem:[%s11338_s1 + $0x15c] ss:$52 sps:$4 sm:$0xff]  }
 0x1e0   :  { %v8672_v1 = vpop.eup %8671  ;;  %5658 = vmatprep.subr.bf16.mxu0 %v8177_v61  ;;  %5822 = vmatprep.subr.bf16.mxu1 %v8180_v62  ;;  %v8246_v61 = vld [vmem:[%s11338_s1 + $0x164] ss:$52 sps:$4 sm:$0xff]  }
 0x1e1   :  { %v8674_v4 = vpop.eup %8673  ;;  %v8241_v62 = vld [vmem:[%s11338_s1 + $0x158] ss:$52 sps:$4 sm:$0xff]  }
 0x1e2   :  { %v8676_v5 = vpop.eup %8675 }
 0x1e3   :  { %v8678_v6 = vpop.eup %8677  ;;  %v6361_v7 = vcombine.low %v8672_v1, %v8676_v5  ;;  %5659 = vmatpush1.bf16.msra.mxu0 %v8175_v63  ;;  %5823 = vmatpush1.bf16.msra.mxu1 %v8178_v0  ;;  %v8244_v63 = vld [vmem:[%s11338_s1 + $0x160] ss:$52 sps:$4 sm:$0xff]   ;;  %v8249_v0 = vld [vmem:[%s11338_s1 + $0x1c4] ss:$52 sps:$4 sm:$0xff]  }
 0x1e4   :  { %v6362_v10 = vcombine.low %v8674_v4, %v8678_v6  ;;  %5660 = vmatprep.subr.bf16.mxu0 %v8183_v2  ;;  %5824 = vmatprep.subr.bf16.mxu1 %v8186_v3  ;;  %v8252_v1 = vld [vmem:[%s11338_s1 + $0x1cc] ss:$52 sps:$4 sm:$0xff]   ;;  %v8250_v3 = vld [vmem:[%s11338_s1 + $0x1c8] ss:$52 sps:$4 sm:$0xff]  }
 0x1e5   :  { %v10260_v14 = vrot.slane %v6361_v7, %v8846_v49  ;;  %v8247_v2 = vld [vmem:[%s11338_s1 + $0x1c0] ss:$52 sps:$4 sm:$0xff]   ;;  %v8253_v6 = vld [vmem:[%s11338_s1 + $0x228] ss:$52 sps:$4 sm:$0xff]   ;;  %v8256_v7 = vld [vmem:[%s11338_s1 + $0x230] ss:$52 sps:$4 sm:$0xff]  }
 0x1e6   :  { %v10263_v52 = vrot.slane %v6362_v10, %v8846_v49  ;;  %v8255_v4 = vld [vmem:[%s11338_s1 + $0x22c] ss:$52 sps:$4 sm:$0xff]   ;;  %v8258_v5 = vld [vmem:[%s11338_s1 + $0x234] ss:$52 sps:$4 sm:$0xff]   ;;  %v8259_v10 = vld [vmem:[%s11338_s1 + $0x290] ss:$52 sps:$4 sm:$0xff]  }
 0x1e7   :  { %5661 = vmatpush1.bf16.msra.mxu0 %v8181_v8  ;;  %5825 = vmatpush1.bf16.msra.mxu1 %v8184_v9  ;;  %v8261_v8 = vld [vmem:[%s11338_s1 + $0x294] ss:$52 sps:$4 sm:$0xff]   ;;  %v8264_v9 = vld [vmem:[%s11338_s1 + $0x29c] ss:$52 sps:$4 sm:$0xff]  }
 0x1e8   :  { %v6393_v19 = vcombine.low %v10260_v14, %v10263_v52  ;;  %5662 = vmatprep.subr.bf16.mxu0 %v8189_v11  ;;  %5826 = vmatprep.subr.bf16.mxu1 %v8192_v12  ;;  %v8262_v11 = vld [vmem:[%s11338_s1 + $0x298] ss:$52 sps:$4 sm:$0xff]   ;;  %v8267_v12 = vld [vmem:[%s11338_s1 + $0x2fc] ss:$52 sps:$4 sm:$0xff]  }
 0x1e9   :  { %v8585_v14 = vld [vmem:[%s11338_s1 + $0x1884] ss:$52 sps:$4 sm:$0xff]   ;;  %v8588_v52 = vld [vmem:[%s11338_s1 + $0x188c] ss:$52 sps:$4 sm:$0xff]  }
 0x1eb   :  { %5663 = vmatpush1.bf16.msra.mxu0 %v8187_v16  ;;  %5827 = vmatpush1.bf16.msra.mxu1 %v8190_v18  ;;  %v8270_v16 = vld [vmem:[%s11338_s1 + $0x304] ss:$52 sps:$4 sm:$0xff]  }
 0x1ec   :  { %5664 = vmatprep.subr.bf16.mxu0 %v8195_v20  ;;  %5828 = vmatprep.subr.bf16.mxu1 %v8198_v21  ;;  %v8265_v18 = vld [vmem:[%s11338_s1 + $0x2f8] ss:$52 sps:$4 sm:$0xff]   ;;  %v8268_v20 = vld [vmem:[%s11338_s1 + $0x300] ss:$52 sps:$4 sm:$0xff]  }
 0x1ed   :  { %v8273_v21 = vld [vmem:[%s11338_s1 + $0x364] ss:$52 sps:$4 sm:$0xff]  }
 0x1ef   :  { %5665 = vmatpush1.bf16.msra.mxu0 %v8193_v22  ;;  %5829 = vmatpush1.bf16.msra.mxu1 %v8196_v24  ;;  %v8276_v22 = vld [vmem:[%s11338_s1 + $0x36c] ss:$52 sps:$4 sm:$0xff]  }
 0x1f0   :  { %5666 = vmatprep.subr.bf16.mxu0 %v8201_v25  ;;  %5830 = vmatprep.subr.bf16.mxu1 %v8204_v26  ;;  %v8271_v24 = vld [vmem:[%s11338_s1 + $0x360] ss:$52 sps:$4 sm:$0xff]   ;;  %v8274_v25 = vld [vmem:[%s11338_s1 + $0x368] ss:$52 sps:$4 sm:$0xff]  }
 0x1f1   :  { %v8279_v26 = vld [vmem:[%s11338_s1 + $0x3cc] ss:$52 sps:$4 sm:$0xff]  }
 0x1f3   :  { %5667 = vmatpush1.bf16.msra.mxu0 %v8199_v28  ;;  %5831 = vmatpush1.bf16.msra.mxu1 %v8202_v29  ;;  %v8282_v28 = vld [vmem:[%s11338_s1 + $0x3d4] ss:$52 sps:$4 sm:$0xff]  }
 0x1f4   :  { %5668 = vmatprep.subr.bf16.mxu0 %v8207_v30  ;;  %5832 = vmatprep.subr.bf16.mxu1 %v8210_v31  ;;  %v8277_v29 = vld [vmem:[%s11338_s1 + $0x3c8] ss:$52 sps:$4 sm:$0xff]   ;;  %v8280_v30 = vld [vmem:[%s11338_s1 + $0x3d0] ss:$52 sps:$4 sm:$0xff]  }
 0x1f5   :  { %v8285_v31 = vld [vmem:[%s11338_s1 + $0x434] ss:$52 sps:$4 sm:$0xff]  }
 0x1f7   :  { %5669 = vmatpush1.bf16.msra.mxu0 %v8205_v32  ;;  %5833 = vmatpush1.bf16.msra.mxu1 %v8208_v34  ;;  %v8288_v32 = vld [vmem:[%s11338_s1 + $0x43c] ss:$52 sps:$4 sm:$0xff]  }
 0x1f8   :  { %5670 = vmatprep.subr.bf16.mxu0 %v8213_v35  ;;  %5834 = vmatprep.subr.bf16.mxu1 %v8216_v36  ;;  %v8283_v34 = vld [vmem:[%s11338_s1 + $0x430] ss:$52 sps:$4 sm:$0xff]   ;;  %v8286_v35 = vld [vmem:[%s11338_s1 + $0x438] ss:$52 sps:$4 sm:$0xff]  }
 0x1f9   :  { %v8291_v36 = vld [vmem:[%s11338_s1 + $0x49c] ss:$52 sps:$4 sm:$0xff]  }
 0x1fb   :  { %5671 = vmatpush1.bf16.msra.mxu0 %v8211_v37  ;;  %5835 = vmatpush1.bf16.msra.mxu1 %v8214_v39  ;;  %v8294_v37 = vld [vmem:[%s11338_s1 + $0x4a4] ss:$52 sps:$4 sm:$0xff]  }
 0x1fc   :  { %5672 = vmatprep.subr.bf16.mxu0 %v8219_v40  ;;  %5836 = vmatprep.subr.bf16.mxu1 %v8222_v41  ;;  %v8289_v39 = vld [vmem:[%s11338_s1 + $0x498] ss:$52 sps:$4 sm:$0xff]   ;;  %v8292_v40 = vld [vmem:[%s11338_s1 + $0x4a0] ss:$52 sps:$4 sm:$0xff]  }
 0x1fd   :  { %v8297_v41 = vld [vmem:[%s11338_s1 + $0x504] ss:$52 sps:$4 sm:$0xff]  }
 0x1ff   :  { %5673 = vmatpush1.bf16.msra.mxu0 %v8217_v42  ;;  %5837 = vmatpush1.bf16.msra.mxu1 %v8220_v44  ;;  %v8300_v42 = vld [vmem:[%s11338_s1 + $0x50c] ss:$52 sps:$4 sm:$0xff]  }
 0x200   :  { %5847 = vmatprep.subr.bf16.mxu0 %v8225_v45  ;;  %6011 = vmatprep.subr.bf16.mxu1 %v8228_v46  ;;  %v8295_v44 = vld [vmem:[%s11338_s1 + $0x500] ss:$52 sps:$4 sm:$0xff]   ;;  %v8298_v45 = vld [vmem:[%s11338_s1 + $0x508] ss:$52 sps:$4 sm:$0xff]  }
 0x201   :  { %v8303_v46 = vld [vmem:[%s11338_s1 + $0x56c] ss:$52 sps:$4 sm:$0xff]  }
 0x202   :  { %5675 = vmatmul.mubr.bf16.vlgmr.msra.gmra.mrb[4].mxu0 %v9545_v43  ;;  %5839 = vmatmul.mubr.bf16.vlgmr.msra.gmra.mrb[4].mxu1 %v9545_v43 }
 0x203   :  { %5848 = vmatpush1.bf16.msra.mxu0 %v8223_v47  ;;  %6012 = vmatpush1.bf16.msra.mxu1 %v8226_v48  ;;  %v8306_v47 = vld [vmem:[%s11338_s1 + $0x574] ss:$52 sps:$4 sm:$0xff]  }
 0x204   :  { %5849 = vmatprep.subr.bf16.mxu0 %v8231_v50  ;;  %6013 = vmatprep.subr.bf16.mxu1 %v8234_v51  ;;  %v8301_v48 = vld [vmem:[%s11338_s1 + $0x568] ss:$52 sps:$4 sm:$0xff]   ;;  %v8304_v50 = vld [vmem:[%s11338_s1 + $0x570] ss:$52 sps:$4 sm:$0xff]  }
 0x205   :  { %5879 = vmatprep.mubr.bf16.mxu0 %v8877_v60  ;;  %6043 = vmatprep.mubr.bf16.mxu1 %v8877_v60  ;;  %v8309_v51 = vld [vmem:[%s11338_s1 + $0x5d4] ss:$52 sps:$4 sm:$0xff]  }
 0x207   :  { %5850 = vmatpush1.bf16.msra.mxu0 %v8229_v53  ;;  %6014 = vmatpush1.bf16.msra.mxu1 %v8232_v54  ;;  %v8312_v53 = vld [vmem:[%s11338_s1 + $0x5dc] ss:$52 sps:$4 sm:$0xff]  }
 0x208   :  { %5851 = vmatprep.subr.bf16.mxu0 %v8237_v55  ;;  %6015 = vmatprep.subr.bf16.mxu1 %v8240_v56  ;;  %v8307_v54 = vld [vmem:[%s11338_s1 + $0x5d0] ss:$52 sps:$4 sm:$0xff]   ;;  %v8310_v55 = vld [vmem:[%s11338_s1 + $0x5d8] ss:$52 sps:$4 sm:$0xff]  }
 0x209   :  { %v8315_v56 = vld [vmem:[%s11338_s1 + $0x63c] ss:$52 sps:$4 sm:$0xff]  }
 0x20b   :  { %5852 = vmatpush1.bf16.msra.mxu0 %v8235_v57  ;;  %6016 = vmatpush1.bf16.msra.mxu1 %v8238_v58  ;;  %v8318_v57 = vld [vmem:[%s11338_s1 + $0x644] ss:$52 sps:$4 sm:$0xff]  }
 0x20c   :  { %5853 = vmatprep.subr.bf16.mxu0 %v8243_v59  ;;  %6017 = vmatprep.subr.bf16.mxu1 %v8246_v61  ;;  %v8313_v58 = vld [vmem:[%s11338_s1 + $0x638] ss:$52 sps:$4 sm:$0xff]   ;;  %v8316_v59 = vld [vmem:[%s11338_s1 + $0x640] ss:$52 sps:$4 sm:$0xff]  }
 0x20d   :  { %v8321_v61 = vld [vmem:[%s11338_s1 + $0x6a4] ss:$52 sps:$4 sm:$0xff]  }
 0x20f   :  { %5854 = vmatpush1.bf16.msra.mxu0 %v8241_v62  ;;  %6018 = vmatpush1.bf16.msra.mxu1 %v8244_v63  ;;  %v8324_v62 = vld [vmem:[%s11338_s1 + $0x6ac] ss:$52 sps:$4 sm:$0xff]  }
 0x210   :  { %5855 = vmatprep.subr.bf16.mxu0 %v8249_v0  ;;  %6019 = vmatprep.subr.bf16.mxu1 %v8252_v1  ;;  %v8319_v63 = vld [vmem:[%s11338_s1 + $0x6a0] ss:$52 sps:$4 sm:$0xff]   ;;  %v8322_v0 = vld [vmem:[%s11338_s1 + $0x6a8] ss:$52 sps:$4 sm:$0xff]  }
 0x211   :  { %v8327_v1 = vld [vmem:[%s11338_s1 + $0x70c] ss:$52 sps:$4 sm:$0xff]  }
 0x213   :  { %5856 = vmatpush1.bf16.msra.mxu0 %v8247_v2  ;;  %6020 = vmatpush1.bf16.msra.mxu1 %v8250_v3  ;;  %v8330_v2 = vld [vmem:[%s11338_s1 + $0x714] ss:$52 sps:$4 sm:$0xff]  }
 0x214   :  { %5857 = vmatprep.subr.bf16.mxu0 %v8255_v4  ;;  %6021 = vmatprep.subr.bf16.mxu1 %v8258_v5  ;;  %v8325_v3 = vld [vmem:[%s11338_s1 + $0x708] ss:$52 sps:$4 sm:$0xff]   ;;  %v8328_v4 = vld [vmem:[%s11338_s1 + $0x710] ss:$52 sps:$4 sm:$0xff]  }
 0x215   :  { %v8333_v5 = vld [vmem:[%s11338_s1 + $0x774] ss:$52 sps:$4 sm:$0xff]  }
 0x217   :  { %5858 = vmatpush1.bf16.msra.mxu0 %v8253_v6  ;;  %6022 = vmatpush1.bf16.msra.mxu1 %v8256_v7  ;;  %v8336_v6 = vld [vmem:[%s11338_s1 + $0x77c] ss:$52 sps:$4 sm:$0xff]  }
 0x218   :  { %5859 = vmatprep.subr.bf16.mxu0 %v8261_v8  ;;  %6023 = vmatprep.subr.bf16.mxu1 %v8264_v9  ;;  %v8331_v7 = vld [vmem:[%s11338_s1 + $0x770] ss:$52 sps:$4 sm:$0xff]   ;;  %v8334_v8 = vld [vmem:[%s11338_s1 + $0x778] ss:$52 sps:$4 sm:$0xff]  }
 0x219   :  { %v8339_v9 = vld [vmem:[%s11338_s1 + $0x7dc] ss:$52 sps:$4 sm:$0xff]  }
 0x21b   :  { %5860 = vmatpush1.bf16.msra.mxu0 %v8259_v10  ;;  %6024 = vmatpush1.bf16.msra.mxu1 %v8262_v11  ;;  %v8342_v10 = vld [vmem:[%s11338_s1 + $0x7e4] ss:$52 sps:$4 sm:$0xff]  }
 0x21c   :  { %5861 = vmatprep.subr.bf16.mxu0 %v8267_v12  ;;  %6025 = vmatprep.subr.bf16.mxu1 %v8270_v16  ;;  %v8337_v11 = vld [vmem:[%s11338_s1 + $0x7d8] ss:$52 sps:$4 sm:$0xff]   ;;  %v8340_v12 = vld [vmem:[%s11338_s1 + $0x7e0] ss:$52 sps:$4 sm:$0xff]  }
 0x21d   :  { %v8345_v16 = vld [vmem:[%s11338_s1 + $0x844] ss:$52 sps:$4 sm:$0xff]  }
 0x21f   :  { %5862 = vmatpush1.bf16.msra.mxu0 %v8265_v18  ;;  %6026 = vmatpush1.bf16.msra.mxu1 %v8268_v20  ;;  %v8348_v18 = vld [vmem:[%s11338_s1 + $0x84c] ss:$52 sps:$4 sm:$0xff]  }
 0x220   :  { %5863 = vmatprep.subr.bf16.mxu0 %v8273_v21  ;;  %6027 = vmatprep.subr.bf16.mxu1 %v8276_v22  ;;  %v8343_v20 = vld [vmem:[%s11338_s1 + $0x840] ss:$52 sps:$4 sm:$0xff]   ;;  %v8346_v21 = vld [vmem:[%s11338_s1 + $0x848] ss:$52 sps:$4 sm:$0xff]  }
 0x221   :  { %v8351_v22 = vld [vmem:[%s11338_s1 + $0x8ac] ss:$52 sps:$4 sm:$0xff]  }
 0x223   :  { %5864 = vmatpush1.bf16.msra.mxu0 %v8271_v24  ;;  %6028 = vmatpush1.bf16.msra.mxu1 %v8274_v25  ;;  %v8354_v24 = vld [vmem:[%s11338_s1 + $0x8b4] ss:$52 sps:$4 sm:$0xff]  }
 0x224   :  { %5865 = vmatprep.subr.bf16.mxu0 %v8279_v26  ;;  %6029 = vmatprep.subr.bf16.mxu1 %v8282_v28  ;;  %v8349_v25 = vld [vmem:[%s11338_s1 + $0x8a8] ss:$52 sps:$4 sm:$0xff]   ;;  %v8352_v26 = vld [vmem:[%s11338_s1 + $0x8b0] ss:$52 sps:$4 sm:$0xff]  }
 0x225   :  { %v8357_v28 = vld [vmem:[%s11338_s1 + $0x914] ss:$52 sps:$4 sm:$0xff]  }
 0x227   :  { %5866 = vmatpush1.bf16.msra.mxu0 %v8277_v29  ;;  %6030 = vmatpush1.bf16.msra.mxu1 %v8280_v30  ;;  %v8360_v29 = vld [vmem:[%s11338_s1 + $0x91c] ss:$52 sps:$4 sm:$0xff]  }
 0x228   :  { %5867 = vmatprep.subr.bf16.mxu0 %v8285_v31  ;;  %6031 = vmatprep.subr.bf16.mxu1 %v8288_v32  ;;  %v8355_v30 = vld [vmem:[%s11338_s1 + $0x910] ss:$52 sps:$4 sm:$0xff]   ;;  %v8358_v31 = vld [vmem:[%s11338_s1 + $0x918] ss:$52 sps:$4 sm:$0xff]  }
 0x229   :  { %v8363_v32 = vld [vmem:[%s11338_s1 + $0x97c] ss:$52 sps:$4 sm:$0xff]  }
 0x22b   :  { %5868 = vmatpush1.bf16.msra.mxu0 %v8283_v34  ;;  %6032 = vmatpush1.bf16.msra.mxu1 %v8286_v35  ;;  %v8366_v34 = vld [vmem:[%s11338_s1 + $0x984] ss:$52 sps:$4 sm:$0xff]  }
 0x22c   :  { %5869 = vmatprep.subr.bf16.mxu0 %v8291_v36  ;;  %6033 = vmatprep.subr.bf16.mxu1 %v8294_v37  ;;  %v8361_v35 = vld [vmem:[%s11338_s1 + $0x978] ss:$52 sps:$4 sm:$0xff]   ;;  %v8364_v36 = vld [vmem:[%s11338_s1 + $0x980] ss:$52 sps:$4 sm:$0xff]  }
 0x22d   :  { %v8369_v37 = vld [vmem:[%s11338_s1 + $0x9e4] ss:$52 sps:$4 sm:$0xff]  }
 0x22f   :  { %5870 = vmatpush1.bf16.msra.mxu0 %v8289_v39  ;;  %6034 = vmatpush1.bf16.msra.mxu1 %v8292_v40  ;;  %v8372_v39 = vld [vmem:[%s11338_s1 + $0x9ec] ss:$52 sps:$4 sm:$0xff]  }
 0x230   :  { %5871 = vmatprep.subr.bf16.mxu0 %v8297_v41  ;;  %6035 = vmatprep.subr.bf16.mxu1 %v8300_v42  ;;  %v8367_v40 = vld [vmem:[%s11338_s1 + $0x9e0] ss:$52 sps:$4 sm:$0xff]   ;;  %v8370_v41 = vld [vmem:[%s11338_s1 + $0x9e8] ss:$52 sps:$4 sm:$0xff]  }
 0x231   :  { %v8375_v42 = vld [vmem:[%s11338_s1 + $0xa4c] ss:$52 sps:$4 sm:$0xff]  }
 0x233   :  { %5872 = vmatpush1.bf16.msra.mxu0 %v8295_v44  ;;  %6036 = vmatpush1.bf16.msra.mxu1 %v8298_v45  ;;  %v8378_v44 = vld [vmem:[%s11338_s1 + $0xa54] ss:$52 sps:$4 sm:$0xff]  }
 0x234   :  { %5873 = vmatprep.subr.bf16.mxu0 %v8303_v46  ;;  %6037 = vmatprep.subr.bf16.mxu1 %v8306_v47  ;;  %v8373_v45 = vld [vmem:[%s11338_s1 + $0xa48] ss:$52 sps:$4 sm:$0xff]   ;;  %v8376_v46 = vld [vmem:[%s11338_s1 + $0xa50] ss:$52 sps:$4 sm:$0xff]  }
 0x235   :  { %v8381_v47 = vld [vmem:[%s11338_s1 + $0xab4] ss:$52 sps:$4 sm:$0xff]  }
 0x237   :  { %5874 = vmatpush1.bf16.msra.mxu0 %v8301_v48  ;;  %6038 = vmatpush1.bf16.msra.mxu1 %v8304_v50  ;;  %v8384_v48 = vld [vmem:[%s11338_s1 + $0xabc] ss:$52 sps:$4 sm:$0xff]  }
 0x238   :  { %5875 = vmatprep.subr.bf16.mxu0 %v8309_v51  ;;  %6039 = vmatprep.subr.bf16.mxu1 %v8312_v53  ;;  %v8379_v50 = vld [vmem:[%s11338_s1 + $0xab0] ss:$52 sps:$4 sm:$0xff]   ;;  %v8382_v51 = vld [vmem:[%s11338_s1 + $0xab8] ss:$52 sps:$4 sm:$0xff]  }
 0x239   :  { %v8387_v53 = vld [vmem:[%s11338_s1 + $0xb1c] ss:$52 sps:$4 sm:$0xff]  }
 0x23b   :  { %5876 = vmatpush1.bf16.msra.mxu0 %v8307_v54  ;;  %6040 = vmatpush1.bf16.msra.mxu1 %v8310_v55  ;;  %v8390_v54 = vld [vmem:[%s11338_s1 + $0xb24] ss:$52 sps:$4 sm:$0xff]  }
 0x23c   :  { %5877 = vmatprep.subr.bf16.mxu0 %v8315_v56  ;;  %6041 = vmatprep.subr.bf16.mxu1 %v8318_v57  ;;  %v8385_v55 = vld [vmem:[%s11338_s1 + $0xb18] ss:$52 sps:$4 sm:$0xff]   ;;  %v8388_v56 = vld [vmem:[%s11338_s1 + $0xb20] ss:$52 sps:$4 sm:$0xff]  }
 0x23d   :  { %v8393_v57 = vld [vmem:[%s11338_s1 + $0xb84] ss:$52 sps:$4 sm:$0xff]  }
 0x23f   :  { %5878 = vmatpush1.bf16.msra.mxu0 %v8313_v58  ;;  %6042 = vmatpush1.bf16.msra.mxu1 %v8316_v59  ;;  %v8396_v58 = vld [vmem:[%s11338_s1 + $0xb8c] ss:$52 sps:$4 sm:$0xff]  }
 0x240   :  { %5888 = vmatprep.subr.bf16.mxu0 %v8321_v61  ;;  %6052 = vmatprep.subr.bf16.mxu1 %v8324_v62  ;;  %v8391_v59 = vld [vmem:[%s11338_s1 + $0xb80] ss:$52 sps:$4 sm:$0xff]   ;;  %v8394_v61 = vld [vmem:[%s11338_s1 + $0xb88] ss:$52 sps:$4 sm:$0xff]  }
 0x241   :  { %v8399_v62 = vld [vmem:[%s11338_s1 + $0xbec] ss:$52 sps:$4 sm:$0xff]  }
 0x242   :  { %5880 = vmatmul.mubr.bf16.vlgmr.msra.gmra.mrb[8].mxu0 %v8930_v13  ;;  %6044 = vmatmul.mubr.bf16.vlgmr.msra.gmra.mrb[8].mxu1 %v8930_v13 }
 0x243   :  { %5889 = vmatpush1.bf16.msra.mxu0 %v8319_v63  ;;  %6053 = vmatpush1.bf16.msra.mxu1 %v8322_v0  ;;  %v8402_v63 = vld [vmem:[%s11338_s1 + $0xbf4] ss:$52 sps:$4 sm:$0xff]  }
 0x244   :  { %5890 = vmatprep.subr.bf16.mxu0 %v8327_v1  ;;  %6054 = vmatprep.subr.bf16.mxu1 %v8330_v2  ;;  %v8397_v0 = vld [vmem:[%s11338_s1 + $0xbe8] ss:$52 sps:$4 sm:$0xff]   ;;  %v8400_v1 = vld [vmem:[%s11338_s1 + $0xbf0] ss:$52 sps:$4 sm:$0xff]  }
 0x245   :  { %5920 = vmatprep.mubr.bf16.mxu0 %v8943_v17  ;;  %6084 = vmatprep.mubr.bf16.mxu1 %v8943_v17  ;;  %v8405_v2 = vld [vmem:[%s11338_s1 + $0xc54] ss:$52 sps:$4 sm:$0xff]  }
 0x247   :  { %5891 = vmatpush1.bf16.msra.mxu0 %v8325_v3  ;;  %6055 = vmatpush1.bf16.msra.mxu1 %v8328_v4  ;;  %v8408_v3 = vld [vmem:[%s11338_s1 + $0xc5c] ss:$52 sps:$4 sm:$0xff]  }
 0x248   :  { %5892 = vmatprep.subr.bf16.mxu0 %v8333_v5  ;;  %6056 = vmatprep.subr.bf16.mxu1 %v8336_v6  ;;  %v8403_v4 = vld [vmem:[%s11338_s1 + $0xc50] ss:$52 sps:$4 sm:$0xff]   ;;  %v8406_v5 = vld [vmem:[%s11338_s1 + $0xc58] ss:$52 sps:$4 sm:$0xff]  }
 0x249   :  { %v8411_v6 = vld [vmem:[%s11338_s1 + $0xcbc] ss:$52 sps:$4 sm:$0xff]  }
 0x24b   :  { %5893 = vmatpush1.bf16.msra.mxu0 %v8331_v7  ;;  %6057 = vmatpush1.bf16.msra.mxu1 %v8334_v8  ;;  %v8414_v7 = vld [vmem:[%s11338_s1 + $0xcc4] ss:$52 sps:$4 sm:$0xff]  }
 0x24c   :  { %5894 = vmatprep.subr.bf16.mxu0 %v8339_v9  ;;  %6058 = vmatprep.subr.bf16.mxu1 %v8342_v10  ;;  %v8409_v8 = vld [vmem:[%s11338_s1 + $0xcb8] ss:$52 sps:$4 sm:$0xff]   ;;  %v8412_v9 = vld [vmem:[%s11338_s1 + $0xcc0] ss:$52 sps:$4 sm:$0xff]  }
 0x24d   :  { %v8417_v10 = vld [vmem:[%s11338_s1 + $0xd24] ss:$52 sps:$4 sm:$0xff]  }
 0x24f   :  { %5895 = vmatpush1.bf16.msra.mxu0 %v8337_v11  ;;  %6059 = vmatpush1.bf16.msra.mxu1 %v8340_v12  ;;  %v8420_v11 = vld [vmem:[%s11338_s1 + $0xd2c] ss:$52 sps:$4 sm:$0xff]  }
 0x250   :  { %5896 = vmatprep.subr.bf16.mxu0 %v8345_v16  ;;  %6060 = vmatprep.subr.bf16.mxu1 %v8348_v18  ;;  %v8415_v12 = vld [vmem:[%s11338_s1 + $0xd20] ss:$52 sps:$4 sm:$0xff]   ;;  %v8418_v16 = vld [vmem:[%s11338_s1 + $0xd28] ss:$52 sps:$4 sm:$0xff]  }
 0x251   :  { %v8423_v18 = vld [vmem:[%s11338_s1 + $0xd8c] ss:$52 sps:$4 sm:$0xff]  }
 0x253   :  { %5897 = vmatpush1.bf16.msra.mxu0 %v8343_v20  ;;  %6061 = vmatpush1.bf16.msra.mxu1 %v8346_v21  ;;  %v8426_v20 = vld [vmem:[%s11338_s1 + $0xd94] ss:$52 sps:$4 sm:$0xff]  }
 0x254   :  { %5898 = vmatprep.subr.bf16.mxu0 %v8351_v22  ;;  %6062 = vmatprep.subr.bf16.mxu1 %v8354_v24  ;;  %v8421_v21 = vld [vmem:[%s11338_s1 + $0xd88] ss:$52 sps:$4 sm:$0xff]   ;;  %v8424_v22 = vld [vmem:[%s11338_s1 + $0xd90] ss:$52 sps:$4 sm:$0xff]  }
 0x255   :  { %v8429_v24 = vld [vmem:[%s11338_s1 + $0xdf4] ss:$52 sps:$4 sm:$0xff]  }
 0x257   :  { %5899 = vmatpush1.bf16.msra.mxu0 %v8349_v25  ;;  %6063 = vmatpush1.bf16.msra.mxu1 %v8352_v26  ;;  %v8432_v25 = vld [vmem:[%s11338_s1 + $0xdfc] ss:$52 sps:$4 sm:$0xff]  }
 0x258   :  { %5900 = vmatprep.subr.bf16.mxu0 %v8357_v28  ;;  %6064 = vmatprep.subr.bf16.mxu1 %v8360_v29  ;;  %v8427_v26 = vld [vmem:[%s11338_s1 + $0xdf0] ss:$52 sps:$4 sm:$0xff]   ;;  %v8430_v28 = vld [vmem:[%s11338_s1 + $0xdf8] ss:$52 sps:$4 sm:$0xff]  }
 0x259   :  { %v8435_v29 = vld [vmem:[%s11338_s1 + $0xe5c] ss:$52 sps:$4 sm:$0xff]  }
 0x25b   :  { %5901 = vmatpush1.bf16.msra.mxu0 %v8355_v30  ;;  %6065 = vmatpush1.bf16.msra.mxu1 %v8358_v31  ;;  %v8438_v30 = vld [vmem:[%s11338_s1 + $0xe64] ss:$52 sps:$4 sm:$0xff]  }
 0x25c   :  { %5902 = vmatprep.subr.bf16.mxu0 %v8363_v32  ;;  %6066 = vmatprep.subr.bf16.mxu1 %v8366_v34  ;;  %v8433_v31 = vld [vmem:[%s11338_s1 + $0xe58] ss:$52 sps:$4 sm:$0xff]   ;;  %v8436_v32 = vld [vmem:[%s11338_s1 + $0xe60] ss:$52 sps:$4 sm:$0xff]  }
 0x25d   :  { %v8441_v34 = vld [vmem:[%s11338_s1 + $0xec4] ss:$52 sps:$4 sm:$0xff]  }
 0x25f   :  { %5903 = vmatpush1.bf16.msra.mxu0 %v8361_v35  ;;  %6067 = vmatpush1.bf16.msra.mxu1 %v8364_v36  ;;  %v8444_v35 = vld [vmem:[%s11338_s1 + $0xecc] ss:$52 sps:$4 sm:$0xff]  }
 0x260   :  { %5904 = vmatprep.subr.bf16.mxu0 %v8369_v37  ;;  %6068 = vmatprep.subr.bf16.mxu1 %v8372_v39  ;;  %v8439_v36 = vld [vmem:[%s11338_s1 + $0xec0] ss:$52 sps:$4 sm:$0xff]   ;;  %v8442_v37 = vld [vmem:[%s11338_s1 + $0xec8] ss:$52 sps:$4 sm:$0xff]  }
 0x261   :  { %v8447_v39 = vld [vmem:[%s11338_s1 + $0xf2c] ss:$52 sps:$4 sm:$0xff]  }
 0x263   :  { %5905 = vmatpush1.bf16.msra.mxu0 %v8367_v40  ;;  %6069 = vmatpush1.bf16.msra.mxu1 %v8370_v41  ;;  %v8450_v40 = vld [vmem:[%s11338_s1 + $0xf34] ss:$52 sps:$4 sm:$0xff]  }
 0x264   :  { %5906 = vmatprep.subr.bf16.mxu0 %v8375_v42  ;;  %6070 = vmatprep.subr.bf16.mxu1 %v8378_v44  ;;  %v8445_v41 = vld [vmem:[%s11338_s1 + $0xf28] ss:$52 sps:$4 sm:$0xff]   ;;  %v8448_v42 = vld [vmem:[%s11338_s1 + $0xf30] ss:$52 sps:$4 sm:$0xff]  }
 0x265   :  { %v8453_v44 = vld [vmem:[%s11338_s1 + $0xf94] ss:$52 sps:$4 sm:$0xff]  }
 0x267   :  { %5907 = vmatpush1.bf16.msra.mxu0 %v8373_v45  ;;  %6071 = vmatpush1.bf16.msra.mxu1 %v8376_v46  ;;  %v8456_v45 = vld [vmem:[%s11338_s1 + $0xf9c] ss:$52 sps:$4 sm:$0xff]  }
 0x268   :  { %5908 = vmatprep.subr.bf16.mxu0 %v8381_v47  ;;  %6072 = vmatprep.subr.bf16.mxu1 %v8384_v48  ;;  %v8451_v46 = vld [vmem:[%s11338_s1 + $0xf90] ss:$52 sps:$4 sm:$0xff]   ;;  %v8454_v47 = vld [vmem:[%s11338_s1 + $0xf98] ss:$52 sps:$4 sm:$0xff]  }
 0x269   :  { %v8459_v48 = vld [vmem:[%s11338_s1 + $0xffc] ss:$52 sps:$4 sm:$0xff]  }
 0x26b   :  { %5909 = vmatpush1.bf16.msra.mxu0 %v8379_v50  ;;  %6073 = vmatpush1.bf16.msra.mxu1 %v8382_v51  ;;  %v8462_v50 = vld [vmem:[%s11338_s1 + $0x1004] ss:$52 sps:$4 sm:$0xff]  }
 0x26c   :  { %5910 = vmatprep.subr.bf16.mxu0 %v8387_v53  ;;  %6074 = vmatprep.subr.bf16.mxu1 %v8390_v54  ;;  %v8457_v51 = vld [vmem:[%s11338_s1 + $0xff8] ss:$52 sps:$4 sm:$0xff]   ;;  %v8460_v53 = vld [vmem:[%s11338_s1 + $0x1000] ss:$52 sps:$4 sm:$0xff]  }
 0x26d   :  { %v8465_v54 = vld [vmem:[%s11338_s1 + $0x1064] ss:$52 sps:$4 sm:$0xff]  }
 0x26f   :  { %5911 = vmatpush1.bf16.msra.mxu0 %v8385_v55  ;;  %6075 = vmatpush1.bf16.msra.mxu1 %v8388_v56  ;;  %v8468_v55 = vld [vmem:[%s11338_s1 + $0x106c] ss:$52 sps:$4 sm:$0xff]  }
 0x270   :  { %5912 = vmatprep.subr.bf16.mxu0 %v8393_v57  ;;  %6076 = vmatprep.subr.bf16.mxu1 %v8396_v58  ;;  %v8463_v56 = vld [vmem:[%s11338_s1 + $0x1060] ss:$52 sps:$4 sm:$0xff]   ;;  %v8466_v57 = vld [vmem:[%s11338_s1 + $0x1068] ss:$52 sps:$4 sm:$0xff]  }
 0x271   :  { %v8471_v58 = vld [vmem:[%s11338_s1 + $0x10cc] ss:$52 sps:$4 sm:$0xff]  }
 0x273   :  { %5913 = vmatpush1.bf16.msra.mxu0 %v8391_v59  ;;  %6077 = vmatpush1.bf16.msra.mxu1 %v8394_v61  ;;  %v8474_v59 = vld [vmem:[%s11338_s1 + $0x10d4] ss:$52 sps:$4 sm:$0xff]  }
 0x274   :  { %5914 = vmatprep.subr.bf16.mxu0 %v8399_v62  ;;  %6078 = vmatprep.subr.bf16.mxu1 %v8402_v63  ;;  %v8469_v61 = vld [vmem:[%s11338_s1 + $0x10c8] ss:$52 sps:$4 sm:$0xff]   ;;  %v8472_v62 = vld [vmem:[%s11338_s1 + $0x10d0] ss:$52 sps:$4 sm:$0xff]  }
 0x275   :  { %v8477_v63 = vld [vmem:[%s11338_s1 + $0x1134] ss:$52 sps:$4 sm:$0xff]  }
 0x277   :  { %5915 = vmatpush1.bf16.msra.mxu0 %v8397_v0  ;;  %6079 = vmatpush1.bf16.msra.mxu1 %v8400_v1  ;;  %v8480_v0 = vld [vmem:[%s11338_s1 + $0x113c] ss:$52 sps:$4 sm:$0xff]  }
 0x278   :  { %5916 = vmatprep.subr.bf16.mxu0 %v8405_v2  ;;  %6080 = vmatprep.subr.bf16.mxu1 %v8408_v3  ;;  %v8475_v1 = vld [vmem:[%s11338_s1 + $0x1130] ss:$52 sps:$4 sm:$0xff]   ;;  %v8478_v2 = vld [vmem:[%s11338_s1 + $0x1138] ss:$52 sps:$4 sm:$0xff]  }
 0x279   :  { %v8483_v3 = vld [vmem:[%s11338_s1 + $0x119c] ss:$52 sps:$4 sm:$0xff]  }
 0x27b   :  { %5917 = vmatpush1.bf16.msra.mxu0 %v8403_v4  ;;  %6081 = vmatpush1.bf16.msra.mxu1 %v8406_v5  ;;  %v8486_v4 = vld [vmem:[%s11338_s1 + $0x11a4] ss:$52 sps:$4 sm:$0xff]  }
 0x27c   :  { %5918 = vmatprep.subr.bf16.mxu0 %v8411_v6  ;;  %6082 = vmatprep.subr.bf16.mxu1 %v8414_v7  ;;  %v8481_v5 = vld [vmem:[%s11338_s1 + $0x1198] ss:$52 sps:$4 sm:$0xff]   ;;  %v8484_v6 = vld [vmem:[%s11338_s1 + $0x11a0] ss:$52 sps:$4 sm:$0xff]  }
 0x27d   :  { %v8489_v7 = vld [vmem:[%s11338_s1 + $0x1204] ss:$52 sps:$4 sm:$0xff]  }
 0x27f   :  { %5919 = vmatpush1.bf16.msra.mxu0 %v8409_v8  ;;  %6083 = vmatpush1.bf16.msra.mxu1 %v8412_v9  ;;  %v8492_v8 = vld [vmem:[%s11338_s1 + $0x120c] ss:$52 sps:$4 sm:$0xff]  }
 0x280   :  { %5929 = vmatprep.subr.bf16.mxu0 %v8417_v10  ;;  %6093 = vmatprep.subr.bf16.mxu1 %v8420_v11  ;;  %v8487_v9 = vld [vmem:[%s11338_s1 + $0x1200] ss:$52 sps:$4 sm:$0xff]   ;;  %v8490_v10 = vld [vmem:[%s11338_s1 + $0x1208] ss:$52 sps:$4 sm:$0xff]  }
 0x281   :  { %v8495_v11 = vld [vmem:[%s11338_s1 + $0x126c] ss:$52 sps:$4 sm:$0xff]  }
 0x282   :  { %5921 = vmatmul.mubr.bf16.vlgmr.msra.gmra.mrb[8].mxu0 %v9141_v23  ;;  %6085 = vmatmul.mubr.bf16.vlgmr.msra.gmra.mrb[8].mxu1 %v9141_v23 }
 0x283   :  { %5930 = vmatpush1.bf16.msra.mxu0 %v8415_v12  ;;  %6094 = vmatpush1.bf16.msra.mxu1 %v8418_v16  ;;  %v8498_v12 = vld [vmem:[%s11338_s1 + $0x1274] ss:$52 sps:$4 sm:$0xff]  }
 0x284   :  { %5931 = vmatprep.subr.bf16.mxu0 %v8423_v18  ;;  %6095 = vmatprep.subr.bf16.mxu1 %v8426_v20  ;;  %v8493_v16 = vld [vmem:[%s11338_s1 + $0x1268] ss:$52 sps:$4 sm:$0xff]   ;;  %v8496_v18 = vld [vmem:[%s11338_s1 + $0x1270] ss:$52 sps:$4 sm:$0xff]  }
 0x285   :  { %5961 = vmatprep.mubr.bf16.mxu0 %v9153_v27  ;;  %6125 = vmatprep.mubr.bf16.mxu1 %v9153_v27  ;;  %v8501_v20 = vld [vmem:[%s11338_s1 + $0x12d4] ss:$52 sps:$4 sm:$0xff]  }
 0x287   :  { %5932 = vmatpush1.bf16.msra.mxu0 %v8421_v21  ;;  %6096 = vmatpush1.bf16.msra.mxu1 %v8424_v22  ;;  %v8504_v21 = vld [vmem:[%s11338_s1 + $0x12dc] ss:$52 sps:$4 sm:$0xff]  }
 0x288   :  { %5933 = vmatprep.subr.bf16.mxu0 %v8429_v24  ;;  %6097 = vmatprep.subr.bf16.mxu1 %v8432_v25  ;;  %v8499_v22 = vld [vmem:[%s11338_s1 + $0x12d0] ss:$52 sps:$4 sm:$0xff]   ;;  %v8502_v24 = vld [vmem:[%s11338_s1 + $0x12d8] ss:$52 sps:$4 sm:$0xff]  }
 0x289   :  { %v8507_v25 = vld [vmem:[%s11338_s1 + $0x133c] ss:$52 sps:$4 sm:$0xff]  }
 0x28b   :  { %5934 = vmatpush1.bf16.msra.mxu0 %v8427_v26  ;;  %6098 = vmatpush1.bf16.msra.mxu1 %v8430_v28  ;;  %v8510_v26 = vld [vmem:[%s11338_s1 + $0x1344] ss:$52 sps:$4 sm:$0xff]  }
 0x28c   :  { %5935 = vmatprep.subr.bf16.mxu0 %v8435_v29  ;;  %6099 = vmatprep.subr.bf16.mxu1 %v8438_v30  ;;  %v8505_v28 = vld [vmem:[%s11338_s1 + $0x1338] ss:$52 sps:$4 sm:$0xff]   ;;  %v8508_v29 = vld [vmem:[%s11338_s1 + $0x1340] ss:$52 sps:$4 sm:$0xff]  }
 0x28d   :  { %v8513_v30 = vld [vmem:[%s11338_s1 + $0x13a4] ss:$52 sps:$4 sm:$0xff]  }
 0x28f   :  { %5936 = vmatpush1.bf16.msra.mxu0 %v8433_v31  ;;  %6100 = vmatpush1.bf16.msra.mxu1 %v8436_v32  ;;  %v8516_v31 = vld [vmem:[%s11338_s1 + $0x13ac] ss:$52 sps:$4 sm:$0xff]  }
 0x290   :  { %5937 = vmatprep.subr.bf16.mxu0 %v8441_v34  ;;  %6101 = vmatprep.subr.bf16.mxu1 %v8444_v35  ;;  %v8511_v32 = vld [vmem:[%s11338_s1 + $0x13a0] ss:$52 sps:$4 sm:$0xff]   ;;  %v8514_v34 = vld [vmem:[%s11338_s1 + $0x13a8] ss:$52 sps:$4 sm:$0xff]  }
 0x291   :  { %v8519_v35 = vld [vmem:[%s11338_s1 + $0x140c] ss:$52 sps:$4 sm:$0xff]  }
 0x293   :  { %5938 = vmatpush1.bf16.msra.mxu0 %v8439_v36  ;;  %6102 = vmatpush1.bf16.msra.mxu1 %v8442_v37  ;;  %v8522_v36 = vld [vmem:[%s11338_s1 + $0x1414] ss:$52 sps:$4 sm:$0xff]  }
 0x294   :  { %5939 = vmatprep.subr.bf16.mxu0 %v8447_v39  ;;  %6103 = vmatprep.subr.bf16.mxu1 %v8450_v40  ;;  %v8517_v37 = vld [vmem:[%s11338_s1 + $0x1408] ss:$52 sps:$4 sm:$0xff]   ;;  %v8520_v39 = vld [vmem:[%s11338_s1 + $0x1410] ss:$52 sps:$4 sm:$0xff]  }
 0x295   :  { %v8525_v40 = vld [vmem:[%s11338_s1 + $0x1474] ss:$52 sps:$4 sm:$0xff]  }
 0x297   :  { %5940 = vmatpush1.bf16.msra.mxu0 %v8445_v41  ;;  %6104 = vmatpush1.bf16.msra.mxu1 %v8448_v42  ;;  %v8528_v41 = vld [vmem:[%s11338_s1 + $0x147c] ss:$52 sps:$4 sm:$0xff]  }
 0x298   :  { %5941 = vmatprep.subr.bf16.mxu0 %v8453_v44  ;;  %6105 = vmatprep.subr.bf16.mxu1 %v8456_v45  ;;  %v8523_v42 = vld [vmem:[%s11338_s1 + $0x1470] ss:$52 sps:$4 sm:$0xff]   ;;  %v8526_v44 = vld [vmem:[%s11338_s1 + $0x1478] ss:$52 sps:$4 sm:$0xff]  }
 0x299   :  { %v8531_v45 = vld [vmem:[%s11338_s1 + $0x14dc] ss:$52 sps:$4 sm:$0xff]  }
 0x29b   :  { %5942 = vmatpush1.bf16.msra.mxu0 %v8451_v46  ;;  %6106 = vmatpush1.bf16.msra.mxu1 %v8454_v47  ;;  %v8534_v46 = vld [vmem:[%s11338_s1 + $0x14e4] ss:$52 sps:$4 sm:$0xff]  }
 0x29c   :  { %5943 = vmatprep.subr.bf16.mxu0 %v8459_v48  ;;  %6107 = vmatprep.subr.bf16.mxu1 %v8462_v50  ;;  %v8529_v47 = vld [vmem:[%s11338_s1 + $0x14d8] ss:$52 sps:$4 sm:$0xff]   ;;  %v8532_v48 = vld [vmem:[%s11338_s1 + $0x14e0] ss:$52 sps:$4 sm:$0xff]  }
 0x29d   :  { %v8537_v50 = vld [vmem:[%s11338_s1 + $0x1544] ss:$52 sps:$4 sm:$0xff]  }
 0x29f   :  { %5944 = vmatpush1.bf16.msra.mxu0 %v8457_v51  ;;  %6108 = vmatpush1.bf16.msra.mxu1 %v8460_v53  ;;  %v8540_v51 = vld [vmem:[%s11338_s1 + $0x154c] ss:$52 sps:$4 sm:$0xff]  }
 0x2a0   :  { %5945 = vmatprep.subr.bf16.mxu0 %v8465_v54  ;;  %6109 = vmatprep.subr.bf16.mxu1 %v8468_v55  ;;  %v8535_v53 = vld [vmem:[%s11338_s1 + $0x1540] ss:$52 sps:$4 sm:$0xff]   ;;  %v8538_v54 = vld [vmem:[%s11338_s1 + $0x1548] ss:$52 sps:$4 sm:$0xff]  }
 0x2a1   :  { %v8543_v55 = vld [vmem:[%s11338_s1 + $0x15ac] ss:$52 sps:$4 sm:$0xff]  }
 0x2a3   :  { %5946 = vmatpush1.bf16.msra.mxu0 %v8463_v56  ;;  %6110 = vmatpush1.bf16.msra.mxu1 %v8466_v57  ;;  %v8546_v56 = vld [vmem:[%s11338_s1 + $0x15b4] ss:$52 sps:$4 sm:$0xff]  }
 0x2a4   :  { %5947 = vmatprep.subr.bf16.mxu0 %v8471_v58  ;;  %6111 = vmatprep.subr.bf16.mxu1 %v8474_v59  ;;  %v8541_v57 = vld [vmem:[%s11338_s1 + $0x15a8] ss:$52 sps:$4 sm:$0xff]   ;;  %v8544_v58 = vld [vmem:[%s11338_s1 + $0x15b0] ss:$52 sps:$4 sm:$0xff]  }
 0x2a5   :  { %v8549_v59 = vld [vmem:[%s11338_s1 + $0x1614] ss:$52 sps:$4 sm:$0xff]  }
 0x2a7   :  { %5948 = vmatpush1.bf16.msra.mxu0 %v8469_v61  ;;  %6112 = vmatpush1.bf16.msra.mxu1 %v8472_v62  ;;  %v8552_v61 = vld [vmem:[%s11338_s1 + $0x161c] ss:$52 sps:$4 sm:$0xff]  }
 0x2a8   :  { %5949 = vmatprep.subr.bf16.mxu0 %v8477_v63  ;;  %6113 = vmatprep.subr.bf16.mxu1 %v8480_v0 }
 0x2ab   :  { %5950 = vmatpush1.bf16.msra.mxu0 %v8475_v1  ;;  %6114 = vmatpush1.bf16.msra.mxu1 %v8478_v2 }
 0x2ac   :  { %5951 = vmatprep.subr.bf16.mxu0 %v8483_v3  ;;  %6115 = vmatprep.subr.bf16.mxu1 %v8486_v4  ;;  %v8547_v4 = vld [vmem:[%s11338_s1 + $0x1610] ss:$52 sps:$4 sm:$0xff]  }
 0x2af   :  { %5952 = vmatpush1.bf16.msra.mxu0 %v8481_v5  ;;  %6116 = vmatpush1.bf16.msra.mxu1 %v8484_v6  ;;  %v8550_v5 = vld [vmem:[%s11338_s1 + $0x1618] ss:$52 sps:$4 sm:$0xff]  }
 0x2b0   :  { %5953 = vmatprep.subr.bf16.mxu0 %v8489_v7  ;;  %6117 = vmatprep.subr.bf16.mxu1 %v8492_v8  ;;  %v8555_v8 = vld [vmem:[%s11338_s1 + $0x167c] ss:$52 sps:$4 sm:$0xff]  }
 0x2b3   :  { %5954 = vmatpush1.bf16.msra.mxu0 %v8487_v9  ;;  %6118 = vmatpush1.bf16.msra.mxu1 %v8490_v10  ;;  %v8558_v9 = vld [vmem:[%s11338_s1 + $0x1684] ss:$52 sps:$4 sm:$0xff]  }
 0x2b4   :  { %5955 = vmatprep.subr.bf16.mxu0 %v8495_v11  ;;  %6119 = vmatprep.subr.bf16.mxu1 %v8498_v12  ;;  %v8553_v10 = vld [vmem:[%s11338_s1 + $0x1678] ss:$52 sps:$4 sm:$0xff]   ;;  %v8556_v11 = vld [vmem:[%s11338_s1 + $0x1680] ss:$52 sps:$4 sm:$0xff]  }
 0x2b5   :  { %v8561_v12 = vld [vmem:[%s11338_s1 + $0x16e4] ss:$52 sps:$4 sm:$0xff]  }
 0x2b7   :  { %5956 = vmatpush1.bf16.msra.mxu0 %v8493_v16  ;;  %6120 = vmatpush1.bf16.msra.mxu1 %v8496_v18  ;;  %v8564_v16 = vld [vmem:[%s11338_s1 + $0x16ec] ss:$52 sps:$4 sm:$0xff]  }
 0x2b8   :  { %5957 = vmatprep.subr.bf16.mxu0 %v8501_v20  ;;  %6121 = vmatprep.subr.bf16.mxu1 %v8504_v21  ;;  %v8559_v18 = vld [vmem:[%s11338_s1 + $0x16e0] ss:$52 sps:$4 sm:$0xff]   ;;  %v8562_v20 = vld [vmem:[%s11338_s1 + $0x16e8] ss:$52 sps:$4 sm:$0xff]  }
 0x2bb   :  { %5958 = vmatpush1.bf16.msra.mxu0 %v8499_v22  ;;  %6122 = vmatpush1.bf16.msra.mxu1 %v8502_v24  ;;  %v8567_v22 = vld [vmem:[%s11338_s1 + $0x174c] ss:$52 sps:$4 sm:$0xff]   ;;  %v8570_v24 = vld [vmem:[%s11338_s1 + $0x1754] ss:$52 sps:$4 sm:$0xff]  }
 0x2bc   :  { %5959 = vmatprep.subr.bf16.mxu0 %v8507_v25  ;;  %6123 = vmatprep.subr.bf16.mxu1 %v8510_v26 }
 0x2bf   :  { %5960 = vmatpush1.bf16.msra.mxu0 %v8505_v28  ;;  %6124 = vmatpush1.bf16.msra.mxu1 %v8508_v29 }
 0x2c0   :  { %5970 = vmatprep.subr.bf16.mxu0 %v8513_v30  ;;  %6134 = vmatprep.subr.bf16.mxu1 %v8516_v31  ;;  %v8565_v30 = vld [vmem:[%s11338_s1 + $0x1748] ss:$52 sps:$4 sm:$0xff]   ;;  %v8568_v31 = vld [vmem:[%s11338_s1 + $0x1750] ss:$52 sps:$4 sm:$0xff]  }
 0x2c2   :  { %5962 = vmatmul.mubr.bf16.vlgmr.msra.gmra.mrb[8].mxu0 %v9344_v33  ;;  %6126 = vmatmul.mubr.bf16.vlgmr.msra.gmra.mrb[8].mxu1 %v9344_v33 }
 0x2c3   :  { %5971 = vmatpush1.bf16.msra.mxu0 %v8511_v32  ;;  %6135 = vmatpush1.bf16.msra.mxu1 %v8514_v34  ;;  %v8573_v34 = vld [vmem:[%s11338_s1 + $0x17b4] ss:$52 sps:$4 sm:$0xff]  }
 0x2c4   :  { %5972 = vmatprep.subr.bf16.mxu0 %v8519_v35  ;;  %6136 = vmatprep.subr.bf16.mxu1 %v8522_v36  ;;  %v8576_v35 = vld [vmem:[%s11338_s1 + $0x17bc] ss:$52 sps:$4 sm:$0xff]  }
 0x2c5   :  { %6002 = vmatprep.mubr.bf16.mxu0 %v9357_v15  ;;  %6166 = vmatprep.mubr.bf16.mxu1 %v9357_v15 }
 0x2c7   :  { %5973 = vmatpush1.bf16.msra.mxu0 %v8517_v37  ;;  %6137 = vmatpush1.bf16.msra.mxu1 %v8520_v39  ;;  %v8571_v39 = vld [vmem:[%s11338_s1 + $0x17b0] ss:$52 sps:$4 sm:$0xff]  }
 0x2c8   :  { %5974 = vmatprep.subr.bf16.mxu0 %v8525_v40  ;;  %6138 = vmatprep.subr.bf16.mxu1 %v8528_v41  ;;  %v8574_v40 = vld [vmem:[%s11338_s1 + $0x17b8] ss:$52 sps:$4 sm:$0xff]  }
 0x2cb   :  { %5975 = vmatpush1.bf16.msra.mxu0 %v8523_v42  ;;  %6139 = vmatpush1.bf16.msra.mxu1 %v8526_v44  ;;  %v8579_v42 = vld [vmem:[%s11338_s1 + $0x181c] ss:$52 sps:$4 sm:$0xff]   ;;  %v8582_v44 = vld [vmem:[%s11338_s1 + $0x1824] ss:$52 sps:$4 sm:$0xff]  }
 0x2cc   :  { %5976 = vmatprep.subr.bf16.mxu0 %v8531_v45  ;;  %6140 = vmatprep.subr.bf16.mxu1 %v8534_v46  ;;  %v6401_v45 = vrot.slane %v6393_v19, %v8846_v49  ;;  %v8583_v19 = vld [vmem:[%s11338_s1 + $0x1880] ss:$52 sps:$4 sm:$0xff]  }
 0x2cf   :  { %5977 = vmatpush1.bf16.msra.mxu0 %v8529_v47  ;;  %6141 = vmatpush1.bf16.msra.mxu1 %v8532_v48  ;;  %v8577_v47 = vld [vmem:[%s11338_s1 + $0x1818] ss:$52 sps:$4 sm:$0xff]   ;;  %v8580_v48 = vld [vmem:[%s11338_s1 + $0x1820] ss:$52 sps:$4 sm:$0xff]  }
 0x2d0   :  { %5978 = vmatprep.subr.bf16.mxu0 %v8537_v50  ;;  %6142 = vmatprep.subr.bf16.mxu1 %v8540_v51  ;;  %v8586_v51 = vld [vmem:[%s11338_s1 + $0x1888] ss:$52 sps:$4 sm:$0xff]  }
 0x2d3   :  { %5979 = vmatpush1.bf16.msra.mxu0 %v8535_v53  ;;  %6143 = vmatpush1.bf16.msra.mxu1 %v8538_v54  ;;  %v8591_v53 = vld [vmem:[%s11338_s1 + $0x18ec] ss:$52 sps:$4 sm:$0xff]   ;;  %v8594_v54 = vld [vmem:[%s11338_s1 + $0x18f4] ss:$52 sps:$4 sm:$0xff]  }
 0x2d4   :  { %5980 = vmatprep.subr.bf16.mxu0 %v8543_v55  ;;  %6144 = vmatprep.subr.bf16.mxu1 %v8546_v56  ;;  %v8589_v55 = vld [vmem:[%s11338_s1 + $0x18e8] ss:$52 sps:$4 sm:$0xff]   ;;  %v8592_v56 = vld [vmem:[%s11338_s1 + $0x18f0] ss:$52 sps:$4 sm:$0xff]  }
 0x2d5   :  { %v5676_v62 = vpop.f32.mrb[4].mxu0  ;;  %v5840_v63 = vpop.f32.mrb[4].mxu1 }
 0x2d6   :  { %8679 = vtanh.f32 %v5676_v62  ;;  %v5678_v0 = vpop.f32.mrb[5].mxu0  ;;  %v5842_v1 = vpop.f32.mrb[5].mxu1  ;;  %v8603_v62 = vld [vmem:[%s11338_s1 + $0x19bc] ss:$52 sps:$4 sm:$0xff]  }
 0x2d7   :  { %8681 = vtanh.f32 %v5840_v63  ;;  %v5680_v2 = vpop.f32.mrb[6].mxu0  ;;  %v5844_v3 = vpop.f32.mrb[6].mxu1  ;;  %5981 = vmatpush1.bf16.msra.mxu0 %v8541_v57  ;;  %6145 = vmatpush1.bf16.msra.mxu1 %v8544_v58  ;;  %v8597_v57 = vld [vmem:[%s11338_s1 + $0x1954] ss:$52 sps:$4 sm:$0xff]   ;;  %v8600_v58 = vld [vmem:[%s11338_s1 + $0x195c] ss:$52 sps:$4 sm:$0xff]  }
 0x2d8   :  { %8683 = vtanh.f32 %v5678_v0  ;;  %v5681_v6 = vpop.f32.mrb[7].mxu0  ;;  %v5845_v7 = vpop.f32.mrb[7].mxu1  ;;  %5982 = vmatprep.subr.bf16.mxu0 %v8549_v59  ;;  %6146 = vmatprep.subr.bf16.mxu1 %v8552_v61  ;;  %v8595_v59 = vld [vmem:[%s11338_s1 + $0x1950] ss:$52 sps:$4 sm:$0xff]   ;;  %v8598_v61 = vld [vmem:[%s11338_s1 + $0x1958] ss:$52 sps:$4 sm:$0xff]  }
 0x2d9   :  { %8685 = vtanh.f32 %v5842_v1  ;;  %v8606_v63 = vld [vmem:[%s11338_s1 + $0x19c4] ss:$52 sps:$4 sm:$0xff]   ;;  %v8604_v1 = vld [vmem:[%s11338_s1 + $0x19c0] ss:$52 sps:$4 sm:$0xff]  }
 0x2da   :  { %v8601_v0 = vld [vmem:[%s11338_s1 + $0x19b8] ss:$52 sps:$4 sm:$0xff]   ;;  %v8607_v2 = vld [vmem:[%s11338_s1 + $0x370] ss:$52 sps:$4 sm:$0xff]  }
 0x2db   :  { %5983 = vmatpush1.bf16.msra.mxu0 %v8547_v4  ;;  %6147 = vmatpush1.bf16.msra.mxu1 %v8550_v5  ;;  %v8608_v3 = vld [vmem:[%s11338_s1 + $0x9f0] ss:$52 sps:$4 sm:$0xff]   ;;  %v8611_v6 = vld [vmem:[%s11338_s1 + $0x3d8] ss:$52 sps:$4 sm:$0xff]  }
 0x2dc   :  { %5984 = vmatprep.subr.bf16.mxu0 %v8555_v8  ;;  %6148 = vmatprep.subr.bf16.mxu1 %v8558_v9  ;;  %v8609_v4 = vld [vmem:[%s11338_s1 + $0x30] ss:$52 sps:$4 sm:$0xff]   ;;  %v8612_v7 = vld [vmem:[%s11338_s1 + $0xa58] ss:$52 sps:$4 sm:$0xff]  }
 0x2dd   :  { %v8610_v5 = vld [vmem:[%s11338_s1 + $0x6b0] ss:$52 sps:$4 sm:$0xff]   ;;  %v8613_v8 = vld [vmem:[%s11338_s1 + $0x98] ss:$52 sps:$4 sm:$0xff]  }
 0x2de   :  { %v8614_v9 = vld [vmem:[%s11338_s1 + $0x718] ss:$52 sps:$4 sm:$0xff]  }
 0x2df   :  { %5985 = vmatpush1.bf16.msra.mxu0 %v8553_v10  ;;  %6149 = vmatpush1.bf16.msra.mxu1 %v8556_v11  ;;  %v8615_v10 = vld [vmem:[%s11338_s1 + $0x440] ss:$52 sps:$4 sm:$0xff]  }
 0x2e0   :  { %v8680_v21 = vpop.eup %8679  ;;  %5986 = vmatprep.subr.bf16.mxu0 %v8561_v12  ;;  %6150 = vmatprep.subr.bf16.mxu1 %v8564_v16  ;;  %v8616_v11 = vld [vmem:[%s11338_s1 + $0xac0] ss:$52 sps:$4 sm:$0xff]  }
 0x2e1   :  { %v8682_v25 = vpop.eup %8681  ;;  %v8617_v12 = vld [vmem:[%s11338_s1 + $0x100] ss:$52 sps:$4 sm:$0xff]  }
 0x2e2   :  { %v8684_v26 = vpop.eup %8683  ;;  %v8618_v16 = vld [vmem:[%s11338_s1 + $0x780] ss:$52 sps:$4 sm:$0xff]  }
 0x2e3   :  { %v8686_v28 = vpop.eup %8685  ;;  %v6363_v29 = vcombine.low %v8680_v21, %v8684_v26  ;;  %5987 = vmatpush1.bf16.msra.mxu0 %v8559_v18  ;;  %6151 = vmatpush1.bf16.msra.mxu1 %v8562_v20  ;;  %v8619_v18 = vld [vmem:[%s11338_s1 + $0x4a8] ss:$52 sps:$4 sm:$0xff]   ;;  %v8623_v21 = vld [vmem:[%s11338_s1 + $0x510] ss:$52 sps:$4 sm:$0xff]   ;;  %v8627_v26 = vld [vmem:[%s11338_s1 + $0x578] ss:$52 sps:$4 sm:$0xff]  }
 0x2e4   :  { %v6364_v32 = vcombine.low %v8682_v25, %v8686_v28  ;;  %5988 = vmatprep.subr.bf16.mxu0 %v8567_v22  ;;  %6152 = vmatprep.subr.bf16.mxu1 %v8570_v24  ;;  %v8622_v20 = vld [vmem:[%s11338_s1 + $0x7e8] ss:$52 sps:$4 sm:$0xff]   ;;  %v8624_v22 = vld [vmem:[%s11338_s1 + $0xb90] ss:$52 sps:$4 sm:$0xff]   ;;  %v8628_v28 = vld [vmem:[%s11338_s1 + $0xbf8] ss:$52 sps:$4 sm:$0xff]  }
 0x2e5   :  { %v6385_v36 = vrot.slane %v6363_v29, %v8846_v49  ;;  %v8625_v24 = vld [vmem:[%s11338_s1 + $0x1d0] ss:$52 sps:$4 sm:$0xff]   ;;  %v8629_v29 = vld [vmem:[%s11338_s1 + $0x238] ss:$52 sps:$4 sm:$0xff]  }
 0x2e6   :  { %v6392_v37 = vrot.slane %v6364_v32, %v8846_v49  ;;  %v8626_v25 = vld [vmem:[%s11338_s1 + $0x850] ss:$52 sps:$4 sm:$0xff]   ;;  %v8632_v32 = vld [vmem:[%s11338_s1 + $0xc60] ss:$52 sps:$4 sm:$0xff]  }
 0x2e7   :  { %5989 = vmatpush1.bf16.msra.mxu0 %v8565_v30  ;;  %6153 = vmatpush1.bf16.msra.mxu1 %v8568_v31  ;;  %v8630_v30 = vld [vmem:[%s11338_s1 + $0x8b8] ss:$52 sps:$4 sm:$0xff]   ;;  %v8631_v31 = vld [vmem:[%s11338_s1 + $0x5e0] ss:$52 sps:$4 sm:$0xff]  }
 0x2e8   :  { %v6394_v41 = vcombine.low %v6385_v36, %v6392_v37  ;;  %5990 = vmatprep.subr.bf16.mxu0 %v8573_v34  ;;  %6154 = vmatprep.subr.bf16.mxu1 %v8576_v35  ;;  %v8633_v34 = vld [vmem:[%s11338_s1 + $0x2a0] ss:$52 sps:$4 sm:$0xff]   ;;  %v8635_v36 = vld [vmem:[%s11338_s1 + $0x648] ss:$52 sps:$4 sm:$0xff]  }
 0x2e9   :  { %v8634_v35 = vld [vmem:[%s11338_s1 + $0x920] ss:$52 sps:$4 sm:$0xff]   ;;  %v8636_v37 = vld [vmem:[%s11338_s1 + $0xcc8] ss:$52 sps:$4 sm:$0xff]  }
 0x2ea   :  { %v6408_v46 = vrot.slane %v6394_v41, %v8846_v49  ;;  %v8639_v41 = vld [vmem:[%s11338_s1 + $0x1070] ss:$52 sps:$4 sm:$0xff]  }
 0x2eb   :  { %5991 = vmatpush1.bf16.msra.mxu0 %v8571_v39  ;;  %6155 = vmatpush1.bf16.msra.mxu1 %v8574_v40  ;;  %v8637_v39 = vld [vmem:[%s11338_s1 + $0x308] ss:$52 sps:$4 sm:$0xff]  }
 0x2ec   :  { %v6409_v50 = vcombine.low %v6401_v45, %v6408_v46  ;;  %5992 = vmatprep.subr.bf16.mxu0 %v8579_v42  ;;  %6156 = vmatprep.subr.bf16.mxu1 %v8582_v44  ;;  %v8638_v40 = vld [vmem:[%s11338_s1 + $0x988] ss:$52 sps:$4 sm:$0xff]   ;;  %v8640_v42 = vld [vmem:[%s11338_s1 + $0x16f0] ss:$52 sps:$4 sm:$0xff]   ;;  %v8643_v46 = vld [vmem:[%s11338_s1 + $0x10d8] ss:$52 sps:$4 sm:$0xff]  }
 0x2ed   :  { %v8641_v44 = vld [vmem:[%s11338_s1 + $0xd30] ss:$52 sps:$4 sm:$0xff]  }
 0x2ee   :  { %6451 = vst [vmem:[%s11340_s2] sm:$0xff] %v6409_v50  ;;  %v8642_v45 = vld [vmem:[%s11338_s1 + $0x13b0] ss:$52 sps:$4 sm:$0xff]   ;;  %v8646_v50 = vld [vmem:[%s11338_s1 + $0x1418] ss:$52 sps:$4 sm:$0xff]  }
 0x2ef   :  { %5993 = vmatpush1.bf16.msra.mxu0 %v8577_v47  ;;  %6157 = vmatpush1.bf16.msra.mxu1 %v8580_v48  ;;  %v8644_v47 = vld [vmem:[%s11338_s1 + $0x1758] ss:$52 sps:$4 sm:$0xff]  }
 0x2f0   :  { %5994 = vmatprep.subr.bf16.mxu0 %v8585_v14  ;;  %6158 = vmatprep.subr.bf16.mxu1 %v8588_v52  ;;  %v8645_v48 = vld [vmem:[%s11338_s1 + $0xd98] ss:$52 sps:$4 sm:$0xff]   ;;  %v8647_v14 = vld [vmem:[%s11338_s1 + $0x1140] ss:$52 sps:$4 sm:$0xff]  }
 0x2f1   :  { %v8650_v52 = vld [vmem:[%s11338_s1 + $0x1480] ss:$52 sps:$4 sm:$0xff]  }
 0x2f3   :  { %5995 = vmatpush1.bf16.msra.mxu0 %v8583_v19  ;;  %6159 = vmatpush1.bf16.msra.mxu1 %v8586_v51  ;;  %v8651_v19 = vld [vmem:[%s11338_s1 + $0x11a8] ss:$52 sps:$4 sm:$0xff]  }
 0x2f4   :  { %5996 = vmatprep.subr.bf16.mxu0 %v8591_v53  ;;  %6160 = vmatprep.subr.bf16.mxu1 %v8594_v54  ;;  %v8654_v51 = vld [vmem:[%s11338_s1 + $0x14e8] ss:$52 sps:$4 sm:$0xff]   ;;  %v8655_v53 = vld [vmem:[%s11338_s1 + $0x1210] ss:$52 sps:$4 sm:$0xff]  }
 0x2f5   :  { %v8656_v54 = vld [vmem:[%s11338_s1 + $0x1890] ss:$52 sps:$4 sm:$0xff]  }
 0x2f7   :  { %5997 = vmatpush1.bf16.msra.mxu0 %v8589_v55  ;;  %6161 = vmatpush1.bf16.msra.mxu1 %v8592_v56  ;;  %v8657_v55 = vld [vmem:[%s11338_s1 + $0xed0] ss:$52 sps:$4 sm:$0xff]  }
 0x2f8   :  { %5998 = vmatprep.subr.bf16.mxu0 %v8597_v57  ;;  %6162 = vmatprep.subr.bf16.mxu1 %v8600_v58  ;;  %v8658_v56 = vld [vmem:[%s11338_s1 + $0x1550] ss:$52 sps:$4 sm:$0xff]   ;;  %v8659_v57 = vld [vmem:[%s11338_s1 + $0x1278] ss:$52 sps:$4 sm:$0xff]  }
 0x2f9   :  { %v8660_v58 = vld [vmem:[%s11338_s1 + $0x18f8] ss:$52 sps:$4 sm:$0xff]  }
 0x2fb   :  { %5999 = vmatpush1.bf16.msra.mxu0 %v8595_v59  ;;  %6163 = vmatpush1.bf16.msra.mxu1 %v8598_v61  ;;  %v8661_v59 = vld [vmem:[%s11338_s1 + $0xf38] ss:$52 sps:$4 sm:$0xff]  }
 0x2fc   :  { %6000 = vmatprep.subr.bf16.mxu0 %v8603_v62  ;;  %6164 = vmatprep.subr.bf16.mxu1 %v8606_v63  ;;  %v8662_v61 = vld [vmem:[%s11338_s1 + $0x15b8] ss:$52 sps:$4 sm:$0xff]   ;;  %v8663_v62 = vld [vmem:[%s11338_s1 + $0x12e0] ss:$52 sps:$4 sm:$0xff]  }
 0x2fd   :  { %v8664_v63 = vld [vmem:[%s11338_s1 + $0x1960] ss:$52 sps:$4 sm:$0xff]  }
 0x2ff   :  { %6001 = vmatpush1.bf16.msra.mxu0 %v8601_v0  ;;  %6165 = vmatpush1.bf16.msra.mxu1 %v8604_v1  ;;  %v8665_v0 = vld [vmem:[%s11338_s1 + $0xfa0] ss:$52 sps:$4 sm:$0xff]  }
 0x300   :  { %7293 = vmatprep.subr.bf16.mxu0 %v8607_v2  ;;  %7315 = vmatprep.subr.bf16.mxu1 %v8608_v3  ;;  %v8666_v1 = vld [vmem:[%s11338_s1 + $0x1620] ss:$52 sps:$4 sm:$0xff]   ;;  %v8667_v2 = vld [vmem:[%s11338_s1 + $0x1348] ss:$52 sps:$4 sm:$0xff]  }
 0x301   :  { %v8668_v3 = vld [vmem:[%s11338_s1 + $0x19c8] ss:$52 sps:$4 sm:$0xff]  }
 0x302   :  { %6003 = vmatmul.mubr.bf16.vlgmr.msra.gmra.mrb[8].mxu0 %v9545_v43  ;;  %6167 = vmatmul.mubr.bf16.vlgmr.msra.gmra.mrb[8].mxu1 %v9545_v43 }
 0x303   :  { %7294 = vmatpush3.bf16.msra.mxu0 %v8609_v4  ;;  %7316 = vmatpush3.bf16.msra.mxu1 %v8610_v5  ;;  %v8669_v4 = vld [vmem:[%s11338_s1 + $0x1008] ss:$52 sps:$4 sm:$0xff]  }
 0x304   :  { %7295 = vmatprep.subr.bf16.mxu0 %v8611_v6  ;;  %7317 = vmatprep.subr.bf16.mxu1 %v8612_v7  ;;  %v8670_v5 = vld [vmem:[%s11338_s1 + $0x1688] ss:$52 sps:$4 sm:$0xff]  }
 0x305   :  { %6207 = vmatprep.mubr.bf16.mxu0 %v8877_v60  ;;  %6247 = vmatprep.mubr.bf16.mxu1 %v8943_v17  ;;  %v8620_v60 = vld [vmem:[%s11338_s1 + $0xb28] ss:$52 sps:$4 sm:$0xff]  }
 0x306   :  { %v8621_v17 = vld [vmem:[%s11338_s1 + $0x168] ss:$52 sps:$4 sm:$0xff]  }
 0x307   :  { %7296 = vmatpush3.bf16.msra.mxu0 %v8613_v8  ;;  %7318 = vmatpush3.bf16.msra.mxu1 %v8614_v9 }
 0x308   :  { %7297 = vmatprep.subr.bf16.mxu0 %v8615_v10  ;;  %7319 = vmatprep.subr.bf16.mxu1 %v8616_v11 }
 0x30b   :  { %7298 = vmatpush3.bf16.msra.mxu0 %v8617_v12  ;;  %7320 = vmatpush3.bf16.msra.mxu1 %v8618_v16 }
 0x30c   :  { %7299 = vmatprep.subr.bf16.mxu0 %v8619_v18  ;;  %7321 = vmatprep.subr.bf16.mxu1 %v8620_v60 }
 0x30f   :  { %7300 = vmatpush3.bf16.msra.mxu0 %v8621_v17  ;;  %7322 = vmatpush3.bf16.msra.mxu1 %v8622_v20 }
 0x310   :  { %7301 = vmatprep.subr.bf16.mxu0 %v8623_v21  ;;  %7323 = vmatprep.subr.bf16.mxu1 %v8624_v22 }
 0x313   :  { %7302 = vmatpush3.bf16.msra.mxu0 %v8625_v24  ;;  %7324 = vmatpush3.bf16.msra.mxu1 %v8626_v25 }
 0x314   :  { %7303 = vmatprep.subr.bf16.mxu0 %v8627_v26  ;;  %7325 = vmatprep.subr.bf16.mxu1 %v8628_v28 }
 0x317   :  { %7304 = vmatpush3.bf16.msra.mxu0 %v8629_v29  ;;  %7326 = vmatpush3.bf16.msra.mxu1 %v8630_v30 }
 0x318   :  { %7305 = vmatprep.subr.bf16.mxu0 %v8631_v31  ;;  %7327 = vmatprep.subr.bf16.mxu1 %v8632_v32 }
 0x31b   :  { %7306 = vmatpush3.bf16.msra.mxu0 %v8633_v34  ;;  %7328 = vmatpush3.bf16.msra.mxu1 %v8634_v35 }
 0x31c   :  { %7307 = vmatprep.subr.bf16.mxu0 %v8635_v36  ;;  %7329 = vmatprep.subr.bf16.mxu1 %v8636_v37 }
 0x31f   :  { %7308 = vmatpush3.bf16.msra.mxu0 %v8637_v39  ;;  %7330 = vmatpush3.bf16.msra.mxu1 %v8638_v40 }
 0x320   :  { %7337 = vmatprep.subr.bf16.mxu0 %v8639_v41  ;;  %7359 = vmatprep.subr.bf16.mxu1 %v8640_v42 }
 0x322   :  { %6208 = vmatmul.mubr.bf16.vlgmr.msra.gmra.mrb[12].mxu0 %v8930_v13  ;;  %6248 = vmatmul.mubr.bf16.vlgmr.msra.gmra.mrb[12].mxu1 %v9141_v23  ;;  %v8648_v13 = vld [vmem:[%s11338_s1 + $0x17c0] ss:$52 sps:$4 sm:$0xff]  }
 0x323   :  { %7338 = vmatpush3.bf16.msra.mxu0 %v8641_v44  ;;  %7360 = vmatpush3.bf16.msra.mxu1 %v8642_v45  ;;  %v8649_v23 = vld [vmem:[%s11338_s1 + $0xe00] ss:$52 sps:$4 sm:$0xff]  }
 0x324   :  { %7339 = vmatprep.subr.bf16.mxu0 %v8643_v46  ;;  %7361 = vmatprep.subr.bf16.mxu1 %v8644_v47 }
 0x325   :  { %6287 = vmatprep.mubr.bf16.mxu0 %v9153_v27  ;;  %6327 = vmatprep.mubr.bf16.mxu1 %v9357_v15  ;;  %v8652_v27 = vld [vmem:[%s11338_s1 + $0x1828] ss:$52 sps:$4 sm:$0xff]  }
 0x326   :  { %v8653_v15 = vld [vmem:[%s11338_s1 + $0xe68] ss:$52 sps:$4 sm:$0xff]  }
 0x327   :  { %7340 = vmatpush3.bf16.msra.mxu0 %v8645_v48  ;;  %7362 = vmatpush3.bf16.msra.mxu1 %v8646_v50 }
 0x328   :  { %7341 = vmatprep.subr.bf16.mxu0 %v8647_v14  ;;  %7363 = vmatprep.subr.bf16.mxu1 %v8648_v13 }
 0x32b   :  { %7342 = vmatpush3.bf16.msra.mxu0 %v8649_v23  ;;  %7364 = vmatpush3.bf16.msra.mxu1 %v8650_v52 }
 0x32c   :  { %7343 = vmatprep.subr.bf16.mxu0 %v8651_v19  ;;  %7365 = vmatprep.subr.bf16.mxu1 %v8652_v27 }
 0x32f   :  { %7344 = vmatpush3.bf16.msra.mxu0 %v8653_v15  ;;  %7366 = vmatpush3.bf16.msra.mxu1 %v8654_v51 }
 0x330   :  { %7345 = vmatprep.subr.bf16.mxu0 %v8655_v53  ;;  %7367 = vmatprep.subr.bf16.mxu1 %v8656_v54 }
 0x333   :  { %7346 = vmatpush3.bf16.msra.mxu0 %v8657_v55  ;;  %7368 = vmatpush3.bf16.msra.mxu1 %v8658_v56 }
 0x334   :  { %7347 = vmatprep.subr.bf16.mxu0 %v8659_v57  ;;  %7369 = vmatprep.subr.bf16.mxu1 %v8660_v58 }
 0x337   :  { %7348 = vmatpush3.bf16.msra.mxu0 %v8661_v59  ;;  %7370 = vmatpush3.bf16.msra.mxu1 %v8662_v61 }
 0x338   :  { %7349 = vmatprep.subr.bf16.mxu0 %v8663_v62  ;;  %7371 = vmatprep.subr.bf16.mxu1 %v8664_v63 }
 0x33b   :  { %7350 = vmatpush3.bf16.msra.mxu0 %v8665_v0  ;;  %7372 = vmatpush3.bf16.msra.mxu1 %v8666_v1 }
 0x33c   :  { %7351 = vmatprep.subr.bf16.mxu0 %v8667_v2  ;;  %7373 = vmatprep.subr.bf16.mxu1 %v8668_v3 }
 0x33f   :  { %7352 = vmatpush3.bf16.msra.mxu0 %v8669_v4  ;;  %7374 = vmatpush3.bf16.msra.mxu1 %v8670_v5 }
 0x342   :  { %6288 = vmatmul.mubr.bf16.vlgmr.msra.gmra.mrb[16].mxu0 %v9344_v33  ;;  %6328 = vmatmul.mubr.bf16.vlgmr.msra.gmra.mrb[16].mxu1 %v9545_v43 }
 0x3d5   :  { %v6004_v6 = vpop.f32.mrb[8].mxu0  ;;  %v6168_v7 = vpop.f32.mrb[8].mxu1 }
 0x3d6   :  { %8687 = vtanh.f32 %v6004_v6  ;;  %v6006_v8 = vpop.f32.mrb[9].mxu0  ;;  %v6170_v9 = vpop.f32.mrb[9].mxu1 }
 0x3d7   :  { %8689 = vtanh.f32 %v6168_v7  ;;  %v6008_v10 = vpop.f32.mrb[10].mxu0  ;;  %v6172_v11 = vpop.f32.mrb[10].mxu1 }
 0x3d8   :  { %8691 = vtanh.f32 %v6006_v8  ;;  %v6009_v12 = vpop.f32.mrb[11].mxu0  ;;  %v6173_v16 = vpop.f32.mrb[11].mxu1 }
 0x3d9   :  { %8693 = vtanh.f32 %v6170_v9 }
 0x3e0   :  { %v8688_v18 = vpop.eup %8687 }
 0x3e1   :  { %v8690_v60 = vpop.eup %8689 }
 0x3e2   :  { %v8692_v17 = vpop.eup %8691 }
 0x3e3   :  { %v8694_v20 = vpop.eup %8693  ;;  %v6410_v21 = vcombine.low %v8688_v18, %v8692_v17 }
 0x3e4   :  { %v6411_v33 = vcombine.low %v8690_v60, %v8694_v20 }
 0x3e5   :  { %v6418_v43 = vrot.slane %v6410_v21, %v8846_v49 }
 0x3e6   :  { %v6425_v22 = vrot.slane %v6411_v33, %v8846_v49 }
 0x3e8   :  { %v6433_v24 = vcombine.low %v6418_v43, %v6425_v22 }
 0x3ea   :  { %v6440_v19 = vrot.slane %v6433_v24, %v8846_v49 }
 0x3f5   :  { %v7309_v25 = vpop.f32.mrb[12].mxu0  ;;  %v7331_v26 = vpop.f32.mrb[12].mxu1 }
 0x3f6   :  { %v7310_v28 = vpop.f32.mrb[13].mxu0  ;;  %v7332_v29 = vpop.f32.mrb[13].mxu1 }
 0x3f7   :  { %v7311_v30 = vadd.f32 %v7310_v28, %v7309_v25  ;;  %v7333_v31 = vadd.f32 %v7332_v29, %v7331_v26  ;;  %v7312_v32 = vpop.f32.mrb[14].mxu0  ;;  %v7334_v34 = vpop.f32.mrb[14].mxu1 }
 0x3f8   :  { %v7313_v35 = vpop.f32.mrb[15].mxu0  ;;  %v7335_v36 = vpop.f32.mrb[15].mxu1 }
 0x3f9   :  { %v6250_v37 = vadd.f32 %v7333_v31, %v7311_v30 }
 0x415   :  { %v7353_v39 = vpop.f32.mrb[16].mxu0  ;;  %v7375_v40 = vpop.f32.mrb[16].mxu1 }
 0x416   :  { %v7354_v41 = vpop.f32.mrb[17].mxu0  ;;  %v7376_v42 = vpop.f32.mrb[17].mxu1 }
 0x417   :  { %v7355_v44 = vadd.f32 %v7354_v41, %v7353_v39  ;;  %v7377_v45 = vadd.f32 %v7376_v42, %v7375_v40  ;;  %v7356_v46 = vpop.f32.mrb[18].mxu0  ;;  %v7378_v47 = vpop.f32.mrb[18].mxu1 }
 0x418   :  { %v7357_v48 = vpop.f32.mrb[19].mxu0  ;;  %v7379_v50 = vpop.f32.mrb[19].mxu1 }
 0x419   :  { %v6290_v14 = vadd.f32 %v7355_v44, %v6250_v37 }
 0x41b   :  { %v6330_v13 = vadd.f32 %v7377_v45, %v6290_v14 }
 0x41d   :  { %8695 = vtanh.f32 %v6330_v13 }
 0x427   :  { %v8696_v23 = vpop.eup %8695 }
 0x428   :  { %v6432_v52 = vrot.slane %v8696_v23, %v8846_v49 }
 0x42a   :  { %v6447_v27 = vrot.slane %v6432_v52, %v8846_v49 }
 0x42c   :  { %v6448_v15 = vcombine.low %v6440_v19, %v6447_v27 }
 0x42e   :  { %6456 = vst.msk [vmem:[%s11340_s2 + $0x8] sm:$0x1f] %vm6454_vm0, %v6448_v15 }

</bundles_post_ra>
